<compile_context>
chip_gen: v7x
topology: tpu7x:2x2x1
jax: 0.10.0
libtpu: 0.0.40
codegen_flags: <defaults>
</compile_context>

<pallas_src>
import functools
import math

import jax
import jax.numpy as jnp
from jax import lax
from jax.experimental import pallas as pl
from jax.experimental.pallas import tpu as pltpu


# ----------------------------------------------------------------------------
# Static tap-offset tables (row-major (dy, dx) enumeration, matches (k,k,C).reshape)
# ----------------------------------------------------------------------------
def _offsets(k):
    p = k // 2
    return tuple((dy, dx) for dy in range(-p, p + 1) for dx in range(-p, p + 1))


_OFF3 = _offsets(3)   # 9 taps, index 4 == (0, 0)
_OFF7 = _offsets(7)   # 49 taps


# ----------------------------------------------------------------------------
# In-kernel helpers
# ----------------------------------------------------------------------------
def _hardswish(x):
    return x * jnp.clip(x + 3.0, 0.0, 6.0) * (1.0 / 6.0)


def _dwconv_tab(x, tab_ref, offsets, side):
    """Depthwise 'same' conv on an (Np, C) value whose rows are a row-major
    (side, side) grid.  tab_ref is a (T, Np, C) Ref of pre-masked per-tap weights
    (valid-mask ⊗ tap-row, built in the wrapper).  Each tap is one static
    pltpu.roll (XLU) + one multiply-add (VPU)."""
    Np = x.shape[0]
    acc = None
    for t, (dy, dx) in enumerate(offsets):
        shift = (-(dy * side + dx)) % Np
        xs = pltpu.roll(x, shift=shift, axis=0) if shift else x
        term = xs * tab_ref[t]
        acc = term if acc is None else acc + term
    return acc


# ----------------------------------------------------------------------------
# The single fused kernel
# ----------------------------------------------------------------------------
def mp_amil_kernel(x_ref, fcw_ref, fcb_ref,
                   cpetab_ref, cpeb_ref,
                   lng_ref, lnb_ref,
                   agglo_ref, agghi_ref, pwlo_ref, pwhi_ref,
                   abw_ref, abb_ref, cw_ref, cb_ref,
                   o_ref, h_scr, *, side, d_attn, eps):
    L = o_ref.shape[-1]
    H = L // 2

    # --- fc: Linear + ReLU (Dropout(0.1) = inference identity) ---------------
    h = jnp.dot(x_ref[...], fcw_ref[...], preferred_element_type=jnp.float32)
    h = jnp.maximum(h + fcb_ref[...], 0.0)                           # (Np, L) f32

    # --- ConvPosEnc: depthwise 3x3 + bias, residual add ----------------------
    h = h + _dwconv_tab(h, cpetab_ref, _OFF3, side) + cpeb_ref[...]
    h_scr[...] = h            # park h in VMEM; not needed again until residual

    # --- LayerNorm ------------------------------------------------------------
    mu = jnp.mean(h, axis=-1, keepdims=True)
    var = jnp.mean(jnp.square(h - mu), axis=-1, keepdims=True)
    cur = (h - mu) * lax.rsqrt(var + eps) * lng_ref[...] + lnb_ref[...]

    # --- Aggregator in two lane-aligned half passes ---------------------------
    #   lanes   0:H  : seg0 identity tap + seg1 3x3          ->  9 taps
    #   lanes   H:L  : seg2 5x5 + seg3 7x7 (zero-embedded)   -> 49 taps
    # Pointwise 1x1 (block-diagonal, seg0 block = I) split along K into the
    # same halves; hardswish on the combined f32 accumulator.
    dwo_lo = _dwconv_tab(cur[:, 0:H], agglo_ref, _OFF3, side)        # (Np, H)
    acc = jnp.dot(dwo_lo.astype(jnp.bfloat16), pwlo_ref[...],
                  preferred_element_type=jnp.float32)                # (Np, L)
    dwo_hi = _dwconv_tab(cur[:, H:L], agghi_ref, _OFF7, side)        # (Np, H)
    acc = acc + jnp.dot(dwo_hi.astype(jnp.bfloat16), pwhi_ref[...],
                        preferred_element_type=jnp.float32)
    agg = _hardswish(acc)

    # --- residual --------------------------------------------------------------
    h = h_scr[...] + agg

    # --- Gated attention pooling (Dropout(0.25) = inference identity) ---------
    # a|b projections fused into one (L, 2D) matmul; tanh on lanes 0:D,
    # sigmoid on lanes D:2D.
    ab = jnp.dot(h.astype(jnp.bfloat16), abw_ref[...],
                 preferred_element_type=jnp.float32) + abb_ref[...]
    a = jnp.tanh(ab[:, 0:d_attn])
    b = jax.nn.sigmoid(ab[:, d_attn:2 * d_attn])
    # score via VPU reduction instead of a 1-column MXU matmul
    s = jnp.sum((a * b) * cw_ref[...], axis=-1, keepdims=True) + cb_ref[...]  # (Np,1)
    m = jnp.max(s, axis=0, keepdims=True)
    e = jnp.exp(s - m)
    wts = e * pl.reciprocal(jnp.sum(e, axis=0, keepdims=True), approx=True)
    o_ref[...] = jnp.sum(wts * h, axis=0, keepdims=True)             # (1, L)


# ----------------------------------------------------------------------------
# Wrapper-side parameter preparation (done ONCE, outside the hot path)
# ----------------------------------------------------------------------------
def prepare_params(p, n_instances, seg=4):
    """Build kernel operands: pre-masked per-tap tables, zero-embedded aggregator
    weights split into lane halves, fused attention projection, bf16 MXU weights."""
    F_in, L = p["fc_w"].shape
    D = p["att_a_w"].shape[1]
    S = L // seg
    H = L // 2
    assert H == 2 * S, "lane-half split assumes seg=4"
    side = int(math.ceil(math.sqrt(n_instances)))
    Np = side * side

    idx = jnp.arange(Np)
    col = idx % side
    row = idx // side

    def tap_table(taps, offsets):
        # taps: (T, C) -> (T, Np, C) with the validity mask baked in per tap.
        out = []
        for t, (dy, dx) in enumerate(offsets):
            valid = ((col + dx >= 0) & (col + dx < side) &
                     (row + dy >= 0) & (row + dy < side)).astype(jnp.float32)
            out.append(valid[:, None] * taps[t][None, :])
        return jnp.stack(out, axis=0)

    # ConvPosEnc 3x3 table over all L lanes
    cpe_tab = tap_table(p["cpe_w"].reshape(9, L), _OFF3)             # (9, Np, L)

    # Aggregator low half (lanes 0:H): seg0 identity center tap, seg1 3x3
    lo = jnp.zeros((9, H), jnp.float32)
    lo = lo.at[4, 0:S].set(1.0)                                      # (0,0) tap
    lo = lo.at[:, S:H].set(p["agg1_dw"].reshape(9, S))
    agg_lo_tab = tap_table(lo, _OFF3)                                # (9, Np, H)

    # Aggregator high half (lanes H:L): seg2 5x5 centered in 7x7, seg3 7x7
    hi = jnp.zeros((7, 7, H), jnp.float32)
    hi = hi.at[1:6, 1:6, 0:S].set(p["agg2_dw"])
    hi = hi.at[:, :, S:H].set(p["agg3_dw"])
    agg_hi_tab = tap_table(hi.reshape(49, H), _OFF7)                 # (49, Np, H)

    # Block-diagonal pointwise 1x1 (seg0 block = I), split along K into halves
    pw = jnp.zeros((L, L), jnp.float32)
    pw = pw.at[0:S, 0:S].set(jnp.eye(S, dtype=jnp.float32))
    pw = pw.at[S:2 * S, S:2 * S].set(p["agg1_pw"])
    pw = pw.at[2 * S:3 * S, 2 * S:3 * S].set(p["agg2_pw"])
    pw = pw.at[3 * S:4 * S, 3 * S:4 * S].set(p["agg3_pw"])
    pw_lo = pw[0:H, :].astype(jnp.bfloat16)
    pw_hi = pw[H:L, :].astype(jnp.bfloat16)

    # Fused gated-attention projection: [a | b]
    ab_w = jnp.concatenate([p["att_a_w"], p["att_b_w"]], axis=1).astype(jnp.bfloat16)
    ab_b = jnp.concatenate([p["att_a_b"], p["att_b_b"]], axis=1)     # (1, 2D)

    ops = dict(
        fc_w=p["fc_w"].astype(jnp.bfloat16), fc_b=p["fc_b"],
        cpe_tab=cpe_tab, cpe_b=p["cpe_b"].reshape(1, L),
        ln_g=p["ln_g"], ln_b=p["ln_b"],
        agg_lo_tab=agg_lo_tab, agg_hi_tab=agg_hi_tab,
        pw_lo=pw_lo, pw_hi=pw_hi,
        ab_w=ab_w, ab_b=ab_b,
        c_w=p["att_c_w"].reshape(1, D), c_b=p["att_c_b"],
    )
    meta = dict(side=side, Np=Np, D=D, L=L, F_in=F_in)
    return ops, meta


# ----------------------------------------------------------------------------
# Forward wrapper (jit this)
# ----------------------------------------------------------------------------
def mp_amil_forward(x_path, ops, *, side, d_attn, eps=1e-5):
    N, F_in = x_path.shape
    L = ops["fc_b"].shape[-1]
    H = L // 2
    D = d_attn
    Np = side * side
    add = Np - N
    # fc+ReLU is row-wise and both dropouts are inference identities, so
    # replication-padding the *input* rows equals the module's post-fc concat.
    x_pad = jnp.concatenate([x_path, x_path[:add]], axis=0) if add else x_path
    x_pad = x_pad.astype(jnp.bfloat16)

    operands = (x_pad, ops["fc_w"], ops["fc_b"],
                ops["cpe_tab"], ops["cpe_b"],
                ops["ln_g"], ops["ln_b"],
                ops["agg_lo_tab"], ops["agg_hi_tab"],
                ops["pw_lo"], ops["pw_hi"],
                ops["ab_w"], ops["ab_b"],
                ops["c_w"], ops["c_b"])

    flops = int(2 * Np * L * F_in            # fc
                + 2 * Np * L * 9             # CPE depthwise
                + 2 * Np * H * (9 + 49)      # aggregator depthwise (half passes)
                + 2 * 2 * Np * H * L         # aggregator pointwise (split-K)
                + 2 * Np * L * (2 * D)       # fused attention projection
                + 2 * Np * D                 # score reduction
                + 2 * Np * L)                # pooling
    transcendentals = int(Np * (2 * D + 1))
    bytes_accessed = int(sum(int(op.size) * op.dtype.itemsize for op in operands)
                         + 4 * L)

    vm = pl.BlockSpec(memory_space=pltpu.MemorySpace.VMEM)
    kernel = functools.partial(mp_amil_kernel, side=side, d_attn=D, eps=eps)
    return pl.pallas_call(
        kernel,
        out_shape=jax.ShapeDtypeStruct((1, L), jnp.float32),
        in_specs=[vm] * len(operands),
        out_specs=vm,
        scratch_shapes=[pltpu.VMEM((Np, L), jnp.float32)],   # parks h across the agg
        compiler_params=pltpu.CompilerParams(vmem_limit_bytes=32 * 1024 * 1024),
        cost_estimate=pl.CostEstimate(flops=flops,
                                      transcendentals=transcendentals,
                                      bytes_accessed=bytes_accessed),
    )(*operands)


# ----------------------------------------------------------------------------
# Pure-JAX reference (for verification)
# ----------------------------------------------------------------------------
def ref_forward(x_path, p, seg=4):
    h = jax.nn.relu(x_path @ p["fc_w"] + p["fc_b"])
    N, L = h.shape
    side = int(math.ceil(math.sqrt(N)))
    add = side * side - N
    h = jnp.concatenate([h, h[:add]], axis=0)
    Np = side * side

    def dwconv(x, w, b=None):
        k = w.shape[0]
        pd = k // 2
        C = x.shape[-1]
        y = lax.conv_general_dilated(
            x[None], w[:, :, None, :], window_strides=(1, 1),
            padding=((pd, pd), (pd, pd)),
            dimension_numbers=("NHWC", "HWIO", "NHWC"),
            feature_group_count=C)[0]
        if b is not None:
            y = y + b
        return y

    def hsw(x):
        return x * jnp.clip(x + 3.0, 0.0, 6.0) / 6.0

    feat = h.reshape(side, side, L)
    feat = dwconv(feat, p["cpe_w"], p["cpe_b"]) + feat
    h = feat.reshape(Np, L)

    mu = h.mean(-1, keepdims=True)
    var = ((h - mu) ** 2).mean(-1, keepdims=True)
    cur = (h - mu) / jnp.sqrt(var + 1e-5) * p["ln_g"] + p["ln_b"]

    S = L // seg
    cur_sp = cur.reshape(side, side, L)
    outs = [hsw(cur_sp[:, :, :S])]
    for i in range(1, seg):
        xi = cur_sp[:, :, i * S:(i + 1) * S]
        y = dwconv(xi, p[f"agg{i}_dw"])
        y = y.reshape(Np, S) @ p[f"agg{i}_pw"]
        outs.append(hsw(y).reshape(side, side, S))
    cur = jnp.concatenate(outs, axis=-1).reshape(Np, L)

    h = h + cur
    a = jnp.tanh(h @ p["att_a_w"] + p["att_a_b"])
    b = jax.nn.sigmoid(h @ p["att_b_w"] + p["att_b_b"])
    A = (a * b) @ p["att_c_w"] + p["att_c_b"]        # (Np, 1)
    A = jax.nn.softmax(A.T, axis=1)                  # (1, Np)
    return A @ h                                     # (1, L)


# ----------------------------------------------------------------------------
# Deterministic parameter init (synthetic; shapes follow MP_AMIL.__init__)
# ----------------------------------------------------------------------------
def init_params(key, F_in, L, D, seg=4):
    S = L // seg
    ks = iter(jax.random.split(key, 32))

    def nrm(shape, scale):
        return jax.random.normal(next(ks), shape, jnp.float32) * scale

    p = {}
    p["fc_w"] = nrm((F_in, L), 1.0 / math.sqrt(F_in))
    p["fc_b"] = nrm((1, L), 0.02)
    p["cpe_w"] = nrm((3, 3, L), 1.0 / 3.0)            # depthwise, groups=L (+bias)
    p["cpe_b"] = nrm((L,), 0.02)
    p["ln_g"] = 1.0 + nrm((1, L), 0.05)
    p["ln_b"] = nrm((1, L), 0.02)
    for i, k in zip((1, 2, 3), (3, 5, 7)):
        p[f"agg{i}_dw"] = nrm((k, k, S), 1.0 / k)          # depthwise, no bias
        p[f"agg{i}_pw"] = nrm((S, S), 1.0 / math.sqrt(S))  # pointwise 1x1, no bias
    p["att_a_w"] = nrm((L, D), 1.0 / math.sqrt(L))
    p["att_a_b"] = nrm((1, D), 0.02)
    p["att_b_w"] = nrm((L, D), 1.0 / math.sqrt(L))
    p["att_b_b"] = nrm((1, D), 0.02)
    p["att_c_w"] = nrm((D, 1), 1.0 / math.sqrt(D))
    p["att_c_b"] = nrm((1, 1), 0.02)
    return p


# ----------------------------------------------------------------------------
if __name__ == "__main__":
    # Small shapes consistent with the module: size = [feat_input, L, D], seg=4
    F_in, L, D = 256, 256, 128
    N = 60          # number of instances -> padded to 8x8 = 64 spatial grid

    key = jax.random.PRNGKey(0)
    kx, kp = jax.random.split(key)
    x_path = jax.random.normal(kx, (N, F_in), jnp.float32)
    params = init_params(kp, F_in, L, D)

    # One-time wrapper-side prep (tap tables, fused/bf16 weights).
    ops, meta = prepare_params(params, N)
    fwd = jax.jit(functools.partial(mp_amil_forward,
                                    side=meta["side"], d_attn=meta["D"]))

    out = fwd(x_path, ops)
    out = jax.block_until_ready(out)
    assert out.shape == (1, L), out.shape

    ref = ref_forward(x_path, params)
    max_err = float(jnp.max(jnp.abs(out - ref)))
    scale = float(jnp.max(jnp.abs(ref))) + 1e-6
    if not math.isfinite(max_err) or max_err > 5e-2 * max(1.0, scale):
        raise AssertionError(f"mismatch vs reference: max_abs_err={max_err}")

    print("KERNEL_OK")
</pallas_src>

<mosaic_0001>
module attributes {stable_mosaic.version = 11 : i64} {
  func.func @mp_amil_kernel(%arg0: memref<64x256xbf16, #tpu.memory_space<vmem>>, %arg1: memref<256x256xbf16, #tpu.memory_space<vmem>>, %arg2: memref<1x256xf32, #tpu.memory_space<vmem>>, %arg3: memref<9x64x256xf32, #tpu.memory_space<vmem>>, %arg4: memref<1x256xf32, #tpu.memory_space<vmem>>, %arg5: memref<1x256xf32, #tpu.memory_space<vmem>>, %arg6: memref<1x256xf32, #tpu.memory_space<vmem>>, %arg7: memref<9x64x128xf32, #tpu.memory_space<vmem>>, %arg8: memref<49x64x128xf32, #tpu.memory_space<vmem>>, %arg9: memref<128x256xbf16, #tpu.memory_space<vmem>>, %arg10: memref<128x256xbf16, #tpu.memory_space<vmem>>, %arg11: memref<256x256xbf16, #tpu.memory_space<vmem>>, %arg12: memref<1x256xf32, #tpu.memory_space<vmem>>, %arg13: memref<1x128xf32, #tpu.memory_space<vmem>>, %arg14: memref<1x1xf32, #tpu.memory_space<vmem>>, %arg15: memref<1x256xf32, #tpu.memory_space<vmem>>, %arg16: memref<64x256xf32, #tpu.memory_space<vmem>>) attributes {dimension_semantics = [], scalar_prefetch = 0 : i64, scratch_operands = 1 : i64, tpu.core_type = #tpu.core_type<tc>} {
    %c0 = arith.constant 0 : index
    %c0_0 = arith.constant 0 : index
    %0 = vector.load %arg0[%c0, %c0_0] : memref<64x256xbf16, #tpu.memory_space<vmem>>, vector<64x256xbf16>
    %c0_1 = arith.constant 0 : index
    %c0_2 = arith.constant 0 : index
    %1 = vector.load %arg1[%c0_1, %c0_2] : memref<256x256xbf16, #tpu.memory_space<vmem>>, vector<256x256xbf16>
    %cst = arith.constant dense<0.000000e+00> : vector<64x256xf32>
    %2 = tpu.matmul %0, %1, %cst {dimension_numbers = #tpu.dot_dimension_numbers<[1], [0], [0], [1], [0, 0, 1, 1], [], []>} : vector<64x256xbf16>, vector<256x256xbf16>, vector<64x256xf32> -> vector<64x256xf32>
    %c0_3 = arith.constant 0 : index
    %c0_4 = arith.constant 0 : index
    %3 = vector.load %arg2[%c0_3, %c0_4] : memref<1x256xf32, #tpu.memory_space<vmem>>, vector<1x256xf32>
    %4 = vector.broadcast %3 : vector<1x256xf32> to vector<64x256xf32>
    %5 = arith.addf %2, %4 : vector<64x256xf32>
    %cst_5 = arith.constant 0.000000e+00 : f32
    %6 = vector.broadcast %cst_5 : f32 to vector<64x256xf32>
    %7 = arith.maximumf %5, %6 : vector<64x256xf32>
    %c9_i32 = arith.constant 9 : i32
    %8 = tpu.dynamic_rotate %7 by %c9_i32 dim 0 : vector<64x256xf32>, i32 -> vector<64x256xf32>
    %c0_6 = arith.constant 0 : index
    %c0_7 = arith.constant 0 : index
    %c0_8 = arith.constant 0 : index
    %9 = vector.load %arg3[%c0_6, %c0_7, %c0_8] : memref<9x64x256xf32, #tpu.memory_space<vmem>>, vector<1x64x256xf32>
    %10 = vector.shape_cast %9 : vector<1x64x256xf32> to vector<64x256xf32>
    %11 = arith.mulf %8, %10 : vector<64x256xf32>
    %c8_i32 = arith.constant 8 : i32
    %12 = tpu.dynamic_rotate %7 by %c8_i32 dim 0 : vector<64x256xf32>, i32 -> vector<64x256xf32>
    %c1 = arith.constant 1 : index
    %c0_9 = arith.constant 0 : index
    %c0_10 = arith.constant 0 : index
    %13 = vector.load %arg3[%c1, %c0_9, %c0_10] : memref<9x64x256xf32, #tpu.memory_space<vmem>>, vector<1x64x256xf32>
    %14 = vector.shape_cast %13 : vector<1x64x256xf32> to vector<64x256xf32>
    %15 = arith.mulf %12, %14 : vector<64x256xf32>
    %16 = arith.addf %11, %15 : vector<64x256xf32>
    %c7_i32 = arith.constant 7 : i32
    %17 = tpu.dynamic_rotate %7 by %c7_i32 dim 0 : vector<64x256xf32>, i32 -> vector<64x256xf32>
    %c2 = arith.constant 2 : index
    %c0_11 = arith.constant 0 : index
    %c0_12 = arith.constant 0 : index
    %18 = vector.load %arg3[%c2, %c0_11, %c0_12] : memref<9x64x256xf32, #tpu.memory_space<vmem>>, vector<1x64x256xf32>
    %19 = vector.shape_cast %18 : vector<1x64x256xf32> to vector<64x256xf32>
    %20 = arith.mulf %17, %19 : vector<64x256xf32>
    %21 = arith.addf %16, %20 : vector<64x256xf32>
    %c1_i32 = arith.constant 1 : i32
    %22 = tpu.dynamic_rotate %7 by %c1_i32 dim 0 : vector<64x256xf32>, i32 -> vector<64x256xf32>
    %c3 = arith.constant 3 : index
    %c0_13 = arith.constant 0 : index
    %c0_14 = arith.constant 0 : index
    %23 = vector.load %arg3[%c3, %c0_13, %c0_14] : memref<9x64x256xf32, #tpu.memory_space<vmem>>, vector<1x64x256xf32>
    %24 = vector.shape_cast %23 : vector<1x64x256xf32> to vector<64x256xf32>
    %25 = arith.mulf %22, %24 : vector<64x256xf32>
    %26 = arith.addf %21, %25 : vector<64x256xf32>
    %c4 = arith.constant 4 : index
    %c0_15 = arith.constant 0 : index
    %c0_16 = arith.constant 0 : index
    %27 = vector.load %arg3[%c4, %c0_15, %c0_16] : memref<9x64x256xf32, #tpu.memory_space<vmem>>, vector<1x64x256xf32>
    %28 = vector.shape_cast %27 : vector<1x64x256xf32> to vector<64x256xf32>
    %29 = arith.mulf %7, %28 : vector<64x256xf32>
    %30 = arith.addf %26, %29 : vector<64x256xf32>
    %c63_i32 = arith.constant 63 : i32
    %31 = tpu.dynamic_rotate %7 by %c63_i32 dim 0 : vector<64x256xf32>, i32 -> vector<64x256xf32>
    %c5 = arith.constant 5 : index
    %c0_17 = arith.constant 0 : index
    %c0_18 = arith.constant 0 : index
    %32 = vector.load %arg3[%c5, %c0_17, %c0_18] : memref<9x64x256xf32, #tpu.memory_space<vmem>>, vector<1x64x256xf32>
    %33 = vector.shape_cast %32 : vector<1x64x256xf32> to vector<64x256xf32>
    %34 = arith.mulf %31, %33 : vector<64x256xf32>
    %35 = arith.addf %30, %34 : vector<64x256xf32>
    %c57_i32 = arith.constant 57 : i32
    %36 = tpu.dynamic_rotate %7 by %c57_i32 dim 0 : vector<64x256xf32>, i32 -> vector<64x256xf32>
    %c6 = arith.constant 6 : index
    %c0_19 = arith.constant 0 : index
    %c0_20 = arith.constant 0 : index
    %37 = vector.load %arg3[%c6, %c0_19, %c0_20] : memref<9x64x256xf32, #tpu.memory_space<vmem>>, vector<1x64x256xf32>
    %38 = vector.shape_cast %37 : vector<1x64x256xf32> to vector<64x256xf32>
    %39 = arith.mulf %36, %38 : vector<64x256xf32>
    %40 = arith.addf %35, %39 : vector<64x256xf32>
    %c56_i32 = arith.constant 56 : i32
    %41 = tpu.dynamic_rotate %7 by %c56_i32 dim 0 : vector<64x256xf32>, i32 -> vector<64x256xf32>
    %c7 = arith.constant 7 : index
    %c0_21 = arith.constant 0 : index
    %c0_22 = arith.constant 0 : index
    %42 = vector.load %arg3[%c7, %c0_21, %c0_22] : memref<9x64x256xf32, #tpu.memory_space<vmem>>, vector<1x64x256xf32>
    %43 = vector.shape_cast %42 : vector<1x64x256xf32> to vector<64x256xf32>
    %44 = arith.mulf %41, %43 : vector<64x256xf32>
    %45 = arith.addf %40, %44 : vector<64x256xf32>
    %c55_i32 = arith.constant 55 : i32
    %46 = tpu.dynamic_rotate %7 by %c55_i32 dim 0 : vector<64x256xf32>, i32 -> vector<64x256xf32>
    %c8 = arith.constant 8 : index
    %c0_23 = arith.constant 0 : index
    %c0_24 = arith.constant 0 : index
    %47 = vector.load %arg3[%c8, %c0_23, %c0_24] : memref<9x64x256xf32, #tpu.memory_space<vmem>>, vector<1x64x256xf32>
    %48 = vector.shape_cast %47 : vector<1x64x256xf32> to vector<64x256xf32>
    %49 = arith.mulf %46, %48 : vector<64x256xf32>
    %50 = arith.addf %45, %49 : vector<64x256xf32>
    %51 = arith.addf %7, %50 : vector<64x256xf32>
    %c0_25 = arith.constant 0 : index
    %c0_26 = arith.constant 0 : index
    %52 = vector.load %arg4[%c0_25, %c0_26] : memref<1x256xf32, #tpu.memory_space<vmem>>, vector<1x256xf32>
    %53 = vector.broadcast %52 : vector<1x256xf32> to vector<64x256xf32>
    %54 = arith.addf %51, %53 : vector<64x256xf32>
    %c0_27 = arith.constant 0 : index
    %c0_28 = arith.constant 0 : index
    %55 = vector.load %arg16[%c0_27, %c0_28] : memref<64x256xf32, #tpu.memory_space<vmem>>, vector<64x256xf32>
    tpu.vector_store %arg16[%c0_27, %c0_28], %54 {strides = array<i32>} : memref<64x256xf32, #tpu.memory_space<vmem>>, vector<64x256xf32>,
    %cst_29 = arith.constant dense<0.000000e+00> : vector<64xf32>
    %56 = vector.multi_reduction <add>, %54, %cst_29 [1] : vector<64x256xf32> to vector<64xf32>
    %57 = vector.shape_cast %56 : vector<64xf32> to vector<64x1xf32>
    %cst_30 = arith.constant 2.560000e+02 : f32
    %58 = vector.broadcast %cst_30 : f32 to vector<64x1xf32>
    %59 = arith.divf %57, %58 : vector<64x1xf32>
    %60 = vector.broadcast %59 : vector<64x1xf32> to vector<64x256xf32>
    %61 = arith.subf %54, %60 : vector<64x256xf32>
    %62 = arith.mulf %61, %61 : vector<64x256xf32>
    %cst_31 = arith.constant dense<0.000000e+00> : vector<64xf32>
    %63 = vector.multi_reduction <add>, %62, %cst_31 [1] : vector<64x256xf32> to vector<64xf32>
    %64 = vector.shape_cast %63 : vector<64xf32> to vector<64x1xf32>
    %cst_32 = arith.constant 2.560000e+02 : f32
    %65 = vector.broadcast %cst_32 : f32 to vector<64x1xf32>
    %66 = arith.divf %64, %65 : vector<64x1xf32>
    %67 = vector.broadcast %59 : vector<64x1xf32> to vector<64x256xf32>
    %68 = arith.subf %54, %67 : vector<64x256xf32>
    %cst_33 = arith.constant 9.99999974E-6 : f32
    %69 = vector.broadcast %cst_33 : f32 to vector<64x1xf32>
    %70 = arith.addf %66, %69 : vector<64x1xf32>
    %71 = math.rsqrt %70 : vector<64x1xf32>
    %72 = vector.broadcast %71 : vector<64x1xf32> to vector<64x256xf32>
    %73 = arith.mulf %68, %72 : vector<64x256xf32>
    %c0_34 = arith.constant 0 : index
    %c0_35 = arith.constant 0 : index
    %74 = vector.load %arg5[%c0_34, %c0_35] : memref<1x256xf32, #tpu.memory_space<vmem>>, vector<1x256xf32>
    %75 = vector.broadcast %74 : vector<1x256xf32> to vector<64x256xf32>
    %76 = arith.mulf %73, %75 : vector<64x256xf32>
    %c0_36 = arith.constant 0 : index
    %c0_37 = arith.constant 0 : index
    %77 = vector.load %arg6[%c0_36, %c0_37] : memref<1x256xf32, #tpu.memory_space<vmem>>, vector<1x256xf32>
    %78 = vector.broadcast %77 : vector<1x256xf32> to vector<64x256xf32>
    %79 = arith.addf %76, %78 : vector<64x256xf32>
    %80 = vector.extract_strided_slice %79 {offsets = [0, 0], sizes = [64, 128], strides = [1, 1]} : vector<64x256xf32> to vector<64x128xf32>
    %c9_i32_38 = arith.constant 9 : i32
    %81 = tpu.dynamic_rotate %80 by %c9_i32_38 dim 0 : vector<64x128xf32>, i32 -> vector<64x128xf32>
    %c0_39 = arith.constant 0 : index
    %c0_40 = arith.constant 0 : index
    %c0_41 = arith.constant 0 : index
    %82 = vector.load %arg7[%c0_39, %c0_40, %c0_41] : memref<9x64x128xf32, #tpu.memory_space<vmem>>, vector<1x64x128xf32>
    %83 = vector.shape_cast %82 : vector<1x64x128xf32> to vector<64x128xf32>
    %84 = arith.mulf %81, %83 : vector<64x128xf32>
    %c8_i32_42 = arith.constant 8 : i32
    %85 = tpu.dynamic_rotate %80 by %c8_i32_42 dim 0 : vector<64x128xf32>, i32 -> vector<64x128xf32>
    %c1_43 = arith.constant 1 : index
    %c0_44 = arith.constant 0 : index
    %c0_45 = arith.constant 0 : index
    %86 = vector.load %arg7[%c1_43, %c0_44, %c0_45] : memref<9x64x128xf32, #tpu.memory_space<vmem>>, vector<1x64x128xf32>
    %87 = vector.shape_cast %86 : vector<1x64x128xf32> to vector<64x128xf32>
    %88 = arith.mulf %85, %87 : vector<64x128xf32>
    %89 = arith.addf %84, %88 : vector<64x128xf32>
    %c7_i32_46 = arith.constant 7 : i32
    %90 = tpu.dynamic_rotate %80 by %c7_i32_46 dim 0 : vector<64x128xf32>, i32 -> vector<64x128xf32>
    %c2_47 = arith.constant 2 : index
    %c0_48 = arith.constant 0 : index
    %c0_49 = arith.constant 0 : index
    %91 = vector.load %arg7[%c2_47, %c0_48, %c0_49] : memref<9x64x128xf32, #tpu.memory_space<vmem>>, vector<1x64x128xf32>
    %92 = vector.shape_cast %91 : vector<1x64x128xf32> to vector<64x128xf32>
    %93 = arith.mulf %90, %92 : vector<64x128xf32>
    %94 = arith.addf %89, %93 : vector<64x128xf32>
    %c1_i32_50 = arith.constant 1 : i32
    %95 = tpu.dynamic_rotate %80 by %c1_i32_50 dim 0 : vector<64x128xf32>, i32 -> vector<64x128xf32>
    %c3_51 = arith.constant 3 : index
    %c0_52 = arith.constant 0 : index
    %c0_53 = arith.constant 0 : index
    %96 = vector.load %arg7[%c3_51, %c0_52, %c0_53] : memref<9x64x128xf32, #tpu.memory_space<vmem>>, vector<1x64x128xf32>
    %97 = vector.shape_cast %96 : vector<1x64x128xf32> to vector<64x128xf32>
    %98 = arith.mulf %95, %97 : vector<64x128xf32>
    %99 = arith.addf %94, %98 : vector<64x128xf32>
    %c4_54 = arith.constant 4 : index
    %c0_55 = arith.constant 0 : index
    %c0_56 = arith.constant 0 : index
    %100 = vector.load %arg7[%c4_54, %c0_55, %c0_56] : memref<9x64x128xf32, #tpu.memory_space<vmem>>, vector<1x64x128xf32>
    %101 = vector.shape_cast %100 : vector<1x64x128xf32> to vector<64x128xf32>
    %102 = arith.mulf %80, %101 : vector<64x128xf32>
    %103 = arith.addf %99, %102 : vector<64x128xf32>
    %c63_i32_57 = arith.constant 63 : i32
    %104 = tpu.dynamic_rotate %80 by %c63_i32_57 dim 0 : vector<64x128xf32>, i32 -> vector<64x128xf32>
    %c5_58 = arith.constant 5 : index
    %c0_59 = arith.constant 0 : index
    %c0_60 = arith.constant 0 : index
    %105 = vector.load %arg7[%c5_58, %c0_59, %c0_60] : memref<9x64x128xf32, #tpu.memory_space<vmem>>, vector<1x64x128xf32>
    %106 = vector.shape_cast %105 : vector<1x64x128xf32> to vector<64x128xf32>
    %107 = arith.mulf %104, %106 : vector<64x128xf32>
    %108 = arith.addf %103, %107 : vector<64x128xf32>
    %c57_i32_61 = arith.constant 57 : i32
    %109 = tpu.dynamic_rotate %80 by %c57_i32_61 dim 0 : vector<64x128xf32>, i32 -> vector<64x128xf32>
    %c6_62 = arith.constant 6 : index
    %c0_63 = arith.constant 0 : index
    %c0_64 = arith.constant 0 : index
    %110 = vector.load %arg7[%c6_62, %c0_63, %c0_64] : memref<9x64x128xf32, #tpu.memory_space<vmem>>, vector<1x64x128xf32>
    %111 = vector.shape_cast %110 : vector<1x64x128xf32> to vector<64x128xf32>
    %112 = arith.mulf %109, %111 : vector<64x128xf32>
    %113 = arith.addf %108, %112 : vector<64x128xf32>
    %c56_i32_65 = arith.constant 56 : i32
    %114 = tpu.dynamic_rotate %80 by %c56_i32_65 dim 0 : vector<64x128xf32>, i32 -> vector<64x128xf32>
    %c7_66 = arith.constant 7 : index
    %c0_67 = arith.constant 0 : index
    %c0_68 = arith.constant 0 : index
    %115 = vector.load %arg7[%c7_66, %c0_67, %c0_68] : memref<9x64x128xf32, #tpu.memory_space<vmem>>, vector<1x64x128xf32>
    %116 = vector.shape_cast %115 : vector<1x64x128xf32> to vector<64x128xf32>
    %117 = arith.mulf %114, %116 : vector<64x128xf32>
    %118 = arith.addf %113, %117 : vector<64x128xf32>
    %c55_i32_69 = arith.constant 55 : i32
    %119 = tpu.dynamic_rotate %80 by %c55_i32_69 dim 0 : vector<64x128xf32>, i32 -> vector<64x128xf32>
    %c8_70 = arith.constant 8 : index
    %c0_71 = arith.constant 0 : index
    %c0_72 = arith.constant 0 : index
    %120 = vector.load %arg7[%c8_70, %c0_71, %c0_72] : memref<9x64x128xf32, #tpu.memory_space<vmem>>, vector<1x64x128xf32>
    %121 = vector.shape_cast %120 : vector<1x64x128xf32> to vector<64x128xf32>
    %122 = arith.mulf %119, %121 : vector<64x128xf32>
    %123 = arith.addf %118, %122 : vector<64x128xf32>
    %124 = arith.truncf %123 : vector<64x128xf32> to vector<64x128xbf16>
    %c0_73 = arith.constant 0 : index
    %c0_74 = arith.constant 0 : index
    %125 = vector.load %arg9[%c0_73, %c0_74] : memref<128x256xbf16, #tpu.memory_space<vmem>>, vector<128x256xbf16>
    %cst_75 = arith.constant dense<0.000000e+00> : vector<64x256xf32>
    %126 = tpu.matmul %124, %125, %cst_75 {dimension_numbers = #tpu.dot_dimension_numbers<[1], [0], [0], [1], [0, 0, 1, 1], [], []>} : vector<64x128xbf16>, vector<128x256xbf16>, vector<64x256xf32> -> vector<64x256xf32>
    %127 = vector.extract_strided_slice %79 {offsets = [0, 128], sizes = [64, 128], strides = [1, 1]} : vector<64x256xf32> to vector<64x128xf32>
    %c27_i32 = arith.constant 27 : i32
    %128 = tpu.dynamic_rotate %127 by %c27_i32 dim 0 : vector<64x128xf32>, i32 -> vector<64x128xf32>
    %c0_76 = arith.constant 0 : index
    %c0_77 = arith.constant 0 : index
    %c0_78 = arith.constant 0 : index
    %129 = vector.load %arg8[%c0_76, %c0_77, %c0_78] : memref<49x64x128xf32, #tpu.memory_space<vmem>>, vector<1x64x128xf32>
    %130 = vector.shape_cast %129 : vector<1x64x128xf32> to vector<64x128xf32>
    %131 = arith.mulf %128, %130 : vector<64x128xf32>
    %c26_i32 = arith.constant 26 : i32
    %132 = tpu.dynamic_rotate %127 by %c26_i32 dim 0 : vector<64x128xf32>, i32 -> vector<64x128xf32>
    %c1_79 = arith.constant 1 : index
    %c0_80 = arith.constant 0 : index
    %c0_81 = arith.constant 0 : index
    %133 = vector.load %arg8[%c1_79, %c0_80, %c0_81] : memref<49x64x128xf32, #tpu.memory_space<vmem>>, vector<1x64x128xf32>
    %134 = vector.shape_cast %133 : vector<1x64x128xf32> to vector<64x128xf32>
    %135 = arith.mulf %132, %134 : vector<64x128xf32>
    %136 = arith.addf %131, %135 : vector<64x128xf32>
    %c25_i32 = arith.constant 25 : i32
    %137 = tpu.dynamic_rotate %127 by %c25_i32 dim 0 : vector<64x128xf32>, i32 -> vector<64x128xf32>
    %c2_82 = arith.constant 2 : index
    %c0_83 = arith.constant 0 : index
    %c0_84 = arith.constant 0 : index
    %138 = vector.load %arg8[%c2_82, %c0_83, %c0_84] : memref<49x64x128xf32, #tpu.memory_space<vmem>>, vector<1x64x128xf32>
    %139 = vector.shape_cast %138 : vector<1x64x128xf32> to vector<64x128xf32>
    %140 = arith.mulf %137, %139 : vector<64x128xf32>
    %141 = arith.addf %136, %140 : vector<64x128xf32>
    %c24_i32 = arith.constant 24 : i32
    %142 = tpu.dynamic_rotate %127 by %c24_i32 dim 0 : vector<64x128xf32>, i32 -> vector<64x128xf32>
    %c3_85 = arith.constant 3 : index
    %c0_86 = arith.constant 0 : index
    %c0_87 = arith.constant 0 : index
    %143 = vector.load %arg8[%c3_85, %c0_86, %c0_87] : memref<49x64x128xf32, #tpu.memory_space<vmem>>, vector<1x64x128xf32>
    %144 = vector.shape_cast %143 : vector<1x64x128xf32> to vector<64x128xf32>
    %145 = arith.mulf %142, %144 : vector<64x128xf32>
    %146 = arith.addf %141, %145 : vector<64x128xf32>
    %c23_i32 = arith.constant 23 : i32
    %147 = tpu.dynamic_rotate %127 by %c23_i32 dim 0 : vector<64x128xf32>, i32 -> vector<64x128xf32>
    %c4_88 = arith.constant 4 : index
    %c0_89 = arith.constant 0 : index
    %c0_90 = arith.constant 0 : index
    %148 = vector.load %arg8[%c4_88, %c0_89, %c0_90] : memref<49x64x128xf32, #tpu.memory_space<vmem>>, vector<1x64x128xf32>
    %149 = vector.shape_cast %148 : vector<1x64x128xf32> to vector<64x128xf32>
    %150 = arith.mulf %147, %149 : vector<64x128xf32>
    %151 = arith.addf %146, %150 : vector<64x128xf32>
    %c22_i32 = arith.constant 22 : i32
    %152 = tpu.dynamic_rotate %127 by %c22_i32 dim 0 : vector<64x128xf32>, i32 -> vector<64x128xf32>
    %c5_91 = arith.constant 5 : index
    %c0_92 = arith.constant 0 : index
    %c0_93 = arith.constant 0 : index
    %153 = vector.load %arg8[%c5_91, %c0_92, %c0_93] : memref<49x64x128xf32, #tpu.memory_space<vmem>>, vector<1x64x128xf32>
    %154 = vector.shape_cast %153 : vector<1x64x128xf32> to vector<64x128xf32>
    %155 = arith.mulf %152, %154 : vector<64x128xf32>
    %156 = arith.addf %151, %155 : vector<64x128xf32>
    %c21_i32 = arith.constant 21 : i32
    %157 = tpu.dynamic_rotate %127 by %c21_i32 dim 0 : vector<64x128xf32>, i32 -> vector<64x128xf32>
    %c6_94 = arith.constant 6 : index
    %c0_95 = arith.constant 0 : index
    %c0_96 = arith.constant 0 : index
    %158 = vector.load %arg8[%c6_94, %c0_95, %c0_96] : memref<49x64x128xf32, #tpu.memory_space<vmem>>, vector<1x64x128xf32>
    %159 = vector.shape_cast %158 : vector<1x64x128xf32> to vector<64x128xf32>
    %160 = arith.mulf %157, %159 : vector<64x128xf32>
    %161 = arith.addf %156, %160 : vector<64x128xf32>
    %c19_i32 = arith.constant 19 : i32
    %162 = tpu.dynamic_rotate %127 by %c19_i32 dim 0 : vector<64x128xf32>, i32 -> vector<64x128xf32>
    %c7_97 = arith.constant 7 : index
    %c0_98 = arith.constant 0 : index
    %c0_99 = arith.constant 0 : index
    %163 = vector.load %arg8[%c7_97, %c0_98, %c0_99] : memref<49x64x128xf32, #tpu.memory_space<vmem>>, vector<1x64x128xf32>
    %164 = vector.shape_cast %163 : vector<1x64x128xf32> to vector<64x128xf32>
    %165 = arith.mulf %162, %164 : vector<64x128xf32>
    %166 = arith.addf %161, %165 : vector<64x128xf32>
    %c18_i32 = arith.constant 18 : i32
    %167 = tpu.dynamic_rotate %127 by %c18_i32 dim 0 : vector<64x128xf32>, i32 -> vector<64x128xf32>
    %c8_100 = arith.constant 8 : index
    %c0_101 = arith.constant 0 : index
    %c0_102 = arith.constant 0 : index
    %168 = vector.load %arg8[%c8_100, %c0_101, %c0_102] : memref<49x64x128xf32, #tpu.memory_space<vmem>>, vector<1x64x128xf32>
    %169 = vector.shape_cast %168 : vector<1x64x128xf32> to vector<64x128xf32>
    %170 = arith.mulf %167, %169 : vector<64x128xf32>
    %171 = arith.addf %166, %170 : vector<64x128xf32>
    %c17_i32 = arith.constant 17 : i32
    %172 = tpu.dynamic_rotate %127 by %c17_i32 dim 0 : vector<64x128xf32>, i32 -> vector<64x128xf32>
    %c9 = arith.constant 9 : index
    %c0_103 = arith.constant 0 : index
    %c0_104 = arith.constant 0 : index
    %173 = vector.load %arg8[%c9, %c0_103, %c0_104] : memref<49x64x128xf32, #tpu.memory_space<vmem>>, vector<1x64x128xf32>
    %174 = vector.shape_cast %173 : vector<1x64x128xf32> to vector<64x128xf32>
    %175 = arith.mulf %172, %174 : vector<64x128xf32>
    %176 = arith.addf %171, %175 : vector<64x128xf32>
    %c16_i32 = arith.constant 16 : i32
    %177 = tpu.dynamic_rotate %127 by %c16_i32 dim 0 : vector<64x128xf32>, i32 -> vector<64x128xf32>
    %c10 = arith.constant 10 : index
    %c0_105 = arith.constant 0 : index
    %c0_106 = arith.constant 0 : index
    %178 = vector.load %arg8[%c10, %c0_105, %c0_106] : memref<49x64x128xf32, #tpu.memory_space<vmem>>, vector<1x64x128xf32>
    %179 = vector.shape_cast %178 : vector<1x64x128xf32> to vector<64x128xf32>
    %180 = arith.mulf %177, %179 : vector<64x128xf32>
    %181 = arith.addf %176, %180 : vector<64x128xf32>
    %c15_i32 = arith.constant 15 : i32
    %182 = tpu.dynamic_rotate %127 by %c15_i32 dim 0 : vector<64x128xf32>, i32 -> vector<64x128xf32>
    %c11 = arith.constant 11 : index
    %c0_107 = arith.constant 0 : index
    %c0_108 = arith.constant 0 : index
    %183 = vector.load %arg8[%c11, %c0_107, %c0_108] : memref<49x64x128xf32, #tpu.memory_space<vmem>>, vector<1x64x128xf32>
    %184 = vector.shape_cast %183 : vector<1x64x128xf32> to vector<64x128xf32>
    %185 = arith.mulf %182, %184 : vector<64x128xf32>
    %186 = arith.addf %181, %185 : vector<64x128xf32>
    %c14_i32 = arith.constant 14 : i32
    %187 = tpu.dynamic_rotate %127 by %c14_i32 dim 0 : vector<64x128xf32>, i32 -> vector<64x128xf32>
    %c12 = arith.constant 12 : index
    %c0_109 = arith.constant 0 : index
    %c0_110 = arith.constant 0 : index
    %188 = vector.load %arg8[%c12, %c0_109, %c0_110] : memref<49x64x128xf32, #tpu.memory_space<vmem>>, vector<1x64x128xf32>
    %189 = vector.shape_cast %188 : vector<1x64x128xf32> to vector<64x128xf32>
    %190 = arith.mulf %187, %189 : vector<64x128xf32>
    %191 = arith.addf %186, %190 : vector<64x128xf32>
    %c13_i32 = arith.constant 13 : i32
    %192 = tpu.dynamic_rotate %127 by %c13_i32 dim 0 : vector<64x128xf32>, i32 -> vector<64x128xf32>
    %c13 = arith.constant 13 : index
    %c0_111 = arith.constant 0 : index
    %c0_112 = arith.constant 0 : index
    %193 = vector.load %arg8[%c13, %c0_111, %c0_112] : memref<49x64x128xf32, #tpu.memory_space<vmem>>, vector<1x64x128xf32>
    %194 = vector.shape_cast %193 : vector<1x64x128xf32> to vector<64x128xf32>
    %195 = arith.mulf %192, %194 : vector<64x128xf32>
    %196 = arith.addf %191, %195 : vector<64x128xf32>
    %c11_i32 = arith.constant 11 : i32
    %197 = tpu.dynamic_rotate %127 by %c11_i32 dim 0 : vector<64x128xf32>, i32 -> vector<64x128xf32>
    %c14 = arith.constant 14 : index
    %c0_113 = arith.constant 0 : index
    %c0_114 = arith.constant 0 : index
    %198 = vector.load %arg8[%c14, %c0_113, %c0_114] : memref<49x64x128xf32, #tpu.memory_space<vmem>>, vector<1x64x128xf32>
    %199 = vector.shape_cast %198 : vector<1x64x128xf32> to vector<64x128xf32>
    %200 = arith.mulf %197, %199 : vector<64x128xf32>
    %201 = arith.addf %196, %200 : vector<64x128xf32>
    %c10_i32 = arith.constant 10 : i32
    %202 = tpu.dynamic_rotate %127 by %c10_i32 dim 0 : vector<64x128xf32>, i32 -> vector<64x128xf32>
    %c15 = arith.constant 15 : index
    %c0_115 = arith.constant 0 : index
    %c0_116 = arith.constant 0 : index
    %203 = vector.load %arg8[%c15, %c0_115, %c0_116] : memref<49x64x128xf32, #tpu.memory_space<vmem>>, vector<1x64x128xf32>
    %204 = vector.shape_cast %203 : vector<1x64x128xf32> to vector<64x128xf32>
    %205 = arith.mulf %202, %204 : vector<64x128xf32>
    %206 = arith.addf %201, %205 : vector<64x128xf32>
    %c9_i32_117 = arith.constant 9 : i32
    %207 = tpu.dynamic_rotate %127 by %c9_i32_117 dim 0 : vector<64x128xf32>, i32 -> vector<64x128xf32>
    %c16 = arith.constant 16 : index
    %c0_118 = arith.constant 0 : index
    %c0_119 = arith.constant 0 : index
    %208 = vector.load %arg8[%c16, %c0_118, %c0_119] : memref<49x64x128xf32, #tpu.memory_space<vmem>>, vector<1x64x128xf32>
    %209 = vector.shape_cast %208 : vector<1x64x128xf32> to vector<64x128xf32>
    %210 = arith.mulf %207, %209 : vector<64x128xf32>
    %211 = arith.addf %206, %210 : vector<64x128xf32>
    %c8_i32_120 = arith.constant 8 : i32
    %212 = tpu.dynamic_rotate %127 by %c8_i32_120 dim 0 : vector<64x128xf32>, i32 -> vector<64x128xf32>
    %c17 = arith.constant 17 : index
    %c0_121 = arith.constant 0 : index
    %c0_122 = arith.constant 0 : index
    %213 = vector.load %arg8[%c17, %c0_121, %c0_122] : memref<49x64x128xf32, #tpu.memory_space<vmem>>, vector<1x64x128xf32>
    %214 = vector.shape_cast %213 : vector<1x64x128xf32> to vector<64x128xf32>
    %215 = arith.mulf %212, %214 : vector<64x128xf32>
    %216 = arith.addf %211, %215 : vector<64x128xf32>
    %c7_i32_123 = arith.constant 7 : i32
    %217 = tpu.dynamic_rotate %127 by %c7_i32_123 dim 0 : vector<64x128xf32>, i32 -> vector<64x128xf32>
    %c18 = arith.constant 18 : index
    %c0_124 = arith.constant 0 : index
    %c0_125 = arith.constant 0 : index
    %218 = vector.load %arg8[%c18, %c0_124, %c0_125] : memref<49x64x128xf32, #tpu.memory_space<vmem>>, vector<1x64x128xf32>
    %219 = vector.shape_cast %218 : vector<1x64x128xf32> to vector<64x128xf32>
    %220 = arith.mulf %217, %219 : vector<64x128xf32>
    %221 = arith.addf %216, %220 : vector<64x128xf32>
    %c6_i32 = arith.constant 6 : i32
    %222 = tpu.dynamic_rotate %127 by %c6_i32 dim 0 : vector<64x128xf32>, i32 -> vector<64x128xf32>
    %c19 = arith.constant 19 : index
    %c0_126 = arith.constant 0 : index
    %c0_127 = arith.constant 0 : index
    %223 = vector.load %arg8[%c19, %c0_126, %c0_127] : memref<49x64x128xf32, #tpu.memory_space<vmem>>, vector<1x64x128xf32>
    %224 = vector.shape_cast %223 : vector<1x64x128xf32> to vector<64x128xf32>
    %225 = arith.mulf %222, %224 : vector<64x128xf32>
    %226 = arith.addf %221, %225 : vector<64x128xf32>
    %c5_i32 = arith.constant 5 : i32
    %227 = tpu.dynamic_rotate %127 by %c5_i32 dim 0 : vector<64x128xf32>, i32 -> vector<64x128xf32>
    %c20 = arith.constant 20 : index
    %c0_128 = arith.constant 0 : index
    %c0_129 = arith.constant 0 : index
    %228 = vector.load %arg8[%c20, %c0_128, %c0_129] : memref<49x64x128xf32, #tpu.memory_space<vmem>>, vector<1x64x128xf32>
    %229 = vector.shape_cast %228 : vector<1x64x128xf32> to vector<64x128xf32>
    %230 = arith.mulf %227, %229 : vector<64x128xf32>
    %231 = arith.addf %226, %230 : vector<64x128xf32>
    %c3_i32 = arith.constant 3 : i32
    %232 = tpu.dynamic_rotate %127 by %c3_i32 dim 0 : vector<64x128xf32>, i32 -> vector<64x128xf32>
    %c21 = arith.constant 21 : index
    %c0_130 = arith.constant 0 : index
    %c0_131 = arith.constant 0 : index
    %233 = vector.load %arg8[%c21, %c0_130, %c0_131] : memref<49x64x128xf32, #tpu.memory_space<vmem>>, vector<1x64x128xf32>
    %234 = vector.shape_cast %233 : vector<1x64x128xf32> to vector<64x128xf32>
    %235 = arith.mulf %232, %234 : vector<64x128xf32>
    %236 = arith.addf %231, %235 : vector<64x128xf32>
    %c2_i32 = arith.constant 2 : i32
    %237 = tpu.dynamic_rotate %127 by %c2_i32 dim 0 : vector<64x128xf32>, i32 -> vector<64x128xf32>
    %c22 = arith.constant 22 : index
    %c0_132 = arith.constant 0 : index
    %c0_133 = arith.constant 0 : index
    %238 = vector.load %arg8[%c22, %c0_132, %c0_133] : memref<49x64x128xf32, #tpu.memory_space<vmem>>, vector<1x64x128xf32>
    %239 = vector.shape_cast %238 : vector<1x64x128xf32> to vector<64x128xf32>
    %240 = arith.mulf %237, %239 : vector<64x128xf32>
    %241 = arith.addf %236, %240 : vector<64x128xf32>
    %c1_i32_134 = arith.constant 1 : i32
    %242 = tpu.dynamic_rotate %127 by %c1_i32_134 dim 0 : vector<64x128xf32>, i32 -> vector<64x128xf32>
    %c23 = arith.constant 23 : index
    %c0_135 = arith.constant 0 : index
    %c0_136 = arith.constant 0 : index
    %243 = vector.load %arg8[%c23, %c0_135, %c0_136] : memref<49x64x128xf32, #tpu.memory_space<vmem>>, vector<1x64x128xf32>
    %244 = vector.shape_cast %243 : vector<1x64x128xf32> to vector<64x128xf32>
    %245 = arith.mulf %242, %244 : vector<64x128xf32>
    %246 = arith.addf %241, %245 : vector<64x128xf32>
    %c24 = arith.constant 24 : index
    %c0_137 = arith.constant 0 : index
    %c0_138 = arith.constant 0 : index
    %247 = vector.load %arg8[%c24, %c0_137, %c0_138] : memref<49x64x128xf32, #tpu.memory_space<vmem>>, vector<1x64x128xf32>
    %248 = vector.shape_cast %247 : vector<1x64x128xf32> to vector<64x128xf32>
    %249 = arith.mulf %127, %248 : vector<64x128xf32>
    %250 = arith.addf %246, %249 : vector<64x128xf32>
    %c63_i32_139 = arith.constant 63 : i32
    %251 = tpu.dynamic_rotate %127 by %c63_i32_139 dim 0 : vector<64x128xf32>, i32 -> vector<64x128xf32>
    %c25 = arith.constant 25 : index
    %c0_140 = arith.constant 0 : index
    %c0_141 = arith.constant 0 : index
    %252 = vector.load %arg8[%c25, %c0_140, %c0_141] : memref<49x64x128xf32, #tpu.memory_space<vmem>>, vector<1x64x128xf32>
    %253 = vector.shape_cast %252 : vector<1x64x128xf32> to vector<64x128xf32>
    %254 = arith.mulf %251, %253 : vector<64x128xf32>
    %255 = arith.addf %250, %254 : vector<64x128xf32>
    %c62_i32 = arith.constant 62 : i32
    %256 = tpu.dynamic_rotate %127 by %c62_i32 dim 0 : vector<64x128xf32>, i32 -> vector<64x128xf32>
    %c26 = arith.constant 26 : index
    %c0_142 = arith.constant 0 : index
    %c0_143 = arith.constant 0 : index
    %257 = vector.load %arg8[%c26, %c0_142, %c0_143] : memref<49x64x128xf32, #tpu.memory_space<vmem>>, vector<1x64x128xf32>
    %258 = vector.shape_cast %257 : vector<1x64x128xf32> to vector<64x128xf32>
    %259 = arith.mulf %256, %258 : vector<64x128xf32>
    %260 = arith.addf %255, %259 : vector<64x128xf32>
    %c61_i32 = arith.constant 61 : i32
    %261 = tpu.dynamic_rotate %127 by %c61_i32 dim 0 : vector<64x128xf32>, i32 -> vector<64x128xf32>
    %c27 = arith.constant 27 : index
    %c0_144 = arith.constant 0 : index
    %c0_145 = arith.constant 0 : index
    %262 = vector.load %arg8[%c27, %c0_144, %c0_145] : memref<49x64x128xf32, #tpu.memory_space<vmem>>, vector<1x64x128xf32>
    %263 = vector.shape_cast %262 : vector<1x64x128xf32> to vector<64x128xf32>
    %264 = arith.mulf %261, %263 : vector<64x128xf32>
    %265 = arith.addf %260, %264 : vector<64x128xf32>
    %c59_i32 = arith.constant 59 : i32
    %266 = tpu.dynamic_rotate %127 by %c59_i32 dim 0 : vector<64x128xf32>, i32 -> vector<64x128xf32>
    %c28 = arith.constant 28 : index
    %c0_146 = arith.constant 0 : index
    %c0_147 = arith.constant 0 : index
    %267 = vector.load %arg8[%c28, %c0_146, %c0_147] : memref<49x64x128xf32, #tpu.memory_space<vmem>>, vector<1x64x128xf32>
    %268 = vector.shape_cast %267 : vector<1x64x128xf32> to vector<64x128xf32>
    %269 = arith.mulf %266, %268 : vector<64x128xf32>
    %270 = arith.addf %265, %269 : vector<64x128xf32>
    %c58_i32 = arith.constant 58 : i32
    %271 = tpu.dynamic_rotate %127 by %c58_i32 dim 0 : vector<64x128xf32>, i32 -> vector<64x128xf32>
    %c29 = arith.constant 29 : index
    %c0_148 = arith.constant 0 : index
    %c0_149 = arith.constant 0 : index
    %272 = vector.load %arg8[%c29, %c0_148, %c0_149] : memref<49x64x128xf32, #tpu.memory_space<vmem>>, vector<1x64x128xf32>
    %273 = vector.shape_cast %272 : vector<1x64x128xf32> to vector<64x128xf32>
    %274 = arith.mulf %271, %273 : vector<64x128xf32>
    %275 = arith.addf %270, %274 : vector<64x128xf32>
    %c57_i32_150 = arith.constant 57 : i32
    %276 = tpu.dynamic_rotate %127 by %c57_i32_150 dim 0 : vector<64x128xf32>, i32 -> vector<64x128xf32>
    %c30 = arith.constant 30 : index
    %c0_151 = arith.constant 0 : index
    %c0_152 = arith.constant 0 : index
    %277 = vector.load %arg8[%c30, %c0_151, %c0_152] : memref<49x64x128xf32, #tpu.memory_space<vmem>>, vector<1x64x128xf32>
    %278 = vector.shape_cast %277 : vector<1x64x128xf32> to vector<64x128xf32>
    %279 = arith.mulf %276, %278 : vector<64x128xf32>
    %280 = arith.addf %275, %279 : vector<64x128xf32>
    %c56_i32_153 = arith.constant 56 : i32
    %281 = tpu.dynamic_rotate %127 by %c56_i32_153 dim 0 : vector<64x128xf32>, i32 -> vector<64x128xf32>
    %c31 = arith.constant 31 : index
    %c0_154 = arith.constant 0 : index
    %c0_155 = arith.constant 0 : index
    %282 = vector.load %arg8[%c31, %c0_154, %c0_155] : memref<49x64x128xf32, #tpu.memory_space<vmem>>, vector<1x64x128xf32>
    %283 = vector.shape_cast %282 : vector<1x64x128xf32> to vector<64x128xf32>
    %284 = arith.mulf %281, %283 : vector<64x128xf32>
    %285 = arith.addf %280, %284 : vector<64x128xf32>
    %c55_i32_156 = arith.constant 55 : i32
    %286 = tpu.dynamic_rotate %127 by %c55_i32_156 dim 0 : vector<64x128xf32>, i32 -> vector<64x128xf32>
    %c32 = arith.constant 32 : index
    %c0_157 = arith.constant 0 : index
    %c0_158 = arith.constant 0 : index
    %287 = vector.load %arg8[%c32, %c0_157, %c0_158] : memref<49x64x128xf32, #tpu.memory_space<vmem>>, vector<1x64x128xf32>
    %288 = vector.shape_cast %287 : vector<1x64x128xf32> to vector<64x128xf32>
    %289 = arith.mulf %286, %288 : vector<64x128xf32>
    %290 = arith.addf %285, %289 : vector<64x128xf32>
    %c54_i32 = arith.constant 54 : i32
    %291 = tpu.dynamic_rotate %127 by %c54_i32 dim 0 : vector<64x128xf32>, i32 -> vector<64x128xf32>
    %c33 = arith.constant 33 : index
    %c0_159 = arith.constant 0 : index
    %c0_160 = arith.constant 0 : index
    %292 = vector.load %arg8[%c33, %c0_159, %c0_160] : memref<49x64x128xf32, #tpu.memory_space<vmem>>, vector<1x64x128xf32>
    %293 = vector.shape_cast %292 : vector<1x64x128xf32> to vector<64x128xf32>
    %294 = arith.mulf %291, %293 : vector<64x128xf32>
    %295 = arith.addf %290, %294 : vector<64x128xf32>
    %c53_i32 = arith.constant 53 : i32
    %296 = tpu.dynamic_rotate %127 by %c53_i32 dim 0 : vector<64x128xf32>, i32 -> vector<64x128xf32>
    %c34 = arith.constant 34 : index
    %c0_161 = arith.constant 0 : index
    %c0_162 = arith.constant 0 : index
    %297 = vector.load %arg8[%c34, %c0_161, %c0_162] : memref<49x64x128xf32, #tpu.memory_space<vmem>>, vector<1x64x128xf32>
    %298 = vector.shape_cast %297 : vector<1x64x128xf32> to vector<64x128xf32>
    %299 = arith.mulf %296, %298 : vector<64x128xf32>
    %300 = arith.addf %295, %299 : vector<64x128xf32>
    %c51_i32 = arith.constant 51 : i32
    %301 = tpu.dynamic_rotate %127 by %c51_i32 dim 0 : vector<64x128xf32>, i32 -> vector<64x128xf32>
    %c35 = arith.constant 35 : index
    %c0_163 = arith.constant 0 : index
    %c0_164 = arith.constant 0 : index
    %302 = vector.load %arg8[%c35, %c0_163, %c0_164] : memref<49x64x128xf32, #tpu.memory_space<vmem>>, vector<1x64x128xf32>
    %303 = vector.shape_cast %302 : vector<1x64x128xf32> to vector<64x128xf32>
    %304 = arith.mulf %301, %303 : vector<64x128xf32>
    %305 = arith.addf %300, %304 : vector<64x128xf32>
    %c50_i32 = arith.constant 50 : i32
    %306 = tpu.dynamic_rotate %127 by %c50_i32 dim 0 : vector<64x128xf32>, i32 -> vector<64x128xf32>
    %c36 = arith.constant 36 : index
    %c0_165 = arith.constant 0 : index
    %c0_166 = arith.constant 0 : index
    %307 = vector.load %arg8[%c36, %c0_165, %c0_166] : memref<49x64x128xf32, #tpu.memory_space<vmem>>, vector<1x64x128xf32>
    %308 = vector.shape_cast %307 : vector<1x64x128xf32> to vector<64x128xf32>
    %309 = arith.mulf %306, %308 : vector<64x128xf32>
    %310 = arith.addf %305, %309 : vector<64x128xf32>
    %c49_i32 = arith.constant 49 : i32
    %311 = tpu.dynamic_rotate %127 by %c49_i32 dim 0 : vector<64x128xf32>, i32 -> vector<64x128xf32>
    %c37 = arith.constant 37 : index
    %c0_167 = arith.constant 0 : index
    %c0_168 = arith.constant 0 : index
    %312 = vector.load %arg8[%c37, %c0_167, %c0_168] : memref<49x64x128xf32, #tpu.memory_space<vmem>>, vector<1x64x128xf32>
    %313 = vector.shape_cast %312 : vector<1x64x128xf32> to vector<64x128xf32>
    %314 = arith.mulf %311, %313 : vector<64x128xf32>
    %315 = arith.addf %310, %314 : vector<64x128xf32>
    %c48_i32 = arith.constant 48 : i32
    %316 = tpu.dynamic_rotate %127 by %c48_i32 dim 0 : vector<64x128xf32>, i32 -> vector<64x128xf32>
    %c38 = arith.constant 38 : index
    %c0_169 = arith.constant 0 : index
    %c0_170 = arith.constant 0 : index
    %317 = vector.load %arg8[%c38, %c0_169, %c0_170] : memref<49x64x128xf32, #tpu.memory_space<vmem>>, vector<1x64x128xf32>
    %318 = vector.shape_cast %317 : vector<1x64x128xf32> to vector<64x128xf32>
    %319 = arith.mulf %316, %318 : vector<64x128xf32>
    %320 = arith.addf %315, %319 : vector<64x128xf32>
    %c47_i32 = arith.constant 47 : i32
    %321 = tpu.dynamic_rotate %127 by %c47_i32 dim 0 : vector<64x128xf32>, i32 -> vector<64x128xf32>
    %c39 = arith.constant 39 : index
    %c0_171 = arith.constant 0 : index
    %c0_172 = arith.constant 0 : index
    %322 = vector.load %arg8[%c39, %c0_171, %c0_172] : memref<49x64x128xf32, #tpu.memory_space<vmem>>, vector<1x64x128xf32>
    %323 = vector.shape_cast %322 : vector<1x64x128xf32> to vector<64x128xf32>
    %324 = arith.mulf %321, %323 : vector<64x128xf32>
    %325 = arith.addf %320, %324 : vector<64x128xf32>
    %c46_i32 = arith.constant 46 : i32
    %326 = tpu.dynamic_rotate %127 by %c46_i32 dim 0 : vector<64x128xf32>, i32 -> vector<64x128xf32>
    %c40 = arith.constant 40 : index
    %c0_173 = arith.constant 0 : index
    %c0_174 = arith.constant 0 : index
    %327 = vector.load %arg8[%c40, %c0_173, %c0_174] : memref<49x64x128xf32, #tpu.memory_space<vmem>>, vector<1x64x128xf32>
    %328 = vector.shape_cast %327 : vector<1x64x128xf32> to vector<64x128xf32>
    %329 = arith.mulf %326, %328 : vector<64x128xf32>
    %330 = arith.addf %325, %329 : vector<64x128xf32>
    %c45_i32 = arith.constant 45 : i32
    %331 = tpu.dynamic_rotate %127 by %c45_i32 dim 0 : vector<64x128xf32>, i32 -> vector<64x128xf32>
    %c41 = arith.constant 41 : index
    %c0_175 = arith.constant 0 : index
    %c0_176 = arith.constant 0 : index
    %332 = vector.load %arg8[%c41, %c0_175, %c0_176] : memref<49x64x128xf32, #tpu.memory_space<vmem>>, vector<1x64x128xf32>
    %333 = vector.shape_cast %332 : vector<1x64x128xf32> to vector<64x128xf32>
    %334 = arith.mulf %331, %333 : vector<64x128xf32>
    %335 = arith.addf %330, %334 : vector<64x128xf32>
    %c43_i32 = arith.constant 43 : i32
    %336 = tpu.dynamic_rotate %127 by %c43_i32 dim 0 : vector<64x128xf32>, i32 -> vector<64x128xf32>
    %c42 = arith.constant 42 : index
    %c0_177 = arith.constant 0 : index
    %c0_178 = arith.constant 0 : index
    %337 = vector.load %arg8[%c42, %c0_177, %c0_178] : memref<49x64x128xf32, #tpu.memory_space<vmem>>, vector<1x64x128xf32>
    %338 = vector.shape_cast %337 : vector<1x64x128xf32> to vector<64x128xf32>
    %339 = arith.mulf %336, %338 : vector<64x128xf32>
    %340 = arith.addf %335, %339 : vector<64x128xf32>
    %c42_i32 = arith.constant 42 : i32
    %341 = tpu.dynamic_rotate %127 by %c42_i32 dim 0 : vector<64x128xf32>, i32 -> vector<64x128xf32>
    %c43 = arith.constant 43 : index
    %c0_179 = arith.constant 0 : index
    %c0_180 = arith.constant 0 : index
    %342 = vector.load %arg8[%c43, %c0_179, %c0_180] : memref<49x64x128xf32, #tpu.memory_space<vmem>>, vector<1x64x128xf32>
    %343 = vector.shape_cast %342 : vector<1x64x128xf32> to vector<64x128xf32>
    %344 = arith.mulf %341, %343 : vector<64x128xf32>
    %345 = arith.addf %340, %344 : vector<64x128xf32>
    %c41_i32 = arith.constant 41 : i32
    %346 = tpu.dynamic_rotate %127 by %c41_i32 dim 0 : vector<64x128xf32>, i32 -> vector<64x128xf32>
    %c44 = arith.constant 44 : index
    %c0_181 = arith.constant 0 : index
    %c0_182 = arith.constant 0 : index
    %347 = vector.load %arg8[%c44, %c0_181, %c0_182] : memref<49x64x128xf32, #tpu.memory_space<vmem>>, vector<1x64x128xf32>
    %348 = vector.shape_cast %347 : vector<1x64x128xf32> to vector<64x128xf32>
    %349 = arith.mulf %346, %348 : vector<64x128xf32>
    %350 = arith.addf %345, %349 : vector<64x128xf32>
    %c40_i32 = arith.constant 40 : i32
    %351 = tpu.dynamic_rotate %127 by %c40_i32 dim 0 : vector<64x128xf32>, i32 -> vector<64x128xf32>
    %c45 = arith.constant 45 : index
    %c0_183 = arith.constant 0 : index
    %c0_184 = arith.constant 0 : index
    %352 = vector.load %arg8[%c45, %c0_183, %c0_184] : memref<49x64x128xf32, #tpu.memory_space<vmem>>, vector<1x64x128xf32>
    %353 = vector.shape_cast %352 : vector<1x64x128xf32> to vector<64x128xf32>
    %354 = arith.mulf %351, %353 : vector<64x128xf32>
    %355 = arith.addf %350, %354 : vector<64x128xf32>
    %c39_i32 = arith.constant 39 : i32
    %356 = tpu.dynamic_rotate %127 by %c39_i32 dim 0 : vector<64x128xf32>, i32 -> vector<64x128xf32>
    %c46 = arith.constant 46 : index
    %c0_185 = arith.constant 0 : index
    %c0_186 = arith.constant 0 : index
    %357 = vector.load %arg8[%c46, %c0_185, %c0_186] : memref<49x64x128xf32, #tpu.memory_space<vmem>>, vector<1x64x128xf32>
    %358 = vector.shape_cast %357 : vector<1x64x128xf32> to vector<64x128xf32>
    %359 = arith.mulf %356, %358 : vector<64x128xf32>
    %360 = arith.addf %355, %359 : vector<64x128xf32>
    %c38_i32 = arith.constant 38 : i32
    %361 = tpu.dynamic_rotate %127 by %c38_i32 dim 0 : vector<64x128xf32>, i32 -> vector<64x128xf32>
    %c47 = arith.constant 47 : index
    %c0_187 = arith.constant 0 : index
    %c0_188 = arith.constant 0 : index
    %362 = vector.load %arg8[%c47, %c0_187, %c0_188] : memref<49x64x128xf32, #tpu.memory_space<vmem>>, vector<1x64x128xf32>
    %363 = vector.shape_cast %362 : vector<1x64x128xf32> to vector<64x128xf32>
    %364 = arith.mulf %361, %363 : vector<64x128xf32>
    %365 = arith.addf %360, %364 : vector<64x128xf32>
    %c37_i32 = arith.constant 37 : i32
    %366 = tpu.dynamic_rotate %127 by %c37_i32 dim 0 : vector<64x128xf32>, i32 -> vector<64x128xf32>
    %c48 = arith.constant 48 : index
    %c0_189 = arith.constant 0 : index
    %c0_190 = arith.constant 0 : index
    %367 = vector.load %arg8[%c48, %c0_189, %c0_190] : memref<49x64x128xf32, #tpu.memory_space<vmem>>, vector<1x64x128xf32>
    %368 = vector.shape_cast %367 : vector<1x64x128xf32> to vector<64x128xf32>
    %369 = arith.mulf %366, %368 : vector<64x128xf32>
    %370 = arith.addf %365, %369 : vector<64x128xf32>
    %371 = arith.truncf %370 : vector<64x128xf32> to vector<64x128xbf16>
    %c0_191 = arith.constant 0 : index
    %c0_192 = arith.constant 0 : index
    %372 = vector.load %arg10[%c0_191, %c0_192] : memref<128x256xbf16, #tpu.memory_space<vmem>>, vector<128x256xbf16>
    %cst_193 = arith.constant dense<0.000000e+00> : vector<64x256xf32>
    %373 = tpu.matmul %371, %372, %cst_193 {dimension_numbers = #tpu.dot_dimension_numbers<[1], [0], [0], [1], [0, 0, 1, 1], [], []>} : vector<64x128xbf16>, vector<128x256xbf16>, vector<64x256xf32> -> vector<64x256xf32>
    %374 = arith.addf %126, %373 : vector<64x256xf32>
    %cst_194 = arith.constant 3.000000e+00 : f32
    %375 = vector.broadcast %cst_194 : f32 to vector<64x256xf32>
    %376 = arith.addf %374, %375 : vector<64x256xf32>
    %cst_195 = arith.constant 0.000000e+00 : f32
    %cst_196 = arith.constant 6.000000e+00 : f32
    %377 = vector.broadcast %cst_195 : f32 to vector<64x256xf32>
    %378 = arith.maximumf %377, %376 : vector<64x256xf32>
    %379 = vector.broadcast %cst_196 : f32 to vector<64x256xf32>
    %380 = arith.minimumf %379, %378 : vector<64x256xf32>
    %381 = arith.mulf %374, %380 : vector<64x256xf32>
    %cst_197 = arith.constant 0.166666672 : f32
    %382 = vector.broadcast %cst_197 : f32 to vector<64x256xf32>
    %383 = arith.mulf %381, %382 : vector<64x256xf32>
    %c0_198 = arith.constant 0 : index
    %c0_199 = arith.constant 0 : index
    %384 = vector.load %arg16[%c0_198, %c0_199] : memref<64x256xf32, #tpu.memory_space<vmem>>, vector<64x256xf32>
    %385 = arith.addf %384, %383 : vector<64x256xf32>
    %386 = arith.truncf %385 : vector<64x256xf32> to vector<64x256xbf16>
    %c0_200 = arith.constant 0 : index
    %c0_201 = arith.constant 0 : index
    %387 = vector.load %arg11[%c0_200, %c0_201] : memref<256x256xbf16, #tpu.memory_space<vmem>>, vector<256x256xbf16>
    %cst_202 = arith.constant dense<0.000000e+00> : vector<64x256xf32>
    %388 = tpu.matmul %386, %387, %cst_202 {dimension_numbers = #tpu.dot_dimension_numbers<[1], [0], [0], [1], [0, 0, 1, 1], [], []>} : vector<64x256xbf16>, vector<256x256xbf16>, vector<64x256xf32> -> vector<64x256xf32>
    %c0_203 = arith.constant 0 : index
    %c0_204 = arith.constant 0 : index
    %389 = vector.load %arg12[%c0_203, %c0_204] : memref<1x256xf32, #tpu.memory_space<vmem>>, vector<1x256xf32>
    %390 = vector.broadcast %389 : vector<1x256xf32> to vector<64x256xf32>
    %391 = arith.addf %388, %390 : vector<64x256xf32>
    %392 = vector.extract_strided_slice %391 {offsets = [0, 0], sizes = [64, 128], strides = [1, 1]} : vector<64x256xf32> to vector<64x128xf32>
    %393 = math.tanh %392 : vector<64x128xf32>
    %394 = vector.extract_strided_slice %391 {offsets = [0, 128], sizes = [64, 128], strides = [1, 1]} : vector<64x256xf32> to vector<64x128xf32>
    %395 = arith.negf %394 : vector<64x128xf32>
    %396 = math.exp %395 : vector<64x128xf32>
    %cst_205 = arith.constant 1.000000e+00 : f32
    %397 = vector.broadcast %cst_205 : f32 to vector<64x128xf32>
    %398 = arith.addf %397, %396 : vector<64x128xf32>
    %399 = arith.divf %397, %398 : vector<64x128xf32>
    %400 = arith.mulf %393, %399 : vector<64x128xf32>
    %c0_206 = arith.constant 0 : index
    %c0_207 = arith.constant 0 : index
    %401 = vector.load %arg13[%c0_206, %c0_207] : memref<1x128xf32, #tpu.memory_space<vmem>>, vector<1x128xf32>
    %402 = vector.broadcast %401 : vector<1x128xf32> to vector<64x128xf32>
    %403 = arith.mulf %400, %402 : vector<64x128xf32>
    %cst_208 = arith.constant dense<0.000000e+00> : vector<64xf32>
    %404 = vector.multi_reduction <add>, %403, %cst_208 [1] : vector<64x128xf32> to vector<64xf32>
    %405 = vector.shape_cast %404 : vector<64xf32> to vector<64x1xf32>
    %c0_209 = arith.constant 0 : index
    %c0_210 = arith.constant 0 : index
    %406 = vector.load %arg14[%c0_209, %c0_210] : memref<1x1xf32, #tpu.memory_space<vmem>>, vector<1x1xf32>
    %407 = vector.broadcast %406 : vector<1x1xf32> to vector<64x1xf32>
    %408 = arith.addf %405, %407 : vector<64x1xf32>
    %cst_211 = arith.constant dense<0xFF800000> : vector<1xf32>
    %409 = vector.multi_reduction <maximumf>, %408, %cst_211 [0] : vector<64x1xf32> to vector<1xf32>
    %410 = vector.shape_cast %409 : vector<1xf32> to vector<1x1xf32>
    %411 = vector.broadcast %410 : vector<1x1xf32> to vector<64x1xf32>
    %412 = arith.subf %408, %411 : vector<64x1xf32>
    %413 = math.exp %412 : vector<64x1xf32>
    %cst_212 = arith.constant dense<0.000000e+00> : vector<1xf32>
    %414 = vector.multi_reduction <add>, %413, %cst_212 [0] : vector<64x1xf32> to vector<1xf32>
    %415 = vector.shape_cast %414 : vector<1xf32> to vector<1x1xf32>
    %416 = tpu.reciprocal %415 {approx = true} : vector<1x1xf32> -> vector<1x1xf32>
    %417 = vector.broadcast %416 : vector<1x1xf32> to vector<64x1xf32>
    %418 = arith.mulf %413, %417 : vector<64x1xf32>
    %419 = vector.broadcast %418 : vector<64x1xf32> to vector<64x256xf32>
    %420 = arith.mulf %419, %385 : vector<64x256xf32>
    %cst_213 = arith.constant dense<0.000000e+00> : vector<256xf32>
    %421 = vector.multi_reduction <add>, %420, %cst_213 [0] : vector<64x256xf32> to vector<256xf32>
    %422 = vector.shape_cast %421 : vector<256xf32> to vector<1x256xf32>
    %c0_214 = arith.constant 0 : index
    %c0_215 = arith.constant 0 : index
    %423 = vector.load %arg15[%c0_214, %c0_215] : memref<1x256xf32, #tpu.memory_space<vmem>>, vector<1x256xf32>
    tpu.vector_store %arg15[%c0_214, %c0_215], %422 {strides = array<i32>} : memref<1x256xf32, #tpu.memory_space<vmem>>, vector<1x256xf32>,
    return
  }
}

</mosaic_0001>

<bundles_post_ra>
// kernel: mp_amil_forward.1
= control target key start
LH: loop header
LB: loop body
LE: loop exit
PB: predicated region body
PF: predicated region fallthrough
CT: control target
= control target key end

     0   :  { %s7275_s0 = inlined_call_operand.vmem [shape: bf16[64,256], index: 0, kind: input, shape index: {}]   ;;  %s7276_s1 = inlined_call_operand.hbm [shape: bf16[256,256], index: 1, kind: input, shape index: {}]   ;;  %s7277_s2 = inlined_call_operand.hbm [shape: f32[1,256], index: 2, kind: input, shape index: {}]   ;;  %s7278_s3 = inlined_call_operand.hbm [shape: f32[9,64,256], index: 3, kind: input, shape index: {}]   ;;  %s7279_s4 = inlined_call_operand.hbm [shape: f32[1,256], index: 4, kind: input, shape index: {}]   ;;  %s7280_s5 = inlined_call_operand.hbm [shape: f32[1,256], index: 5, kind: input, shape index: {}]   ;;  %s7281_s6 = inlined_call_operand.hbm [shape: f32[1,256], index: 6, kind: input, shape index: {}]   ;;  %s7282_s7 = inlined_call_operand.hbm [shape: f32[9,64,128], index: 7, kind: input, shape index: {}]   ;;  %s7283_s8 = inlined_call_operand.hbm [shape: f32[49,64,128], index: 8, kind: input, shape index: {}]   ;;  %s7284_s9 = inlined_call_operand.hbm [shape: bf16[128,256], index: 9, kind: input, shape index: {}]   ;;  %s7285_s10 = inlined_call_operand.hbm [shape: bf16[128,256], index: 10, kind: input, shape index: {}]   ;;  %s7286_s11 = inlined_call_operand.hbm [shape: bf16[256,256], index: 11, kind: input, shape index: {}]   ;;  %s7287_s12 = inlined_call_operand.hbm [shape: f32[1,256], index: 12, kind: input, shape index: {}]   ;;  %s7288_s13 = inlined_call_operand.hbm [shape: f32[1,128], index: 13, kind: input, shape index: {}]   ;;  %s7289_s14 = inlined_call_operand.<no memory space> [shape: f32[1,1], index: 14, kind: input, shape index: {}]   ;;  %s7290_s15 = inlined_call_operand.hbm [shape: f32[1,256], index: 15, kind: output, shape index: {}]  }
   0x1   :  { %v20_v0 = vstv %s7289_s14 }
   0x2   :  { %21 = vst [vmem:[#allocation3] sm:$0x1] %v20_v0 }
   0x3   :  { %22 = vsyncpa [#allocation5], 0 }
   0x4   :  { %23 = vsyncpa [#allocation8], 0 }
   0x5   :  { %24 = vsyncpa [#allocation11], 0 }
   0x6   :  { %25 = vsyncpa [#allocation14], 0 }
   0x7   :  { %26 = vsyncpa [#allocation17], 0 }
   0x8   :  { %27 = vsyncpa [#allocation20], 0 }
   0x9   :  { %28 = vsyncpa [#allocation23], 0 }
   0xa   :  { %29 = vsyncpa [#allocation6], 0  ;;  %s4678_s20 = smov [#allocation7]   ;;  %s4679_s22 = smov [#allocation10]  }
   0xb   :  { %s50_s21 = sshll.u32 %s4678_s20, 4  ;;  %s72_s23 = sshll.u32 %s4679_s22, 4  ;;  %s51_s21 = int_to_ptr.vmem [resolvable:$true] %s50_s21  ;;  %s73_s23 = int_to_ptr.vmem [resolvable:$true] %s72_s23 }
   0xc   :  { %s4354_s26 = scalar_lea.hbm %s7277_s2, 32 }
   0xd   :  { %p4355_p0 = scmp.ne.s32.totalorder %s7277_s2, %s4354_s26  ;;  %p4358_p1 = scmp.lt.u32.totalorder %s4354_s26, %s7277_s2 }
   0xf   :  { %p4360_p2 = pnand %p4358_p1, %p4355_p0 }
  0x11   :  { %4363 = shalt.err (!%p4360_p2)
}
  0x12   :  { %s4364_s30 = scalar_lea.vmem %s51_s21, 32  ;;  %p4369_p4 = scmp.lt.s32.totalorder %s51_s21, %s51_s21 }
  0x13   :  { %p4365_p3 = scmp.ne.s32.totalorder %s51_s21, %s4364_s30  ;;  %p4370_p5 = scmp.lt.s32.totalorder %s4364_s30, %s4364_s30 }
  0x15   :  { %p4371_p6 = por %p4370_p5, %p4369_p4 }
  0x17   :  { %p4372_p7 = pnand %p4371_p6, %p4365_p3 }
  0x19   :  { %4375 = shalt.err (!%p4372_p7)
}
  0x1a   :  { %53 = dma.hbm_to_vmem [thread:$0]  %s7277_s2, 32, %s51_s21, [#allocation8]  }
  0x1b   :  { %s4376_s20 = scalar_lea.hbm %s7279_s4, 32 }
  0x1c   :  { %p4377_p8 = scmp.ne.s32.totalorder %s7279_s4, %s4376_s20  ;;  %p4380_p9 = scmp.lt.u32.totalorder %s4376_s20, %s7279_s4 }
  0x1e   :  { %p4382_p10 = pnand %p4380_p9, %p4377_p8 }
  0x20   :  { %4385 = shalt.err (!%p4382_p10)
}
  0x21   :  { %s4386_s14 = scalar_lea.vmem %s73_s23, 32  ;;  %p4391_p12 = scmp.lt.s32.totalorder %s73_s23, %s73_s23 }
  0x22   :  { %p4387_p11 = scmp.ne.s32.totalorder %s73_s23, %s4386_s14  ;;  %p4392_p13 = scmp.lt.s32.totalorder %s4386_s14, %s4386_s14 }
  0x24   :  { %p4393_p0 = por %p4392_p13, %p4391_p12 }
  0x26   :  { %p4394_p1 = pnand %p4393_p0, %p4387_p11 }
  0x28   :  { %4397 = shalt.err (!%p4394_p1)
}
  0x29   :  { %75 = dma.hbm_to_vmem [thread:$0]  %s7279_s4, 32, %s73_s23, [#allocation11]  }
  0x2a   :  { %s4680_s27 = smov [#allocation13]   ;;  %s4398_s16 = scalar_lea.hbm %s7281_s6, 32 }
  0x2b   :  { %s92_s28 = sshll.u32 %s4680_s27, 4  ;;  %p4399_p2 = scmp.ne.s32.totalorder %s7281_s6, %s4398_s16  ;;  %s93_s28 = int_to_ptr.vmem [resolvable:$true] %s92_s28 }
  0x2c   :  { %p4402_p3 = scmp.lt.u32.totalorder %s4398_s16, %s7281_s6 }
  0x2e   :  { %p4404_p4 = pnand %p4402_p3, %p4399_p2 }
  0x30   :  { %4407 = shalt.err (!%p4404_p4)
}
  0x31   :  { %s4408_s22 = scalar_lea.vmem %s93_s28, 32  ;;  %p4413_p6 = scmp.lt.s32.totalorder %s93_s28, %s93_s28 }
  0x32   :  { %p4409_p5 = scmp.ne.s32.totalorder %s93_s28, %s4408_s22  ;;  %p4414_p7 = scmp.lt.s32.totalorder %s4408_s22, %s4408_s22 }
  0x34   :  { %p4415_p8 = por %p4414_p7, %p4413_p6 }
  0x36   :  { %p4416_p9 = pnand %p4415_p8, %p4409_p5 }
  0x38   :  { %4419 = shalt.err (!%p4416_p9)
}
  0x39   :  { %95 = dma.hbm_to_vmem [thread:$0]  %s7281_s6, 32, %s93_s28, [#allocation14]  }
  0x3a   :  { %s4681_s24 = smov [#allocation16]   ;;  %s4682_s26 = smov [#allocation19]  }
  0x3b   :  { %s113_s25 = sshll.u32 %s4681_s24, 4  ;;  %s137_s14 = sshll.u32 %s4682_s26, 4  ;;  %s114_s25 = int_to_ptr.vmem [resolvable:$true] %s113_s25  ;;  %s138_s14 = int_to_ptr.vmem [resolvable:$true] %s137_s14 }
  0x3c   :  { %s4420_s27 = scalar_lea.hbm %s7283_s8, 50176 }
  0x3d   :  { %p4421_p10 = scmp.ne.s32.totalorder %s7283_s8, %s4420_s27  ;;  %p4424_p11 = scmp.lt.u32.totalorder %s4420_s27, %s7283_s8 }
  0x3f   :  { %p4426_p12 = pnand %p4424_p11, %p4421_p10 }
  0x41   :  { %4429 = shalt.err (!%p4426_p12)
}
  0x42   :  { %s4430_s6 = scalar_lea.vmem %s114_s25, 50176  ;;  %p4435_p0 = scmp.lt.s32.totalorder %s114_s25, %s114_s25 }
  0x43   :  { %p4431_p13 = scmp.ne.s32.totalorder %s114_s25, %s4430_s6  ;;  %p4436_p1 = scmp.lt.s32.totalorder %s4430_s6, %s4430_s6 }
  0x45   :  { %p4437_p2 = por %p4436_p1, %p4435_p0 }
  0x47   :  { %p4438_p3 = pnand %p4437_p2, %p4431_p13 }
  0x49   :  { %4441 = shalt.err (!%p4438_p3)
}
  0x4a   :  { %s4683_s28 = smov 128   ;;  %s4684_s18 = smov 8  }
  0x4b   :  { %119 = dma.hbm_to_vmem [thread:$0]  %s7283_s8, 50176, %s114_s25, [#allocation17], %s4683_s28, %s4683_s28, %s4684_s18  }
  0x4c   :  { %s4442_s23 = scalar_lea.hbm %s7285_s10, 2048 }
  0x4d   :  { %p4443_p4 = scmp.ne.s32.totalorder %s7285_s10, %s4442_s23  ;;  %p4446_p5 = scmp.lt.u32.totalorder %s4442_s23, %s7285_s10 }
  0x4f   :  { %p4448_p6 = pnand %p4446_p5, %p4443_p4 }
  0x51   :  { %4451 = shalt.err (!%p4448_p6)
}
  0x52   :  { %s4452_s27 = scalar_lea.vmem %s138_s14, 2048  ;;  %p4457_p8 = scmp.lt.s32.totalorder %s138_s14, %s138_s14 }
  0x53   :  { %p4453_p7 = scmp.ne.s32.totalorder %s138_s14, %s4452_s27  ;;  %p4458_p9 = scmp.lt.s32.totalorder %s4452_s27, %s4452_s27 }
  0x55   :  { %p4459_p10 = por %p4458_p9, %p4457_p8 }
  0x57   :  { %p4460_p11 = pnand %p4459_p10, %p4453_p7 }
  0x59   :  { %4463 = shalt.err (!%p4460_p11)
}
  0x5a   :  { %143 = dma.hbm_to_vmem [thread:$0]  %s7285_s10, 2048, %s138_s14, [#allocation20], %s4683_s28, %s4683_s28, %s4684_s18  }
  0x5b   :  { %s4685_s29 = smov [#allocation22]   ;;  %s4686_s16 = smov [#allocation4]  }
  0x5c   :  { %s162_s30 = sshll.u32 %s4685_s29, 4  ;;  %s37_s17 = sshll.u32 %s4686_s16, 4  ;;  %s163_s30 = int_to_ptr.vmem [resolvable:$true] %s162_s30  ;;  %s38_s17 = int_to_ptr.vmem [resolvable:$true] %s37_s17 }
  0x5d   :  { %s4464_s20 = scalar_lea.hbm %s7287_s12, 32 }
  0x5e   :  { %p4465_p12 = scmp.ne.s32.totalorder %s7287_s12, %s4464_s20  ;;  %p4468_p13 = scmp.lt.u32.totalorder %s4464_s20, %s7287_s12 }
  0x60   :  { %p4470_p0 = pnand %p4468_p13, %p4465_p12 }
  0x62   :  { %4473 = shalt.err (!%p4470_p0)
}
  0x63   :  { %s4474_s10 = scalar_lea.vmem %s163_s30, 32  ;;  %p4479_p2 = scmp.lt.s32.totalorder %s163_s30, %s163_s30 }
  0x64   :  { %p4475_p1 = scmp.ne.s32.totalorder %s163_s30, %s4474_s10  ;;  %p4480_p3 = scmp.lt.s32.totalorder %s4474_s10, %s4474_s10 }
  0x66   :  { %p4481_p4 = por %p4480_p3, %p4479_p2 }
  0x68   :  { %p4482_p5 = pnand %p4481_p4, %p4475_p1 }
  0x6a   :  { %4485 = shalt.err (!%p4482_p5)
}
  0x6b   :  { %165 = dma.hbm_to_vmem [thread:$0]  %s7287_s12, 32, %s163_s30, [#allocation23]  }
  0x6c   :  { %s4486_s27 = scalar_lea.hbm %s7276_s1, 4096 }
  0x6d   :  { %p4487_p6 = scmp.ne.s32.totalorder %s7276_s1, %s4486_s27  ;;  %p4490_p7 = scmp.lt.u32.totalorder %s4486_s27, %s7276_s1 }
  0x6f   :  { %p4492_p8 = pnand %p4490_p7, %p4487_p6 }
  0x71   :  { %4495 = shalt.err (!%p4492_p8)
}
  0x72   :  { %s4496_s6 = scalar_lea.vmem %s38_s17, 4096  ;;  %p4501_p10 = scmp.lt.s32.totalorder %s38_s17, %s38_s17 }
  0x73   :  { %p4497_p9 = scmp.ne.s32.totalorder %s38_s17, %s4496_s6  ;;  %p4502_p11 = scmp.lt.s32.totalorder %s4496_s6, %s4496_s6 }
  0x75   :  { %p4503_p12 = por %p4502_p11, %p4501_p10 }
  0x77   :  { %p4504_p13 = pnand %p4503_p12, %p4497_p9 }
  0x79   :  { %4507 = shalt.err (!%p4504_p13)
}
  0x7a   :  { %43 = dma.hbm_to_vmem [thread:$0]  %s7276_s1, 4096, %s38_s17, [#allocation5], %s4683_s28, %s4683_s28, %s4684_s18  }
  0x7b   :  { %s4687_s19 = smov [#allocation9]   ;;  %s4508_s23 = scalar_lea.hbm %s7278_s3, 18432 }
  0x7c   :  { %s59_s20 = sshll.u32 %s4687_s19, 4  ;;  %p4509_p0 = scmp.ne.s32.totalorder %s7278_s3, %s4508_s23  ;;  %s60_s20 = int_to_ptr.vmem [resolvable:$true] %s59_s20 }
  0x7d   :  { %p4512_p1 = scmp.lt.u32.totalorder %s4508_s23, %s7278_s3 }
  0x7f   :  { %p4514_p2 = pnand %p4512_p1, %p4509_p0 }
  0x81   :  { %4517 = shalt.err (!%p4514_p2)
}
  0x82   :  { %s4518_s2 = scalar_lea.vmem %s60_s20, 18432  ;;  %p4523_p4 = scmp.lt.s32.totalorder %s60_s20, %s60_s20 }
  0x83   :  { %p4519_p3 = scmp.ne.s32.totalorder %s60_s20, %s4518_s2  ;;  %p4524_p5 = scmp.lt.s32.totalorder %s4518_s2, %s4518_s2 }
  0x85   :  { %p4525_p6 = por %p4524_p5, %p4523_p4 }
  0x87   :  { %p4526_p7 = pnand %p4525_p6, %p4519_p3 }
  0x89   :  { %4529 = shalt.err (!%p4526_p7)
}
  0x8a   :  { %s4688_s1 = smov 256   ;;  %s4689_s17 = smov 16  }
  0x8b   :  { %65 = dma.hbm_to_vmem [thread:$0]  %s7278_s3, 18432, %s60_s20, [#allocation8], %s4688_s1, %s4688_s1, %s4689_s17  }
  0x8c   :  { %s4690_s8 = smov [#allocation12]   ;;  %s4691_s29 = smov [#allocation15]  }
  0x8d   :  { %s82_s25 = sshll.u32 %s4690_s8, 4  ;;  %s101_s16 = sshll.u32 %s4691_s29, 4  ;;  %s83_s25 = int_to_ptr.vmem [resolvable:$true] %s82_s25  ;;  %s4886_s16 = int_to_ptr.vmem [resolvable:$true] %s101_s16 }
  0x8e   :  { %s4530_s30 = scalar_lea.hbm %s7280_s5, 32 }
  0x8f   :  { %p4531_p8 = scmp.ne.s32.totalorder %s7280_s5, %s4530_s30  ;;  %p4534_p9 = scmp.lt.u32.totalorder %s4530_s30, %s7280_s5 }
  0x91   :  { %p4536_p10 = pnand %p4534_p9, %p4531_p8 }
  0x93   :  { %4539 = shalt.err (!%p4536_p10)
}
  0x94   :  { %s4540_s3 = scalar_lea.vmem %s83_s25, 32  ;;  %p4545_p12 = scmp.lt.s32.totalorder %s83_s25, %s83_s25 }
  0x95   :  { %p4541_p11 = scmp.ne.s32.totalorder %s83_s25, %s4540_s3  ;;  %p4546_p13 = scmp.lt.s32.totalorder %s4540_s3, %s4540_s3 }
  0x97   :  { %p4547_p0 = por %p4546_p13, %p4545_p12 }
  0x99   :  { %p4548_p1 = pnand %p4547_p0, %p4541_p11 }
  0x9b   :  { %4551 = shalt.err (!%p4548_p1)
}
  0x9c   :  { %85 = dma.hbm_to_vmem [thread:$0]  %s7280_s5, 32, %s83_s25, [#allocation11]  }
  0x9d   :  { %s4552_s26 = scalar_lea.hbm %s7282_s7, 9216 }
  0x9e   :  { %p4553_p2 = scmp.ne.s32.totalorder %s7282_s7, %s4552_s26  ;;  %p4556_p3 = scmp.lt.u32.totalorder %s4552_s26, %s7282_s7 }
  0xa0   :  { %p4558_p4 = pnand %p4556_p3, %p4553_p2 }
  0xa2   :  { %4561 = shalt.err (!%p4558_p4)
}
  0xa3   :  { %s4562_s27 = scalar_lea.vmem %s4886_s16, 9216  ;;  %p4567_p6 = scmp.lt.s32.totalorder %s4886_s16, %s4886_s16 }
  0xa4   :  { %p4563_p5 = scmp.ne.s32.totalorder %s4886_s16, %s4562_s27  ;;  %p4568_p7 = scmp.lt.s32.totalorder %s4562_s27, %s4562_s27 }
  0xa6   :  { %p4569_p8 = por %p4568_p7, %p4567_p6 }
  0xa8   :  { %p4570_p9 = pnand %p4569_p8, %p4563_p5 }
  0xaa   :  { %4573 = shalt.err (!%p4570_p9)
}
  0xab   :  { %107 = dma.hbm_to_vmem [thread:$0]  %s7282_s7, 9216, %s4886_s16, [#allocation14], %s4683_s28, %s4683_s28, %s4684_s18  }
  0xac   :  { %s4692_s25 = smov [#allocation18]   ;;  %s4693_s6 = smov [#allocation21]  }
  0xad   :  { %s125_s29 = sshll.u32 %s4692_s25, 4  ;;  %s149_s12 = sshll.u32 %s4693_s6, 4  ;;  %s126_s29 = int_to_ptr.vmem [resolvable:$true] %s125_s29  ;;  %s4920_s12 = int_to_ptr.vmem [resolvable:$true] %s149_s12 }
  0xae   :  { %s4574_s22 = scalar_lea.hbm %s7284_s9, 2048 }
  0xaf   :  { %p4575_p10 = scmp.ne.s32.totalorder %s7284_s9, %s4574_s22  ;;  %p4578_p11 = scmp.lt.u32.totalorder %s4574_s22, %s7284_s9 }
  0xb1   :  { %p4580_p12 = pnand %p4578_p11, %p4575_p10 }
  0xb3   :  { %4583 = shalt.err (!%p4580_p12)
}
  0xb4   :  { %s4584_s7 = scalar_lea.vmem %s126_s29, 2048  ;;  %p4589_p0 = scmp.lt.s32.totalorder %s126_s29, %s126_s29 }
  0xb5   :  { %p4585_p13 = scmp.ne.s32.totalorder %s126_s29, %s4584_s7  ;;  %p4590_p1 = scmp.lt.s32.totalorder %s4584_s7, %s4584_s7 }
  0xb7   :  { %p4591_p2 = por %p4590_p1, %p4589_p0 }
  0xb9   :  { %p4592_p3 = pnand %p4591_p2, %p4585_p13 }
  0xbb   :  { %4595 = shalt.err (!%p4592_p3)
}
  0xbc   :  { %131 = dma.hbm_to_vmem [thread:$0]  %s7284_s9, 2048, %s126_s29, [#allocation17], %s4683_s28, %s4683_s28, %s4684_s18  }
  0xbd   :  { %s4596_s26 = scalar_lea.hbm %s7286_s11, 4096 }
  0xbe   :  { %p4597_p4 = scmp.ne.s32.totalorder %s7286_s11, %s4596_s26  ;;  %p4600_p5 = scmp.lt.u32.totalorder %s4596_s26, %s7286_s11 }
  0xc0   :  { %p4602_p6 = pnand %p4600_p5, %p4597_p4 }
  0xc2   :  { %4605 = shalt.err (!%p4602_p6)
}
  0xc3   :  { %s4606_s27 = scalar_lea.vmem %s4920_s12, 4096  ;;  %p4611_p8 = scmp.lt.s32.totalorder %s4920_s12, %s4920_s12 }
  0xc4   :  { %p4607_p7 = scmp.ne.s32.totalorder %s4920_s12, %s4606_s27  ;;  %p4612_p9 = scmp.lt.s32.totalorder %s4606_s27, %s4606_s27 }
  0xc6   :  { %p4613_p10 = por %p4612_p9, %p4611_p8 }
  0xc8   :  { %p4614_p11 = pnand %p4613_p10, %p4607_p7 }
  0xca   :  { %4617 = shalt.err (!%p4614_p11)
}
  0xcb   :  { %155 = dma.hbm_to_vmem [thread:$0]  %s7286_s11, 4096, %s4920_s12, [#allocation20], %s4683_s28, %s4683_s28, %s4684_s18  }
  0xcc   :  { %s4694_s8 = smov [#allocation24]   ;;  %s4618_s30 = scalar_lea.hbm %s7288_s13, 16 }
  0xcd   :  { %s172_s25 = sshll.u32 %s4694_s8, 4  ;;  %p4619_p12 = scmp.ne.s32.totalorder %s7288_s13, %s4618_s30  ;;  %s173_s25 = int_to_ptr.vmem [resolvable:$true] %s172_s25 }
  0xce   :  { %p4622_p13 = scmp.lt.u32.totalorder %s4618_s30, %s7288_s13 }
  0xd0   :  { %p4624_p0 = pnand %p4622_p13, %p4619_p12 }
  0xd2   :  { %4627 = shalt.err (!%p4624_p0)
}
  0xd3   :  { %s4628_s3 = scalar_lea.vmem %s173_s25, 16  ;;  %s4632_s11 = scalar_lea.vmem %s173_s25, 32 }
  0xd4   :  { %p4629_p1 = scmp.ne.s32.totalorder %s173_s25, %s4628_s3  ;;  %p4633_p2 = scmp.lt.s32.totalorder %s173_s25, %s173_s25 }
  0xd5   :  { %p4634_p3 = scmp.lt.s32.totalorder %s4632_s11, %s4628_s3 }
  0xd7   :  { %p4635_p4 = por %p4634_p3, %p4633_p2 }
  0xd9   :  { %p4636_p5 = pnand %p4635_p4, %p4629_p1 }
  0xdb   :  { %4639 = shalt.err (!%p4636_p5)
}
  0xdc   :  { %175 = dma.hbm_to_vmem [thread:$0]  %s7288_s13, 16, %s173_s25, [#allocation23]  }
  0xdd   :  { %4662 = dma.done.wait [#allocation5], 4096  }
  0xde   :  { %4663 = vsyncadd [#allocation5], 4294963200 }
  0xdf   :  { %4664 = dma.done.wait [#allocation8], 18464  }
  0xe0   :  { %4665 = vsyncadd [#allocation8], 4294948832 }
  0xe1   :  { %4666 = dma.done.wait [#allocation11], 64  }
  0xe2   :  { %4667 = vsyncadd [#allocation11], 4294967232 }
  0xe3   :  { %4668 = dma.done.wait [#allocation14], 9248  }
  0xe4   :  { %4669 = vsyncadd [#allocation14], 4294958048 }
  0xe5   :  { %4670 = dma.done.wait [#allocation17], 52224  }
  0xe6   :  { %4671 = vsyncadd [#allocation17], 4294915072 }
  0xe7   :  { %4672 = dma.done.wait [#allocation20], 6144  }
  0xe8   :  { %4673 = vsyncadd [#allocation20], 4294961152 }
  0xe9   :  { %4674 = dma.done.wait [#allocation23], 48  }
  0xea   :  { %4675 = vsyncadd [#allocation23], 4294967248  ;;  %v4099_v1 = vld [vmem:[#allocation4 + $0x4] ss:$8 sps:$4 sm:$0xff]   ;;  %v4101_v2 = vld [vmem:[#allocation4] ss:$8 sps:$4 sm:$0xff]   ;;  %v7291_v41 = vlaneseq }
  0xeb   :  { %470 = vmatprep.subr.bf16.mxu0 %v4099_v1  ;;  %v4102_v3 = vld [vmem:[#allocation4 + $0x14] ss:$8 sps:$4 sm:$0xff]   ;;  %v4104_v4 = vld [vmem:[#allocation4 + $0x10] ss:$8 sps:$4 sm:$0xff]   ;;  %v4105_v5 = vld [vmem:[#allocation4 + $0x24] ss:$8 sps:$4 sm:$0xff]  }
  0xec   :  { %471 = vmatpush1.bf16.msra.mxu0 %v4101_v2  ;;  %v4107_v6 = vld [vmem:[#allocation4 + $0x20] ss:$8 sps:$4 sm:$0xff]   ;;  %v4108_v7 = vld [vmem:[#allocation4 + $0x34] ss:$8 sps:$4 sm:$0xff]   ;;  %v4110_v8 = vld [vmem:[#allocation4 + $0x30] ss:$8 sps:$4 sm:$0xff]  }
  0xed   :  { %472 = vmatprep.subr.bf16.mxu0 %v4102_v3  ;;  %v4111_v9 = vld [vmem:[#allocation4 + $0x44] ss:$8 sps:$4 sm:$0xff]   ;;  %v4113_v10 = vld [vmem:[#allocation4 + $0x40] ss:$8 sps:$4 sm:$0xff]   ;;  %v4114_v11 = vld [vmem:[#allocation4 + $0x54] ss:$8 sps:$4 sm:$0xff]  }
  0xee   :  { %v4116_v12 = vld [vmem:[#allocation4 + $0x50] ss:$8 sps:$4 sm:$0xff]   ;;  %v4117_v13 = vld [vmem:[#allocation4 + $0x64] ss:$8 sps:$4 sm:$0xff]   ;;  %v4119_v15 = vld [vmem:[#allocation4 + $0x60] ss:$8 sps:$4 sm:$0xff]  }
  0xef   :  { %v4149_v14 = vld [vmem:[%s7275_s0 + $0x4] ss:$8 sps:$4 sm:$0xff]   ;;  %v4120_v16 = vld [vmem:[#allocation4 + $0x74] ss:$8 sps:$4 sm:$0xff]   ;;  %v4122_v17 = vld [vmem:[#allocation4 + $0x70] ss:$8 sps:$4 sm:$0xff]  }
  0xf0   :  { %473 = vmatpush1.bf16.msra.mxu0 %v4104_v4  ;;  %502 = vmatprep.mubr.bf16.mxu0 %v4149_v14  ;;  %v4123_v18 = vld [vmem:[#allocation4 + $0x84] ss:$8 sps:$4 sm:$0xff]   ;;  %v4125_v19 = vld [vmem:[#allocation4 + $0x80] ss:$8 sps:$4 sm:$0xff]   ;;  %v4126_v20 = vld [vmem:[#allocation4 + $0x94] ss:$8 sps:$4 sm:$0xff]  }
  0xf1   :  { %474 = vmatprep.subr.bf16.mxu0 %v4105_v5  ;;  %v4128_v21 = vld [vmem:[#allocation4 + $0x90] ss:$8 sps:$4 sm:$0xff]   ;;  %v4129_v22 = vld [vmem:[#allocation4 + $0xa4] ss:$8 sps:$4 sm:$0xff]   ;;  %v4131_v23 = vld [vmem:[#allocation4 + $0xa0] ss:$8 sps:$4 sm:$0xff]  }
  0xf2   :  { %v4132_v24 = vld [vmem:[#allocation4 + $0xb4] ss:$8 sps:$4 sm:$0xff]   ;;  %v4134_v25 = vld [vmem:[#allocation4 + $0xb0] ss:$8 sps:$4 sm:$0xff]   ;;  %v4135_v26 = vld [vmem:[#allocation4 + $0xc4] ss:$8 sps:$4 sm:$0xff]  }
  0xf3   :  { %v4137_v27 = vld [vmem:[#allocation4 + $0xc0] ss:$8 sps:$4 sm:$0xff]   ;;  %v4138_v28 = vld [vmem:[#allocation4 + $0xd4] ss:$8 sps:$4 sm:$0xff]   ;;  %v4140_v29 = vld [vmem:[#allocation4 + $0xd0] ss:$8 sps:$4 sm:$0xff]  }
  0xf4   :  { %475 = vmatpush1.bf16.msra.mxu0 %v4107_v6  ;;  %v4141_v30 = vld [vmem:[#allocation4 + $0xe4] ss:$8 sps:$4 sm:$0xff]   ;;  %v4143_v31 = vld [vmem:[#allocation4 + $0xe0] ss:$8 sps:$4 sm:$0xff]   ;;  %v4144_v32 = vld [vmem:[#allocation4 + $0xf4] ss:$8 sps:$4 sm:$0xff]  }
  0xf5   :  { %476 = vmatprep.subr.bf16.mxu0 %v4108_v7  ;;  %v4146_v33 = vld [vmem:[#allocation4 + $0xf0] ss:$8 sps:$4 sm:$0xff]   ;;  %v4147_v34 = vld [vmem:[%s7275_s0] ss:$8 sps:$4 sm:$0xff]   ;;  %v4153_v37 = vld [vmem:[%s7275_s0 + $0x24] ss:$8 sps:$4 sm:$0xff]  }
  0xf6   :  { %v4150_v35 = vld [vmem:[%s7275_s0 + $0x14] ss:$8 sps:$4 sm:$0xff]   ;;  %v4152_v36 = vld [vmem:[%s7275_s0 + $0x10] ss:$8 sps:$4 sm:$0xff]   ;;  %v4155_v38 = vld [vmem:[%s7275_s0 + $0x20] ss:$8 sps:$4 sm:$0xff]  }
  0xf7   :  { %v4156_v39 = vld [vmem:[%s7275_s0 + $0x34] ss:$8 sps:$4 sm:$0xff]   ;;  %v4158_v40 = vld [vmem:[%s7275_s0 + $0x30] ss:$8 sps:$4 sm:$0xff]   ;;  %v4994_v42 = vshrl.u32 %v7291_v41, 7  ;;  %v807_v56 = vld [vmem:[#allocation9 + $0x200] sm:$0xff] }
  0xf8   :  { %477 = vmatpush1.bf16.msra.mxu0 %v4110_v8  ;;  %v258_v44 = vld [vmem:[#allocation7] sm:$0x3]  ;;  %v1067_v53 = vld [vmem:[#allocation10] sm:$0x3]  ;;  %v629_v55 = vld [vmem:[#allocation9 + $0x90] sm:$0xff]  ;;  %vm3713_vm6 = vcmask 7168  }
  0xf9   :  { %478 = vmatprep.subr.bf16.mxu0 %v4111_v9  ;;  %7499 = vst [vmem:[#allocation34_spill] sm:$0xff] %v4994_v42  ;;  %v4997_v43 = vsub.s32 0, %v4994_v42  ;;  %v5000_v45 = vsub.s32 1, %v4994_v42  ;;  %vm577_vm0 = vcmp.lt.s32.totalorder %v4994_v42, 1  ;;  %v630_v60 = vld [vmem:[#allocation9 + $0x98] sm:$0xff]  ;;  %v808_v61 = vld [vmem:[#allocation9 + $0x208] sm:$0xff] }
  0xfa   :  { %vm691_vm1 = vcmp.lt.s32.totalorder %v4994_v42, 7  ;;  %v631_v0 = vld [vmem:[#allocation9 + $0xa0] sm:$0xff]  ;;  %v809_v1 = vld [vmem:[#allocation9 + $0x210] sm:$0xff]  ;;  %vm1572_vm2 = vcmp.lt.s32.totalorder %v4994_v42, 3  ;;  %vm1605_vm3 = vcmp.lt.s32.totalorder %v4994_v42, 2  ;;  %vm1754_vm4 = vcmp.lt.s32.totalorder %v4994_v42, 6 }
  0xfb   :  { %7500 = vst [vmem:[#allocation35_spill] sm:$0xff] %v4997_v43  ;;  %7501 = vst [vmem:[#allocation36_spill] sm:$0xff] %v5000_v45  ;;  %v5003_v46 = vrot.slane %v258_v44, %v4997_v43  ;;  %v5006_v47 = vrot.slane %v258_v44, %v5000_v45  ;;  %v5021_v2 = vrot.slane %v1067_v53, %v4997_v43  ;;  %vm1796_vm5 = vcmp.lt.s32.totalorder %v4994_v42, 5  ;;  %s4697_s0 = smov [#allocation25]  }
  0xfc   :  { %479 = vmatpush1.bf16.msra.mxu0 %v4113_v10  ;;  %v5024_v3 = vrot.slane %v1067_v53, %v5000_v45  ;;  %v635_v53 = vld [vmem:[#allocation9 + $0xc0] sm:$0xff]  ;;  %v817_v45 = vld [vmem:[#allocation9 + $0x250] sm:$0xff]  ;;  %s3900_s8 = sshll.u32 %s4697_s0, 4  ;;  %s3901_s8 = int_to_ptr.vmem [resolvable:$true] %s3900_s8 }
  0xfd   :  { %480 = vmatprep.subr.bf16.mxu0 %v4114_v11  ;;  %s4640_s25 = scalar_lea.vmem %s3901_s8, 32  ;;  %p4645_p7 = scmp.lt.s32.totalorder %s3901_s8, %s3901_s8 }
  0xfe   :  { %p4641_p6 = scmp.ne.s32.totalorder %s3901_s8, %s4640_s25  ;;  %p4646_p8 = scmp.lt.s32.totalorder %s4640_s25, %s4640_s25 }
 0x100   :  { %481 = vmatpush1.bf16.msra.mxu0 %v4116_v12  ;;  %v632_v12 = vld [vmem:[#allocation9 + $0xa8] sm:$0xff]  ;;  %p4647_p9 = por %p4646_p8, %p4645_p7 }
 0x101   :  { %482 = vmatprep.subr.bf16.mxu0 %v4117_v13 }
 0x102   :  { %p4648_p10 = pnand %p4647_p9, %p4641_p6 }
 0x104   :  { %483 = vmatpush1.bf16.msra.mxu0 %v4119_v15 }
 0x105   :  { %484 = vmatprep.subr.bf16.mxu0 %v4120_v16 }
 0x108   :  { %485 = vmatpush1.bf16.msra.mxu0 %v4122_v17 }
 0x109   :  { %486 = vmatprep.subr.bf16.mxu0 %v4123_v18  ;;  %v810_v18 = vld [vmem:[#allocation9 + $0x218] sm:$0xff] }
 0x10c   :  { %487 = vmatpush1.bf16.msra.mxu0 %v4125_v19 }
 0x10d   :  { %488 = vmatprep.subr.bf16.mxu0 %v4126_v20 }
 0x110   :  { %489 = vmatpush1.bf16.msra.mxu0 %v4128_v21 }
 0x111   :  { %490 = vmatprep.subr.bf16.mxu0 %v4129_v22 }
 0x114   :  { %491 = vmatpush1.bf16.msra.mxu0 %v4131_v23 }
 0x115   :  { %492 = vmatprep.subr.bf16.mxu0 %v4132_v24  ;;  %v968_v24 = vld [vmem:[#allocation9 + $0x3f0] sm:$0xff] }
 0x118   :  { %493 = vmatpush1.bf16.msra.mxu0 %v4134_v25 }
 0x119   :  { %494 = vmatprep.subr.bf16.mxu0 %v4135_v26 }
 0x11c   :  { %495 = vmatpush1.bf16.msra.mxu0 %v4137_v27 }
 0x11d   :  { %496 = vmatprep.subr.bf16.mxu0 %v4138_v28  ;;  %v711_v28 = vld [vmem:[#allocation9 + $0x110] sm:$0xff] }
 0x120   :  { %497 = vmatpush1.bf16.msra.mxu0 %v4140_v29  ;;  %v712_v29 = vld [vmem:[#allocation9 + $0x118] sm:$0xff] }
 0x121   :  { %498 = vmatprep.subr.bf16.mxu0 %v4141_v30  ;;  %v969_v30 = vld [vmem:[#allocation9 + $0x3f8] sm:$0xff] }
 0x124   :  { %499 = vmatpush1.bf16.msra.mxu0 %v4143_v31 }
 0x125   :  { %500 = vmatprep.subr.bf16.mxu0 %v4144_v32 }
 0x128   :  { %501 = vmatpush1.bf16.msra.mxu0 %v4146_v33 }
 0x12b   :  { %503 = vmatmul.mubr.bf16.vlgmr.msra.gmra.mrb[0].mxu0 %v4147_v34  ;;  %v633_v34 = vld [vmem:[#allocation9 + $0xb0] sm:$0xff] }
 0x12c   :  { %512 = vmatprep.mubr.bf16.mxu0 %v4150_v35  ;;  %v811_v35 = vld [vmem:[#allocation9 + $0x220] sm:$0xff] }
 0x133   :  { %513 = vmatmul.mubr.bf16.gmra.mrb[4].mxu0 %v4152_v36 }
 0x134   :  { %522 = vmatprep.mubr.bf16.mxu0 %v4153_v37 }
 0x13b   :  { %523 = vmatmul.mubr.bf16.gmra.mrb[8].mxu0 %v4155_v38 }
 0x13c   :  { %532 = vmatprep.mubr.bf16.mxu0 %v4156_v39 }
 0x143   :  { %533 = vmatmul.mubr.bf16.gmra.mrb[12].mxu0 %v4158_v40 }
 0x1fe   :  { %v504_v48 = vpop.f32.mrb[0].mxu0 }
 0x1ff   :  { %v505_v49 = vadd.f32 %v504_v48, %v5003_v46  ;;  %v506_v50 = vpop.f32.mrb[1].mxu0  ;;  %v634_v48 = vld [vmem:[#allocation9 + $0xb8] sm:$0xff] }
 0x200   :  { %v507_v51 = vadd.f32 %v506_v50, %v5006_v47  ;;  %v508_v52 = vpop.f32.mrb[2].mxu0 }
 0x201   :  { %v5010_v54 = vmax.f32 %v505_v49, 0.0  ;;  %v509_v57 = vadd.f32 %v508_v52, %v5003_v46  ;;  %v510_v58 = vpop.f32.mrb[3].mxu0  ;;  %v812_v49 = vld [vmem:[#allocation9 + $0x228] sm:$0xff] }
 0x202   :  { %v5014_v59 = vmax.f32 %v507_v51, 0.0  ;;  %v511_v62 = vadd.f32 %v510_v58, %v5006_v47 }
 0x203   :  { %v5018_v63 = vmax.f32 %v509_v57, 0.0  ;;  %v7298_v4 = vrot.slane %v5010_v54, 7  ;;  %v5028_v5 = vmul.f32 %v629_v55, %v5010_v54  ;;  %v5031_v6 = vmul.f32 %v807_v56, %v5010_v54  ;;  %v813_v55 = vld [vmem:[#allocation9 + $0x230] sm:$0xff] }
 0x204   :  { %v5033_v7 = vmax.f32 %v511_v62, 0.0  ;;  %v7297_v8 = vrot.slane %v5014_v59, 7  ;;  %v5037_v9 = vmul.f32 %v630_v60, %v5014_v59  ;;  %v5040_v10 = vmul.f32 %v808_v61, %v5014_v59 }
 0x205   :  { %7502 = vst [vmem:[#allocation37_spill] sm:$0xff] %v5018_v63  ;;  %7503 = vst [vmem:[#allocation38_spill] sm:$0xff] %v5028_v5  ;;  %v7293_v11 = vrot.slane %v5018_v63, 7  ;;  %v5044_v13 = vmul.f32 %v631_v0, %v5018_v63  ;;  %v5047_v14 = vmul.f32 %v809_v1, %v5018_v63  ;;  %v7301_v17 = vrot.slane %v5010_v54, 1  ;;  %v636_v1 = vld [vmem:[#allocation9 + $0xc8] sm:$0xff] }
 0x206   :  { %7504 = vst [vmem:[#allocation39_spill] sm:$0xff] %v5031_v6  ;;  %7505 = vst [vmem:[#allocation40_spill] sm:$0xff] %v5033_v7  ;;  %v7292_v15 = vrot.slane %v5033_v7, 7  ;;  %v514_v16 = vpop.f32.mrb[4].mxu0  ;;  %v7299_v21 = vrot.slane %v5014_v59, 1  ;;  %v7296_v22 = vrot.slane %v5018_v63, 1  ;;  %v5056_v25 = vmul.f32 %v632_v12, %v5033_v7 }
 0x207   :  { %7506 = vst [vmem:[#allocation41_spill] sm:$0xff] %v5040_v10  ;;  %7507 = vst [vmem:[#allocation42_spill] sm:$0xff] %v5044_v13  ;;  %v515_v19 = vadd.f32 %v514_v16, %v5003_v46  ;;  %v516_v20 = vpop.f32.mrb[5].mxu0  ;;  %v7295_v23 = vrot.slane %v5033_v7, 1  ;;  %v5065_v31 = vsel %vm577_vm0, %v7298_v4, %v7293_v11  ;;  %v5093_v40 = vmul.f32 %v810_v18, %v5033_v7  ;;  %v721_v6 = vld [vmem:[#allocation9 + $0x160] sm:$0xff]  ;;  %v865_v63 = vld [vmem:[#allocation9 + $0x2c8] sm:$0xff] }
 0x208   :  { %7508 = vst [vmem:[#allocation43_spill] sm:$0xff] %v5047_v14  ;;  %7509 = vst [vmem:[#allocation44_spill] sm:$0xff] %v5056_v25  ;;  %v517_v26 = vadd.f32 %v516_v20, %v5006_v47  ;;  %v518_v27 = vpop.f32.mrb[6].mxu0  ;;  %v5073_v32 = vsel %vm577_vm0, %v7297_v8, %v7292_v15  ;;  %v704_v38 = vsel %vm691_vm1, %v7301_v17, %v7296_v22  ;;  %v602_v20 = vld [vmem:[#allocation9 + $0x40] sm:$0xff] }
 0x209   :  { %7510 = vst [vmem:[#allocation45_spill] sm:$0xff] %v5065_v31  ;;  %7511 = vst [vmem:[#allocation46_spill] sm:$0xff] %v5073_v32  ;;  %v5075_v33 = vmax.f32 %v515_v19, 0.0  ;;  %v519_v36 = vadd.f32 %v518_v27, %v5003_v46  ;;  %v520_v37 = vpop.f32.mrb[7].mxu0  ;;  %v5090_v39 = vsel %vm691_vm1, %v7299_v21, %v7295_v23  ;;  %v5099_v51 = vmul.f32 %v968_v24, %v5010_v54  ;;  %v856_v24 = vld [vmem:[#allocation9 + $0x280] sm:$0xff] }
 0x20a   :  { %7513 = vst [vmem:[#allocation48_spill] sm:$0xff] %v5090_v39  ;;  %7514 = vst [vmem:[#allocation49_spill] sm:$0xff] %v5093_v40  ;;  %v5095_v44 = vmax.f32 %v517_v26, 0.0  ;;  %v521_v50 = vadd.f32 %v520_v37, %v5006_v47  ;;  %v5103_v56 = vmul.f32 %v711_v28, %v704_v38  ;;  %v5106_v57 = vmul.f32 %v712_v29, %v5090_v39  ;;  %v815_v27 = vld [vmem:[#allocation9 + $0x240] sm:$0xff] }
 0x20b   :  { %7512 = vst [vmem:[#allocation47_spill] sm:$0xff] %v5075_v33  ;;  %7516 = vst [vmem:[#allocation51_spill] sm:$0xff] %v5099_v51  ;;  %v5101_v52 = vmax.f32 %v519_v36, 0.0  ;;  %v5109_v58 = vmul.f32 %v969_v30, %v5014_v59  ;;  %v7294_v60 = vrot.slane %v5075_v33, 7  ;;  %v5113_v61 = vmul.f32 %v633_v34, %v5075_v33  ;;  %v603_v30 = vld [vmem:[#allocation9 + $0x48] sm:$0xff]  ;;  %v866_v51 = vld [vmem:[#allocation9 + $0x2d0] sm:$0xff] }
 0x20c   :  { %7515 = vst [vmem:[#allocation50_spill] sm:$0xff] %v5095_v44  ;;  %7518 = vst [vmem:[#allocation53_spill] sm:$0xff] %v5103_v56  ;;  %v5116_v62 = vmul.f32 %v811_v35, %v5075_v33  ;;  %v5118_v0 = vmax.f32 %v521_v50, 0.0  ;;  %v7300_v12 = vrot.slane %v5095_v44, 7  ;;  %v5122_v16 = vmul.f32 %v634_v48, %v5095_v44  ;;  %v857_v35 = vld [vmem:[#allocation9 + $0x288] sm:$0xff] }
 0x20d   :  { %7517 = vst [vmem:[#allocation52_spill] sm:$0xff] %v5101_v52  ;;  %7519 = vst [vmem:[#allocation54_spill] sm:$0xff] %v5106_v57  ;;  %v5125_v18 = vmul.f32 %v812_v49, %v5095_v44  ;;  %v565_v19 = vrot.slane %v5101_v52, 7  ;;  %v651_v26 = vmul.f32 %v635_v53, %v5101_v52  ;;  %v5131_v28 = vmul.f32 %v813_v55, %v5101_v52  ;;  %v1017_v53 = vld [vmem:[#allocation9 + $0x470] sm:$0xff]  ;;  %v914_v33 = vld [vmem:[#allocation9 + $0x348] sm:$0xff] }
 0x20e   :  { %7520 = vst [vmem:[#allocation55_spill] sm:$0xff] %v5109_v58  ;;  %7521 = vst [vmem:[#allocation56_spill] sm:$0xff] %v5113_v61  ;;  %v566_v29 = vrot.slane %v5118_v0, 7  ;;  %v524_v34 = vpop.f32.mrb[8].mxu0  ;;  %v652_v37 = vmul.f32 %v636_v1, %v5118_v0  ;;  %v599_v1 = vld [vmem:[#allocation9 + $0x28] sm:$0xff]  ;;  %v5158_v4 = vmul.f32 %v857_v35, %v5090_v39  ;;  %v5165_v17 = vmul.f32 %v1017_v53, %v704_v38  ;;  %v1011_v57 = vld [vmem:[#allocation9 + $0x440] sm:$0xff] }
 0x20f   :  { %7522 = vst [vmem:[#allocation57_spill] sm:$0xff] %v5116_v62  ;;  %7523 = vst [vmem:[#allocation58_spill] sm:$0xff] %v5118_v0  ;;  %v5138_v36 = vsel %vm577_vm0, %v7294_v60, %v565_v19  ;;  %v525_v49 = vadd.f32 %v524_v34, %v5003_v46  ;;  %v526_v50 = vpop.f32.mrb[9].mxu0  ;;  %v5151_v60 = vmul.f32 %v856_v24, %v704_v38  ;;  %v637_v34 = vld [vmem:[#allocation9 + $0xd0] sm:$0xff]  ;;  %v7533_v53 = vrot.slane %v5101_v52, 1  ;;  %v606_v62 = vld [vmem:[#allocation9 + $0x60] sm:$0xff] }
 0x210   :  { %7524 = vst [vmem:[#allocation59_spill] sm:$0xff] %v5122_v16  ;;  %7525 = vst [vmem:[#allocation60_spill] sm:$0xff] %v5125_v18  ;;  %v618_v55 = vmul.f32 %v602_v20, %v5138_v36  ;;  %v5148_v41 = vsel %vm577_vm0, %v7300_v12, %v566_v29  ;;  %v527_v15 = vadd.f32 %v526_v50, %v5006_v47  ;;  %v528_v11 = vpop.f32.mrb[10].mxu0  ;;  %v638_v50 = vld [vmem:[#allocation9 + $0xd8] sm:$0xff]  ;;  %v607_v61 = vld [vmem:[#allocation9 + $0x68] sm:$0xff] }
 0x211   :  { %7526 = vst [vmem:[#allocation61_spill] sm:$0xff] %v5131_v28  ;;  %7527 = vst [vmem:[#allocation62_spill] sm:$0xff] %v5138_v36  ;;  %v619_v23 = vmul.f32 %v603_v30, %v5148_v41  ;;  %v5154_v22 = vmax.f32 %v525_v49, 0.0  ;;  %v529_v8 = vadd.f32 %v528_v11, %v5003_v46  ;;  %v530_v20 = vpop.f32.mrb[11].mxu0  ;;  %v604_v49 = vld [vmem:[#allocation9 + $0x50] sm:$0xff]  ;;  %v5172_v35 = vmul.f32 %v599_v1, %v5073_v32 }
 0x212   :  { %7528 = vst [vmem:[#allocation63_spill] sm:$0xff] %v5148_v41  ;;  %7529 = vst [vmem:[#allocation64_spill] sm:$0xff] %v5151_v60  ;;  %v5160_v21 = vadd.f32 %v651_v26, %v618_v55  ;;  %v5162_v12 = vmax.f32 %v527_v15, 0.0  ;;  %v531_v24 = vadd.f32 %v530_v20, %v5006_v47  ;;  %v605_v55 = vld [vmem:[#allocation9 + $0x58] sm:$0xff]  ;;  %v718_v60 = vld [vmem:[#allocation9 + $0x148] sm:$0xff] }
 0x213   :  { %7530 = vst [vmem:[#allocation65_spill] sm:$0xff] %v5158_v4  ;;  %7531 = vst [vmem:[#allocation66_spill] sm:$0xff] %v5165_v17  ;;  %v5167_v48 = vadd.f32 %v652_v37, %v619_v23  ;;  %v567_v30 = vrot.slane %v5154_v22, 7  ;;  %v7310_v11 = vrot.slane %v5154_v22, 1  ;;  %v653_v26 = vmul.f32 %v637_v34, %v5154_v22  ;;  %v639_v23 = vld [vmem:[#allocation9 + $0xe0] sm:$0xff]  ;;  %v818_v41 = vld [vmem:[#allocation9 + $0x258] sm:$0xff] }
 0x214   :  { %v568_v15 = vrot.slane %v5162_v12, 7  ;;  %v5177_v38 = vmax.f32 %v529_v8, 0.0  ;;  %v654_v34 = vmul.f32 %v638_v50, %v5162_v12  ;;  %v5192_v43 = vmax.f32 %v531_v24, 0.0  ;;  %v640_v8 = vld [vmem:[#allocation9 + $0xe8] sm:$0xff]  ;;  %v769_v17 = vld [vmem:[#allocation9 + $0x1d8] sm:$0xff] }
 0x215   :  { %v5181_v37 = vsel %vm577_vm0, %v565_v19, %v567_v30  ;;  %v5189_v1 = vsel %vm691_vm1, %v7533_v53, %v7310_v11  ;;  %v5201_v18 = vmul.f32 %v815_v27, %v5154_v22  ;;  %v7536_v50 = vrot.slane %v5162_v12, 1 }
 0x216   :  { %7532 = vst [vmem:[#allocation67_spill] sm:$0xff] %v5181_v37  ;;  %7534 = vst [vmem:[#allocation68_spill] sm:$0xff] %v5189_v1  ;;  %v620_v20 = vmul.f32 %v604_v49, %v5181_v37  ;;  %v5197_v19 = vsel %vm577_vm0, %v566_v29, %v568_v15  ;;  %v534_v36 = vpop.f32.mrb[12].mxu0  ;;  %v7537_v24 = vrot.slane %v5118_v0, 1  ;;  %v655_v29 = vmul.f32 %v639_v23, %v5177_v38 }
 0x217   :  { %7535 = vst [vmem:[#allocation69_spill] sm:$0xff] %v5197_v19  ;;  %v621_v53 = vmul.f32 %v605_v55, %v5197_v19  ;;  %v536_v28 = vpop.f32.mrb[13].mxu0  ;;  %v5217_v27 = vmul.f32 %v817_v45, %v5177_v38  ;;  %v656_v55 = vmul.f32 %v640_v8, %v5192_v43  ;;  %v535_v14 = vadd.f32 %v534_v36, %v5003_v46  ;;  %v642_v36 = vld [vmem:[#allocation9 + $0xf8] sm:$0xff] }
 0x218   :  { %v5210_v49 = vsel %vm691_vm1, %v7537_v24, %v7536_v50  ;;  %v5214_v40 = vadd.f32 %v653_v26, %v620_v20  ;;  %v538_v16 = vpop.f32.mrb[14].mxu0  ;;  %v5222_v50 = vmul.f32 %v818_v41, %v5192_v43  ;;  %v641_v24 = vld [vmem:[#allocation9 + $0xf0] sm:$0xff]  ;;  %v537_v23 = vadd.f32 %v536_v28, %v5006_v47 }
 0x219   :  { %7538 = vst [vmem:[#allocation70_spill] sm:$0xff] %v5210_v49  ;;  %v539_v11 = vadd.f32 %v538_v16, %v5003_v46  ;;  %v540_v0 = vpop.f32.mrb[15].mxu0  ;;  %v7539_v26 = vrot.slane %v5177_v38, 7  ;;  %v5232_v20 = vmax.f32 %v535_v14, 0.0  ;;  %v7540_v41 = vrot.slane %v5192_v43, 7  ;;  %v821_v14 = vld [vmem:[#allocation9 + $0x270] sm:$0xff] }
 0x21a   :  { %v541_v8 = vadd.f32 %v540_v0, %v5006_v47  ;;  %v5242_v16 = vadd.f32 %v654_v34, %v621_v53  ;;  %v5244_v28 = vmax.f32 %v537_v23, 0.0  ;;  %v719_v34 = vld [vmem:[#allocation9 + $0x150] sm:$0xff]  ;;  %v686_v10 = vrot.slane %v5192_v43, 1 }
 0x21b   :  { %v5230_v45 = vsel %vm577_vm0, %v567_v30, %v7539_v26  ;;  %v5239_v13 = vsel %vm577_vm0, %v568_v15, %v7540_v41  ;;  %v5246_v52 = vmax.f32 %v539_v11, 0.0  ;;  %v627_v30 = vld [vmem:[#allocation9 + $0x80] sm:$0xff]  ;;  %v628_v26 = vld [vmem:[#allocation9 + $0x88] sm:$0xff]  ;;  %v5251_v0 = vmul.f32 %v641_v24, %v5232_v20  ;;  %v720_v11 = vld [vmem:[#allocation9 + $0x158] sm:$0xff] }
 0x21c   :  { %v622_v46 = vmul.f32 %v606_v62, %v5230_v45  ;;  %v623_v4 = vmul.f32 %v607_v61, %v5239_v13  ;;  %v5253_v15 = vmax.f32 %v541_v8, 0.0  ;;  %v685_v62 = vrot.slane %v5177_v38, 1  ;;  %v717_v41 = vld [vmem:[#allocation9 + $0x140] sm:$0xff] }
 0x21d   :  { %v5258_v53 = vmul.f32 %v642_v36, %v5244_v28  ;;  %v766_v61 = vld [vmem:[#allocation9 + $0x1c0] sm:$0xff]  ;;  %v5262_v47 = vmul.f32 %v627_v30, %v5246_v52  ;;  %v5265_v24 = vmul.f32 %v821_v14, %v5246_v52  ;;  %v722_v30 = vld [vmem:[#allocation9 + $0x168] sm:$0xff]  ;;  %v7541_v32 = vrot.slane %v5154_v22, 1 }
 0x21e   :  { %v671_v23 = vadd.f32 %v655_v29, %v622_v46  ;;  %v5269_v31 = vmul.f32 %v628_v26, %v5253_v15  ;;  %v672_v36 = vadd.f32 %v656_v55, %v623_v4  ;;  %v733_v26 = vmul.f32 %v717_v41, %v5189_v1  ;;  %v767_v4 = vld [vmem:[#allocation9 + $0x1c8] sm:$0xff]  ;;  %v768_v55 = vld [vmem:[#allocation9 + $0x1d0] sm:$0xff] }
 0x21f   :  { %v5278_v14 = vsel %vm691_vm1, %v7541_v32, %v685_v62  ;;  %v734_v8 = vmul.f32 %v718_v60, %v5210_v49  ;;  %v782_v29 = vmul.f32 %v766_v61, %v5181_v37  ;;  %v7542_v46 = vrot.slane %v5232_v20, 1  ;;  %v816_v49 = vld [vmem:[#allocation9 + $0x248] sm:$0xff] }
 0x220   :  { %v7543_v58 = vrot.slane %v5244_v28, 1  ;;  %v7544_v7 = vrot.slane %v5162_v12, 1  ;;  %v735_v41 = vmul.f32 %v719_v34, %v5278_v14  ;;  %v783_v56 = vmul.f32 %v767_v4, %v5197_v19  ;;  %v913_v34 = vld [vmem:[#allocation9 + $0x340] sm:$0xff] }
 0x221   :  { %v694_v39 = vsel %vm691_vm1, %v685_v62, %v7542_v46  ;;  %v749_v62 = vadd.f32 %v733_v26, %v5160_v21  ;;  %v864_v46 = vld [vmem:[#allocation9 + $0x2c0] sm:$0xff]  ;;  %v784_v44 = vmul.f32 %v768_v55, %v5230_v45  ;;  %v832_v21 = vmul.f32 %v816_v49, %v5162_v12  ;;  %v963_v26 = vld [vmem:[#allocation9 + $0x3c8] sm:$0xff] }
 0x222   :  { %v695_v32 = vsel %vm691_vm1, %v686_v10, %v7543_v58  ;;  %v5295_v60 = vsel %vm691_vm1, %v7544_v7, %v686_v10  ;;  %v737_v37 = vmul.f32 %v721_v6, %v694_v39  ;;  %v750_v58 = vadd.f32 %v734_v8, %v5167_v48  ;;  %v867_v10 = vld [vmem:[#allocation9 + $0x2d8] sm:$0xff] }
 0x223   :  { %v736_v61 = vmul.f32 %v720_v11, %v5295_v60  ;;  %v738_v1 = vmul.f32 %v722_v30, %v695_v32  ;;  %v785_v7 = vmul.f32 %v769_v17, %v5239_v13  ;;  %v798_v11 = vadd.f32 %v782_v29, %v749_v62  ;;  %v962_v30 = vld [vmem:[#allocation9 + $0x3c0] sm:$0xff]  ;;  %v1012_v17 = vld [vmem:[#allocation9 + $0x448] sm:$0xff] }
 0x224   :  { %v5304_v5 = vadd.f32 %v737_v37, %v671_v23  ;;  %v799_v48 = vadd.f32 %v783_v56, %v750_v58  ;;  %v880_v8 = vmul.f32 %v864_v46, %v5278_v14  ;;  %v881_v4 = vmul.f32 %v865_v63, %v5295_v60  ;;  %v608_v23 = vld [vmem:[#allocation9 + $0x70] sm:$0xff] }
 0x225   :  { %v5306_v6 = vadd.f32 %v738_v1, %v672_v36  ;;  %v882_v55 = vmul.f32 %v866_v51, %v694_v39  ;;  %v847_v19 = vadd.f32 %v5201_v18, %v798_v11  ;;  %v883_v25 = vmul.f32 %v867_v10, %v695_v32  ;;  %v609_v36 = vld [vmem:[#allocation9 + $0x78] sm:$0xff] }
 0x226   :  { %v929_v37 = vmul.f32 %v913_v34, %v5230_v45  ;;  %v930_v1 = vmul.f32 %v914_v33, %v5239_v13  ;;  %v848_v49 = vadd.f32 %v832_v21, %v799_v48  ;;  %v978_v29 = vmul.f32 %v962_v30, %v5177_v38  ;;  %v724_v21 = vld [vmem:[#allocation9 + $0x178] sm:$0xff]  ;;  %v915_v48 = vld [vmem:[#allocation9 + $0x350] sm:$0xff] }
 0x227   :  { %v979_v56 = vmul.f32 %v963_v26, %v5192_v43  ;;  %v1027_v62 = vmul.f32 %v1011_v57, %v694_v39  ;;  %v896_v46 = vadd.f32 %v880_v8, %v847_v19  ;;  %v1028_v58 = vmul.f32 %v1012_v17, %v695_v32  ;;  %v723_v32 = vld [vmem:[#allocation9 + $0x170] sm:$0xff] }
 0x228   :  { %v7545_v63 = vrot.slane %v5232_v20, 7  ;;  %v7546_v51 = vrot.slane %v5177_v38, 7  ;;  %v7547_v13 = vrot.slane %v5244_v28, 7  ;;  %v7548_v33 = vrot.slane %v5192_v43, 7 }
 0x229   :  { %v897_v10 = vadd.f32 %v881_v4, %v848_v49  ;;  %v689_v19 = vrot.slane %v5246_v52, 1  ;;  %v945_v34 = vadd.f32 %v929_v37, %v896_v46  ;;  %v690_v11 = vrot.slane %v5253_v15, 1  ;;  %v916_v37 = vld [vmem:[#allocation9 + $0x358] sm:$0xff] }
 0x22a   :  { %v5322_v18 = vsel %vm577_vm0, %v7546_v51, %v7545_v63  ;;  %v5330_v45 = vsel %vm577_vm0, %v7548_v33, %v7547_v13  ;;  %v751_v30 = vadd.f32 %v735_v41, %v5214_v40  ;;  %v752_v26 = vadd.f32 %v736_v61, %v5242_v16  ;;  %v965_v51 = vld [vmem:[#allocation9 + $0x3d8] sm:$0xff]  ;;  %v1013_v13 = vld [vmem:[#allocation9 + $0x450] sm:$0xff] }
 0x22b   :  { %v624_v39 = vmul.f32 %v608_v23, %v5322_v18  ;;  %v625_v57 = vmul.f32 %v609_v36, %v5330_v45  ;;  %v946_v8 = vadd.f32 %v930_v1, %v897_v10  ;;  %v7549_v23 = vrot.slane %v5232_v20, 1 }
 0x22c   :  { %v994_v49 = vadd.f32 %v978_v29, %v945_v34  ;;  %v7550_v46 = vrot.slane %v5244_v28, 1  ;;  %v800_v41 = vadd.f32 %v784_v44, %v751_v30  ;;  %v801_v1 = vadd.f32 %v785_v7, %v752_v26  ;;  %v594_v7 = vld [vmem:[#allocation9] sm:$0xff] }
 0x22d   :  { %v673_v17 = vadd.f32 %v5251_v0, %v624_v39  ;;  %v674_v4 = vadd.f32 %v5258_v53, %v625_v57  ;;  %v5344_v36 = vsel %vm691_vm1, %v7549_v23, %v689_v19  ;;  %v964_v0 = vld [vmem:[#allocation9 + $0x3d0] sm:$0xff]  ;;  %v995_v61 = vadd.f32 %v979_v56, %v946_v8  ;;  %v1014_v57 = vld [vmem:[#allocation9 + $0x458] sm:$0xff]  ;;  %v770_v23 = vld [vmem:[#allocation9 + $0x1e0] sm:$0xff] }
 0x22e   :  { %v5350_v40 = vsel %vm691_vm1, %v7550_v46, %v690_v11  ;;  %v739_v16 = vmul.f32 %v723_v32, %v5344_v36  ;;  %v931_v63 = vmul.f32 %v915_v48, %v5322_v18  ;;  %v1043_v33 = vadd.f32 %v1027_v62, %v994_v49  ;;  %v595_v48 = vld [vmem:[#allocation9 + $0x8] sm:$0xff] }
 0x22f   :  { %v740_v53 = vmul.f32 %v724_v21, %v5350_v40  ;;  %v849_v10 = vadd.f32 %v5217_v27, %v800_v41  ;;  %v932_v39 = vmul.f32 %v916_v37, %v5330_v45  ;;  %v1044_v34 = vadd.f32 %v1028_v58, %v995_v61  ;;  %v710_v41 = vld [vmem:[#allocation9 + $0x108] sm:$0xff] }
 0x230   :  { %v5355_v29 = vadd.f32 %v739_v16, %v673_v17  ;;  %v850_v44 = vadd.f32 %v5222_v50, %v801_v1  ;;  %v980_v56 = vmul.f32 %v964_v0, %v5232_v20  ;;  %v1059_v21 = vadd.f32 %v1043_v33, %v5154_v22  ;;  %v822_v0 = vld [vmem:[#allocation9 + $0x278] sm:$0xff]  ;;  %v772_v33 = vld [vmem:[#allocation9 + $0x1f0] sm:$0xff] }
 0x231   :  { %v5359_v32 = vadd.f32 %v740_v53, %v674_v4  ;;  %v898_v30 = vadd.f32 %v882_v55, %v849_v10  ;;  %v981_v62 = vmul.f32 %v965_v51, %v5244_v28  ;;  %v1029_v26 = vmul.f32 %v1013_v13, %v5344_v36  ;;  %v771_v13 = vld [vmem:[#allocation9 + $0x1e8] sm:$0xff] }
 0x232   :  { %v1060_v27 = vadd.f32 %v1044_v34, %v5162_v12  ;;  %v899_v8 = vadd.f32 %v883_v25, %v850_v44  ;;  %v1030_v58 = vmul.f32 %v1014_v57, %v5350_v40  ;;  %v7551_v17 = vrot.slane %v5246_v52, 7 }
 0x233   :  { %v7552_v50 = vrot.slane %v5232_v20, 7  ;;  %v5375_v55 = vadd.f32 %v5021_v2, %v1059_v21  ;;  %v947_v37 = vadd.f32 %v931_v63, %v898_v30  ;;  %v7554_v49 = vrot.slane %v5253_v15, 7 }
 0x234   :  { %v7555_v46 = vrot.slane %v5244_v28, 7  ;;  %v5384_v61 = vadd.f32 %v5024_v3, %v1060_v27  ;;  %v948_v53 = vadd.f32 %v932_v39, %v899_v8  ;;  %v7557_v51 = vrot.slane %v5010_v54, 1  ;;  %v819_v39 = vld [vmem:[#allocation9 + $0x260] sm:$0xff]  ;;  %v773_v27 = vld [vmem:[#allocation9 + $0x1f8] sm:$0xff]  ;;  %v820_v8 = vld [vmem:[#allocation9 + $0x268] sm:$0xff] }
 0x235   :  { %v578_v4 = vsel %vm577_vm0, %v7552_v50, %v7551_v17  ;;  %7553 = vst [vmem:[#allocation71_spill] sm:$0xff] %v5375_v55  ;;  %v996_v10 = vadd.f32 %v980_v56, %v947_v37  ;;  %v7558_v34 = vrot.slane %v5014_v59, 1  ;;  %v5402_v56 = vmul.f32 %v822_v0, %v5253_v15  ;;  %v869_v37 = vld [vmem:[#allocation9 + $0x2e8] sm:$0xff] }
 0x236   :  { %v579_v25 = vsel %vm577_vm0, %v7555_v46, %v7554_v49  ;;  %v610_v16 = vmul.f32 %v594_v7, %v578_v4  ;;  %7556 = vst [vmem:[#allocation72_spill] sm:$0xff] %v5384_v61  ;;  %v5390_v63 = vsel %vm691_vm1, %v689_v19, %v7557_v51  ;;  %v786_v7 = vmul.f32 %v770_v23, %v5322_v18  ;;  %v871_v49 = vld [vmem:[#allocation9 + $0x2f8] sm:$0xff]  ;;  %v917_v46 = vld [vmem:[#allocation9 + $0x360] sm:$0xff]  ;;  %v918_v0 = vld [vmem:[#allocation9 + $0x368] sm:$0xff] }
 0x237   :  { %v611_v1 = vmul.f32 %v595_v48, %v579_v25  ;;  %v707_v44 = vsel %vm691_vm1, %v690_v11, %v7558_v34  ;;  %v1123_v21 = vadd.f32 %v5384_v61, %v5375_v55  ;;  %v997_v30 = vadd.f32 %v981_v62, %v948_v53  ;;  %v868_v11 = vld [vmem:[#allocation9 + $0x2e0] sm:$0xff] }
 0x238   :  { %v659_v57 = vadd.f32 %v5262_v47, %v610_v16  ;;  %v726_v48 = vmul.f32 %v710_v41, %v707_v44  ;;  %v1045_v47 = vadd.f32 %v1029_v26, %v996_v10  ;;  %v787_v17 = vmul.f32 %v771_v13, %v5330_v45  ;;  %v966_v53 = vld [vmem:[#allocation9 + $0x3e0] sm:$0xff] }
 0x239   :  { %v660_v19 = vadd.f32 %v5269_v31, %v611_v1  ;;  %v788_v50 = vmul.f32 %v772_v33, %v578_v4  ;;  %1124 = vadd.xlane.f32.xlu0 %v1123_v21  ;;  %v1046_v18 = vadd.f32 %v1030_v58, %v997_v30  ;;  %v802_v62 = vadd.f32 %v786_v7, %v5304_v5  ;;  %v709_v58 = vld [vmem:[#allocation9 + $0x100] sm:$0xff]  ;;  %v967_v33 = vld [vmem:[#allocation9 + $0x3e8] sm:$0xff] }
 0x23a   :  { %v835_v31 = vmul.f32 %v819_v39, %v5232_v20  ;;  %v1061_v16 = vadd.f32 %v1045_v47, %v5177_v38  ;;  %v789_v41 = vmul.f32 %v773_v27, %v579_v25  ;;  %v803_v26 = vadd.f32 %v787_v17, %v5306_v6  ;;  %v1015_v10 = vld [vmem:[#allocation9 + $0x460] sm:$0xff]  ;;  %v1016_v39 = vld [vmem:[#allocation9 + $0x468] sm:$0xff]  ;;  %v597_v47 = vld [vmem:[#allocation9 + $0x18] sm:$0xff] }
 0x23b   :  { %v5405_v23 = vadd.f32 %v726_v48, %v660_v19  ;;  %v836_v45 = vmul.f32 %v820_v8, %v5244_v28  ;;  %v1062_v1 = vadd.f32 %v1046_v18, %v5192_v43  ;;  %v884_v13 = vmul.f32 %v868_v11, %v5344_v36  ;;  %v870_v48 = vld [vmem:[#allocation9 + $0x2f0] sm:$0xff] }
 0x23c   :  { %v851_v51 = vadd.f32 %v835_v31, %v802_v62  ;;  %v885_v5 = vmul.f32 %v869_v37, %v5350_v40  ;;  %v5416_v34 = vadd.f32 %v5021_v2, %v1061_v16  ;;  %v887_v7 = vmul.f32 %v871_v49, %v707_v44  ;;  %v759_v62 = vld [vmem:[#allocation9 + $0x188] sm:$0xff]  ;;  %v919_v31 = vld [vmem:[#allocation9 + $0x370] sm:$0xff] }
 0x23d   :  { %v852_v38 = vadd.f32 %v836_v45, %v803_v26  ;;  %v933_v6 = vmul.f32 %v917_v46, %v578_v4  ;;  %v5419_v21 = vadd.f32 %v5024_v3, %v1062_v1  ;;  %v934_v43 = vmul.f32 %v918_v0, %v579_v25  ;;  %v596_v0 = vld [vmem:[#allocation9 + $0x10] sm:$0xff] }
 0x23e   :  { %7559 = vst [vmem:[#allocation73_spill] sm:$0xff] %v5416_v34  ;;  %v900_v30 = vadd.f32 %v884_v13, %v851_v51  ;;  %v982_v19 = vmul.f32 %v966_v53, %v5246_v52  ;;  %v983_v40 = vmul.f32 %v967_v33, %v5253_v15  ;;  %v1031_v27 = vmul.f32 %v1015_v10, %v5390_v63  ;;  %v920_v13 = vld [vmem:[#allocation9 + $0x378] sm:$0xff] }
 0x23f   :  { %7560 = vst [vmem:[#allocation74_spill] sm:$0xff] %v5419_v21  ;;  %v901_v36 = vadd.f32 %v885_v5, %v852_v38  ;;  %v725_v8 = vmul.f32 %v709_v58, %v5390_v63  ;;  %v1126_v4 = vadd.f32 %v5419_v21, %v5416_v34  ;;  %v1032_v11 = vmul.f32 %v1016_v39, %v707_v44 }
 0x240   :  { %v949_v17 = vadd.f32 %v933_v6, %v900_v30  ;;  %v7561_v37 = vrot.slane %v5010_v54, 7  ;;  %v7562_v25 = vrot.slane %v5246_v52, 7  ;;  %v7563_v16 = vrot.slane %v5014_v59, 7 }
 0x241   :  { %v950_v49 = vadd.f32 %v934_v43, %v901_v36  ;;  %v741_v46 = vadd.f32 %v725_v8, %v659_v57  ;;  %v7564_v26 = vrot.slane %v5253_v15, 7  ;;  %v804_v44 = vadd.f32 %v788_v50, %v5355_v29  ;;  %1127 = vadd.xlane.f32.xlu0 %v1126_v4  ;;  %v758_v50 = vld [vmem:[#allocation9 + $0x180] sm:$0xff] }
 0x242   :  { %v592_v18 = vsel %vm577_vm0, %v7562_v25, %v7561_v37  ;;  %v998_v53 = vadd.f32 %v982_v19, %v949_v17  ;;  %v886_v1 = vmul.f32 %v870_v48, %v5390_v63  ;;  %v805_v51 = vadd.f32 %v789_v41, %v5359_v32  ;;  %v7565_v63 = vld [vmem:[#allocation44_spill] sm:$0xff]  ;;  %v7566_v41 = vld [vmem:[#allocation54_spill] sm:$0xff] }
 0x243   :  { %v593_v45 = vsel %vm577_vm0, %v7564_v26, %v7563_v16  ;;  %v999_v5 = vadd.f32 %v983_v40, %v950_v49  ;;  %v853_v33 = vadd.f32 %v5265_v24, %v804_v44  ;;  %v935_v10 = vmul.f32 %v919_v31, %v592_v18  ;;  %v7567_v40 = vld [vmem:[#allocation38_spill] sm:$0xff]  ;;  %v7574_v26 = vld [vmem:[#allocation37_spill] sm:$0xff]  ;;  %v7576_v44 = vld [vmem:[#allocation40_spill] sm:$0xff] }
 0x244   :  { %v613_v58 = vmul.f32 %v597_v47, %v593_v45  ;;  %v775_v57 = vmul.f32 %v759_v62, %v593_v45  ;;  %v1047_v38 = vadd.f32 %v1031_v27, %v998_v53  ;;  %v854_v39 = vadd.f32 %v5402_v56, %v805_v51  ;;  %v1018_v56 = vld [vmem:[#allocation9 + $0x478] sm:$0xff]  ;;  %v7569_v17 = vld [vmem:[#allocation50_spill] sm:$0xff] }
 0x245   :  { %v612_v30 = vmul.f32 %v596_v0, %v592_v18  ;;  %v1048_v29 = vadd.f32 %v1032_v11, %v999_v5  ;;  %v902_v43 = vadd.f32 %v886_v1, %v853_v33  ;;  %v936_v19 = vmul.f32 %v920_v13, %v593_v45  ;;  %v7568_v47 = vld [vmem:[#allocation47_spill] sm:$0xff]  ;;  %v714_v37 = vld [vmem:[#allocation9 + $0x128] sm:$0xff]  ;;  %v7579_v13 = vld [vmem:[#allocation48_spill] sm:$0xff] }
 0x246   :  { %v662_v6 = vadd.f32 %v5037_v9, %v613_v58  ;;  %v664_v48 = vadd.f32 %v7565_v63, %v5172_v35  ;;  %v1063_v32 = vadd.f32 %v1047_v38, %v5232_v20  ;;  %v903_v24 = vadd.f32 %v887_v7, %v854_v39  ;;  %v7571_v20 = vld [vmem:[#allocation53_spill] sm:$0xff]  ;;  %v761_v7 = vld [vmem:[#allocation9 + $0x198] sm:$0xff] }
 0x247   :  { %v661_v27 = vadd.f32 %v7567_v40, %v612_v30  ;;  %v1064_v9 = vadd.f32 %v1048_v29, %v5244_v28  ;;  %v951_v8 = vadd.f32 %v935_v10, %v902_v43  ;;  %v679_v4 = vrot.slane %v7568_v47, 1  ;;  %v7573_v28 = vld [vmem:[#allocation51_spill] sm:$0xff]  ;;  %v905_v38 = vld [vmem:[#allocation9 + $0x300] sm:$0xff]  ;;  %v7580_v30 = vld [vmem:[#allocation66_spill] sm:$0xff] }
 0x248   :  { %v5449_v36 = vadd.f32 %v7566_v41, %v662_v6  ;;  %v680_v11 = vrot.slane %v7569_v17, 1  ;;  %v5456_v25 = vadd.f32 %v5021_v2, %v1063_v32  ;;  %v952_v35 = vadd.f32 %v936_v19, %v903_v24  ;;  %v7578_v58 = vld [vmem:[#allocation55_spill] sm:$0xff]  ;;  %v906_v6 = vld [vmem:[#allocation9 + $0x308] sm:$0xff]  ;;  %v954_v63 = vld [vmem:[#allocation9 + $0x380] sm:$0xff] }
 0x249   :  { %v5459_v62 = vadd.f32 %v7571_v20, %v661_v27  ;;  %v774_v31 = vmul.f32 %v758_v50, %v592_v18  ;;  %v5462_v49 = vadd.f32 %v5024_v3, %v1064_v9  ;;  %v1000_v16 = vadd.f32 %v7573_v28, %v951_v8  ;;  %v713_v18 = vld [vmem:[#allocation9 + $0x120] sm:$0xff]  ;;  %v7581_v50 = vld [vmem:[#allocation46_spill] sm:$0xff]  ;;  %v7582_v27 = vld [vmem:[#allocation39_spill] sm:$0xff] }
 0x24a   :  { %7570 = vst [vmem:[#allocation44_spill] sm:$0xff] %v5456_v25  ;;  %v7575_v45 = vrot.slane %v7574_v26, 1  ;;  %v7577_v53 = vrot.slane %v7576_v44, 1  ;;  %v1001_v51 = vadd.f32 %v7578_v58, %v952_v35  ;;  %v1034_v5 = vmul.f32 %v1018_v56, %v7579_v13  ;;  %v955_v32 = vld [vmem:[#allocation9 + $0x388] sm:$0xff]  ;;  %v1003_v9 = vld [vmem:[#allocation9 + $0x400] sm:$0xff]  ;;  %v760_v35 = vld [vmem:[#allocation9 + $0x190] sm:$0xff] }
 0x24b   :  { %7572 = vst [vmem:[#allocation54_spill] sm:$0xff] %v5462_v49  ;;  %v790_v10 = vadd.f32 %v774_v31, %v741_v46  ;;  %v1129_v39 = vadd.f32 %v5462_v49, %v5456_v25  ;;  %v1049_v29 = vadd.f32 %v7580_v30, %v1000_v16  ;;  %v777_v43 = vmul.f32 %v761_v7, %v7581_v50  ;;  %v1004_v8 = vld [vmem:[#allocation9 + $0x408] sm:$0xff]  ;;  %v7585_v16 = vld [vmem:[#allocation64_spill] sm:$0xff] }
 0x24c   :  { %v5469_v0 = vsel %vm691_vm1, %v7575_v45, %v679_v4  ;;  %v5477_v1 = vsel %vm691_vm1, %v7577_v53, %v680_v11  ;;  %v791_v19 = vadd.f32 %v775_v57, %v5405_v23  ;;  %v1050_v41 = vadd.f32 %v1034_v5, %v1001_v51  ;;  %v7583_v20 = vld [vmem:[#allocation41_spill] sm:$0xff]  ;;  %v600_v5 = vld [vmem:[#allocation9 + $0x30] sm:$0xff] }
 0x24d   :  { %v730_v33 = vmul.f32 %v714_v37, %v5477_v1  ;;  %v729_v24 = vmul.f32 %v713_v18, %v5469_v0  ;;  %v839_v46 = vadd.f32 %v7582_v27, %v790_v10  ;;  %1130 = vadd.xlane.f32.xlu1 %v1129_v39  ;;  %v1065_v56 = vadd.f32 %v1049_v29, %v5246_v52  ;;  %v598_v37 = vld [vmem:[#allocation9 + $0x20] sm:$0xff]  ;;  %v715_v39 = vld [vmem:[#allocation9 + $0x130] sm:$0xff] }
 0x24e   :  { %v840_v31 = vadd.f32 %v7583_v20, %v791_v19  ;;  %v7584_v7 = vld [vmem:[#allocation45_spill] sm:$0xff]  ;;  %v922_v57 = vmul.f32 %v906_v6, %v7581_v50  ;;  %v1066_v28 = vadd.f32 %v1050_v41, %v5253_v15  ;;  %v970_v45 = vmul.f32 %v954_v63, %v7574_v26  ;;  %v601_v6 = vld [vmem:[#allocation9 + $0x38] sm:$0xff] }
 0x24f   :  { %v5488_v40 = vadd.f32 %v730_v33, %v664_v48  ;;  %v921_v23 = vmul.f32 %v905_v38, %v7584_v7  ;;  %v888_v48 = vadd.f32 %v7585_v16, %v839_v46  ;;  %v971_v53 = vmul.f32 %v955_v32, %v7576_v44  ;;  %v7587_v52 = vld [vmem:[#allocation65_spill] sm:$0xff]  ;;  %v7593_v27 = vld [vmem:[#allocation52_spill] sm:$0xff] }
 0x250   :  { %v5500_v18 = vadd.f32 %v5021_v2, %v1065_v56  ;;  %v889_v58 = vadd.f32 %v7587_v52, %v840_v31  ;;  %v1019_v51 = vmul.f32 %v1003_v9, %v5469_v0  ;;  %v1020_v13 = vmul.f32 %v1004_v8, %v5477_v1  ;;  %v716_v8 = vld [vmem:[#allocation9 + $0x138] sm:$0xff]  ;;  %v7595_v31 = vld [vmem:[#allocation42_spill] sm:$0xff] }
 0x251   :  { %v5506_v33 = vadd.f32 %v5024_v3, %v1066_v28  ;;  %v937_v15 = vadd.f32 %v921_v23, %v888_v48  ;;  %v614_v10 = vmul.f32 %v598_v37, %v7584_v7  ;;  %v776_v38 = vmul.f32 %v760_v35, %v7584_v7  ;;  %v814_v56 = vld [vmem:[#allocation9 + $0x238] sm:$0xff]  ;;  %v858_v35 = vld [vmem:[#allocation9 + $0x290] sm:$0xff] }
 0x252   :  { %7586 = vst [vmem:[#allocation38_spill] sm:$0xff] %v5500_v18  ;;  %v938_v30 = vadd.f32 %v922_v57, %v889_v58  ;;  %v7589_v29 = vrot.slane %v7568_v47, 7  ;;  %v7590_v50 = vrot.slane %v7574_v26, 7  ;;  %v7591_v63 = vrot.slane %v7569_v17, 7  ;;  %v859_v57 = vld [vmem:[#allocation9 + $0x298] sm:$0xff]  ;;  %v7596_v48 = vld [vmem:[#allocation58_spill] sm:$0xff] }
 0x253   :  { %7588 = vst [vmem:[#allocation47_spill] sm:$0xff] %v5506_v33  ;;  %v7592_v32 = vrot.slane %v7576_v44, 7  ;;  %v7594_v46 = vrot.slane %v7593_v27, 1  ;;  %v1132_v37 = vadd.f32 %v5506_v33, %v5500_v18  ;;  %v986_v20 = vadd.f32 %v970_v45, %v937_v15  ;;  %v762_v15 = vld [vmem:[#allocation9 + $0x1a0] sm:$0xff] }
 0x254   :  { %v588_v19 = vsel %vm577_vm0, %v7590_v50, %v7589_v29  ;;  %v663_v7 = vadd.f32 %v7595_v31, %v614_v10  ;;  %v987_v28 = vadd.f32 %v971_v53, %v938_v30  ;;  %v7597_v52 = vrot.slane %v7596_v48, 1  ;;  %v763_v10 = vld [vmem:[#allocation9 + $0x1a8] sm:$0xff]  ;;  %v7599_v30 = vld [vmem:[#allocation59_spill] sm:$0xff] }
 0x255   :  { %v589_v41 = vsel %vm577_vm0, %v7592_v32, %v7591_v63  ;;  %v700_v9 = vsel %vm691_vm1, %v679_v4, %v7594_v46  ;;  %v616_v23 = vmul.f32 %v600_v5, %v588_v19  ;;  %1133 = vadd.xlane.f32.xlu1 %v1132_v37  ;;  %v1035_v29 = vadd.f32 %v1019_v51, %v986_v20  ;;  %v7598_v63 = vld [vmem:[#allocation56_spill] sm:$0xff]  ;;  %v907_v37 = vld [vmem:[#allocation9 + $0x310] sm:$0xff] }
 0x256   :  { %v617_v16 = vmul.f32 %v601_v6, %v589_v41  ;;  %v701_v4 = vsel %vm691_vm1, %v680_v11, %v7597_v52  ;;  %v731_v58 = vmul.f32 %v715_v39, %v700_v9  ;;  %v745_v50 = vadd.f32 %v729_v24, %v663_v7  ;;  %v860_v39 = vld [vmem:[#allocation9 + $0x2a0] sm:$0xff]  ;;  %v1005_v52 = vld [vmem:[#allocation9 + $0x410] sm:$0xff] }
 0x257   :  { %v665_v32 = vadd.f32 %v7598_v63, %v616_v23  ;;  %v732_v45 = vmul.f32 %v716_v8, %v701_v4  ;;  %v5537_v5 = vmul.f32 %v814_v56, %v7596_v48  ;;  %v874_v53 = vmul.f32 %v858_v35, %v5469_v0  ;;  %v861_v8 = vld [vmem:[#allocation9 + $0x2a8] sm:$0xff]  ;;  %v908_v0 = vld [vmem:[#allocation9 + $0x318] sm:$0xff] }
 0x258   :  { %v1036_v6 = vadd.f32 %v1020_v13, %v987_v28  ;;  %v666_v46 = vadd.f32 %v7599_v30, %v617_v16  ;;  %v875_v31 = vmul.f32 %v859_v57, %v5477_v1  ;;  %v1051_v11 = vadd.f32 %v1035_v29, %v5010_v54  ;;  %v956_v13 = vld [vmem:[#allocation9 + $0x390] sm:$0xff]  ;;  %v7602_v28 = vld [vmem:[#allocation49_spill] sm:$0xff] }
 0x259   :  { %v792_v51 = vadd.f32 %v776_v38, %v5459_v62  ;;  %v793_v24 = vadd.f32 %v777_v43, %v5449_v36  ;;  %v747_v56 = vadd.f32 %v731_v58, %v665_v32  ;;  %v778_v7 = vmul.f32 %v762_v15, %v588_v19  ;;  %v7601_v57 = vld [vmem:[#allocation43_spill] sm:$0xff] }
 0x25a   :  { %v1052_v20 = vadd.f32 %v1036_v6, %v5014_v59  ;;  %v779_v23 = vmul.f32 %v763_v10, %v589_v41  ;;  %v5547_v35 = vadd.f32 %v5021_v2, %v1051_v11  ;;  %v748_v1 = vadd.f32 %v732_v45, %v666_v46  ;;  %v957_v38 = vld [vmem:[#allocation9 + $0x398] sm:$0xff]  ;;  %v909_v10 = vld [vmem:[#allocation9 + $0x320] sm:$0xff]  ;;  %v910_v45 = vld [vmem:[#allocation9 + $0x328] sm:$0xff] }
 0x25b   :  { %v841_v54 = vadd.f32 %v7601_v57, %v792_v51  ;;  %v842_v62 = vadd.f32 %v7602_v28, %v793_v24  ;;  %v876_v43 = vmul.f32 %v860_v39, %v700_v9  ;;  %v877_v16 = vmul.f32 %v861_v8, %v701_v4  ;;  %v1006_v58 = vld [vmem:[#allocation9 + $0x418] sm:$0xff]  ;;  %v958_v51 = vld [vmem:[#allocation9 + $0x3a0] sm:$0xff]  ;;  %v764_v24 = vld [vmem:[#allocation9 + $0x1b0] sm:$0xff] }
 0x25c   :  { %7600 = vst [vmem:[#allocation50_spill] sm:$0xff] %v5547_v35  ;;  %v5552_v36 = vadd.f32 %v5024_v3, %v1052_v20  ;;  %v923_v59 = vmul.f32 %v907_v37, %v588_v19  ;;  %v924_v32 = vmul.f32 %v908_v0, %v589_v41  ;;  %v972_v15 = vmul.f32 %v956_v13, %v7568_v47  ;;  %v765_v41 = vld [vmem:[#allocation9 + $0x1b8] sm:$0xff]  ;;  %v7604_v37 = vld [vmem:[#allocation57_spill] sm:$0xff]  ;;  %v7606_v57 = vld [vmem:[#allocation62_spill] sm:$0xff] }
 0x25d   :  { %v890_v29 = vadd.f32 %v874_v53, %v841_v54  ;;  %v891_v63 = vadd.f32 %v875_v31, %v842_v62  ;;  %v973_v30 = vmul.f32 %v957_v38, %v7569_v17  ;;  %v794_v46 = vadd.f32 %v778_v7, %v745_v50  ;;  %v959_v31 = vld [vmem:[#allocation9 + $0x3a8] sm:$0xff]  ;;  %v7605_v0 = vld [vmem:[#allocation60_spill] sm:$0xff]  ;;  %v7607_v28 = vld [vmem:[#allocation63_spill] sm:$0xff] }
 0x25e   :  { %7603 = vst [vmem:[#allocation53_spill] sm:$0xff] %v5552_v36  ;;  %v1111_v6 = vadd.f32 %v5552_v36, %v5547_v35  ;;  %v795_v11 = vadd.f32 %v779_v23, %v5488_v40  ;;  %v1021_v8 = vmul.f32 %v1005_v52, %v700_v9  ;;  %v1022_v53 = vmul.f32 %v1006_v58, %v701_v4  ;;  %v862_v50 = vld [vmem:[#allocation9 + $0x2b0] sm:$0xff]  ;;  %v863_v9 = vld [vmem:[#allocation9 + $0x2b8] sm:$0xff]  ;;  %v1007_v58 = vld [vmem:[#allocation9 + $0x420] sm:$0xff] }
 0x25f   :  { %v939_v19 = vadd.f32 %v923_v59, %v890_v29  ;;  %v940_v39 = vadd.f32 %v924_v32, %v891_v63  ;;  %v843_v20 = vadd.f32 %v7604_v37, %v794_v46  ;;  %v925_v54 = vmul.f32 %v909_v10, %v7606_v57  ;;  %v1008_v10 = vld [vmem:[#allocation9 + $0x428] sm:$0xff] }
 0x260   :  { %1112 = vadd.xlane.f32.xlu0 %v1111_v6  ;;  %v844_v13 = vadd.f32 %v7605_v0, %v795_v11  ;;  %v926_v62 = vmul.f32 %v910_v45, %v7607_v28  ;;  %v974_v23 = vmul.f32 %v958_v51, %v7593_v27  ;;  %v780_v38 = vmul.f32 %v764_v24, %v7606_v57  ;;  %v7608_v45 = vld [vmem:[#allocation68_spill] sm:$0xff]  ;;  %v7609_v51 = vld [vmem:[#allocation70_spill] sm:$0xff] }
 0x261   :  { %v988_v7 = vadd.f32 %v972_v15, %v939_v19  ;;  %v989_v40 = vadd.f32 %v973_v30, %v940_v39  ;;  %v892_v4 = vadd.f32 %v876_v43, %v843_v20  ;;  %v975_v52 = vmul.f32 %v959_v31, %v7596_v48  ;;  %v911_v24 = vld [vmem:[#allocation9 + $0x330] sm:$0xff]  ;;  %v7610_v31 = vld [vmem:[#allocation61_spill] sm:$0xff] }
 0x262   :  { %v893_v59 = vadd.f32 %v877_v16, %v844_v13  ;;  %v781_v29 = vmul.f32 %v765_v41, %v7607_v28  ;;  %v796_v6 = vadd.f32 %v780_v38, %v747_v56  ;;  %v878_v46 = vmul.f32 %v862_v50, %v7608_v45  ;;  %v960_v0 = vld [vmem:[#allocation9 + $0x3b0] sm:$0xff] }
 0x263   :  { %v1037_v63 = vadd.f32 %v1021_v8, %v988_v7  ;;  %v1038_v32 = vadd.f32 %v1022_v53, %v989_v40  ;;  %v941_v15 = vadd.f32 %v925_v54, %v892_v4  ;;  %v879_v19 = vmul.f32 %v863_v9, %v7609_v51  ;;  %v912_v8 = vld [vmem:[#allocation9 + $0x338] sm:$0xff]  ;;  %v7614_v7 = vld [vmem:[#allocation69_spill] sm:$0xff] }
 0x264   :  { %v942_v30 = vadd.f32 %v926_v62, %v893_v59  ;;  %v797_v11 = vadd.f32 %v781_v29, %v748_v1  ;;  %v1023_v39 = vmul.f32 %v1007_v58, %v7608_v45  ;;  %v845_v41 = vadd.f32 %v7610_v31, %v796_v6  ;;  %v961_v54 = vld [vmem:[#allocation9 + $0x3b8] sm:$0xff] }
 0x265   :  { %v1053_v43 = vadd.f32 %v1037_v63, %v7574_v26  ;;  %v1054_v16 = vadd.f32 %v1038_v32, %v7576_v44  ;;  %v990_v53 = vadd.f32 %v974_v23, %v941_v15  ;;  %v1024_v56 = vmul.f32 %v1008_v10, %v7609_v51  ;;  %v7613_v44 = vld [vmem:[#allocation67_spill] sm:$0xff] }
 0x266   :  { %v991_v37 = vadd.f32 %v975_v52, %v942_v30  ;;  %v846_v20 = vadd.f32 %v5537_v5, %v797_v11  ;;  %v894_v26 = vadd.f32 %v878_v46, %v845_v41  ;;  %v927_v57 = vmul.f32 %v911_v24, %v7613_v44  ;;  %v1009_v23 = vld [vmem:[#allocation9 + $0x430] sm:$0xff]  ;;  %v1010_v4 = vld [vmem:[#allocation9 + $0x438] sm:$0xff] }
 0x267   :  { %v5576_v1 = vadd.f32 %v5021_v2, %v1053_v43  ;;  %v5579_v13 = vadd.f32 %v5024_v3, %v1054_v16  ;;  %v1039_v28 = vadd.f32 %v1023_v39, %v990_v53  ;;  %v928_v40 = vmul.f32 %v912_v8, %v7614_v7 }
 0x268   :  { %v1040_v62 = vadd.f32 %v1024_v56, %v991_v37  ;;  %v895_v50 = vadd.f32 %v879_v19, %v846_v20  ;;  %v943_v38 = vadd.f32 %v927_v57, %v894_v26  ;;  %v976_v9 = vmul.f32 %v960_v0, %v5154_v22 }
 0x269   :  { %7611 = vst [vmem:[#allocation51_spill] sm:$0xff] %v5576_v1  ;;  %7612 = vst [vmem:[#allocation37_spill] sm:$0xff] %v5579_v13  ;;  %v1114_v5 = vadd.f32 %v5579_v13, %v5576_v1  ;;  %v1055_v59 = vadd.f32 %v1039_v28, %v7568_v47  ;;  %v977_v29 = vmul.f32 %v961_v54, %v5162_v12 }
 0x26a   :  { %v1056_v52 = vadd.f32 %v1040_v62, %v7569_v17  ;;  %v944_v58 = vadd.f32 %v928_v40, %v895_v50  ;;  %v992_v63 = vadd.f32 %v976_v9, %v943_v38  ;;  %v1025_v32 = vmul.f32 %v1009_v23, %v5278_v14 }
 0x26b   :  { %1115 = vadd.xlane.f32.xlu1 %v1114_v5  ;;  %v5591_v10 = vadd.f32 %v5021_v2, %v1055_v59  ;;  %v1026_v22 = vmul.f32 %v1010_v4, %v5295_v60 }
 0x26c   :  { %v5594_v6 = vadd.f32 %v5024_v3, %v1056_v52  ;;  %v993_v45 = vadd.f32 %v977_v29, %v944_v58  ;;  %v1041_v46 = vadd.f32 %v1025_v32, %v992_v63 }
 0x26d   :  { %7615 = vst [vmem:[#allocation40_spill] sm:$0xff] %v5591_v10 }
 0x26e   :  { %7616 = vst [vmem:[#allocation55_spill] sm:$0xff] %v5594_v6  ;;  %v1117_v47 = vadd.f32 %v5594_v6, %v5591_v10  ;;  %v1042_v17 = vadd.f32 %v1026_v22, %v993_v45  ;;  %v1057_v12 = vadd.f32 %v1041_v46, %v7593_v27 }
 0x270   :  { %1118 = vadd.xlane.f32.xlu0 %v1117_v47  ;;  %v1058_v15 = vadd.f32 %v1042_v17, %v7596_v48  ;;  %v5602_v14 = vadd.f32 %v5021_v2, %v1057_v12 }
 0x272   :  { %7617 = vst [vmem:[#allocation48_spill] sm:$0xff] %v5602_v14  ;;  %v5605_v30 = vadd.f32 %v5024_v3, %v1058_v15 }
 0x274   :  { %7618 = vst [vmem:[#allocation66_spill] sm:$0xff] %v5605_v30  ;;  %v1120_v11 = vadd.f32 %v5605_v30, %v5602_v14 }
 0x276   :  { %1121 = vadd.xlane.f32.xlu1 %v1120_v11 }
 0x2c6   :  { %v1125_v60 = vpop.xlane.xlu0 %1124 }
 0x2c7   :  { %v1140_v51 = vmul.f32 0.00390625, %v1125_v60 }
 0x2c9   :  { %v5610_v19 = vsub.f32 %v5375_v55, %v1140_v51  ;;  %v5613_v27 = vsub.f32 %v5384_v61, %v1140_v51  ;;  %v1987_v55 = vld [vmem:[#allocation16 + $0x370] sm:$0xff] }
 0x2cb   :  { %v1168_v48 = vmul.f32 %v5610_v19, %v5610_v19  ;;  %v1169_v2 = vmul.f32 %v5613_v27, %v5613_v27 }
 0x2cd   :  { %v1188_v3 = vadd.f32 %v1169_v2, %v1168_v48 }
 0x2ce   :  { %v1128_v24 = vpop.xlane.xlu0 %1127 }
 0x2cf   :  { %v1141_v43 = vmul.f32 0.00390625, %v1128_v24  ;;  %1189 = vadd.xlane.f32.xlu0 %v1188_v3 }
 0x2d1   :  { %v5620_v16 = vsub.f32 %v5416_v34, %v1141_v43  ;;  %v5623_v39 = vsub.f32 %v5419_v21, %v1141_v43  ;;  %v2087_v34 = vld [vmem:[#allocation16 + $0x470] sm:$0xff] }
 0x2d3   :  { %v1170_v31 = vmul.f32 %v5620_v16, %v5620_v16  ;;  %v1171_v41 = vmul.f32 %v5623_v39, %v5623_v39 }
 0x2d5   :  { %v1191_v8 = vadd.f32 %v1171_v41, %v1170_v31 }
 0x2d7   :  { %1192 = vadd.xlane.f32.xlu1 %v1191_v8  ;;  %v4159_v8 = vld [vmem:[#allocation19 + $0x4] ss:$8 sps:$4 sm:$0xff]  }
 0x2d8   :  { %2980 = vmatprep.subr.bf16.mxu1 %v4159_v8 }
 0x2da   :  { %v1131_v53 = vpop.xlane.xlu1 %1130 }
 0x2db   :  { %v1142_v37 = vmul.f32 0.00390625, %v1131_v53  ;;  %v4161_v53 = vld [vmem:[#allocation19] ss:$8 sps:$4 sm:$0xff]  }
 0x2dc   :  { %2981 = vmatpush1.bf16.msra.mxu1 %v4161_v53 }
 0x2dd   :  { %v5630_v56 = vsub.f32 %v5456_v25, %v1142_v37  ;;  %v5633_v20 = vsub.f32 %v5462_v49, %v1142_v37  ;;  %v4162_v37 = vld [vmem:[#allocation19 + $0x14] ss:$8 sps:$4 sm:$0xff]  }
 0x2de   :  { %2982 = vmatprep.subr.bf16.mxu1 %v4162_v37 }
 0x2df   :  { %v1172_v0 = vmul.f32 %v5630_v56, %v5630_v56  ;;  %v1173_v26 = vmul.f32 %v5633_v20, %v5633_v20 }
 0x2e1   :  { %v1194_v57 = vadd.f32 %v1173_v26, %v1172_v0  ;;  %v4164_v0 = vld [vmem:[#allocation19 + $0x10] ss:$8 sps:$4 sm:$0xff]   ;;  %v4165_v26 = vld [vmem:[#allocation19 + $0x24] ss:$8 sps:$4 sm:$0xff]  }
 0x2e2   :  { %v1134_v44 = vpop.xlane.xlu1 %1133  ;;  %2983 = vmatpush1.bf16.msra.mxu1 %v4164_v0 }
 0x2e3   :  { %v1143_v54 = vmul.f32 0.00390625, %v1134_v44  ;;  %1195 = vadd.xlane.f32.xlu0 %v1194_v57  ;;  %v7333_v44 = vmov 0   ;;  %v4167_v57 = vld [vmem:[#allocation19 + $0x20] ss:$8 sps:$4 sm:$0xff]   ;;  %2984 = vmatprep.subr.bf16.mxu1 %v4165_v26 }
 0x2e4   :  { %3012 = vmatprep.mubr.bf16.mxu1 %v7333_v44  ;;  %4098 = vset.pattern.permute.xlu1 %v7333_v44 }
 0x2e5   :  { %v5640_v28 = vsub.f32 %v5500_v18, %v1143_v54  ;;  %v5643_v62 = vsub.f32 %v5506_v33, %v1143_v54  ;;  %4097 = vset.pattern.permute.xlu0 %v7333_v44  ;;  %v4168_v54 = vld [vmem:[#allocation19 + $0x34] ss:$8 sps:$4 sm:$0xff]  }
 0x2e6   :  { %2985 = vmatpush1.bf16.msra.mxu1 %v4167_v57 }
 0x2e7   :  { %v1174_v50 = vmul.f32 %v5640_v28, %v5640_v28  ;;  %v1175_v7 = vmul.f32 %v5643_v62, %v5643_v62  ;;  %2986 = vmatprep.subr.bf16.mxu1 %v4168_v54 }
 0x2e9   :  { %v1197_v40 = vadd.f32 %v1175_v7, %v1174_v50  ;;  %v4170_v50 = vld [vmem:[#allocation19 + $0x30] ss:$8 sps:$4 sm:$0xff]   ;;  %v4171_v7 = vld [vmem:[#allocation19 + $0x44] ss:$8 sps:$4 sm:$0xff]  }
 0x2ea   :  { %2987 = vmatpush1.bf16.msra.mxu1 %v4170_v50 }
 0x2eb   :  { %1198 = vadd.xlane.f32.xlu1 %v1197_v40  ;;  %v4173_v40 = vld [vmem:[#allocation19 + $0x40] ss:$8 sps:$4 sm:$0xff]   ;;  %2988 = vmatprep.subr.bf16.mxu1 %v4171_v7 }
 0x2ed   :  { %v1113_v23 = vpop.xlane.xlu0 %1112 }
 0x2ee   :  { %v1136_v5 = vmul.f32 0.00390625, %v1113_v23  ;;  %v4174_v23 = vld [vmem:[#allocation19 + $0x54] ss:$8 sps:$4 sm:$0xff]   ;;  %2989 = vmatpush1.bf16.msra.mxu1 %v4173_v40 }
 0x2ef   :  { %2990 = vmatprep.subr.bf16.mxu1 %v4174_v23 }
 0x2f0   :  { %v5650_v38 = vsub.f32 %v5547_v35, %v1136_v5  ;;  %v5653_v9 = vsub.f32 %v5552_v36, %v1136_v5  ;;  %v4176_v5 = vld [vmem:[#allocation19 + $0x50] ss:$8 sps:$4 sm:$0xff]  }
 0x2f2   :  { %v1160_v4 = vmul.f32 %v5650_v38, %v5650_v38  ;;  %v1161_v59 = vmul.f32 %v5653_v9, %v5653_v9  ;;  %2991 = vmatpush1.bf16.msra.mxu1 %v4176_v5 }
 0x2f4   :  { %v1176_v52 = vadd.f32 %v1161_v59, %v1160_v4  ;;  %v4177_v4 = vld [vmem:[#allocation19 + $0x64] ss:$8 sps:$4 sm:$0xff]   ;;  %v4179_v59 = vld [vmem:[#allocation19 + $0x60] ss:$8 sps:$4 sm:$0xff]  }
 0x2f5   :  { %2992 = vmatprep.subr.bf16.mxu1 %v4177_v4  ;;  %v1688_v4 = vld [vmem:[#allocation16 + $0xf8] sm:$0xff] }
 0x2f6   :  { %1177 = vadd.xlane.f32.xlu0 %v1176_v52  ;;  %v4180_v52 = vld [vmem:[#allocation19 + $0x74] ss:$8 sps:$4 sm:$0xff]   ;;  %2993 = vmatpush1.bf16.msra.mxu1 %v4179_v59 }
 0x2f7   :  { %2994 = vmatprep.subr.bf16.mxu1 %v4180_v52 }
 0x2f8   :  { %v1116_v58 = vpop.xlane.xlu1 %1115 }
 0x2f9   :  { %v1137_v29 = vmul.f32 0.00390625, %v1116_v58  ;;  %v4182_v58 = vld [vmem:[#allocation19 + $0x70] ss:$8 sps:$4 sm:$0xff]  }
 0x2fa   :  { %2995 = vmatpush1.bf16.msra.mxu1 %v4182_v58 }
 0x2fb   :  { %v5660_v63 = vsub.f32 %v5576_v1, %v1137_v29  ;;  %v5663_v32 = vsub.f32 %v5579_v13, %v1137_v29  ;;  %v4185_v29 = vld [vmem:[#allocation18 + $0x4] ss:$8 sps:$4 sm:$0xff]  }
 0x2fc   :  { %3133 = vmatprep.subr.bf16.mxu1 %v4185_v29 }
 0x2fd   :  { %v1119_v45 = vpop.xlane.xlu0 %1118  ;;  %v1162_v22 = vmul.f32 %v5660_v63, %v5660_v63  ;;  %v1163_v46 = vmul.f32 %v5663_v32, %v5663_v32 }
 0x2fe   :  { %v1138_v47 = vmul.f32 0.00390625, %v1119_v45 }
 0x2ff   :  { %v1179_v17 = vadd.f32 %v1163_v46, %v1162_v22 }
 0x300   :  { %v5670_v12 = vsub.f32 %v5591_v10, %v1138_v47  ;;  %v5673_v15 = vsub.f32 %v5594_v6, %v1138_v47 }
 0x301   :  { %1180 = vadd.xlane.f32.xlu1 %v1179_v17 }
 0x302   :  { %v1164_v11 = vmul.f32 %v5670_v12, %v5670_v12  ;;  %v1165_v60 = vmul.f32 %v5673_v15, %v5673_v15 }
 0x303   :  { %v1122_v51 = vpop.xlane.xlu1 %1121 }
 0x304   :  { %v1139_v48 = vmul.f32 0.00390625, %v1122_v51  ;;  %v1182_v2 = vadd.f32 %v1165_v60, %v1164_v11  ;;  %v1240_v11 = vld [vmem:[#allocation12] sm:$0x3]  ;;  %v1268_v51 = vld [vmem:[#allocation13] sm:$0x3] }
 0x306   :  { %v5680_v3 = vsub.f32 %v5602_v14, %v1139_v48  ;;  %v5683_v24 = vsub.f32 %v5605_v30, %v1139_v48  ;;  %1183 = vadd.xlane.f32.xlu0 %v1182_v2  ;;  %v7619_v48 = vld [vmem:[#allocation35_spill] sm:$0xff] }
 0x307   :  { %v5693_v2 = vrot.slane %v1240_v11, %v7619_v48  ;;  %v5699_v8 = vrot.slane %v1268_v51, %v7619_v48  ;;  %v1582_v30 = vld [vmem:[#allocation16 + $0x8] sm:$0xff] }
 0x308   :  { %v1166_v43 = vmul.f32 %v5680_v3, %v5680_v3  ;;  %v1167_v31 = vmul.f32 %v5683_v24, %v5683_v24 }
 0x30a   :  { %v1185_v41 = vadd.f32 %v1167_v31, %v1166_v43  ;;  %v7620_v43 = vld [vmem:[#allocation36_spill] sm:$0xff] }
 0x30b   :  { %v5696_v31 = vrot.slane %v1240_v11, %v7620_v43  ;;  %v5704_v0 = vrot.slane %v1268_v51, %v7620_v43 }
 0x30c   :  { %1186 = vadd.xlane.f32.xlu1 %v1185_v41 }
 0x35c   :  { %v1190_v45 = vpop.xlane.xlu0 %1189 }
 0x35d   :  { %v1204_v22 = vmul.f32 0.00390625, %v1190_v45  ;;  %v2086_v45 = vld [vmem:[#allocation16 + $0x468] sm:$0xff] }
 0x35f   :  { %v1212_v46 = vadd.f32 1e-05, %v1204_v22 }
 0x361   :  { %4255 = vrsqrt.f32 %v1212_v46 }
 0x364   :  { %v1193_v47 = vpop.xlane.xlu1 %1192 }
 0x365   :  { %v1205_v17 = vmul.f32 0.00390625, %v1193_v47 }
 0x367   :  { %v1213_v60 = vadd.f32 1e-05, %v1205_v17  ;;  %v2260_v17 = vld [vmem:[#allocation16 + $0x620] sm:$0xff] }
 0x369   :  { %4257 = vrsqrt.f32 %v1213_v60 }
 0x36b   :  { %v4256_v41 = vpop.eup %4255 }
 0x36c   :  { %v1232_v53 = vmul.f32 %v4256_v41, %v5610_v19  ;;  %v1233_v37 = vmul.f32 %v4256_v41, %v5613_v27  ;;  %v1813_v41 = vld [vmem:[#allocation16 + $0x1b8] sm:$0xff] }
 0x36e   :  { %v1260_v26 = vmul.f32 %v5693_v2, %v1232_v53  ;;  %v1261_v57 = vmul.f32 %v5696_v31, %v1233_v37  ;;  %v1681_v37 = vld [vmem:[#allocation16 + $0xc0] sm:$0xff] }
 0x370   :  { %v1196_v54 = vpop.xlane.xlu0 %1195  ;;  %v5709_v50 = vadd.f32 %v5699_v8, %v1260_v26  ;;  %v5712_v40 = vadd.f32 %v5704_v0, %v1261_v57 }
 0x371   :  { %v1206_v7 = vmul.f32 0.00390625, %v1196_v54 }
 0x372   :  { %7621 = vst [vmem:[#allocation46_spill] sm:$0xff] %v5709_v50  ;;  %7622 = vst [vmem:[#allocation39_spill] sm:$0xff] %v5712_v40  ;;  %v7335_v29 = vrot.slane %v5712_v40, 5  ;;  %v7337_v22 = vrot.slane %v5712_v40, 6  ;;  %v7339_v46 = vrot.slane %v5712_v40, 7  ;;  %v5726_v47 = vmul.f32 %v1688_v4, %v5712_v40  ;;  %v1913_v4 = vld [vmem:[#allocation16 + $0x2b8] sm:$0xff] }
 0x373   :  { %v1214_v23 = vadd.f32 1e-05, %v1206_v7  ;;  %v4258_v5 = vpop.eup %4257  ;;  %v7342_v51 = vrot.slane %v5712_v40, 1  ;;  %v5741_v54 = vmul.f32 %v2086_v45, %v5712_v40  ;;  %v1863_v45 = vld [vmem:[#allocation16 + $0x238] sm:$0xff]  ;;  %v7634_v48 = vrot.slane %v5712_v40, 2  ;;  %v1722_v50 = vld [vmem:[#allocation16 + $0x100] sm:$0xff] }
 0x374   :  { %v1234_v19 = vmul.f32 %v4258_v5, %v5620_v16  ;;  %v1235_v27 = vmul.f32 %v4258_v5, %v5623_v39  ;;  %v1912_v16 = vld [vmem:[#allocation16 + $0x2b0] sm:$0xff]  ;;  %v7637_v43 = vrot.slane %v5712_v40, 3 }
 0x375   :  { %4259 = vrsqrt.f32 %v1214_v23  ;;  %v5738_v57 = vmul.f32 %v1912_v16, %v5712_v40  ;;  %7626 = vst [vmem:[#allocation65_spill] sm:$0xff] %v5741_v54  ;;  %v1581_v23 = vld [vmem:[#allocation16] sm:$0xff]  ;;  %v1729_v16 = vld [vmem:[#allocation16 + $0x138] sm:$0xff] }
 0x376   :  { %v1262_v59 = vmul.f32 %v5693_v2, %v1234_v19  ;;  %v1263_v52 = vmul.f32 %v5696_v31, %v1235_v27  ;;  %v1615_v19 = vld [vmem:[#allocation16 + $0x40] sm:$0xff] }
 0x377   :  { %7625 = vst [vmem:[#allocation64_spill] sm:$0xff] %v5738_v57 }
 0x378   :  { %v1199_v58 = vpop.xlane.xlu1 %1198  ;;  %v5729_v11 = vadd.f32 %v5699_v8, %v1262_v59  ;;  %v5732_v60 = vadd.f32 %v5704_v0, %v1263_v52  ;;  %v5747_v59 = vmul.f32 %v2260_v17, %v5712_v40  ;;  %v1656_v52 = vld [vmem:[#allocation16 + $0x80] sm:$0xff] }
 0x379   :  { %v1207_v39 = vmul.f32 0.00390625, %v1199_v58 }
 0x37a   :  { %7623 = vst [vmem:[#allocation41_spill] sm:$0xff] %v5729_v11  ;;  %7624 = vst [vmem:[#allocation45_spill] sm:$0xff] %v5732_v60  ;;  %v7336_v7 = vrot.slane %v5732_v60, 5  ;;  %v7338_v5 = vrot.slane %v5732_v60, 6  ;;  %v7340_v27 = vrot.slane %v5732_v60, 7  ;;  %v7343_v58 = vrot.slane %v5732_v60, 1 }
 0x37b   :  { %v1215_v53 = vadd.f32 1e-05, %v1207_v39  ;;  %7627 = vst [vmem:[#allocation52_spill] sm:$0xff] %v5747_v59  ;;  %v1689_v26 = vmul.f32 %v1681_v37, %v5732_v60  ;;  %v7650_v14 = vrot.slane %v5732_v60, 5  ;;  %v7652_v13 = vrot.slane %v5732_v60, 6 }
 0x37c   :  { %v5758_v44 = vsel %vm1572_vm2, %v7335_v29, %v7336_v7  ;;  %v5766_v17 = vsel %vm1605_vm3, %v7337_v22, %v7338_v5  ;;  %v1838_v29 = vld [vmem:[#allocation16 + $0x1f8] sm:$0xff]  ;;  %v5785_v22 = vsel %vm691_vm1, %v7342_v51, %v7343_v58  ;;  %v7636_v58 = vrot.slane %v5732_v60, 3 }
 0x37d   :  { %4261 = vrsqrt.f32 %v1215_v53  ;;  %7628 = vst [vmem:[#allocation42_spill] sm:$0xff] %v5758_v44  ;;  %7629 = vst [vmem:[#allocation58_spill] sm:$0xff] %v5766_v17  ;;  %v5774_v53 = vsel %vm577_vm0, %v7339_v46, %v7340_v27  ;;  %v1589_v7 = vmul.f32 %v1581_v23, %v5758_v44  ;;  %v1623_v39 = vmul.f32 %v1615_v19, %v5766_v17  ;;  %v1771_v5 = vld [vmem:[#allocation16 + $0x178] sm:$0xff] }
 0x37e   :  { %7630 = vst [vmem:[#allocation56_spill] sm:$0xff] %v5774_v53  ;;  %7631 = vst [vmem:[#allocation59_spill] sm:$0xff] %v5785_v22  ;;  %v5788_v46 = vmul.f32 %v1913_v4, %v5732_v60  ;;  %v1664_v27 = vmul.f32 %v1656_v52, %v5774_v53  ;;  %v5792_v23 = vmul.f32 %v1729_v16, %v5785_v22  ;;  %v7633_v19 = vrot.slane %v5732_v60, 2  ;;  %v1888_v52 = vld [vmem:[#allocation16 + $0x278] sm:$0xff] }
 0x37f   :  { %v4260_v37 = vpop.eup %4259  ;;  %v5808_v4 = vsel %vm1796_vm5, %v7637_v43, %v7636_v58  ;;  %v1631_v49 = vadd.f32 %v1623_v39, %v1589_v7  ;;  %v5813_v18 = vmul.f32 %v1838_v29, %v5758_v44  ;;  %v5822_v58 = vmul.f32 %v1863_v45, %v5766_v17 }
 0x380   :  { %7632 = vst [vmem:[#allocation43_spill] sm:$0xff] %v5788_v46  ;;  %v5800_v51 = vsel %vm1754_vm4, %v7634_v48, %v7633_v19  ;;  %7638 = vst [vmem:[#allocation57_spill] sm:$0xff] %v5808_v4  ;;  %v1236_v16 = vmul.f32 %v4260_v37, %v5630_v56  ;;  %v1237_v25 = vmul.f32 %v4260_v37, %v5633_v20  ;;  %v1937_v48 = vld [vmem:[#allocation16 + $0x2f0] sm:$0xff]  ;;  %v7656_v59 = vrot.slane %v5732_v60, 1 }
 0x381   :  { %7635 = vst [vmem:[#allocation49_spill] sm:$0xff] %v5800_v51  ;;  %v1962_v19 = vld [vmem:[#allocation16 + $0x330] sm:$0xff]  ;;  %v5816_v61 = vmul.f32 %v1771_v5, %v5800_v51  ;;  %v5819_v43 = vmul.f32 %v1813_v41, %v5808_v4  ;;  %v1672_v29 = vadd.f32 %v1664_v27, %v1631_v49  ;;  %v5827_v39 = vmul.f32 %v1888_v52, %v5774_v53 }
 0x382   :  { %v2012_v56 = vld [vmem:[#allocation16 + $0x3b0] sm:$0xff]  ;;  %v1264_v20 = vmul.f32 %v5693_v2, %v1236_v16  ;;  %v1265_v7 = vmul.f32 %v5696_v31, %v1237_v25  ;;  %v5830_v10 = vmul.f32 %v1937_v48, %v5785_v22  ;;  %v5833_v41 = vmul.f32 %v1962_v19, %v5800_v51  ;;  %v2111_v16 = vld [vmem:[#allocation16 + $0x4a8] sm:$0xff] }
 0x383   :  { %v1178_v33 = vpop.xlane.xlu0 %1177  ;;  %7639 = vst [vmem:[#allocation60_spill] sm:$0xff] %v5827_v39  ;;  %v2037_v37 = vld [vmem:[#allocation16 + $0x3f0] sm:$0xff]  ;;  %v5836_v45 = vmul.f32 %v1987_v55, %v5808_v4  ;;  %v1697_v27 = vadd.f32 %v1689_v26, %v1672_v29  ;;  %v5845_v52 = vmul.f32 %v2012_v56, %v5758_v44  ;;  %v5854_v55 = vmul.f32 %v2087_v34, %v5732_v60  ;;  %v1616_v26 = vld [vmem:[#allocation16 + $0x48] sm:$0xff] }
 0x384   :  { %v1200_v21 = vmul.f32 0.00390625, %v1178_v33  ;;  %v2062_v33 = vld [vmem:[#allocation16 + $0x430] sm:$0xff]  ;;  %7640 = vst [vmem:[#allocation62_spill] sm:$0xff] %v5830_v10  ;;  %7641 = vst [vmem:[#allocation63_spill] sm:$0xff] %v5833_v41  ;;  %v5839_v25 = vadd.f32 %v5699_v8, %v1264_v20  ;;  %v5842_v49 = vadd.f32 %v5704_v0, %v1265_v7  ;;  %v5860_v29 = vmul.f32 %v2111_v16, %v5785_v22  ;;  %v1682_v34 = vld [vmem:[#allocation16 + $0xc8] sm:$0xff] }
 0x385   :  { %7642 = vst [vmem:[#allocation68_spill] sm:$0xff] %v5836_v45  ;;  %7645 = vst [vmem:[#allocation67_spill] sm:$0xff] %v5845_v52  ;;  %v5851_v48 = vmul.f32 %v2062_v33, %v5774_v53  ;;  %v1683_v51 = vld [vmem:[#allocation16 + $0xd0] sm:$0xff]  ;;  %v1723_v52 = vld [vmem:[#allocation16 + $0x108] sm:$0xff] }
 0x386   :  { %v1208_v5 = vadd.f32 1e-05, %v1200_v21  ;;  %7643 = vst [vmem:[#allocation70_spill] sm:$0xff] %v5839_v25  ;;  %7644 = vst [vmem:[#allocation61_spill] sm:$0xff] %v5842_v49  ;;  %v5848_v21 = vmul.f32 %v2037_v37, %v5766_v17  ;;  %v1570_v20 = vrot.slane %v5842_v49, 5  ;;  %v1603_v7 = vrot.slane %v5842_v49, 6 }
 0x387   :  { %7647 = vst [vmem:[#allocation75_spill] sm:$0xff] %v5851_v48  ;;  %7648 = vst [vmem:[#allocation76_spill] sm:$0xff] %v5854_v55  ;;  %v4262_v19 = vpop.eup %4261  ;;  %v1645_v56 = vrot.slane %v5842_v49, 7  ;;  %v1711_v6 = vrot.slane %v5842_v49, 1  ;;  %v7654_v37 = vrot.slane %v5732_v60, 7  ;;  %v1329_v25 = vld [vmem:[#allocation15 + $0x40] sm:$0xff]  ;;  %v1690_v22 = vmul.f32 %v1682_v34, %v5842_v49 }
 0x388   :  { %4263 = vrsqrt.f32 %v1208_v5  ;;  %7646 = vst [vmem:[#allocation69_spill] sm:$0xff] %v5848_v21  ;;  %7649 = vst [vmem:[#allocation77_spill] sm:$0xff] %v5860_v29  ;;  %v1238_v33 = vmul.f32 %v4262_v19, %v5640_v28  ;;  %v1239_v5 = vmul.f32 %v4262_v19, %v5643_v62  ;;  %v5870_v35 = vsel %vm1572_vm2, %v7650_v14, %v1570_v20  ;;  %v1657_v62 = vld [vmem:[#allocation16 + $0x88] sm:$0xff] }
 0x389   :  { %7651 = vst [vmem:[#allocation78_spill] sm:$0xff] %v5870_v35  ;;  %v5876_v16 = vsel %vm1605_vm3, %v7652_v13, %v1603_v7  ;;  %v5882_v28 = vsel %vm577_vm0, %v7654_v37, %v1645_v56  ;;  %v7377_v19 = vrot.slane %v5842_v49, 2  ;;  %v1590_v1 = vmul.f32 %v1582_v30, %v5870_v35  ;;  %v1764_v13 = vld [vmem:[#allocation16 + $0x140] sm:$0xff] }
 0x38a   :  { %7653 = vst [vmem:[#allocation79_spill] sm:$0xff] %v5876_v16  ;;  %7655 = vst [vmem:[#allocation80_spill] sm:$0xff] %v5882_v28  ;;  %v1266_v36 = vmul.f32 %v5693_v2, %v1238_v33  ;;  %v1267_v14 = vmul.f32 %v5696_v31, %v1239_v5  ;;  %v1624_v11 = vmul.f32 %v1616_v26, %v5876_v16  ;;  %v7658_v33 = vrot.slane %v5732_v60, 2  ;;  %v1831_v5 = vld [vmem:[#allocation16 + $0x1c0] sm:$0xff] }
 0x38b   :  { %v5894_v37 = vsel %vm691_vm1, %v7656_v59, %v1711_v6  ;;  %v7380_v26 = vrot.slane %v5842_v49, 3  ;;  %v1665_v44 = vmul.f32 %v1657_v62, %v5882_v28 }
 0x38c   :  { %7657 = vst [vmem:[#allocation81_spill] sm:$0xff] %v5894_v37  ;;  %v5902_v30 = vsel %vm1754_vm4, %v7658_v33, %v7377_v19  ;;  %v5906_v53 = vadd.f32 %v5699_v8, %v1266_v36  ;;  %v5909_v34 = vadd.f32 %v5704_v0, %v1267_v14  ;;  %v1632_v59 = vadd.f32 %v1624_v11, %v1590_v1  ;;  %v1617_v14 = vld [vmem:[#allocation16 + $0x50] sm:$0xff] }
 0x38d   :  { %7659 = vst [vmem:[#allocation82_spill] sm:$0xff] %v5902_v30  ;;  %v1730_v29 = vmul.f32 %v1722_v50, %v5894_v37  ;;  %v1772_v33 = vmul.f32 %v1764_v13, %v5902_v30  ;;  %v7662_v19 = vrot.slane %v5732_v60, 3  ;;  %v5928_v50 = vmul.f32 %v1831_v5, %v5870_v35  ;;  %v1659_v35 = vld [vmem:[#allocation16 + $0x98] sm:$0xff] }
 0x38e   :  { %7660 = vst [vmem:[#allocation83_spill] sm:$0xff] %v5906_v53  ;;  %7661 = vst [vmem:[#allocation84_spill] sm:$0xff] %v5909_v34  ;;  %v1181_v17 = vpop.xlane.xlu1 %1180  ;;  %v5924_v1 = vmul.f32 %v1329_v25, %v5906_v53  ;;  %v1571_v11 = vrot.slane %v5909_v34, 5  ;;  %v1604_v13 = vrot.slane %v5909_v34, 6  ;;  %v1646_v60 = vrot.slane %v5909_v34, 7  ;;  %v1658_v25 = vld [vmem:[#allocation16 + $0x90] sm:$0xff] }
 0x38f   :  { %v1201_v4 = vmul.f32 0.00390625, %v1181_v17  ;;  %v5920_v36 = vsel %vm1796_vm5, %v7662_v19, %v7380_v26  ;;  %v1583_v17 = vld [vmem:[#allocation16 + $0x10] sm:$0xff]  ;;  %v1673_v55 = vadd.f32 %v1665_v44, %v1632_v59  ;;  %v1691_v26 = vmul.f32 %v1683_v51, %v5909_v34  ;;  %v7724_v42 = vld [vmem:[#allocation61_spill] sm:$0xff] }
 0x390   :  { %7663 = vst [vmem:[#allocation85_spill] sm:$0xff] %v5920_v36  ;;  %7664 = vst [vmem:[#allocation86_spill] sm:$0xff] %v5924_v1  ;;  %v5934_v19 = vsel %vm1572_vm2, %v1570_v20, %v1571_v11  ;;  %v1712_v1 = vrot.slane %v5909_v34, 1  ;;  %v1738_v53 = vadd.f32 %v1730_v29, %v1697_v27  ;;  %v5943_v20 = vsel %vm1605_vm3, %v1603_v7, %v1604_v13  ;;  %v1806_v29 = vld [vmem:[#allocation16 + $0x180] sm:$0xff] }
 0x391   :  { %v1209_v62 = vadd.f32 1e-05, %v1201_v4  ;;  %7665 = vst [vmem:[#allocation87_spill] sm:$0xff] %v5934_v19  ;;  %v1591_v44 = vmul.f32 %v1583_v17, %v5934_v19  ;;  %7666 = vst [vmem:[#allocation88_spill] sm:$0xff] %v5943_v20  ;;  %v5947_v21 = vsel %vm577_vm0, %v1645_v56, %v1646_v60  ;;  %v1698_v51 = vadd.f32 %v1690_v22, %v1673_v55 }
 0x392   :  { %v4264_v54 = vpop.eup %4263  ;;  %7667 = vst [vmem:[#allocation89_spill] sm:$0xff] %v5947_v21  ;;  %v5955_v7 = vsel %vm691_vm1, %v1711_v6, %v1712_v1  ;;  %v1753_v56 = vrot.slane %v5909_v34, 2 }
 0x393   :  { %v1224_v5 = vmul.f32 %v4264_v54, %v5650_v38  ;;  %v1225_v4 = vmul.f32 %v4264_v54, %v5653_v9  ;;  %4265 = vrsqrt.f32 %v1209_v62  ;;  %v1184_v48 = vpop.xlane.xlu0 %1183  ;;  %v1625_v9 = vmul.f32 %v1617_v14, %v5943_v20  ;;  %7668 = vst [vmem:[#allocation90_spill] sm:$0xff] %v5955_v7  ;;  %v1684_v14 = vld [vmem:[#allocation16 + $0xd8] sm:$0xff] }
 0x394   :  { %v1202_v59 = vmul.f32 0.00390625, %v1184_v48  ;;  %v1666_v54 = vmul.f32 %v1658_v25, %v5947_v21  ;;  %v1330_v48 = vld [vmem:[#allocation15 + $0x48] sm:$0xff]  ;;  %v1780_v62 = vadd.f32 %v1772_v33, %v1738_v53  ;;  %v1731_v25 = vmul.f32 %v1723_v52, %v5955_v7 }
 0x395   :  { %v1252_v27 = vmul.f32 %v5693_v2, %v1224_v5  ;;  %v1253_v38 = vmul.f32 %v5696_v31, %v1225_v4  ;;  %v1633_v5 = vadd.f32 %v1625_v9, %v1591_v44  ;;  %v7671_v4 = vrot.slane %v5842_v49, 2  ;;  %v1618_v9 = vld [vmem:[#allocation16 + $0x58] sm:$0xff] }
 0x396   :  { %v1210_v17 = vadd.f32 1e-05, %v1202_v59  ;;  %v1795_v59 = vrot.slane %v5909_v34, 3  ;;  %v1814_v53 = vmul.f32 %v1806_v29, %v5920_v36  ;;  %v1765_v29 = vld [vmem:[#allocation16 + $0x148] sm:$0xff] }
 0x397   :  { %v5959_v22 = vadd.f32 %v5699_v8, %v1252_v27  ;;  %v5962_v55 = vadd.f32 %v5704_v0, %v1253_v38  ;;  %v5969_v6 = vsel %vm1754_vm4, %v7671_v4, %v1753_v56  ;;  %v1584_v38 = vld [vmem:[#allocation16 + $0x18] sm:$0xff]  ;;  %v1674_v4 = vadd.f32 %v1666_v54, %v1633_v5 }
 0x398   :  { %4267 = vrsqrt.f32 %v1210_v17  ;;  %7672 = vst [vmem:[#allocation93_spill] sm:$0xff] %v5969_v6  ;;  %v1739_v5 = vadd.f32 %v1731_v25, %v1698_v51 }
 0x399   :  { %7669 = vst [vmem:[#allocation91_spill] sm:$0xff] %v5959_v22  ;;  %7670 = vst [vmem:[#allocation92_spill] sm:$0xff] %v5962_v55  ;;  %v5974_v33 = vmul.f32 %v1330_v48, %v5959_v22  ;;  %v1187_v27 = vpop.xlane.xlu1 %1186  ;;  %v7387_v44 = vrot.slane %v5962_v55, 5  ;;  %v7392_v52 = vrot.slane %v5962_v55, 6  ;;  %v7393_v17 = vrot.slane %v5962_v55, 7 }
 0x39a   :  { %v1203_v45 = vmul.f32 0.00390625, %v1187_v27  ;;  %v1692_v41 = vmul.f32 %v1684_v14, %v5962_v55  ;;  %v1699_v36 = vadd.f32 %v1691_v26, %v1674_v4  ;;  %v1807_v4 = vld [vmem:[#allocation16 + $0x188] sm:$0xff]  ;;  %v7693_v10 = vrot.slane %v5962_v55, 1 }
 0x39b   :  { %7673 = vst [vmem:[#allocation94_spill] sm:$0xff] %v5974_v33  ;;  %v5985_v48 = vsel %vm1572_vm2, %v1571_v11, %v7387_v44  ;;  %v5991_v33 = vsel %vm1605_vm3, %v1604_v13, %v7392_v52  ;;  %v5997_v54 = vsel %vm577_vm0, %v1646_v60, %v7393_v17  ;;  %v1724_v44 = vld [vmem:[#allocation16 + $0x110] sm:$0xff]  ;;  %v7677_v13 = vrot.slane %v5962_v55, 1 }
 0x39c   :  { %7674 = vst [vmem:[#allocation95_spill] sm:$0xff] %v5985_v48  ;;  %7675 = vst [vmem:[#allocation96_spill] sm:$0xff] %v5991_v33  ;;  %v1211_v14 = vadd.f32 1e-05, %v1203_v45  ;;  %v1592_v27 = vmul.f32 %v1584_v38, %v5985_v48  ;;  %v1626_v30 = vmul.f32 %v1618_v9, %v5991_v33  ;;  %v1667_v11 = vmul.f32 %v1659_v35, %v5997_v54  ;;  %v1766_v17 = vld [vmem:[#allocation16 + $0x150] sm:$0xff] }
 0x39d   :  { %7676 = vst [vmem:[#allocation97_spill] sm:$0xff] %v5997_v54  ;;  %v4266_v22 = vpop.eup %4265  ;;  %v6006_v52 = vsel %vm691_vm1, %v1712_v1, %v7677_v13  ;;  %v1746_v60 = vrot.slane %v5962_v55, 2  ;;  %v1773_v45 = vmul.f32 %v1765_v29, %v5969_v6  ;;  %v1788_v1 = vrot.slane %v5962_v55, 3 }
 0x39e   :  { %7678 = vst [vmem:[#allocation98_spill] sm:$0xff] %v6006_v52  ;;  %v1226_v51 = vmul.f32 %v4266_v22, %v5660_v63  ;;  %v1227_v25 = vmul.f32 %v4266_v22, %v5663_v32  ;;  %4269 = vrsqrt.f32 %v1211_v14  ;;  %v1634_v35 = vadd.f32 %v1626_v30, %v1592_v27  ;;  %v1808_v22 = vld [vmem:[#allocation16 + $0x190] sm:$0xff]  ;;  %v1685_v30 = vld [vmem:[#allocation16 + $0xe0] sm:$0xff] }
 0x39f   :  { %v1732_v38 = vmul.f32 %v1724_v44, %v6006_v52  ;;  %v6015_v26 = vsel %vm1754_vm4, %v1753_v56, %v1746_v60  ;;  %v6017_v9 = vadd.f32 %v1773_v45, %v1739_v5  ;;  %v7680_v44 = vrot.slane %v5842_v49, 3  ;;  %v1620_v52 = vld [vmem:[#allocation16 + $0x68] sm:$0xff] }
 0x3a0   :  { %7679 = vst [vmem:[#allocation99_spill] sm:$0xff] %v6015_v26  ;;  %v1254_v13 = vmul.f32 %v5693_v2, %v1226_v51  ;;  %v1255_v29 = vmul.f32 %v5696_v31, %v1227_v25  ;;  %v1675_v63 = vadd.f32 %v1667_v11, %v1634_v35  ;;  %v1774_v32 = vmul.f32 %v1766_v17, %v6015_v26 }
 0x3a1   :  { %v1740_v14 = vadd.f32 %v1732_v38, %v1699_v36  ;;  %v6027_v56 = vsel %vm1796_vm5, %v7680_v44, %v1795_v59  ;;  %v6031_v5 = vsel %vm1796_vm5, %v1795_v59, %v1788_v1  ;;  %v6033_v27 = vadd.f32 %v1814_v53, %v1780_v62  ;;  %v1585_v38 = vld [vmem:[#allocation16 + $0x20] sm:$0xff] }
 0x3a2   :  { %7681 = vst [vmem:[#allocation100_spill] sm:$0xff] %v6027_v56  ;;  %7682 = vst [vmem:[#allocation101_spill] sm:$0xff] %v6031_v5  ;;  %v4268_v45 = vpop.eup %4267  ;;  %v6036_v11 = vadd.f32 %v5699_v8, %v1254_v13  ;;  %v6039_v17 = vadd.f32 %v5704_v0, %v1255_v29  ;;  %v6041_v36 = vadd.f32 %v1692_v41, %v1675_v63  ;;  %v1619_v29 = vld [vmem:[#allocation16 + $0x60] sm:$0xff] }
 0x3a3   :  { %v6044_v51 = vmul.f32 %v1807_v4, %v6027_v56  ;;  %v1228_v25 = vmul.f32 %v4268_v45, %v5670_v12  ;;  %v1229_v35 = vmul.f32 %v4268_v45, %v5673_v15  ;;  %v6048_v59 = vadd.f32 %v1774_v32, %v1740_v14  ;;  %v1660_v15 = vld [vmem:[#allocation16 + $0xa0] sm:$0xff] }
 0x3a4   :  { %7683 = vst [vmem:[#allocation102_spill] sm:$0xff] %v6036_v11  ;;  %7684 = vst [vmem:[#allocation103_spill] sm:$0xff] %v6039_v17  ;;  %v6051_v62 = vmul.f32 %v1808_v22, %v6031_v5  ;;  %v1565_v53 = vrot.slane %v6039_v17, 5  ;;  %v1598_v13 = vrot.slane %v6039_v17, 6  ;;  %v1640_v41 = vrot.slane %v6039_v17, 7 }
 0x3a5   :  { %v1693_v4 = vmul.f32 %v1685_v30, %v6039_v17  ;;  %v1256_v63 = vmul.f32 %v5693_v2, %v1228_v25  ;;  %v1257_v12 = vmul.f32 %v5696_v31, %v1229_v35  ;;  %v1706_v32 = vrot.slane %v6039_v17, 1 }
 0x3a6   :  { %v7685_v14 = vrot.slane %v5962_v55, 5  ;;  %v7687_v45 = vrot.slane %v5962_v55, 6  ;;  %v7689_v25 = vrot.slane %v5962_v55, 7  ;;  %v7410_v22 = vrot.slane %v6039_v17, 3 }
 0x3a7   :  { %v6081_v11 = vadd.f32 %v5699_v8, %v1256_v63  ;;  %v7695_v63 = vrot.slane %v6039_v17, 2 }
 0x3a8   :  { %v6065_v44 = vsel %vm1572_vm2, %v7685_v14, %v1565_v53  ;;  %v6071_v30 = vsel %vm1605_vm3, %v7687_v45, %v1598_v13  ;;  %v6077_v35 = vsel %vm577_vm0, %v7689_v25, %v1640_v41  ;;  %v6084_v14 = vadd.f32 %v5704_v0, %v1257_v12  ;;  %v1686_v45 = vld [vmem:[#allocation16 + $0xe8] sm:$0xff]  ;;  %v4270_v26 = vpop.eup %4269 }
 0x3a9   :  { %7686 = vst [vmem:[#allocation104_spill] sm:$0xff] %v6065_v44  ;;  %7688 = vst [vmem:[#allocation105_spill] sm:$0xff] %v6071_v30  ;;  %v1593_v5 = vmul.f32 %v1585_v38, %v6065_v44  ;;  %v1627_v56 = vmul.f32 %v1619_v29, %v6071_v30  ;;  %v1668_v6 = vmul.f32 %v1660_v15, %v6077_v35 }
 0x3aa   :  { %7690 = vst [vmem:[#allocation106_spill] sm:$0xff] %v6077_v35  ;;  %7691 = vst [vmem:[#allocation107_spill] sm:$0xff] %v6081_v11  ;;  %v6093_v25 = vsel %vm691_vm1, %v7693_v10, %v1706_v32  ;;  %v6099_v12 = vsel %vm1754_vm4, %v1746_v60, %v7695_v63  ;;  %v6105_v38 = vsel %vm1796_vm5, %v1788_v1, %v7410_v22  ;;  %v1566_v11 = vrot.slane %v6084_v14, 5  ;;  %v1586_v10 = vld [vmem:[#allocation16 + $0x28] sm:$0xff] }
 0x3ab   :  { %7692 = vst [vmem:[#allocation108_spill] sm:$0xff] %v6084_v14  ;;  %7694 = vst [vmem:[#allocation109_spill] sm:$0xff] %v6093_v25  ;;  %v1230_v29 = vmul.f32 %v4270_v26, %v5680_v3  ;;  %v1231_v15 = vmul.f32 %v4270_v26, %v5683_v24  ;;  %v1599_v37 = vrot.slane %v6084_v14, 6  ;;  %v1635_v7 = vadd.f32 %v1627_v56, %v1593_v5  ;;  %v1661_v63 = vld [vmem:[#allocation16 + $0xa8] sm:$0xff]  ;;  %v1725_v56 = vld [vmem:[#allocation16 + $0x118] sm:$0xff] }
 0x3ac   :  { %7696 = vst [vmem:[#allocation110_spill] sm:$0xff] %v6099_v12  ;;  %7697 = vst [vmem:[#allocation111_spill] sm:$0xff] %v6105_v38  ;;  %v1641_v60 = vrot.slane %v6084_v14, 7  ;;  %v1694_v46 = vmul.f32 %v1686_v45, %v6084_v14  ;;  %v1707_v57 = vrot.slane %v6084_v14, 1  ;;  %v6118_v24 = vsel %vm1572_vm2, %v1565_v53, %v1566_v11  ;;  %v1726_v5 = vld [vmem:[#allocation16 + $0x120] sm:$0xff] }
 0x3ad   :  { %v1258_v1 = vmul.f32 %v5693_v2, %v1230_v29  ;;  %v1259_v3 = vmul.f32 %v5696_v31, %v1231_v15  ;;  %7698 = vst [vmem:[#allocation112_spill] sm:$0xff] %v6118_v24  ;;  %v6122_v26 = vsel %vm1605_vm3, %v1598_v13, %v1599_v37  ;;  %v1594_v22 = vmul.f32 %v1586_v10, %v6118_v24  ;;  %v1687_v31 = vld [vmem:[#allocation16 + $0xf0] sm:$0xff] }
 0x3ae   :  { %7699 = vst [vmem:[#allocation113_spill] sm:$0xff] %v6122_v26  ;;  %v1628_v45 = vmul.f32 %v1620_v52, %v6122_v26  ;;  %v6128_v55 = vsel %vm577_vm0, %v1640_v41, %v1641_v60  ;;  %v1676_v2 = vadd.f32 %v1668_v6, %v1635_v7  ;;  %v6139_v15 = vsel %vm691_vm1, %v1706_v32, %v1707_v57  ;;  %v1587_v10 = vld [vmem:[#allocation16 + $0x30] sm:$0xff] }
 0x3af   :  { %7700 = vst [vmem:[#allocation114_spill] sm:$0xff] %v6128_v55  ;;  %v6131_v29 = vadd.f32 %v5699_v8, %v1258_v1  ;;  %v6134_v53 = vadd.f32 %v5704_v0, %v1259_v3  ;;  %v1669_v13 = vmul.f32 %v1661_v63, %v6128_v55  ;;  %7703 = vst [vmem:[#allocation117_spill] sm:$0xff] %v6139_v15  ;;  %v1588_v8 = vld [vmem:[#allocation16 + $0x38] sm:$0xff]  ;;  %v1621_v0 = vld [vmem:[#allocation16 + $0x70] sm:$0xff] }
 0x3b0   :  { %v1636_v52 = vadd.f32 %v1628_v45, %v1594_v22  ;;  %v1701_v34 = vadd.f32 %v1693_v4, %v1676_v2  ;;  %v1733_v41 = vmul.f32 %v1725_v56, %v6093_v25  ;;  %v1734_v7 = vmul.f32 %v1726_v5, %v6139_v15  ;;  %v1622_v3 = vld [vmem:[#allocation16 + $0x78] sm:$0xff] }
 0x3b1   :  { %7701 = vst [vmem:[#allocation115_spill] sm:$0xff] %v6131_v29  ;;  %7702 = vst [vmem:[#allocation116_spill] sm:$0xff] %v6134_v53  ;;  %v1567_v6 = vrot.slane %v6134_v53, 5  ;;  %v1600_v1 = vrot.slane %v6134_v53, 6  ;;  %v1642_v63 = vrot.slane %v6134_v53, 7  ;;  %v1695_v29 = vmul.f32 %v1687_v31, %v6134_v53 }
 0x3b2   :  { %v1677_v32 = vadd.f32 %v1669_v13, %v1636_v52  ;;  %v1708_v49 = vrot.slane %v6134_v53, 1  ;;  %v1741_v4 = vadd.f32 %v1733_v41, %v6041_v36  ;;  %v1742_v22 = vadd.f32 %v1734_v7, %v1701_v34  ;;  %v1662_v34 = vld [vmem:[#allocation16 + $0xb0] sm:$0xff]  ;;  %v1663_v13 = vld [vmem:[#allocation16 + $0xb8] sm:$0xff] }
 0x3b3   :  { %v7704_v56 = vrot.slane %v5712_v40, 5  ;;  %v6157_v45 = vsel %vm1572_vm2, %v1566_v11, %v1567_v6  ;;  %v7705_v2 = vrot.slane %v5712_v40, 6  ;;  %v6167_v36 = vsel %vm1605_vm3, %v1599_v37, %v1600_v1 }
 0x3b4   :  { %v1595_v52 = vmul.f32 %v1587_v10, %v6157_v45  ;;  %v1629_v7 = vmul.f32 %v1621_v0, %v6167_v36  ;;  %v6181_v37 = vsel %vm577_vm0, %v1641_v60, %v1642_v63  ;;  %v7709_v10 = vrot.slane %v5712_v40, 1  ;;  %v1727_v0 = vld [vmem:[#allocation16 + $0x128] sm:$0xff] }
 0x3b5   :  { %v6153_v5 = vsel %vm1572_vm2, %v1567_v6, %v7704_v56  ;;  %v6163_v31 = vsel %vm1605_vm3, %v1600_v1, %v7705_v2  ;;  %v1728_v6 = vld [vmem:[#allocation16 + $0x130] sm:$0xff]  ;;  %v7706_v56 = vrot.slane %v5712_v40, 7  ;;  %7708 = vst [vmem:[#allocation119_spill] sm:$0xff] %v6181_v37  ;;  %v1702_v1 = vadd.f32 %v1694_v46, %v1677_v32  ;;  %v1768_v32 = vld [vmem:[#allocation16 + $0x160] sm:$0xff] }
 0x3b6   :  { %v1596_v41 = vmul.f32 %v1588_v8, %v6153_v5  ;;  %v1630_v11 = vmul.f32 %v1622_v3, %v6163_v31  ;;  %v6187_v8 = vsel %vm691_vm1, %v1708_v49, %v7709_v10  ;;  %v1767_v3 = vld [vmem:[#allocation16 + $0x158] sm:$0xff]  ;;  %v1637_v15 = vadd.f32 %v1629_v7, %v1595_v52  ;;  %v1770_v7 = vld [vmem:[#allocation16 + $0x170] sm:$0xff] }
 0x3b7   :  { %v6177_v2 = vsel %vm577_vm0, %v1642_v63, %v7706_v56  ;;  %7710 = vst [vmem:[#allocation120_spill] sm:$0xff] %v6187_v8  ;;  %v1670_v39 = vmul.f32 %v1662_v34, %v6181_v37  ;;  %v6193_v55 = vsel %vm691_vm1, %v1707_v57, %v1708_v49  ;;  %v1736_v46 = vmul.f32 %v1728_v6, %v6187_v8 }
 0x3b8   :  { %7707 = vst [vmem:[#allocation118_spill] sm:$0xff] %v6177_v2  ;;  %v1638_v25 = vadd.f32 %v1630_v11, %v1596_v41  ;;  %v1671_v56 = vmul.f32 %v1663_v13, %v6177_v2  ;;  %7711 = vst [vmem:[#allocation121_spill] sm:$0xff] %v6193_v55  ;;  %v1748_v60 = vrot.slane %v6084_v14, 2  ;;  %v1749_v63 = vrot.slane %v6134_v53, 2  ;;  %v1769_v41 = vld [vmem:[#allocation16 + $0x168] sm:$0xff] }
 0x3b9   :  { %v1678_v10 = vadd.f32 %v1670_v39, %v1637_v15  ;;  %v1735_v52 = vmul.f32 %v1727_v0, %v6193_v55  ;;  %v1775_v34 = vmul.f32 %v1767_v3, %v6099_v12  ;;  %v7712_v13 = vrot.slane %v5712_v40, 2  ;;  %v1810_v55 = vld [vmem:[#allocation16 + $0x1a0] sm:$0xff]  ;;  %v1811_v2 = vld [vmem:[#allocation16 + $0x1a8] sm:$0xff] }
 0x3ba   :  { %v1679_v35 = vadd.f32 %v1671_v56, %v1638_v25  ;;  %v6208_v49 = vsel %vm1754_vm4, %v1748_v60, %v1749_v63  ;;  %v7714_v11 = vrot.slane %v6039_v17, 2  ;;  %v1790_v25 = vrot.slane %v6084_v14, 3  ;;  %v1809_v56 = vld [vmem:[#allocation16 + $0x198] sm:$0xff] }
 0x3bb   :  { %v6204_v57 = vsel %vm1754_vm4, %v1749_v63, %v7712_v13  ;;  %7713 = vst [vmem:[#allocation122_spill] sm:$0xff] %v6208_v49  ;;  %v1703_v15 = vadd.f32 %v1695_v29, %v1678_v10  ;;  %v1743_v0 = vadd.f32 %v1735_v52, %v1702_v1  ;;  %v1777_v13 = vmul.f32 %v1769_v41, %v6208_v49 }
 0x3bc   :  { %v6214_v39 = vsel %vm1754_vm4, %v7714_v11, %v1748_v60  ;;  %v1704_v6 = vadd.f32 %v5726_v47, %v1679_v35  ;;  %v1778_v63 = vmul.f32 %v1770_v7, %v6204_v57  ;;  %v1783_v12 = vadd.f32 %v1775_v34, %v1741_v4  ;;  %v1812_v35 = vld [vmem:[#allocation16 + $0x1b0] sm:$0xff] }
 0x3bd   :  { %7715 = vst [vmem:[#allocation123_spill] sm:$0xff] %v6214_v39  ;;  %v1776_v3 = vmul.f32 %v1768_v32, %v6214_v39  ;;  %v1791_v8 = vrot.slane %v6134_v53, 3  ;;  %v1744_v60 = vadd.f32 %v1736_v46, %v1703_v15  ;;  %v7716_v29 = vrot.slane %v6039_v17, 3  ;;  %v1833_v34 = vld [vmem:[#allocation16 + $0x1d0] sm:$0xff]  ;;  %v1834_v15 = vld [vmem:[#allocation16 + $0x1d8] sm:$0xff] }
 0x3be   :  { %v1745_v11 = vadd.f32 %v5792_v23, %v1704_v6  ;;  %v1785_v1 = vadd.f32 %v1777_v13, %v1743_v0  ;;  %v7718_v32 = vrot.slane %v5712_v40, 3  ;;  %v1817_v23 = vmul.f32 %v1809_v56, %v6105_v38  ;;  %v1835_v6 = vld [vmem:[#allocation16 + $0x1e0] sm:$0xff]  ;;  %v1836_v56 = vld [vmem:[#allocation16 + $0x1e8] sm:$0xff]  ;;  %v1837_v13 = vld [vmem:[#allocation16 + $0x1f0] sm:$0xff] }
 0x3bf   :  { %v1784_v14 = vadd.f32 %v1776_v3, %v1742_v22  ;;  %v6227_v47 = vsel %vm1796_vm5, %v7716_v29, %v1790_v25  ;;  %v6237_v46 = vsel %vm1796_vm5, %v1790_v25, %v1791_v8  ;;  %v1832_v22 = vld [vmem:[#allocation16 + $0x1c8] sm:$0xff]  ;;  %v1786_v10 = vadd.f32 %v1778_v63, %v1744_v60  ;;  %v7725_v40 = vld [vmem:[#allocation84_spill] sm:$0xff] }
 0x3c0   :  { %7717 = vst [vmem:[#allocation124_spill] sm:$0xff] %v6227_v47  ;;  %v6233_v4 = vsel %vm1796_vm5, %v1791_v8, %v7718_v32  ;;  %7719 = vst [vmem:[#allocation125_spill] sm:$0xff] %v6237_v46  ;;  %v1787_v52 = vadd.f32 %v5816_v61, %v1745_v11  ;;  %v1818_v41 = vmul.f32 %v1810_v55, %v6227_v47  ;;  %v1858_v32 = vld [vmem:[#allocation16 + $0x210] sm:$0xff] }
 0x3c1   :  { %v1819_v7 = vmul.f32 %v1811_v2, %v6237_v46  ;;  %v1820_v0 = vmul.f32 %v1812_v35, %v6233_v4  ;;  %v1823_v3 = vadd.f32 %v6044_v51, %v6017_v9  ;;  %v1824_v8 = vadd.f32 %v6051_v62, %v6048_v59  ;;  %v1856_v9 = vld [vmem:[#allocation16 + $0x200] sm:$0xff]  ;;  %v1857_v51 = vld [vmem:[#allocation16 + $0x208] sm:$0xff] }
 0x3c2   :  { %v1825_v25 = vadd.f32 %v1817_v23, %v1783_v12  ;;  %v1826_v63 = vadd.f32 %v1818_v41, %v1784_v14  ;;  %v1829_v55 = vadd.f32 %v5819_v43, %v1787_v52  ;;  %v1840_v2 = vmul.f32 %v1832_v22, %v5934_v19  ;;  %v1859_v12 = vld [vmem:[#allocation16 + $0x218] sm:$0xff]  ;;  %v1861_v23 = vld [vmem:[#allocation16 + $0x228] sm:$0xff] }
 0x3c3   :  { %v1827_v61 = vadd.f32 %v1819_v7, %v1785_v1  ;;  %v1828_v60 = vadd.f32 %v1820_v0, %v1786_v10  ;;  %v1841_v11 = vmul.f32 %v1833_v34, %v5985_v48  ;;  %v1842_v29 = vmul.f32 %v1834_v15, %v6065_v44  ;;  %v1860_v1 = vld [vmem:[#allocation16 + $0x220] sm:$0xff]  ;;  %v1862_v7 = vld [vmem:[#allocation16 + $0x230] sm:$0xff] }
 0x3c4   :  { %v1843_v35 = vmul.f32 %v1835_v6, %v6118_v24  ;;  %v1844_v59 = vmul.f32 %v1836_v56, %v6157_v45  ;;  %v1845_v62 = vmul.f32 %v1837_v13, %v6153_v5  ;;  %v1847_v14 = vadd.f32 %v5928_v50, %v6033_v27  ;;  %v1881_v56 = vld [vmem:[#allocation16 + $0x240] sm:$0xff] }
 0x3c5   :  { %v1848_v43 = vadd.f32 %v1840_v2, %v1823_v3  ;;  %v1849_v22 = vadd.f32 %v1841_v11, %v1824_v8  ;;  %v1850_v10 = vadd.f32 %v1842_v29, %v1825_v25  ;;  %v1854_v41 = vadd.f32 %v5813_v18, %v1829_v55  ;;  %v1882_v8 = vld [vmem:[#allocation16 + $0x248] sm:$0xff]  ;;  %v1883_v25 = vld [vmem:[#allocation16 + $0x250] sm:$0xff] }
 0x3c6   :  { %v1851_v52 = vadd.f32 %v1843_v35, %v1826_v63  ;;  %v1852_v34 = vadd.f32 %v1844_v59, %v1827_v61  ;;  %v1853_v15 = vadd.f32 %v1845_v62, %v1828_v60  ;;  %v1864_v6 = vmul.f32 %v1856_v9, %v5876_v16  ;;  %v1884_v63 = vld [vmem:[#allocation16 + $0x258] sm:$0xff]  ;;  %v1885_v60 = vld [vmem:[#allocation16 + $0x260] sm:$0xff]  ;;  %v1886_v11 = vld [vmem:[#allocation16 + $0x268] sm:$0xff] }
 0x3c7   :  { %v1865_v0 = vmul.f32 %v1857_v51, %v5943_v20  ;;  %v1866_v13 = vmul.f32 %v1858_v32, %v5991_v33  ;;  %v1867_v50 = vmul.f32 %v1859_v12, %v6071_v30  ;;  %v1868_v27 = vmul.f32 %v1860_v1, %v6122_v26  ;;  %v1887_v29 = vld [vmem:[#allocation16 + $0x270] sm:$0xff] }
 0x3c8   :  { %v1869_v3 = vmul.f32 %v1861_v23, %v6167_v36  ;;  %v1870_v18 = vmul.f32 %v1862_v7, %v6163_v31  ;;  %v1872_v61 = vadd.f32 %v1864_v6, %v1847_v14  ;;  %v1879_v2 = vadd.f32 %v5822_v58, %v1854_v41  ;;  %v1906_v23 = vld [vmem:[#allocation16 + $0x280] sm:$0xff] }
 0x3c9   :  { %v1873_v55 = vadd.f32 %v1865_v0, %v1848_v43  ;;  %v1874_v35 = vadd.f32 %v1866_v13, %v1849_v22  ;;  %v1875_v9 = vadd.f32 %v1867_v50, %v1850_v10  ;;  %v1876_v51 = vadd.f32 %v1868_v27, %v1851_v52  ;;  %v7720_v7 = vld [vmem:[#allocation106_spill] sm:$0xff]  ;;  %v1908_v10 = vld [vmem:[#allocation16 + $0x290] sm:$0xff]  ;;  %v1909_v52 = vld [vmem:[#allocation16 + $0x298] sm:$0xff] }
 0x3ca   :  { %v1877_v32 = vadd.f32 %v1869_v3, %v1852_v34  ;;  %v1878_v59 = vadd.f32 %v1870_v18, %v1853_v15  ;;  %v1889_v62 = vmul.f32 %v1881_v56, %v5882_v28  ;;  %v1890_v12 = vmul.f32 %v1882_v8, %v5947_v21  ;;  %v7721_v43 = vld [vmem:[#allocation114_spill] sm:$0xff]  ;;  %v7723_v56 = vld [vmem:[#allocation60_spill] sm:$0xff] }
 0x3cb   :  { %v1891_v1 = vmul.f32 %v1883_v25, %v5997_v54  ;;  %v1892_v14 = vmul.f32 %v1884_v63, %v7720_v7  ;;  %v1893_v6 = vmul.f32 %v1885_v60, %v7721_v43  ;;  %v1894_v58 = vmul.f32 %v1886_v11, %v6181_v37  ;;  %v7722_v41 = vld [vmem:[#allocation118_spill] sm:$0xff]  ;;  %v7726_v28 = vld [vmem:[#allocation92_spill] sm:$0xff] }
 0x3cc   :  { %v1895_v0 = vmul.f32 %v1887_v29, %v7722_v41  ;;  %v1907_v22 = vld [vmem:[#allocation16 + $0x288] sm:$0xff]  ;;  %v1897_v34 = vadd.f32 %v1889_v62, %v1872_v61  ;;  %v1898_v15 = vadd.f32 %v1890_v12, %v1873_v55  ;;  %v1904_v50 = vadd.f32 %v7723_v56, %v1879_v2  ;;  %v1910_v27 = vld [vmem:[#allocation16 + $0x2a0] sm:$0xff]  ;;  %v1933_v55 = vld [vmem:[#allocation16 + $0x2d0] sm:$0xff] }
 0x3cd   :  { %v1899_v13 = vadd.f32 %v1891_v1, %v1874_v35  ;;  %v1911_v3 = vld [vmem:[#allocation16 + $0x2a8] sm:$0xff]  ;;  %v1900_v8 = vadd.f32 %v1892_v14, %v1875_v9  ;;  %v1901_v25 = vadd.f32 %v1893_v6, %v1876_v51  ;;  %v1902_v18 = vadd.f32 %v1894_v58, %v1877_v32  ;;  %v1931_v37 = vld [vmem:[#allocation16 + $0x2c0] sm:$0xff]  ;;  %v7727_v35 = vld [vmem:[#allocation108_spill] sm:$0xff] }
 0x3ce   :  { %v1903_v63 = vadd.f32 %v1895_v0, %v1878_v59  ;;  %v1914_v60 = vmul.f32 %v1906_v23, %v7724_v42  ;;  %v1915_v11 = vmul.f32 %v1907_v22, %v7725_v40  ;;  %v1916_v29 = vmul.f32 %v1908_v10, %v7726_v28  ;;  %v1932_v61 = vld [vmem:[#allocation16 + $0x2c8] sm:$0xff]  ;;  %v7728_v12 = vld [vmem:[#allocation64_spill] sm:$0xff]  ;;  %v1935_v1 = vld [vmem:[#allocation16 + $0x2e0] sm:$0xff] }
 0x3cf   :  { %v1917_v41 = vmul.f32 %v1909_v52, %v6039_v17  ;;  %v1918_v62 = vmul.f32 %v1910_v27, %v7727_v35  ;;  %v1919_v2 = vmul.f32 %v1911_v3, %v6134_v53  ;;  %v7729_v51 = vld [vmem:[#allocation43_spill] sm:$0xff]  ;;  %v1934_v59 = vld [vmem:[#allocation16 + $0x2d8] sm:$0xff]  ;;  %v7730_v56 = vld [vmem:[#allocation90_spill] sm:$0xff] }
 0x3d0   :  { %v1928_v9 = vadd.f32 %v7728_v12, %v1903_v63  ;;  %v1929_v32 = vadd.f32 %v7729_v51, %v1904_v50  ;;  %v1936_v23 = vld [vmem:[#allocation16 + $0x2e8] sm:$0xff]  ;;  %v1922_v14 = vadd.f32 %v1914_v60, %v1897_v34  ;;  %v1923_v6 = vadd.f32 %v1915_v11, %v1898_v15  ;;  %v1938_v22 = vld [vmem:[#allocation16 + $0x2f8] sm:$0xff]  ;;  %v1956_v35 = vld [vmem:[#allocation16 + $0x300] sm:$0xff] }
 0x3d1   :  { %v1924_v58 = vadd.f32 %v1916_v29, %v1899_v13  ;;  %v1925_v0 = vadd.f32 %v1917_v41, %v1900_v8  ;;  %v1926_v10 = vadd.f32 %v1918_v62, %v1901_v25  ;;  %v1927_v52 = vadd.f32 %v1919_v2, %v1902_v18  ;;  %v7731_v17 = vld [vmem:[#allocation98_spill] sm:$0xff]  ;;  %v7732_v3 = vld [vmem:[#allocation109_spill] sm:$0xff]  ;;  %v7735_v28 = vld [vmem:[#allocation120_spill] sm:$0xff] }
 0x3d2   :  { %v1939_v42 = vmul.f32 %v1931_v37, %v7730_v56  ;;  %v1940_v27 = vmul.f32 %v1932_v61, %v7731_v17  ;;  %v1941_v53 = vmul.f32 %v1933_v55, %v7732_v3  ;;  %v7733_v63 = vld [vmem:[#allocation117_spill] sm:$0xff]  ;;  %v1944_v40 = vmul.f32 %v1936_v23, %v7735_v28  ;;  %v1957_v34 = vld [vmem:[#allocation16 + $0x308] sm:$0xff]  ;;  %v1958_v15 = vld [vmem:[#allocation16 + $0x310] sm:$0xff] }
 0x3d3   :  { %v1942_v12 = vmul.f32 %v1934_v59, %v7733_v63  ;;  %v7734_v50 = vld [vmem:[#allocation121_spill] sm:$0xff]  ;;  %v7737_v60 = vld [vmem:[#allocation62_spill] sm:$0xff]  ;;  %v7739_v23 = vld [vmem:[#allocation99_spill] sm:$0xff] }
 0x3d4   :  { %v1943_v51 = vmul.f32 %v1935_v1, %v7734_v50  ;;  %v1959_v13 = vld [vmem:[#allocation16 + $0x318] sm:$0xff]  ;;  %v1947_v25 = vadd.f32 %v1939_v42, %v1922_v14  ;;  %v1948_v18 = vadd.f32 %v1940_v27, %v1923_v6  ;;  %v1953_v37 = vadd.f32 %v7737_v60, %v1928_v9  ;;  %v1960_v11 = vld [vmem:[#allocation16 + $0x320] sm:$0xff]  ;;  %v1961_v29 = vld [vmem:[#allocation16 + $0x328] sm:$0xff] }
 0x3d5   :  { %v7736_v41 = vld [vmem:[#allocation81_spill] sm:$0xff]  ;;  %v1949_v62 = vadd.f32 %v1941_v53, %v1924_v58  ;;  %v1950_v55 = vadd.f32 %v1942_v12, %v1925_v0  ;;  %v1952_v59 = vadd.f32 %v1944_v40, %v1927_v52  ;;  %v1965_v28 = vmul.f32 %v1957_v34, %v7739_v23  ;;  %v7740_v63 = vld [vmem:[#allocation110_spill] sm:$0xff]  ;;  %v1983_v58 = vld [vmem:[#allocation16 + $0x350] sm:$0xff] }
 0x3d6   :  { %v1946_v8 = vmul.f32 %v1938_v22, %v7736_v41  ;;  %v1963_v61 = vld [vmem:[#allocation16 + $0x338] sm:$0xff]  ;;  %v1951_v2 = vadd.f32 %v1943_v51, %v1926_v10  ;;  %v1966_v3 = vmul.f32 %v1958_v15, %v7740_v63  ;;  %v1981_v17 = vld [vmem:[#allocation16 + $0x340] sm:$0xff]  ;;  %v1967_v42 = vmul.f32 %v1959_v13, %v6214_v39  ;;  %v1982_v53 = vld [vmem:[#allocation16 + $0x348] sm:$0xff] }
 0x3d7   :  { %v7738_v1 = vld [vmem:[#allocation93_spill] sm:$0xff]  ;;  %v1968_v14 = vmul.f32 %v1960_v11, %v6208_v49  ;;  %v1969_v9 = vmul.f32 %v1961_v29, %v6204_v57  ;;  %v7741_v6 = vld [vmem:[#allocation82_spill] sm:$0xff]  ;;  %v7743_v60 = vld [vmem:[#allocation100_spill] sm:$0xff] }
 0x3d8   :  { %v1954_v56 = vadd.f32 %v1946_v8, %v1929_v32  ;;  %v1964_v50 = vmul.f32 %v1956_v35, %v7738_v1  ;;  %v1971_v22 = vmul.f32 %v1963_v61, %v7741_v6  ;;  %v1984_v0 = vld [vmem:[#allocation16 + $0x358] sm:$0xff]  ;;  %v1973_v32 = vadd.f32 %v1965_v28, %v1948_v18  ;;  %v7742_v35 = vld [vmem:[#allocation63_spill] sm:$0xff]  ;;  %v1985_v27 = vld [vmem:[#allocation16 + $0x360] sm:$0xff] }
 0x3d9   :  { %v1974_v10 = vadd.f32 %v1966_v3, %v1949_v62  ;;  %v1978_v52 = vadd.f32 %v7742_v35, %v1953_v37  ;;  %v1986_v12 = vld [vmem:[#allocation16 + $0x368] sm:$0xff]  ;;  %v1988_v51 = vld [vmem:[#allocation16 + $0x378] sm:$0xff]  ;;  %v1975_v34 = vadd.f32 %v1967_v42, %v1950_v55  ;;  %v1976_v15 = vadd.f32 %v1968_v14, %v1951_v2  ;;  %v2008_v2 = vld [vmem:[#allocation16 + $0x390] sm:$0xff] }
 0x3da   :  { %v1972_v40 = vadd.f32 %v1964_v50, %v1947_v25  ;;  %v1977_v13 = vadd.f32 %v1969_v9, %v1952_v59  ;;  %v1979_v8 = vadd.f32 %v1971_v22, %v1954_v56  ;;  %v1989_v11 = vmul.f32 %v1981_v17, %v7743_v60  ;;  %v7744_v29 = vld [vmem:[#allocation101_spill] sm:$0xff]  ;;  %v2007_v28 = vld [vmem:[#allocation16 + $0x388] sm:$0xff]  ;;  %v7746_v62 = vld [vmem:[#allocation68_spill] sm:$0xff] }
 0x3db   :  { %v1990_v1 = vmul.f32 %v1982_v53, %v7744_v29  ;;  %v1991_v61 = vmul.f32 %v1983_v58, %v6105_v38  ;;  %v1992_v6 = vmul.f32 %v1984_v0, %v6227_v47  ;;  %v2006_v50 = vld [vmem:[#allocation16 + $0x380] sm:$0xff]  ;;  %v1993_v3 = vmul.f32 %v1985_v27, %v6237_v46  ;;  %v2009_v56 = vld [vmem:[#allocation16 + $0x398] sm:$0xff]  ;;  %v2011_v22 = vld [vmem:[#allocation16 + $0x3a8] sm:$0xff] }
 0x3dc   :  { %v1994_v25 = vmul.f32 %v1986_v12, %v6233_v4  ;;  %v7745_v18 = vld [vmem:[#allocation85_spill] sm:$0xff]  ;;  %v2003_v55 = vadd.f32 %v7746_v62, %v1978_v52  ;;  %v1997_v17 = vadd.f32 %v1989_v11, %v1972_v40  ;;  %v2014_v27 = vmul.f32 %v2006_v50, %v5934_v19  ;;  %v2032_v40 = vld [vmem:[#allocation16 + $0x3c8] sm:$0xff] }
 0x3dd   :  { %v1996_v37 = vmul.f32 %v1988_v51, %v7745_v18  ;;  %v2010_v59 = vld [vmem:[#allocation16 + $0x3a0] sm:$0xff]  ;;  %v1998_v42 = vadd.f32 %v1990_v1, %v1973_v32  ;;  %v1999_v14 = vadd.f32 %v1991_v61, %v1974_v10  ;;  %v2000_v9 = vadd.f32 %v1992_v6, %v1975_v34  ;;  %v2013_v53 = vld [vmem:[#allocation16 + $0x3b8] sm:$0xff]  ;;  %v2033_v1 = vld [vmem:[#allocation16 + $0x3d0] sm:$0xff] }
 0x3de   :  { %v2001_v58 = vadd.f32 %v1993_v3, %v1976_v15  ;;  %v2002_v0 = vadd.f32 %v1994_v25, %v1977_v13  ;;  %v2015_v12 = vmul.f32 %v2007_v28, %v5985_v48  ;;  %v2016_v51 = vmul.f32 %v2008_v2, %v6065_v44  ;;  %v2031_v60 = vld [vmem:[#allocation16 + $0x3c0] sm:$0xff]  ;;  %v7748_v15 = vld [vmem:[#allocation67_spill] sm:$0xff] }
 0x3df   :  { %v2004_v35 = vadd.f32 %v1996_v37, %v1979_v8  ;;  %v2017_v52 = vmul.f32 %v2009_v56, %v6118_v24  ;;  %v2018_v62 = vmul.f32 %v2010_v59, %v6157_v45  ;;  %v2019_v6 = vmul.f32 %v2011_v22, %v6153_v5  ;;  %v7747_v32 = vld [vmem:[#allocation78_spill] sm:$0xff]  ;;  %v2034_v8 = vld [vmem:[#allocation16 + $0x3d8] sm:$0xff] }
 0x3e0   :  { %v2021_v10 = vmul.f32 %v2013_v53, %v7747_v32  ;;  %v2022_v34 = vadd.f32 %v2014_v27, %v1997_v17  ;;  %v2028_v13 = vadd.f32 %v7748_v15, %v2003_v55  ;;  %v2035_v11 = vld [vmem:[#allocation16 + $0x3e0] sm:$0xff]  ;;  %v2036_v61 = vld [vmem:[#allocation16 + $0x3e8] sm:$0xff]  ;;  %v2023_v50 = vadd.f32 %v2015_v12, %v1998_v42  ;;  %v2038_v37 = vld [vmem:[#allocation16 + $0x3f8] sm:$0xff] }
 0x3e1   :  { %v2024_v28 = vadd.f32 %v2016_v51, %v1999_v14  ;;  %v2025_v3 = vadd.f32 %v2017_v52, %v2000_v9  ;;  %v2026_v25 = vadd.f32 %v2018_v62, %v2001_v58  ;;  %v2027_v2 = vadd.f32 %v2019_v6, %v2002_v0  ;;  %v2063_v22 = vld [vmem:[#allocation16 + $0x438] sm:$0xff]  ;;  %v2056_v42 = vld [vmem:[#allocation16 + $0x400] sm:$0xff]  ;;  %v2057_v14 = vld [vmem:[#allocation16 + $0x408] sm:$0xff] }
 0x3e2   :  { %v2029_v56 = vadd.f32 %v2021_v10, %v2004_v35  ;;  %v2039_v59 = vmul.f32 %v2031_v60, %v5943_v20  ;;  %v2040_v19 = vmul.f32 %v2032_v40, %v5991_v33  ;;  %v2041_v53 = vmul.f32 %v2033_v1, %v6071_v30  ;;  %v2058_v9 = vld [vmem:[#allocation16 + $0x410] sm:$0xff]  ;;  %v7749_v12 = vld [vmem:[#allocation69_spill] sm:$0xff]  ;;  %v2061_v62 = vld [vmem:[#allocation16 + $0x428] sm:$0xff] }
 0x3e3   :  { %v2042_v17 = vmul.f32 %v2034_v8, %v6122_v26  ;;  %v2043_v55 = vmul.f32 %v2035_v11, %v6167_v36  ;;  %v2044_v27 = vmul.f32 %v2036_v61, %v6163_v31  ;;  %v2046_v58 = vmul.f32 %v2038_v37, %v5876_v16  ;;  %v2059_v51 = vld [vmem:[#allocation16 + $0x418] sm:$0xff]  ;;  %v2060_v52 = vld [vmem:[#allocation16 + $0x420] sm:$0xff] }
 0x3e4   :  { %v2047_v0 = vadd.f32 %v2039_v59, %v2022_v34  ;;  %v2048_v35 = vadd.f32 %v2040_v19, %v2023_v50  ;;  %v2053_v60 = vadd.f32 %v7749_v12, %v2028_v13  ;;  %v2049_v40 = vadd.f32 %v2041_v53, %v2024_v28  ;;  %v2081_v20 = vld [vmem:[#allocation16 + $0x440] sm:$0xff]  ;;  %v7750_v19 = vld [vmem:[#allocation119_spill] sm:$0xff]  ;;  %v7752_v59 = vld [vmem:[#allocation80_spill] sm:$0xff] }
 0x3e5   :  { %v2050_v1 = vadd.f32 %v2042_v17, %v2025_v3  ;;  %v2051_v6 = vadd.f32 %v2043_v55, %v2026_v25  ;;  %v2052_v10 = vadd.f32 %v2044_v27, %v2027_v2  ;;  %v2054_v15 = vadd.f32 %v2046_v58, %v2029_v56  ;;  %v7751_v13 = vld [vmem:[#allocation118_spill] sm:$0xff]  ;;  %v2083_v3 = vld [vmem:[#allocation16 + $0x450] sm:$0xff]  ;;  %v2084_v25 = vld [vmem:[#allocation16 + $0x458] sm:$0xff] }
 0x3e6   :  { %v2064_v8 = vmul.f32 %v2056_v42, %v5947_v21  ;;  %v2065_v11 = vmul.f32 %v2057_v14, %v5997_v54  ;;  %v2066_v61 = vmul.f32 %v2058_v9, %v7720_v7  ;;  %v2067_v34 = vmul.f32 %v2059_v51, %v7721_v43  ;;  %v2082_v28 = vld [vmem:[#allocation16 + $0x448] sm:$0xff]  ;;  %v2085_v27 = vld [vmem:[#allocation16 + $0x460] sm:$0xff]  ;;  %v2088_v42 = vld [vmem:[#allocation16 + $0x478] sm:$0xff] }
 0x3e7   :  { %v2068_v50 = vmul.f32 %v2060_v52, %v7750_v19  ;;  %v2069_v37 = vmul.f32 %v2061_v62, %v7751_v13  ;;  %v2071_v12 = vmul.f32 %v2063_v22, %v7752_v59  ;;  %v7753_v17 = vld [vmem:[#allocation75_spill] sm:$0xff]  ;;  %v7754_v21 = vld [vmem:[#allocation84_spill] sm:$0xff]  ;;  %v2106_v7 = vld [vmem:[#allocation16 + $0x480] sm:$0xff] }
 0x3e8   :  { %v2072_v2 = vadd.f32 %v2064_v8, %v2047_v0  ;;  %v2073_v56 = vadd.f32 %v2065_v11, %v2048_v35  ;;  %v2074_v53 = vadd.f32 %v2066_v61, %v2049_v40  ;;  %v2078_v55 = vadd.f32 %v7753_v17, %v2053_v60  ;;  %v7755_v19 = vld [vmem:[#allocation92_spill] sm:$0xff]  ;;  %v7756_v13 = vld [vmem:[#allocation103_spill] sm:$0xff]  ;;  %v7759_v60 = vld [vmem:[#allocation61_spill] sm:$0xff] }
 0x3e9   :  { %v2075_v14 = vadd.f32 %v2067_v34, %v2050_v1  ;;  %v2076_v9 = vadd.f32 %v2068_v50, %v2051_v6  ;;  %v2077_v58 = vadd.f32 %v2069_v37, %v2052_v10  ;;  %v2079_v51 = vadd.f32 %v2071_v12, %v2054_v15  ;;  %v7757_v59 = vld [vmem:[#allocation108_spill] sm:$0xff]  ;;  %v2107_v0 = vld [vmem:[#allocation16 + $0x488] sm:$0xff]  ;;  %v7760_v61 = vld [vmem:[#allocation65_spill] sm:$0xff] }
 0x3ea   :  { %v2089_v52 = vmul.f32 %v2081_v20, %v7754_v21  ;;  %v2090_v62 = vmul.f32 %v2082_v28, %v7755_v19  ;;  %v2091_v22 = vmul.f32 %v2083_v3, %v7756_v13  ;;  %v2092_v43 = vmul.f32 %v2084_v25, %v7757_v59  ;;  %v2108_v35 = vld [vmem:[#allocation16 + $0x490] sm:$0xff]  ;;  %v2109_v15 = vld [vmem:[#allocation16 + $0x498] sm:$0xff]  ;;  %v2110_v34 = vld [vmem:[#allocation16 + $0x4a0] sm:$0xff] }
 0x3eb   :  { %v7758_v40 = vld [vmem:[#allocation116_spill] sm:$0xff]  ;;  %v2096_v11 = vmul.f32 %v2088_v42, %v7759_v60  ;;  %v2102_v1 = vadd.f32 %v7760_v61, %v2077_v58  ;;  %v7762_v21 = vld [vmem:[#allocation98_spill] sm:$0xff]  ;;  %v7763_v13 = vld [vmem:[#allocation109_spill] sm:$0xff] }
 0x3ec   :  { %v2093_v8 = vmul.f32 %v2085_v27, %v7758_v40  ;;  %v7761_v6 = vld [vmem:[#allocation76_spill] sm:$0xff]  ;;  %v2097_v50 = vadd.f32 %v2089_v52, %v2072_v2  ;;  %v2098_v37 = vadd.f32 %v2090_v62, %v2073_v56  ;;  %v2099_v12 = vadd.f32 %v2091_v22, %v2074_v53  ;;  %v2136_v40 = vld [vmem:[#allocation16 + $0x4e8] sm:$0xff]  ;;  %v7764_v42 = vld [vmem:[#allocation117_spill] sm:$0xff] }
 0x3ed   :  { %v2103_v10 = vadd.f32 %v7761_v6, %v2078_v55  ;;  %v2112_v20 = vld [vmem:[#allocation16 + $0x4b0] sm:$0xff]  ;;  %v2100_v28 = vadd.f32 %v2092_v43, %v2075_v14  ;;  %v2113_v3 = vld [vmem:[#allocation16 + $0x4b8] sm:$0xff]  ;;  %v2104_v17 = vadd.f32 %v2096_v11, %v2079_v51  ;;  %v2114_v59 = vmul.f32 %v2106_v7, %v7762_v21  ;;  %v2131_v2 = vld [vmem:[#allocation16 + $0x4c0] sm:$0xff] }
 0x3ee   :  { %v2101_v25 = vadd.f32 %v2093_v8, %v2076_v9  ;;  %v2115_v27 = vmul.f32 %v2107_v0, %v7763_v13  ;;  %v2116_v60 = vmul.f32 %v2108_v35, %v7764_v42  ;;  %v7765_v58 = vld [vmem:[#allocation121_spill] sm:$0xff]  ;;  %v7766_v55 = vld [vmem:[#allocation120_spill] sm:$0xff]  ;;  %v2120_v19 = vmul.f32 %v2112_v20, %v7736_v41  ;;  %v2132_v56 = vld [vmem:[#allocation16 + $0x4c8] sm:$0xff] }
 0x3ef   :  { %v2117_v61 = vmul.f32 %v2109_v15, %v7765_v58  ;;  %v2118_v6 = vmul.f32 %v2110_v34, %v7766_v55  ;;  %v2133_v53 = vld [vmem:[#allocation16 + $0x4d0] sm:$0xff]  ;;  %v7767_v43 = vld [vmem:[#allocation90_spill] sm:$0xff]  ;;  %v2122_v9 = vadd.f32 %v2114_v59, %v2097_v50  ;;  %v7768_v52 = vld [vmem:[#allocation77_spill] sm:$0xff]  ;;  %v2139_v20 = vmul.f32 %v2131_v2, %v7739_v23 }
 0x3f0   :  { %v2121_v14 = vmul.f32 %v2113_v3, %v7767_v43  ;;  %v2123_v51 = vadd.f32 %v2115_v27, %v2098_v37  ;;  %v2127_v7 = vadd.f32 %v7768_v52, %v2102_v1  ;;  %v2134_v62 = vld [vmem:[#allocation16 + $0x4d8] sm:$0xff]  ;;  %v2135_v22 = vld [vmem:[#allocation16 + $0x4e0] sm:$0xff]  ;;  %v2137_v0 = vld [vmem:[#allocation16 + $0x4f0] sm:$0xff]  ;;  %v2124_v8 = vadd.f32 %v2116_v60, %v2099_v12 }
 0x3f1   :  { %v2125_v35 = vadd.f32 %v2117_v61, %v2100_v28  ;;  %v2126_v11 = vadd.f32 %v2118_v6, %v2101_v25  ;;  %v2128_v15 = vadd.f32 %v2120_v19, %v2103_v10  ;;  %v2138_v21 = vld [vmem:[#allocation16 + $0x4f8] sm:$0xff]  ;;  %v2140_v41 = vmul.f32 %v2132_v56, %v7740_v63  ;;  %v2161_v3 = vld [vmem:[#allocation16 + $0x528] sm:$0xff]  ;;  %v2156_v12 = vld [vmem:[#allocation16 + $0x500] sm:$0xff] }
 0x3f2   :  { %v2129_v34 = vadd.f32 %v2121_v14, %v2104_v17  ;;  %v2141_v55 = vmul.f32 %v2133_v53, %v6214_v39  ;;  %v2142_v59 = vmul.f32 %v2134_v62, %v6208_v49  ;;  %v2143_v1 = vmul.f32 %v2135_v22, %v6204_v57  ;;  %v7769_v50 = vld [vmem:[#allocation49_spill] sm:$0xff]  ;;  %v7770_v27 = vld [vmem:[#allocation82_spill] sm:$0xff]  ;;  %v2158_v19 = vld [vmem:[#allocation16 + $0x510] sm:$0xff] }
 0x3f3   :  { %v2144_v37 = vmul.f32 %v2136_v40, %v7769_v50  ;;  %v2145_v60 = vmul.f32 %v2137_v0, %v7770_v27  ;;  %v2157_v28 = vld [vmem:[#allocation16 + $0x508] sm:$0xff]  ;;  %v7771_v10 = vld [vmem:[#allocation93_spill] sm:$0xff]  ;;  %v2147_v17 = vadd.f32 %v2139_v20, %v2122_v9  ;;  %v2148_v61 = vadd.f32 %v2140_v41, %v2123_v51  ;;  %v2162_v53 = vld [vmem:[#allocation16 + $0x530] sm:$0xff] }
 0x3f4   :  { %v2146_v25 = vmul.f32 %v2138_v21, %v7771_v10  ;;  %v2149_v6 = vadd.f32 %v2141_v55, %v2124_v8  ;;  %v2159_v2 = vld [vmem:[#allocation16 + $0x518] sm:$0xff]  ;;  %v2160_v56 = vld [vmem:[#allocation16 + $0x520] sm:$0xff]  ;;  %v2150_v14 = vadd.f32 %v2142_v59, %v2125_v35  ;;  %v2151_v52 = vadd.f32 %v2143_v1, %v2126_v11  ;;  %v2186_v50 = vld [vmem:[#allocation16 + $0x568] sm:$0xff] }
 0x3f5   :  { %v2152_v62 = vadd.f32 %v2144_v37, %v2127_v7  ;;  %v2153_v23 = vadd.f32 %v2145_v60, %v2128_v15  ;;  %v2163_v22 = vld [vmem:[#allocation16 + $0x538] sm:$0xff]  ;;  %v2164_v40 = vmul.f32 %v2156_v12, %v7744_v29  ;;  %v2165_v0 = vmul.f32 %v2157_v28, %v6105_v38  ;;  %v2181_v8 = vld [vmem:[#allocation16 + $0x540] sm:$0xff]  ;;  %v2182_v7 = vld [vmem:[#allocation16 + $0x548] sm:$0xff] }
 0x3f6   :  { %v2154_v43 = vadd.f32 %v2146_v25, %v2129_v34  ;;  %v2166_v27 = vmul.f32 %v2158_v19, %v6227_v47  ;;  %v2167_v21 = vmul.f32 %v2159_v2, %v6237_v46  ;;  %v2168_v41 = vmul.f32 %v2160_v56, %v6233_v4  ;;  %v7772_v55 = vld [vmem:[#allocation57_spill] sm:$0xff]  ;;  %v2183_v35 = vld [vmem:[#allocation16 + $0x550] sm:$0xff]  ;;  %v2211_v10 = vld [vmem:[#allocation16 + $0x5a8] sm:$0xff] }
 0x3f7   :  { %v2169_v9 = vmul.f32 %v2161_v3, %v7772_v55  ;;  %v2170_v51 = vmul.f32 %v2162_v53, %v7745_v18  ;;  %v7773_v11 = vld [vmem:[#allocation100_spill] sm:$0xff]  ;;  %v2172_v34 = vadd.f32 %v2164_v40, %v2147_v17  ;;  %v2173_v20 = vadd.f32 %v2165_v0, %v2148_v61  ;;  %v2185_v37 = vld [vmem:[#allocation16 + $0x560] sm:$0xff] }
 0x3f8   :  { %v2171_v15 = vmul.f32 %v2163_v22, %v7773_v11  ;;  %v2174_v59 = vadd.f32 %v2166_v27, %v2149_v6  ;;  %v2184_v1 = vld [vmem:[#allocation16 + $0x558] sm:$0xff]  ;;  %v2187_v60 = vld [vmem:[#allocation16 + $0x570] sm:$0xff]  ;;  %v2175_v12 = vadd.f32 %v2167_v21, %v2150_v14  ;;  %v2176_v28 = vadd.f32 %v2168_v41, %v2151_v52  ;;  %v7774_v61 = vld [vmem:[#allocation42_spill] sm:$0xff] }
 0x3f9   :  { %v2177_v19 = vadd.f32 %v2169_v9, %v2152_v62  ;;  %v2178_v25 = vadd.f32 %v2170_v51, %v2153_v23  ;;  %v2188_v2 = vld [vmem:[#allocation16 + $0x578] sm:$0xff]  ;;  %v2189_v3 = vmul.f32 %v2181_v8, %v5985_v48  ;;  %v2190_v53 = vmul.f32 %v2182_v7, %v6065_v44  ;;  %v2206_v52 = vld [vmem:[#allocation16 + $0x580] sm:$0xff]  ;;  %v2207_v62 = vld [vmem:[#allocation16 + $0x588] sm:$0xff] }
 0x3fa   :  { %v2179_v56 = vadd.f32 %v2171_v15, %v2154_v43  ;;  %v2191_v29 = vmul.f32 %v2183_v35, %v6118_v24  ;;  %v2192_v17 = vmul.f32 %v2184_v1, %v6157_v45  ;;  %v2193_v27 = vmul.f32 %v2185_v37, %v6153_v5  ;;  %v2208_v23 = vld [vmem:[#allocation16 + $0x590] sm:$0xff]  ;;  %v2209_v41 = vld [vmem:[#allocation16 + $0x598] sm:$0xff]  ;;  %v2210_v9 = vld [vmem:[#allocation16 + $0x5a0] sm:$0xff] }
 0x3fb   :  { %v2194_v6 = vmul.f32 %v2186_v50, %v7774_v61  ;;  %v2195_v14 = vmul.f32 %v2187_v60, %v7747_v32  ;;  %v7775_v22 = vld [vmem:[#allocation87_spill] sm:$0xff]  ;;  %v2197_v40 = vadd.f32 %v2189_v3, %v2172_v34  ;;  %v2198_v0 = vadd.f32 %v2190_v53, %v2173_v20  ;;  %v2213_v1 = vld [vmem:[#allocation16 + $0x5b8] sm:$0xff]  ;;  %v7776_v20 = vld [vmem:[#allocation58_spill] sm:$0xff] }
 0x3fc   :  { %v2196_v43 = vmul.f32 %v2188_v2, %v7775_v22  ;;  %v2199_v21 = vadd.f32 %v2191_v29, %v2174_v59  ;;  %v2212_v51 = vld [vmem:[#allocation16 + $0x5b0] sm:$0xff]  ;;  %v2200_v8 = vadd.f32 %v2192_v17, %v2175_v12  ;;  %v2201_v7 = vadd.f32 %v2193_v27, %v2176_v28  ;;  %v2236_v11 = vld [vmem:[#allocation16 + $0x5e8] sm:$0xff]  ;;  %v2231_v28 = vld [vmem:[#allocation16 + $0x5c0] sm:$0xff] }
 0x3fd   :  { %v2202_v35 = vadd.f32 %v2194_v6, %v2177_v19  ;;  %v2203_v15 = vadd.f32 %v2195_v14, %v2178_v25  ;;  %v2214_v50 = vmul.f32 %v2206_v52, %v5991_v33  ;;  %v2215_v60 = vmul.f32 %v2207_v62, %v6071_v30  ;;  %v2232_v19 = vld [vmem:[#allocation16 + $0x5c8] sm:$0xff]  ;;  %v2233_v25 = vld [vmem:[#allocation16 + $0x5d0] sm:$0xff]  ;;  %v2234_v27 = vld [vmem:[#allocation16 + $0x5d8] sm:$0xff] }
 0x3fe   :  { %v2204_v37 = vadd.f32 %v2196_v43, %v2179_v56  ;;  %v2216_v48 = vmul.f32 %v2208_v23, %v6122_v26  ;;  %v2217_v34 = vmul.f32 %v2209_v41, %v6167_v36  ;;  %v2218_v29 = vmul.f32 %v2210_v9, %v6163_v31  ;;  %v7777_v2 = vld [vmem:[#allocation88_spill] sm:$0xff]  ;;  %v2235_v6 = vld [vmem:[#allocation16 + $0x5e0] sm:$0xff] }
 0x3ff   :  { %v2219_v59 = vmul.f32 %v2211_v10, %v7776_v20  ;;  %v2220_v12 = vmul.f32 %v2212_v51, %v5876_v16  ;;  %v2221_v56 = vmul.f32 %v2213_v1, %v7777_v2  ;;  %v2222_v3 = vadd.f32 %v2214_v50, %v2197_v40  ;;  %v2237_v14 = vld [vmem:[#allocation16 + $0x5f0] sm:$0xff]  ;;  %v2256_v41 = vld [vmem:[#allocation16 + $0x600] sm:$0xff]  ;;  %v2261_v1 = vld [vmem:[#allocation16 + $0x628] sm:$0xff] }
 0x400   :  { %v2223_v53 = vadd.f32 %v2215_v60, %v2198_v0  ;;  %v2224_v17 = vadd.f32 %v2216_v48, %v2199_v21  ;;  %v2225_v52 = vadd.f32 %v2217_v34, %v2200_v8  ;;  %v2226_v62 = vadd.f32 %v2218_v29, %v2201_v7  ;;  %v7779_v51 = vld [vmem:[#allocation106_spill] sm:$0xff]  ;;  %v7781_v40 = vld [vmem:[#allocation119_spill] sm:$0xff]  ;;  %v7783_v50 = vld [vmem:[#allocation56_spill] sm:$0xff] }
 0x401   :  { %v2227_v23 = vadd.f32 %v2219_v59, %v2202_v35  ;;  %v2228_v43 = vadd.f32 %v2220_v12, %v2203_v15  ;;  %v6378_v9 = vadd.f32 %v2221_v56, %v2204_v37  ;;  %v2239_v10 = vmul.f32 %v2231_v28, %v5997_v54  ;;  %v7780_v22 = vld [vmem:[#allocation114_spill] sm:$0xff]  ;;  %v7784_v8 = vld [vmem:[#allocation80_spill] sm:$0xff]  ;;  %v7786_v2 = vld [vmem:[#allocation103_spill] sm:$0xff] }
 0x402   :  { %v2240_v33 = vmul.f32 %v2232_v19, %v7779_v51  ;;  %v2241_v16 = vmul.f32 %v2233_v25, %v7780_v22  ;;  %v2242_v0 = vmul.f32 %v2234_v27, %v7781_v40  ;;  %v7782_v48 = vld [vmem:[#allocation118_spill] sm:$0xff]  ;;  %v2244_v60 = vmul.f32 %v2236_v11, %v7783_v50  ;;  %v2258_v15 = vld [vmem:[#allocation16 + $0x610] sm:$0xff]  ;;  %v2259_v34 = vld [vmem:[#allocation16 + $0x618] sm:$0xff] }
 0x403   :  { %7778 = vst [vmem:[#allocation60_spill] sm:$0xff] %v6378_v9  ;;  %v2243_v21 = vmul.f32 %v2235_v6, %v7782_v48  ;;  %v2245_v7 = vmul.f32 %v2237_v14, %v7784_v8  ;;  %v2257_v35 = vld [vmem:[#allocation16 + $0x608] sm:$0xff]  ;;  %v2247_v37 = vadd.f32 %v2239_v10, %v2222_v3  ;;  %v2262_v12 = vld [vmem:[#allocation16 + $0x630] sm:$0xff]  ;;  %v2281_v56 = vld [vmem:[#allocation16 + $0x640] sm:$0xff] }
 0x404   :  { %v2248_v29 = vadd.f32 %v2240_v33, %v2223_v53  ;;  %v2249_v59 = vadd.f32 %v2241_v16, %v2224_v17  ;;  %v7785_v28 = vld [vmem:[#allocation92_spill] sm:$0xff]  ;;  %v2250_v25 = vadd.f32 %v2242_v0, %v2225_v52  ;;  %v2252_v54 = vadd.f32 %v2244_v60, %v2227_v23  ;;  %v7789_v8 = vld [vmem:[#allocation45_spill] sm:$0xff]  ;;  %v2282_v22 = vld [vmem:[#allocation16 + $0x648] sm:$0xff] }
 0x405   :  { %v2264_v19 = vmul.f32 %v2256_v41, %v7785_v28  ;;  %v2251_v9 = vadd.f32 %v2243_v21, %v2226_v62  ;;  %v2253_v27 = vadd.f32 %v2245_v7, %v2228_v43  ;;  %v2265_v6 = vmul.f32 %v2257_v35, %v7786_v2  ;;  %v7787_v48 = vld [vmem:[#allocation108_spill] sm:$0xff]  ;;  %v7790_v16 = vld [vmem:[#allocation61_spill] sm:$0xff]  ;;  %v2286_v62 = vld [vmem:[#allocation16 + $0x668] sm:$0xff] }
 0x406   :  { %v2266_v11 = vmul.f32 %v2258_v15, %v7787_v48  ;;  %v7788_v50 = vld [vmem:[#allocation116_spill] sm:$0xff]  ;;  %v2269_v40 = vmul.f32 %v2261_v1, %v7789_v8  ;;  %v2270_v53 = vmul.f32 %v2262_v12, %v7790_v16  ;;  %v2285_v52 = vld [vmem:[#allocation16 + $0x660] sm:$0xff]  ;;  %v2289_v23 = vmul.f32 %v2281_v56, %v7763_v13  ;;  %v2307_v35 = vld [vmem:[#allocation16 + $0x688] sm:$0xff] }
 0x407   :  { %v2267_v14 = vmul.f32 %v2259_v34, %v7788_v50  ;;  %v2283_v3 = vld [vmem:[#allocation16 + $0x650] sm:$0xff]  ;;  %v2284_v33 = vld [vmem:[#allocation16 + $0x658] sm:$0xff]  ;;  %v2272_v17 = vadd.f32 %v2264_v19, %v2247_v37  ;;  %v2306_v43 = vld [vmem:[#allocation16 + $0x680] sm:$0xff]  ;;  %v2273_v0 = vadd.f32 %v2265_v6, %v2248_v29  ;;  %v2290_v1 = vmul.f32 %v2282_v22, %v7764_v42 }
 0x408   :  { %v7791_v41 = vld [vmem:[#allocation52_spill] sm:$0xff]  ;;  %v2274_v21 = vadd.f32 %v2266_v11, %v2249_v59  ;;  %v2277_v7 = vadd.f32 %v2269_v40, %v2252_v54  ;;  %v6395_v15 = vadd.f32 %v2270_v53, %v2253_v27  ;;  %v2291_v34 = vmul.f32 %v2283_v3, %v7765_v58  ;;  %v7795_v16 = vld [vmem:[#allocation81_spill] sm:$0xff]  ;;  %v2311_v59 = vld [vmem:[#allocation16 + $0x6a8] sm:$0xff] }
 0x409   :  { %v2276_v10 = vadd.f32 %v7791_v41, %v2251_v9  ;;  %v2275_v60 = vadd.f32 %v2267_v14, %v2250_v25  ;;  %v7793_v12 = vld [vmem:[#allocation120_spill] sm:$0xff]  ;;  %v7794_v41 = vld [vmem:[#allocation59_spill] sm:$0xff]  ;;  %v2294_v56 = vmul.f32 %v2286_v62, %v7795_v16  ;;  %v2297_v13 = vadd.f32 %v2289_v23, %v2272_v17  ;;  %v2310_v29 = vld [vmem:[#allocation16 + $0x6a0] sm:$0xff] }
 0x40a   :  { %7792 = vst [vmem:[#allocation64_spill] sm:$0xff] %v6395_v15  ;;  %v2292_v37 = vmul.f32 %v2284_v33, %v7793_v12  ;;  %v2308_v19 = vld [vmem:[#allocation16 + $0x690] sm:$0xff]  ;;  %v2309_v9 = vld [vmem:[#allocation16 + $0x698] sm:$0xff]  ;;  %v2293_v28 = vmul.f32 %v2285_v52, %v7794_v41  ;;  %v2314_v54 = vmul.f32 %v2306_v43, %v7740_v63  ;;  %v2298_v40 = vadd.f32 %v2290_v1, %v2273_v0  ;;  %v2331_v6 = vld [vmem:[#allocation16 + $0x6c0] sm:$0xff] }
 0x40b   :  { %v2299_v25 = vadd.f32 %v2291_v34, %v2274_v21  ;;  %v2315_v22 = vmul.f32 %v2307_v35, %v6214_v39  ;;  %v2332_v11 = vld [vmem:[#allocation16 + $0x6c8] sm:$0xff]  ;;  %v2302_v3 = vadd.f32 %v2294_v56, %v2277_v7  ;;  %v2316_v33 = vmul.f32 %v2308_v19, %v6208_v49  ;;  %v2333_v52 = vld [vmem:[#allocation16 + $0x6d0] sm:$0xff]  ;;  %v2334_v62 = vld [vmem:[#allocation16 + $0x6d8] sm:$0xff] }
 0x40c   :  { %v2300_v27 = vadd.f32 %v2292_v37, %v2275_v60  ;;  %v2301_v14 = vadd.f32 %v2293_v28, %v2276_v10  ;;  %v2317_v53 = vmul.f32 %v2309_v9, %v6204_v57  ;;  %v7796_v17 = vld [vmem:[#allocation49_spill] sm:$0xff]  ;;  %v7797_v15 = vld [vmem:[#allocation82_spill] sm:$0xff]  ;;  %v2322_v43 = vadd.f32 %v2314_v54, %v2297_v13 }
 0x40d   :  { %v2318_v23 = vmul.f32 %v2310_v29, %v7796_v17  ;;  %v2319_v16 = vmul.f32 %v2311_v59, %v7797_v15  ;;  %v2323_v0 = vadd.f32 %v2315_v22, %v2298_v40  ;;  %v2335_v21 = vld [vmem:[#allocation16 + $0x6e0] sm:$0xff]  ;;  %v2336_v60 = vld [vmem:[#allocation16 + $0x6e8] sm:$0xff]  ;;  %v2324_v1 = vadd.f32 %v2316_v33, %v2299_v25  ;;  %v2358_v29 = vld [vmem:[#allocation16 + $0x710] sm:$0xff] }
 0x40e   :  { %v2325_v35 = vadd.f32 %v2317_v53, %v2300_v27  ;;  %v2339_v34 = vmul.f32 %v2331_v6, %v6105_v38  ;;  %v2340_v28 = vmul.f32 %v2332_v11, %v6227_v47  ;;  %v2356_v10 = vld [vmem:[#allocation16 + $0x700] sm:$0xff]  ;;  %v2357_v7 = vld [vmem:[#allocation16 + $0x708] sm:$0xff]  ;;  %v2341_v9 = vmul.f32 %v2333_v52, %v6237_v46  ;;  %v2359_v59 = vld [vmem:[#allocation16 + $0x718] sm:$0xff] }
 0x40f   :  { %v2326_v37 = vadd.f32 %v2318_v23, %v2301_v14  ;;  %v2327_v19 = vadd.f32 %v2319_v16, %v2302_v3  ;;  %v2342_v56 = vmul.f32 %v2334_v62, %v6233_v4  ;;  %v2343_v13 = vmul.f32 %v2335_v21, %v7772_v55  ;;  %v2360_v27 = vld [vmem:[#allocation16 + $0x720] sm:$0xff]  ;;  %v2361_v22 = vld [vmem:[#allocation16 + $0x728] sm:$0xff]  ;;  %v2383_v21 = vld [vmem:[#allocation16 + $0x750] sm:$0xff] }
 0x410   :  { %v2344_v54 = vmul.f32 %v2336_v60, %v7745_v18  ;;  %v2347_v40 = vadd.f32 %v2339_v34, %v2322_v43  ;;  %v2348_v25 = vadd.f32 %v2340_v28, %v2323_v0  ;;  %v2349_v6 = vadd.f32 %v2341_v9, %v2324_v1  ;;  %v2381_v14 = vld [vmem:[#allocation16 + $0x740] sm:$0xff]  ;;  %v2382_v3 = vld [vmem:[#allocation16 + $0x748] sm:$0xff]  ;;  %v2384_v60 = vld [vmem:[#allocation16 + $0x758] sm:$0xff] }
 0x411   :  { %v2350_v11 = vadd.f32 %v2342_v56, %v2325_v35  ;;  %v2364_v33 = vmul.f32 %v2356_v10, %v6065_v44  ;;  %v2365_v16 = vmul.f32 %v2357_v7, %v6118_v24  ;;  %v2351_v53 = vadd.f32 %v2343_v13, %v2326_v37  ;;  %v2385_v34 = vld [vmem:[#allocation16 + $0x760] sm:$0xff]  ;;  %v2407_v9 = vld [vmem:[#allocation16 + $0x788] sm:$0xff]  ;;  %v2408_v56 = vld [vmem:[#allocation16 + $0x790] sm:$0xff] }
 0x412   :  { %v2352_v52 = vadd.f32 %v2344_v54, %v2327_v19  ;;  %v2366_v62 = vmul.f32 %v2358_v29, %v6157_v45  ;;  %v2367_v23 = vmul.f32 %v2359_v59, %v6153_v5  ;;  %v2368_v43 = vmul.f32 %v2360_v27, %v7774_v61  ;;  %v2406_v28 = vld [vmem:[#allocation16 + $0x780] sm:$0xff]  ;;  %v2409_v29 = vld [vmem:[#allocation16 + $0x798] sm:$0xff] }
 0x413   :  { %v2369_v0 = vmul.f32 %v2361_v22, %v7747_v32  ;;  %v2372_v1 = vadd.f32 %v2364_v33, %v2347_v40  ;;  %v2373_v35 = vadd.f32 %v2365_v16, %v2348_v25  ;;  %v2389_v37 = vmul.f32 %v2381_v14, %v6071_v30  ;;  %v2410_v25 = vld [vmem:[#allocation16 + $0x7a0] sm:$0xff]  ;;  %v2432_v16 = vld [vmem:[#allocation16 + $0x7c8] sm:$0xff]  ;;  %v7802_v44 = vld [vmem:[#allocation56_spill] sm:$0xff] }
 0x414   :  { %v6420_v10 = vadd.f32 %v2366_v62, %v2349_v6  ;;  %v2375_v7 = vadd.f32 %v2367_v23, %v2350_v11  ;;  %v2390_v19 = vmul.f32 %v2382_v3, %v6122_v26  ;;  %v2376_v59 = vadd.f32 %v2368_v43, %v2351_v53  ;;  %v2431_v27 = vld [vmem:[#allocation16 + $0x7c0] sm:$0xff] }
 0x415   :  { %v6424_v13 = vadd.f32 %v2369_v0, %v2352_v52  ;;  %v6427_v54 = vmul.f32 %v2383_v21, %v6167_v36  ;;  %v2392_v40 = vmul.f32 %v2384_v60, %v6163_v31  ;;  %v2393_v22 = vmul.f32 %v2385_v34, %v7776_v20  ;;  %v2456_v14 = vld [vmem:[#allocation16 + $0x800] sm:$0xff]  ;;  %v7800_v52 = vld [vmem:[#allocation119_spill] sm:$0xff] }
 0x416   :  { %v2397_v6 = vadd.f32 %v2389_v37, %v2372_v1  ;;  %v2398_v11 = vadd.f32 %v2390_v19, %v2373_v35  ;;  %v2414_v33 = vmul.f32 %v2406_v28, %v7779_v51  ;;  %v7799_v62 = vld [vmem:[#allocation114_spill] sm:$0xff]  ;;  %v6434_v23 = vmul.f32 %v2408_v56, %v7800_v52  ;;  %v2458_v60 = vld [vmem:[#allocation16 + $0x810] sm:$0xff]  ;;  %v2459_v35 = vld [vmem:[#allocation16 + $0x818] sm:$0xff] }
 0x417   :  { %7798 = vst [vmem:[#allocation43_spill] sm:$0xff] %v6424_v13  ;;  %v2400_v3 = vadd.f32 %v2392_v40, %v2375_v7  ;;  %v2415_v53 = vmul.f32 %v2407_v9, %v7799_v62  ;;  %v7801_v21 = vld [vmem:[#allocation118_spill] sm:$0xff]  ;;  %v2401_v30 = vadd.f32 %v2393_v22, %v2376_v59  ;;  %v2418_v38 = vmul.f32 %v2410_v25, %v7802_v44  ;;  %v2483_v40 = vld [vmem:[#allocation16 + $0x850] sm:$0xff] }
 0x418   :  { %v2417_v43 = vmul.f32 %v2409_v29, %v7801_v21  ;;  %v2457_v0 = vld [vmem:[#allocation16 + $0x808] sm:$0xff]  ;;  %v2422_v34 = vadd.f32 %v2414_v33, %v2397_v6  ;;  %v2439_v1 = vmul.f32 %v2431_v27, %v7786_v2  ;;  %v2481_v28 = vld [vmem:[#allocation16 + $0x840] sm:$0xff]  ;;  %v2440_v9 = vmul.f32 %v2432_v16, %v7787_v48  ;;  %v2484_v29 = vld [vmem:[#allocation16 + $0x858] sm:$0xff] }
 0x419   :  { %v2482_v37 = vld [vmem:[#allocation16 + $0x848] sm:$0xff]  ;;  %v2423_v19 = vadd.f32 %v2415_v53, %v2398_v11  ;;  %v2464_v56 = vmul.f32 %v2456_v14, %v7764_v42  ;;  %v2506_v51 = vld [vmem:[#allocation16 + $0x880] sm:$0xff]  ;;  %v6443_v63 = vadd.f32 %v2418_v38, %v2401_v30  ;;  %v2465_v25 = vmul.f32 %v2457_v0, %v7765_v58  ;;  %v2508_v6 = vld [vmem:[#allocation16 + $0x890] sm:$0xff] }
 0x41a   :  { %v6439_v7 = vadd.f32 %v2417_v43, %v2400_v3  ;;  %v2447_v59 = vadd.f32 %v2439_v1, %v2422_v34  ;;  %v6447_v27 = vmul.f32 %v2458_v60, %v7793_v12  ;;  %v2507_v22 = vld [vmem:[#allocation16 + $0x888] sm:$0xff]  ;;  %v2509_v11 = vld [vmem:[#allocation16 + $0x898] sm:$0xff]  ;;  %v6450_v3 = vmul.f32 %v2459_v35, %v7794_v41  ;;  %v2531_v53 = vld [vmem:[#allocation16 + $0x8c0] sm:$0xff] }
 0x41b   :  { %7803 = vst [vmem:[#allocation62_spill] sm:$0xff] %v6443_v63  ;;  %v2448_v33 = vadd.f32 %v2440_v9, %v2423_v19  ;;  %v2489_v16 = vmul.f32 %v2481_v28, %v6214_v39  ;;  %v2490_v14 = vmul.f32 %v2482_v37, %v6208_v49  ;;  %v2532_v30 = vld [vmem:[#allocation16 + $0x8c8] sm:$0xff]  ;;  %v2556_v38 = vld [vmem:[#allocation16 + $0x900] sm:$0xff]  ;;  %v6455_v0 = vmul.f32 %v2483_v40, %v6204_v57 }
 0x41c   :  { %v2472_v43 = vadd.f32 %v2464_v56, %v2447_v59  ;;  %v6458_v60 = vmul.f32 %v2484_v29, %v7796_v17  ;;  %v2514_v34 = vmul.f32 %v2506_v51, %v6227_v47  ;;  %v2557_v1 = vld [vmem:[#allocation16 + $0x908] sm:$0xff]  ;;  %v2581_v19 = vld [vmem:[#allocation16 + $0x940] sm:$0xff]  ;;  %v2515_v28 = vmul.f32 %v2507_v22, %v6237_v46 }
 0x41d   :  { %v2582_v35 = vld [vmem:[#allocation16 + $0x948] sm:$0xff]  ;;  %v2473_v9 = vadd.f32 %v2465_v25, %v2448_v33  ;;  %v6463_v37 = vmul.f32 %v2508_v6, %v6233_v4  ;;  %v6466_v39 = vmul.f32 %v2509_v11, %v7772_v55  ;;  %v2606_v56 = vld [vmem:[#allocation16 + $0x980] sm:$0xff]  ;;  %v2539_v29 = vmul.f32 %v2531_v53, %v6118_v24 }
 0x41e   :  { %v2607_v40 = vld [vmem:[#allocation16 + $0x988] sm:$0xff]  ;;  %v2631_v59 = vld [vmem:[#allocation16 + $0x9c0] sm:$0xff]  ;;  %v2497_v42 = vadd.f32 %v2489_v16, %v2472_v43  ;;  %v2540_v51 = vmul.f32 %v2532_v30, %v6157_v45  ;;  %v2564_v47 = vmul.f32 %v2556_v38, %v6122_v26  ;;  %v2565_v6 = vmul.f32 %v2557_v1, %v6167_v36 }
 0x41f   :  { %7804 = vst [vmem:[#allocation63_spill] sm:$0xff] %v6463_v37  ;;  %7805 = vst [vmem:[#allocation85_spill] sm:$0xff] %v6466_v39  ;;  %v2632_v2 = vld [vmem:[#allocation16 + $0x9c8] sm:$0xff]  ;;  %v2656_v25 = vld [vmem:[#allocation16 + $0xa00] sm:$0xff]  ;;  %v2498_v22 = vadd.f32 %v2490_v14, %v2473_v9  ;;  %v2589_v63 = vmul.f32 %v2581_v19, %v7799_v62  ;;  %v2590_v11 = vmul.f32 %v2582_v35, %v7800_v52 }
 0x420   :  { %v2657_v33 = vld [vmem:[#allocation16 + $0xa08] sm:$0xff]  ;;  %v2681_v13 = vld [vmem:[#allocation16 + $0xa40] sm:$0xff]  ;;  %v2522_v16 = vadd.f32 %v2514_v34, %v2497_v42  ;;  %v2614_v53 = vmul.f32 %v2606_v56, %v7787_v48  ;;  %v6476_v30 = vmul.f32 %v2607_v40, %v7788_v50  ;;  %v6479_v38 = vmul.f32 %v2631_v59, %v7765_v58 }
 0x421   :  { %v2682_v37 = vld [vmem:[#allocation16 + $0xa48] sm:$0xff]  ;;  %v2706_v39 = vld [vmem:[#allocation16 + $0xa80] sm:$0xff]  ;;  %v2523_v1 = vadd.f32 %v2515_v28, %v2498_v22  ;;  %v6482_v19 = vmul.f32 %v2632_v2, %v7793_v12  ;;  %v6485_v35 = vmul.f32 %v2656_v25, %v6208_v49  ;;  %v6488_v42 = vmul.f32 %v2657_v33, %v6204_v57 }
 0x422   :  { %v2707_v43 = vld [vmem:[#allocation16 + $0xa88] sm:$0xff]  ;;  %v2731_v14 = vld [vmem:[#allocation16 + $0xac0] sm:$0xff]  ;;  %v2547_v48 = vadd.f32 %v2539_v29, %v2522_v16  ;;  %v6491_v59 = vmul.f32 %v2681_v13, %v6237_v46  ;;  %v6494_v58 = vmul.f32 %v2682_v37, %v6233_v4  ;;  %v6497_v28 = vmul.f32 %v2706_v39, %v6157_v45  ;;  %v2434_v46 = vld [vmem:[#allocation16 + $0x7d8] sm:$0xff] }
 0x423   :  { %v2732_v9 = vld [vmem:[#allocation16 + $0xac8] sm:$0xff]  ;;  %v2756_v34 = vld [vmem:[#allocation16 + $0xb00] sm:$0xff]  ;;  %v2548_v49 = vadd.f32 %v2540_v51, %v2523_v1  ;;  %v6500_v33 = vmul.f32 %v2707_v43, %v6153_v5  ;;  %v6503_v62 = vmul.f32 %v2731_v14, %v6167_v36  ;;  %v2433_v36 = vld [vmem:[#allocation16 + $0x7d0] sm:$0xff] }
 0x424   :  { %v2757_v56 = vld [vmem:[#allocation16 + $0xb08] sm:$0xff]  ;;  %v2781_v40 = vld [vmem:[#allocation16 + $0xb40] sm:$0xff]  ;;  %v6506_v29 = vmul.f32 %v2732_v9, %v6163_v31  ;;  %v2572_v26 = vadd.f32 %v2564_v47, %v2547_v48  ;;  %v6509_v45 = vmul.f32 %v2756_v34, %v7800_v52  ;;  %v2534_v14 = vld [vmem:[#allocation16 + $0x8d8] sm:$0xff] }
 0x425   :  { %v2782_v2 = vld [vmem:[#allocation16 + $0xb48] sm:$0xff]  ;;  %v2806_v22 = vld [vmem:[#allocation16 + $0xb80] sm:$0xff]  ;;  %v6512_v39 = vmul.f32 %v2757_v56, %v7801_v21  ;;  %v6515_v51 = vmul.f32 %v2781_v40, %v7788_v50  ;;  %v2573_v1 = vadd.f32 %v2565_v6, %v2548_v49  ;;  %v2533_v48 = vld [vmem:[#allocation16 + $0x8d0] sm:$0xff] }
 0x426   :  { %v2807_v25 = vld [vmem:[#allocation16 + $0xb88] sm:$0xff]  ;;  %7806 = vst [vmem:[#allocation68_spill] sm:$0xff] %v6506_v29  ;;  %v2831_v13 = vld [vmem:[#allocation16 + $0xbc0] sm:$0xff]  ;;  %v6521_v29 = vmul.f32 %v2806_v22, %v7793_v12  ;;  %v2597_v56 = vadd.f32 %v2589_v63, %v2572_v26  ;;  %v2558_v6 = vld [vmem:[#allocation16 + $0x910] sm:$0xff]  ;;  %v2441_v26 = vmul.f32 %v2433_v36, %v7788_v50 }
 0x427   :  { %v2832_v16 = vld [vmem:[#allocation16 + $0xbc8] sm:$0xff]  ;;  %v2856_v37 = vld [vmem:[#allocation16 + $0xc00] sm:$0xff]  ;;  %7807 = vst [vmem:[#allocation78_spill] sm:$0xff] %v6515_v51  ;;  %v6524_v47 = vmul.f32 %v2807_v25, %v7794_v41  ;;  %v6529_v40 = vmul.f32 %v2831_v13, %v6204_v57  ;;  %v2559_v12 = vld [vmem:[#allocation16 + $0x918] sm:$0xff]  ;;  %v2598_v22 = vadd.f32 %v2590_v11, %v2573_v1  ;;  %v6549_v11 = vmul.f32 %v2534_v14, %v7774_v61 }
 0x428   :  { %v2857_v43 = vld [vmem:[#allocation16 + $0xc08] sm:$0xff]  ;;  %v6532_v51 = vmul.f32 %v2832_v16, %v7796_v17  ;;  %v6535_v49 = vmul.f32 %v2856_v37, %v6233_v4  ;;  %v2583_v57 = vld [vmem:[#allocation16 + $0x950] sm:$0xff]  ;;  %v2584_v63 = vld [vmem:[#allocation16 + $0x958] sm:$0xff]  ;;  %v2622_v13 = vadd.f32 %v2614_v53, %v2597_v56  ;;  %v6546_v16 = vmul.f32 %v2533_v48, %v6153_v5 }
 0x429   :  { %v7808_v9 = vld [vmem:[#allocation39_spill] sm:$0xff]  ;;  %7809 = vst [vmem:[#allocation67_spill] sm:$0xff] %v6524_v47  ;;  %v4207_v52 = vld [vmem:[#allocation21] ss:$8 sps:$4 sm:$0xff]   ;;  %v6538_v25 = vmul.f32 %v2857_v43, %v7772_v55  ;;  %v2399_v47 = vadd.f32 %v6427_v54, %v6420_v10  ;;  %v2609_v43 = vld [vmem:[#allocation16 + $0x998] sm:$0xff]  ;;  %v2623_v10 = vadd.f32 %v6476_v30, %v2598_v22  ;;  %v6554_v54 = vmul.f32 %v2558_v6, %v6163_v31 }
 0x42a   :  { %v6518_v24 = vmul.f32 %v2782_v2, %v7808_v9  ;;  %v6526_v34 = vld [vmem:[#allocation21 + $0x4] ss:$8 sps:$4 sm:$0xff]   ;;  %v4212_v2 = vld [vmem:[#allocation21 + $0x14] ss:$8 sps:$4 sm:$0xff]   ;;  %v2442_v4 = vmul.f32 %v2434_v46, %v7808_v9  ;;  %v4210_v1 = vld [vmem:[#allocation21 + $0x10] ss:$8 sps:$4 sm:$0xff]   ;;  %v6557_v53 = vmul.f32 %v2559_v12, %v7776_v20  ;;  %v2647_v14 = vadd.f32 %v6479_v38, %v2622_v13 }
 0x42b   :  { %7810 = vst [vmem:[#allocation69_spill] sm:$0xff] %v6526_v34  ;;  %3530 = vmatprep.subr.bf16.mxu0 %v6526_v34  ;;  %v2608_v37 = vld [vmem:[#allocation16 + $0x990] sm:$0xff]  ;;  %v2424_v50 = vadd.f32 %v6434_v23, %v2399_v47  ;;  %v2634_v5 = vld [vmem:[#allocation16 + $0x9d8] sm:$0xff]  ;;  %v4215_v36 = vld [vmem:[#allocation21 + $0x24] ss:$8 sps:$4 sm:$0xff]   ;;  %v6565_v30 = vmul.f32 %v2584_v63, %v7802_v44  ;;  %v2648_v47 = vadd.f32 %v6482_v19, %v2623_v10 }
 0x42c   :  { %3531 = vmatpush1.bf16.msra.mxu0 %v4207_v52  ;;  %v2633_v46 = vld [vmem:[#allocation16 + $0x9d0] sm:$0xff]  ;;  %v2450_v48 = vadd.f32 %v2442_v4, %v6439_v7  ;;  %v6562_v52 = vmul.f32 %v2583_v57, %v7801_v21  ;;  %v2659_v31 = vld [vmem:[#allocation16 + $0xa18] sm:$0xff]  ;;  %v6569_v6 = vmul.f32 %v2608_v37, %v7808_v9  ;;  %v6572_v12 = vmul.f32 %v2609_v43, %v7789_v8  ;;  %v4213_v9 = vld [vmem:[#allocation21 + $0x20] ss:$8 sps:$4 sm:$0xff]  }
 0x42d   :  { %3532 = vmatprep.subr.bf16.mxu0 %v4212_v2  ;;  %v2658_v23 = vld [vmem:[#allocation16 + $0xa10] sm:$0xff]  ;;  %v2449_v56 = vadd.f32 %v2441_v26, %v2424_v50  ;;  %v2684_v2 = vld [vmem:[#allocation16 + $0xa58] sm:$0xff]  ;;  %v2672_v7 = vadd.f32 %v6485_v35, %v2647_v14  ;;  %v6577_v22 = vmul.f32 %v2633_v46, %v7794_v41  ;;  %v2673_v13 = vadd.f32 %v6488_v42, %v2648_v47 }
 0x42e   :  { %v2683_v38 = vld [vmem:[#allocation16 + $0xa50] sm:$0xff]  ;;  %v2475_v21 = vadd.f32 %v6450_v3, %v2450_v48  ;;  %v7811_v57 = vld [vmem:[#allocation81_spill] sm:$0xff]  ;;  %v6585_v37 = vmul.f32 %v2658_v23, %v7796_v17  ;;  %v6588_v35 = vmul.f32 %v2659_v31, %v7797_v15  ;;  %v6596_v42 = vmul.f32 %v2684_v2, %v7745_v18 }
 0x42f   :  { %v6580_v63 = vmul.f32 %v2634_v5, %v7811_v57  ;;  %v2708_v19 = vld [vmem:[#allocation16 + $0xa90] sm:$0xff]  ;;  %v2709_v26 = vld [vmem:[#allocation16 + $0xa98] sm:$0xff]  ;;  %v2474_v4 = vadd.f32 %v6447_v27, %v2449_v56  ;;  %v2697_v10 = vadd.f32 %v6491_v59, %v2672_v7  ;;  %v2698_v46 = vadd.f32 %v6494_v58, %v2673_v13  ;;  %v4221_v13 = vld [vmem:[#allocation21 + $0x44] ss:$8 sps:$4 sm:$0xff]  }
 0x430   :  { %3533 = vmatpush1.bf16.msra.mxu0 %v4210_v1  ;;  %v2733_v3 = vld [vmem:[#allocation16 + $0xad0] sm:$0xff]  ;;  %v2734_v41 = vld [vmem:[#allocation16 + $0xad8] sm:$0xff]  ;;  %v2500_v50 = vadd.f32 %v6458_v60, %v2475_v21  ;;  %v6593_v1 = vmul.f32 %v2683_v38, %v7772_v55  ;;  %v6601_v14 = vmul.f32 %v2708_v19, %v7774_v61 }
 0x431   :  { %3534 = vmatprep.subr.bf16.mxu0 %v4215_v36  ;;  %v4218_v43 = vld [vmem:[#allocation21 + $0x34] ss:$8 sps:$4 sm:$0xff]   ;;  %v2499_v5 = vadd.f32 %v6455_v0, %v2474_v4  ;;  %v6604_v36 = vmul.f32 %v2709_v26, %v7747_v32  ;;  %v2722_v55 = vadd.f32 %v6497_v28, %v2697_v10  ;;  %v6609_v31 = vmul.f32 %v2733_v3, %v7776_v20  ;;  %v4216_v61 = vld [vmem:[#allocation21 + $0x30] ss:$8 sps:$4 sm:$0xff]  }
 0x432   :  { %v2758_v27 = vld [vmem:[#allocation16 + $0xb10] sm:$0xff]  ;;  %v2759_v17 = vld [vmem:[#allocation16 + $0xb18] sm:$0xff]  ;;  %v2723_v38 = vadd.f32 %v6500_v33, %v2698_v46 }
 0x433   :  { %v2783_v59 = vld [vmem:[#allocation16 + $0xb50] sm:$0xff]  ;;  %v2784_v60 = vld [vmem:[#allocation16 + $0xb58] sm:$0xff]  ;;  %v6617_v21 = vmul.f32 %v2758_v27, %v7802_v44  ;;  %v2747_v4 = vadd.f32 %v6503_v62, %v2722_v55  ;;  %v2386_v62 = vld [vmem:[#allocation16 + $0x768] sm:$0xff] }
 0x434   :  { %v7812_v48 = vld [vmem:[#allocation85_spill] sm:$0xff]  ;;  %v7813_v47 = vld [vmem:[#allocation79_spill] sm:$0xff]  ;;  %3535 = vmatpush1.bf16.msra.mxu0 %v4213_v9  ;;  %v7815_v28 = vld [vmem:[#allocation80_spill] sm:$0xff]  ;;  %v6625_v9 = vmul.f32 %v2783_v59, %v7789_v8 }
 0x435   :  { %v2525_v23 = vadd.f32 %v7812_v48, %v2500_v50  ;;  %v6612_v56 = vmul.f32 %v2734_v41, %v7813_v47  ;;  %v2808_v58 = vld [vmem:[#allocation16 + $0xb90] sm:$0xff]  ;;  %v2809_v0 = vld [vmem:[#allocation16 + $0xb98] sm:$0xff]  ;;  %v6620_v19 = vmul.f32 %v2759_v17, %v7815_v28  ;;  %3536 = vmatprep.subr.bf16.mxu0 %v4218_v43  ;;  %v7818_v43 = vld [vmem:[#allocation90_spill] sm:$0xff]  ;;  %v2772_v59 = vadd.f32 %v6509_v45, %v2747_v4 }
 0x436   :  { %v7814_v2 = vld [vmem:[#allocation63_spill] sm:$0xff]  ;;  %v2834_v20 = vld [vmem:[#allocation16 + $0xbd8] sm:$0xff]  ;;  %v6633_v46 = vmul.f32 %v2808_v58, %v7811_v57  ;;  %v4219_v58 = vld [vmem:[#allocation21 + $0x40] ss:$8 sps:$4 sm:$0xff]  }
 0x437   :  { %v2524_v7 = vadd.f32 %v7814_v2, %v2499_v5  ;;  %v2833_v26 = vld [vmem:[#allocation16 + $0xbd0] sm:$0xff]  ;;  %v2550_v3 = vadd.f32 %v6549_v11, %v2525_v23  ;;  %v7816_v33 = vld [vmem:[#allocation61_spill] sm:$0xff]  ;;  %v6636_v5 = vmul.f32 %v2809_v0, %v7818_v43  ;;  %v2411_v11 = vld [vmem:[#allocation16 + $0x7a8] sm:$0xff] }
 0x438   :  { %v6628_v41 = vmul.f32 %v2784_v60, %v7816_v33  ;;  %v2858_v10 = vld [vmem:[#allocation16 + $0xc10] sm:$0xff]  ;;  %v2859_v44 = vld [vmem:[#allocation16 + $0xc18] sm:$0xff]  ;;  %v6641_v60 = vmul.f32 %v2833_v26, %v7797_v15  ;;  %3537 = vmatpush1.bf16.msra.mxu0 %v4216_v61  ;;  %v2394_v61 = vmul.f32 %v2386_v62, %v7813_v47  ;;  %v2419_v34 = vmul.f32 %v2411_v11, %v7815_v28 }
 0x439   :  { %v7817_v50 = vld [vmem:[#allocation68_spill] sm:$0xff]  ;;  %v2549_v17 = vadd.f32 %v6546_v16, %v2524_v7  ;;  %v2575_v55 = vadd.f32 %v6557_v53, %v2550_v3  ;;  %v7819_v48 = vld [vmem:[#allocation93_spill] sm:$0xff]  ;;  %v2436_v16 = vld [vmem:[#allocation16 + $0x7e8] sm:$0xff]  ;;  %v6649_v7 = vmul.f32 %v2858_v10, %v7745_v18  ;;  %3538 = vmatprep.subr.bf16.mxu0 %v4221_v13 }
 0x43a   :  { %v2748_v27 = vadd.f32 %v7817_v50, %v2723_v38  ;;  %v6644_v23 = vmul.f32 %v2834_v20, %v7819_v48  ;;  %v2435_v38 = vld [vmem:[#allocation16 + $0x7e0] sm:$0xff]  ;;  %v7821_v45 = vld [vmem:[#allocation100_spill] sm:$0xff] }
 0x43b   :  { %v2574_v0 = vadd.f32 %v6554_v54, %v2549_v17  ;;  %7820 = vst [vmem:[#allocation75_spill] sm:$0xff] %v6649_v7  ;;  %v6652_v4 = vmul.f32 %v2859_v44, %v7821_v45  ;;  %v2460_v53 = vld [vmem:[#allocation16 + $0x820] sm:$0xff]  ;;  %v4224_v26 = vld [vmem:[#allocation21 + $0x54] ss:$8 sps:$4 sm:$0xff]   ;;  %v2600_v50 = vadd.f32 %v6565_v30, %v2575_v55  ;;  %v2444_v44 = vmul.f32 %v2436_v16, %v7816_v33  ;;  %v2486_v55 = vld [vmem:[#allocation16 + $0x868] sm:$0xff] }
 0x43c   :  { %v2773_v2 = vadd.f32 %v6512_v39, %v2748_v27  ;;  %v7822_v3 = vld [vmem:[#allocation78_spill] sm:$0xff]  ;;  %v2443_v27 = vmul.f32 %v2435_v38, %v7789_v8  ;;  %v2468_v62 = vmul.f32 %v2460_v53, %v7811_v57  ;;  %3539 = vmatpush1.bf16.msra.mxu0 %v4219_v58  ;;  %v4222_v11 = vld [vmem:[#allocation21 + $0x50] ss:$8 sps:$4 sm:$0xff]  }
 0x43d   :  { %v2797_v20 = vadd.f32 %v7822_v3, %v2772_v59  ;;  %v2461_v39 = vld [vmem:[#allocation16 + $0x828] sm:$0xff]  ;;  %v2599_v10 = vadd.f32 %v6562_v52, %v2574_v0  ;;  %v2485_v17 = vld [vmem:[#allocation16 + $0x860] sm:$0xff]  ;;  %v2625_v59 = vadd.f32 %v6572_v12, %v2600_v50  ;;  %3540 = vmatprep.subr.bf16.mxu0 %v4224_v26  ;;  %v2494_v50 = vmul.f32 %v2486_v55, %v7819_v48 }
 0x43e   :  { %v2798_v54 = vadd.f32 %v6518_v24, %v2773_v2  ;;  %v7823_v3 = vld [vmem:[#allocation43_spill] sm:$0xff]  ;;  %v7825_v2 = vld [vmem:[#allocation62_spill] sm:$0xff]  ;;  %v2469_v38 = vmul.f32 %v2461_v39, %v7818_v43  ;;  %v2493_v57 = vmul.f32 %v2485_v17, %v7797_v15 }
 0x43f   :  { %v2822_v13 = vadd.f32 %v6521_v29, %v2797_v20  ;;  %v2402_v30 = vadd.f32 %v2394_v61, %v7823_v3  ;;  %v7824_v7 = vld [vmem:[#allocation67_spill] sm:$0xff]  ;;  %v2624_v52 = vadd.f32 %v6569_v6, %v2599_v10  ;;  %v2451_v8 = vadd.f32 %v2443_v27, %v7825_v2  ;;  %v2510_v16 = vld [vmem:[#allocation16 + $0x8a0] sm:$0xff] }
 0x440   :  { %v2823_v24 = vadd.f32 %v7824_v7, %v2798_v54  ;;  %v4227_v29 = vld [vmem:[#allocation21 + $0x64] ss:$8 sps:$4 sm:$0xff]   ;;  %v2650_v0 = vadd.f32 %v6580_v63, %v2625_v59  ;;  %v2518_v63 = vmul.f32 %v2510_v16, %v7745_v18  ;;  %3541 = vmatpush1.bf16.msra.mxu0 %v4222_v11  ;;  %v4225_v15 = vld [vmem:[#allocation21 + $0x60] ss:$8 sps:$4 sm:$0xff]   ;;  %v7827_v16 = vld [vmem:[#allocation88_spill] sm:$0xff] }
 0x441   :  { %v2847_v12 = vadd.f32 %v6529_v40, %v2822_v13  ;;  %v2427_v20 = vadd.f32 %v2419_v34, %v2402_v30  ;;  %v2511_v58 = vld [vmem:[#allocation16 + $0x8a8] sm:$0xff]  ;;  %v2649_v7 = vadd.f32 %v6577_v22, %v2624_v52  ;;  %v2476_v6 = vadd.f32 %v2468_v62, %v2451_v8  ;;  %v2535_v61 = vld [vmem:[#allocation16 + $0x8e0] sm:$0xff]  ;;  %3542 = vmatprep.subr.bf16.mxu0 %v4227_v29 }
 0x442   :  { %v2848_v53 = vadd.f32 %v6532_v51, %v2823_v24  ;;  %v2536_v39 = vld [vmem:[#allocation16 + $0x8e8] sm:$0xff]  ;;  %v2675_v54 = vadd.f32 %v6588_v35, %v2650_v0  ;;  %v2560_v34 = vld [vmem:[#allocation16 + $0x920] sm:$0xff]  ;;  %v2519_v27 = vmul.f32 %v2511_v58, %v7821_v45 }
 0x443   :  { %v2872_v26 = vadd.f32 %v6535_v49, %v2847_v12  ;;  %v2452_v40 = vadd.f32 %v2444_v44, %v2427_v20  ;;  %v2674_v51 = vadd.f32 %v6585_v37, %v2649_v7  ;;  %v2501_v22 = vadd.f32 %v2493_v57, %v2476_v6  ;;  %v2561_v17 = vld [vmem:[#allocation16 + $0x928] sm:$0xff]  ;;  %v2585_v13 = vld [vmem:[#allocation16 + $0x960] sm:$0xff]  ;;  %v4230_v12 = vld [vmem:[#allocation21 + $0x74] ss:$8 sps:$4 sm:$0xff]  }
 0x444   :  { %v2873_v10 = vadd.f32 %v6538_v25, %v2848_v53  ;;  %v4183_v59 = vld [vmem:[#allocation18] ss:$8 sps:$4 sm:$0xff]   ;;  %v2700_v49 = vadd.f32 %v6596_v42, %v2675_v54  ;;  %v2543_v44 = vmul.f32 %v2535_v61, %v7747_v32  ;;  %v7826_v18 = vld [vmem:[#allocation87_spill] sm:$0xff]  ;;  %v2568_v24 = vmul.f32 %v2560_v34, %v7813_v47  ;;  %3543 = vmatpush1.bf16.msra.mxu0 %v4225_v15 }
 0x445   :  { %v2477_v35 = vadd.f32 %v2469_v38, %v2452_v40  ;;  %v2544_v3 = vmul.f32 %v2536_v39, %v7826_v18  ;;  %v2586_v30 = vld [vmem:[#allocation16 + $0x968] sm:$0xff]  ;;  %v2610_v62 = vld [vmem:[#allocation16 + $0x9a0] sm:$0xff]  ;;  %v4188_v25 = vld [vmem:[#allocation18 + $0x14] ss:$8 sps:$4 sm:$0xff]   ;;  %v2699_v37 = vadd.f32 %v6593_v1, %v2674_v51  ;;  %v2526_v11 = vadd.f32 %v2518_v63, %v2501_v22  ;;  %3544 = vmatprep.subr.bf16.mxu0 %v4230_v12 }
 0x446   :  { %v2880_v55 = vpack.c.bf16 %v2873_v10, %v2872_v26  ;;  %v2611_v52 = vld [vmem:[#allocation16 + $0x9a8] sm:$0xff]  ;;  %v2725_v2 = vadd.f32 %v6604_v36, %v2700_v49  ;;  %v2569_v42 = vmul.f32 %v2561_v17, %v7827_v16  ;;  %v2593_v38 = vmul.f32 %v2585_v13, %v7815_v28  ;;  %v2635_v32 = vld [vmem:[#allocation16 + $0x9e0] sm:$0xff]  ;;  %v4228_v36 = vld [vmem:[#allocation21 + $0x70] ss:$8 sps:$4 sm:$0xff]  }
 0x447   :  { %v2502_v8 = vadd.f32 %v2494_v50, %v2477_v35  ;;  %v2636_v29 = vld [vmem:[#allocation16 + $0x9e8] sm:$0xff]  ;;  %v2724_v0 = vadd.f32 %v6601_v14, %v2699_v37  ;;  %v2551_v20 = vadd.f32 %v2543_v44, %v2526_v11  ;;  %v7828_v1 = vld [vmem:[#allocation89_spill] sm:$0xff]  ;;  %v2618_v47 = vmul.f32 %v2610_v62, %v7816_v33  ;;  %v4186_v50 = vld [vmem:[#allocation18 + $0x10] ss:$8 sps:$4 sm:$0xff]  }
 0x448   :  { %3013 = vmatmul.mubr.bf16.vlgmr.msra.gmra.mrb[0].mxu1 %v2880_v55  ;;  %v2594_v57 = vmul.f32 %v2586_v30, %v7828_v1  ;;  %v2660_v58 = vld [vmem:[#allocation16 + $0xa20] sm:$0xff]  ;;  %v2661_v53 = vld [vmem:[#allocation16 + $0xa28] sm:$0xff]  ;;  %v7830_v28 = vmov 0   ;;  %v2750_v61 = vadd.f32 %v6612_v56, %v2725_v2  ;;  %v7831_v26 = vld [vmem:[#allocation84_spill] sm:$0xff]  ;;  %v2643_v15 = vmul.f32 %v2635_v32, %v7818_v43  ;;  %3545 = vmatpush1.bf16.msra.mxu0 %v4228_v36 }
 0x449   :  { %v7829_v7 = vld [vmem:[#allocation83_spill] sm:$0xff]  ;;  %3134 = vmatpush1.bf16.msra.mxu1 %v4183_v59  ;;  %3022 = vmatprep.mubr.bf16.mxu1 %v7830_v28  ;;  %v2527_v39 = vadd.f32 %v2519_v27, %v2502_v8  ;;  %v6697_v54 = vmul.f32 %v2611_v52, %v7831_v26  ;;  %v2685_v14 = vld [vmem:[#allocation16 + $0xa60] sm:$0xff]  ;;  %v2749_v33 = vadd.f32 %v6609_v31, %v2724_v0  ;;  %v7836_v36 = vld [vmem:[#allocation96_spill] sm:$0xff] }
 0x44a   :  { %v2686_v40 = vld [vmem:[#allocation16 + $0xa68] sm:$0xff]  ;;  %3135 = vmatprep.subr.bf16.mxu1 %v4188_v25  ;;  %v2576_v34 = vadd.f32 %v2568_v24, %v2551_v20  ;;  %v2710_v22 = vld [vmem:[#allocation16 + $0xaa0] sm:$0xff]  ;;  %v2775_v56 = vadd.f32 %v6620_v19, %v2750_v61  ;;  %v2668_v13 = vmul.f32 %v2660_v58, %v7819_v48  ;;  %v2693_v25 = vmul.f32 %v2685_v14, %v7821_v45  ;;  %v4194_v20 = vld [vmem:[#allocation18 + $0x34] ss:$8 sps:$4 sm:$0xff]  }
 0x44b   :  { %v4191_v63 = vld [vmem:[#allocation18 + $0x24] ss:$8 sps:$4 sm:$0xff]   ;;  %v2552_v27 = vadd.f32 %v2544_v3, %v2527_v39  ;;  %v2774_v62 = vadd.f32 %v6617_v21, %v2749_v33  ;;  %v4231_v24 = vld [vmem:[#allocation21 + $0x80] ss:$8 sps:$4 sm:$0xff]   ;;  %v6716_v32 = vmul.f32 %v2710_v22, %v7826_v18 }
 0x44c   :  { %v7832_v10 = vld [vmem:[#allocation98_spill] sm:$0xff]  ;;  %v7833_v59 = vld [vmem:[#allocation99_spill] sm:$0xff]  ;;  %v2601_v55 = vadd.f32 %v2593_v38, %v2576_v34  ;;  %v7834_v37 = vld [vmem:[#allocation101_spill] sm:$0xff]  ;;  %v2800_v2 = vadd.f32 %v6628_v41, %v2775_v56 }
 0x44d   :  { %v6702_v51 = vmul.f32 %v2636_v29, %v7832_v10  ;;  %v2711_v17 = vld [vmem:[#allocation16 + $0xaa8] sm:$0xff]  ;;  %v6707_v49 = vmul.f32 %v2661_v53, %v7833_v59  ;;  %v2735_v35 = vld [vmem:[#allocation16 + $0xae0] sm:$0xff]  ;;  %v6712_v11 = vmul.f32 %v2686_v40, %v7834_v37  ;;  %3136 = vmatpush1.bf16.msra.mxu1 %v4186_v50  ;;  %v2577_v8 = vadd.f32 %v2569_v42, %v2552_v27  ;;  %v7839_v56 = vld [vmem:[#allocation92_spill] sm:$0xff] }
 0x44e   :  { %v2736_v44 = vld [vmem:[#allocation16 + $0xae8] sm:$0xff]  ;;  %v2785_v30 = vld [vmem:[#allocation16 + $0xb60] sm:$0xff]  ;;  %3137 = vmatprep.subr.bf16.mxu1 %v4191_v63  ;;  %v2799_v0 = vadd.f32 %v6625_v9, %v2774_v62  ;;  %v2626_v58 = vadd.f32 %v2618_v47, %v2601_v55  ;;  %v6723_v53 = vmul.f32 %v2735_v35, %v7827_v16  ;;  %v2825_v61 = vadd.f32 %v6636_v5, %v2800_v2  ;;  %v6735_v47 = vld [vmem:[#allocation21 + $0x94] ss:$8 sps:$4 sm:$0xff]  }
 0x44f   :  { %v4233_v31 = vld [vmem:[#allocation21 + $0x84] ss:$8 sps:$4 sm:$0xff]   ;;  %v4189_v52 = vld [vmem:[#allocation18 + $0x20] ss:$8 sps:$4 sm:$0xff]   ;;  %v6726_v50 = vmul.f32 %v2736_v44, %v7836_v36  ;;  %v2602_v39 = vadd.f32 %v2594_v57, %v2577_v8  ;;  %7838 = vst [vmem:[#allocation65_spill] sm:$0xff] %v6735_v47  ;;  %v2238_v27 = vld [vmem:[#allocation16 + $0x5f8] sm:$0xff] }
 0x450   :  { %v2760_v19 = vld [vmem:[#allocation16 + $0xb20] sm:$0xff]  ;;  %v2761_v3 = vld [vmem:[#allocation16 + $0xb28] sm:$0xff]  ;;  %3546 = vmatprep.subr.bf16.mxu0 %v4233_v31  ;;  %v2824_v34 = vadd.f32 %v6633_v46, %v2799_v0  ;;  %v2651_v22 = vadd.f32 %v2643_v15, %v2626_v58  ;;  %v6744_v35 = vld [vmem:[#allocation21 + $0x90] ss:$8 sps:$4 sm:$0xff]   ;;  %v2850_v44 = vadd.f32 %v6644_v23, %v2825_v61 }
 0x451   :  { %v7835_v29 = vld [vmem:[#allocation95_spill] sm:$0xff]  ;;  %v2810_v12 = vld [vmem:[#allocation16 + $0xba0] sm:$0xff]  ;;  %v6730_v14 = vmul.f32 %v2760_v19, %v7828_v1  ;;  %3547 = vmatpush1.bf16.msra.mxu0 %v4231_v24  ;;  %7840 = vst [vmem:[#allocation76_spill] sm:$0xff] %v6744_v35  ;;  %3138 = vmatpush1.bf16.msra.mxu1 %v4189_v52  ;;  %v2627_v62 = vadd.f32 %v6697_v54, %v2602_v39  ;;  %v2263_v55 = vld [vmem:[#allocation16 + $0x638] sm:$0xff] }
 0x452   :  { %v6719_v21 = vmul.f32 %v2711_v17, %v7835_v29  ;;  %v2786_v38 = vld [vmem:[#allocation16 + $0xb68] sm:$0xff]  ;;  %v2835_v42 = vld [vmem:[#allocation16 + $0xbe0] sm:$0xff]  ;;  %v6739_v17 = vmul.f32 %v2785_v30, %v7831_v26  ;;  %v4192_v31 = vld [vmem:[#allocation18 + $0x30] ss:$8 sps:$4 sm:$0xff]   ;;  %v6749_v46 = vmul.f32 %v2810_v12, %v7832_v10  ;;  %3139 = vmatprep.subr.bf16.mxu1 %v4194_v20  ;;  %v2676_v2 = vadd.f32 %v2668_v13, %v2651_v22 }
 0x453   :  { %v2811_v41 = vld [vmem:[#allocation16 + $0xba8] sm:$0xff]  ;;  %v7837_v40 = vld [vmem:[#allocation97_spill] sm:$0xff]  ;;  %v6742_v5 = vmul.f32 %v2786_v38, %v7839_v56  ;;  %v2287_v19 = vld [vmem:[#allocation16 + $0x670] sm:$0xff]  ;;  %v6756_v8 = vmul.f32 %v2835_v42, %v7833_v59  ;;  %v2875_v12 = vadd.f32 %v6652_v4, %v2850_v44  ;;  %v2652_v0 = vadd.f32 %v6702_v51, %v2627_v62  ;;  %3548 = vmatprep.subr.bf16.mxu0 %v6735_v47 }
 0x454   :  { %v6733_v63 = vmul.f32 %v2761_v3, %v7837_v40  ;;  %v2836_v9 = vld [vmem:[#allocation16 + $0xbe8] sm:$0xff]  ;;  %v2860_v33 = vld [vmem:[#allocation16 + $0xc20] sm:$0xff]  ;;  %v2849_v3 = vadd.f32 %v6641_v60, %v2824_v34  ;;  %v2288_v54 = vld [vmem:[#allocation16 + $0x678] sm:$0xff]  ;;  %v2701_v39 = vadd.f32 %v2693_v25, %v2676_v2  ;;  %v2271_v4 = vmul.f32 %v2263_v55, %v7831_v26 }
 0x455   :  { %v2861_v57 = vld [vmem:[#allocation16 + $0xc28] sm:$0xff]  ;;  %v7841_v15 = vld [vmem:[#allocation109_spill] sm:$0xff]  ;;  %v2312_v38 = vld [vmem:[#allocation16 + $0x6b0] sm:$0xff]  ;;  %v6764_v58 = vmul.f32 %v2860_v33, %v7834_v37  ;;  %3549 = vmatpush1.bf16.msra.mxu0 %v6744_v35  ;;  %3140 = vmatpush1.bf16.msra.mxu1 %v4192_v31  ;;  %v2677_v22 = vadd.f32 %v6707_v49, %v2652_v0  ;;  %v2296_v44 = vmul.f32 %v2288_v54, %v7832_v10 }
 0x456   :  { %v6752_v30 = vmul.f32 %v2811_v41, %v7841_v15  ;;  %v4197_v24 = vld [vmem:[#allocation18 + $0x44] ss:$8 sps:$4 sm:$0xff]   ;;  %v2313_v20 = vld [vmem:[#allocation16 + $0x6b8] sm:$0xff]  ;;  %v2337_v34 = vld [vmem:[#allocation16 + $0x6f0] sm:$0xff]  ;;  %v2320_v62 = vmul.f32 %v2312_v38, %v7819_v48 }
 0x457   :  { %v7842_v23 = vld [vmem:[#allocation110_spill] sm:$0xff]  ;;  %v7843_v41 = vld [vmem:[#allocation111_spill] sm:$0xff]  ;;  %v2338_v51 = vld [vmem:[#allocation16 + $0x6f8] sm:$0xff]  ;;  %3141 = vmatprep.subr.bf16.mxu1 %v4197_v24  ;;  %v2321_v31 = vmul.f32 %v2313_v20, %v7833_v59  ;;  %v2702_v49 = vadd.f32 %v6712_v11, %v2677_v22 }
 0x458   :  { %v6759_v52 = vmul.f32 %v2836_v9, %v7842_v23  ;;  %v6767_v60 = vmul.f32 %v2861_v57, %v7843_v41  ;;  %v6770_v13 = vld [vmem:[#allocation21 + $0xa4] ss:$8 sps:$4 sm:$0xff]   ;;  %v2246_v9 = vmul.f32 %v2238_v27, %v7828_v1  ;;  %v4195_v33 = vld [vmem:[#allocation18 + $0x40] ss:$8 sps:$4 sm:$0xff]   ;;  %v2295_v57 = vmul.f32 %v2287_v19, %v7818_v43  ;;  %v2363_v25 = vld [vmem:[#allocation16 + $0x738] sm:$0xff] }
 0x459   :  { %7844 = vst [vmem:[#allocation77_spill] sm:$0xff] %v6770_v13  ;;  %v7845_v42 = vld [vmem:[#allocation75_spill] sm:$0xff]  ;;  %v2726_v27 = vadd.f32 %v6716_v32, %v2701_v39  ;;  %v7847_v0 = vld [vmem:[#allocation64_spill] sm:$0xff]  ;;  %v2345_v19 = vmul.f32 %v2337_v34, %v7821_v45  ;;  %v2346_v48 = vmul.f32 %v2338_v51, %v7834_v37  ;;  %v6787_v38 = vld [vmem:[#allocation21 + $0xa0] ss:$8 sps:$4 sm:$0xff]   ;;  %3550 = vmatprep.subr.bf16.mxu0 %v6770_v13 }
 0x45a   :  { %v2874_v61 = vadd.f32 %v7845_v42, %v2849_v3  ;;  %v2362_v3 = vld [vmem:[#allocation16 + $0x730] sm:$0xff]  ;;  %v2303_v43 = vadd.f32 %v2295_v57, %v7847_v0  ;;  %v2388_v54 = vld [vmem:[#allocation16 + $0x778] sm:$0xff]  ;;  %7848 = vst [vmem:[#allocation57_spill] sm:$0xff] %v6787_v38  ;;  %v2371_v20 = vmul.f32 %v2363_v25, %v7835_v29  ;;  %v2727_v45 = vadd.f32 %v6719_v21, %v2702_v49  ;;  %v4203_v57 = vld [vmem:[#allocation18 + $0x64] ss:$8 sps:$4 sm:$0xff]  }
 0x45b   :  { %v4200_v55 = vld [vmem:[#allocation18 + $0x54] ss:$8 sps:$4 sm:$0xff]   ;;  %v2751_v32 = vadd.f32 %v6723_v53, %v2726_v27  ;;  %3142 = vmatpush1.bf16.msra.mxu1 %v4195_v33  ;;  %v2396_v25 = vmul.f32 %v2388_v54, %v7836_v36  ;;  %3551 = vmatpush1.bf16.msra.mxu0 %v6787_v38  ;;  %v1496_v38 = vld [vmem:[#allocation15 + $0x1c8] sm:$0xff] }
 0x45c   :  { %v2881_v2 = vpack.c.bf16 %v2875_v12, %v2874_v61  ;;  %v7846_v42 = vld [vmem:[#allocation60_spill] sm:$0xff]  ;;  %v2370_v12 = vmul.f32 %v2362_v3, %v7826_v18  ;;  %v2328_v34 = vadd.f32 %v2320_v62, %v2303_v43  ;;  %3143 = vmatprep.subr.bf16.mxu1 %v4200_v55  ;;  %v2752_v33 = vadd.f32 %v6726_v50, %v2727_v45 }
 0x45d   :  { %v2254_v6 = vadd.f32 %v2246_v9, %v7846_v42  ;;  %v2387_v35 = vld [vmem:[#allocation16 + $0x770] sm:$0xff]  ;;  %v2413_v61 = vld [vmem:[#allocation16 + $0x7b8] sm:$0xff]  ;;  %v2776_v18 = vadd.f32 %v6730_v14, %v2751_v32  ;;  %v7851_v42 = vld [vmem:[#allocation102_spill] sm:$0xff] }
 0x45e   :  { %3023 = vmatmul.mubr.bf16.gmra.mrb[4].mxu1 %v2881_v2  ;;  %v2412_v11 = vld [vmem:[#allocation16 + $0x7b0] sm:$0xff]  ;;  %v2395_v51 = vmul.f32 %v2387_v35, %v7827_v16  ;;  %v2438_v53 = vld [vmem:[#allocation16 + $0x7f8] sm:$0xff]  ;;  %v1297_v21 = vrot.slane %v7851_v42, 7  ;;  %v2353_v62 = vadd.f32 %v2345_v19, %v2328_v34  ;;  %v6805_v35 = vmul.f32 %v2413_v61, %v7837_v40  ;;  %v4201_v32 = vld [vmem:[#allocation18 + $0x60] ss:$8 sps:$4 sm:$0xff]  }
 0x45f   :  { %v2279_v24 = vadd.f32 %v2271_v4, %v2254_v6  ;;  %v6793_v39 = vld [vmem:[#allocation21 + $0xb4] ss:$8 sps:$4 sm:$0xff]   ;;  %3032 = vmatprep.mubr.bf16.mxu1 %v7830_v28  ;;  %v4198_v9 = vld [vmem:[#allocation18 + $0x50] ss:$8 sps:$4 sm:$0xff]   ;;  %v2420_v16 = vmul.f32 %v2412_v11, %v7828_v1  ;;  %v6813_v54 = vmul.f32 %v2438_v53, %v7839_v56  ;;  %v2777_v1 = vadd.f32 %v6733_v63, %v2752_v33 }
 0x460   :  { %7849 = vst [vmem:[#allocation42_spill] sm:$0xff] %v6793_v39  ;;  %v2437_v22 = vld [vmem:[#allocation16 + $0x7f0] sm:$0xff]  ;;  %v2463_v27 = vld [vmem:[#allocation16 + $0x838] sm:$0xff]  ;;  %3552 = vmatprep.subr.bf16.mxu0 %v6793_v39  ;;  %3144 = vmatpush1.bf16.msra.mxu1 %v4198_v9 }
 0x461   :  { %v7850_v6 = vld [vmem:[#allocation91_spill] sm:$0xff]  ;;  %v2304_v3 = vadd.f32 %v2296_v44, %v2279_v24  ;;  %v2488_v0 = vld [vmem:[#allocation16 + $0x878] sm:$0xff]  ;;  %v2801_v44 = vadd.f32 %v6739_v17, %v2776_v18  ;;  %v2445_v43 = vmul.f32 %v2437_v22, %v7831_v26  ;;  %v2378_v24 = vadd.f32 %v2370_v12, %v2353_v62  ;;  %3145 = vmatprep.subr.bf16.mxu1 %v4203_v57 }
 0x462   :  { %v1296_v4 = vrot.slane %v7850_v6, 7  ;;  %v2462_v2 = vld [vmem:[#allocation16 + $0x830] sm:$0xff]  ;;  %v2513_v19 = vld [vmem:[#allocation16 + $0x8b8] sm:$0xff]  ;;  %v6819_v61 = vmul.f32 %v2463_v27, %v7841_v15  ;;  %v6826_v22 = vmul.f32 %v2488_v0, %v7842_v23 }
 0x463   :  { %v2487_v49 = vld [vmem:[#allocation16 + $0x870] sm:$0xff]  ;;  %v2329_v55 = vadd.f32 %v2321_v31, %v2304_v3  ;;  %v2470_v11 = vmul.f32 %v2462_v2, %v7832_v10  ;;  %v2538_v31 = vld [vmem:[#allocation16 + $0x8f8] sm:$0xff]  ;;  %v2826_v26 = vadd.f32 %v6749_v46, %v2801_v44  ;;  %v2802_v10 = vadd.f32 %v6742_v5, %v2777_v1 }
 0x464   :  { %v6808_v14 = vld [vmem:[#allocation21 + $0xb0] ss:$8 sps:$4 sm:$0xff]   ;;  %v6823_v34 = vmul.f32 %v2487_v49, %v7833_v59  ;;  %v4206_v12 = vld [vmem:[#allocation18 + $0x74] ss:$8 sps:$4 sm:$0xff]   ;;  %v2403_v53 = vadd.f32 %v2395_v51, %v2378_v24  ;;  %v6833_v3 = vmul.f32 %v2513_v19, %v7843_v41  ;;  %3146 = vmatpush1.bf16.msra.mxu1 %v4201_v32  ;;  %v7855_v24 = vld [vmem:[#allocation106_spill] sm:$0xff] }
 0x465   :  { %7852 = vst [vmem:[#allocation58_spill] sm:$0xff] %v6808_v14  ;;  %v2512_v50 = vld [vmem:[#allocation16 + $0x8b0] sm:$0xff]  ;;  %v2354_v45 = vadd.f32 %v2346_v48, %v2329_v55  ;;  %v2563_v9 = vld [vmem:[#allocation16 + $0x938] sm:$0xff]  ;;  %3553 = vmatpush1.bf16.msra.mxu0 %v6808_v14  ;;  %v2851_v59 = vadd.f32 %v6756_v8, %v2826_v26  ;;  %v2827_v62 = vadd.f32 %v6752_v30, %v2802_v10  ;;  %v1471_v14 = vld [vmem:[#allocation15 + $0x188] sm:$0xff] }
 0x466   :  { %v2537_v17 = vld [vmem:[#allocation16 + $0x8f0] sm:$0xff]  ;;  %v6830_v18 = vmul.f32 %v2512_v50, %v7834_v37  ;;  %v2588_v48 = vld [vmem:[#allocation16 + $0x978] sm:$0xff]  ;;  %v2428_v49 = vadd.f32 %v2420_v16, %v2403_v53  ;;  %3147 = vmatprep.subr.bf16.mxu1 %v4206_v12 }
 0x467   :  { %v2562_v63 = vld [vmem:[#allocation16 + $0x930] sm:$0xff]  ;;  %v2379_v57 = vadd.f32 %v2371_v20, %v2354_v45  ;;  %v6838_v2 = vmul.f32 %v2537_v17, %v7835_v29  ;;  %v2613_v51 = vld [vmem:[#allocation16 + $0x9b8] sm:$0xff]  ;;  %v2876_v50 = vadd.f32 %v6764_v58, %v2851_v59  ;;  %v6855_v17 = vmul.f32 %v2588_v48, %v7855_v24 }
 0x468   :  { %v2587_v46 = vld [vmem:[#allocation16 + $0x970] sm:$0xff]  ;;  %v6845_v0 = vmul.f32 %v2562_v63, %v7836_v36  ;;  %v7854_v44 = vld [vmem:[#allocation105_spill] sm:$0xff]  ;;  %v2852_v36 = vadd.f32 %v6759_v52, %v2827_v62 }
 0x469   :  { %v7853_v27 = vld [vmem:[#allocation104_spill] sm:$0xff]  ;;  %v6848_v55 = vmul.f32 %v2563_v9, %v7854_v44  ;;  %v2404_v19 = vadd.f32 %v2396_v25, %v2379_v57  ;;  %v6852_v1 = vmul.f32 %v2587_v46, %v7837_v40  ;;  %v7856_v32 = vld [vmem:[#allocation103_spill] sm:$0xff]  ;;  %v7857_v10 = vld [vmem:[#allocation117_spill] sm:$0xff] }
 0x46a   :  { %v6841_v33 = vmul.f32 %v2538_v31, %v7853_v27  ;;  %v2612_v5 = vld [vmem:[#allocation16 + $0x9b0] sm:$0xff]  ;;  %v2638_v8 = vld [vmem:[#allocation16 + $0x9f8] sm:$0xff]  ;;  %v2453_v31 = vadd.f32 %v2445_v43, %v2428_v49  ;;  %v6862_v45 = vmul.f32 %v2613_v51, %v7856_v32  ;;  %v2877_v12 = vadd.f32 %v6767_v60, %v2852_v36 }
 0x46b   :  { %v2637_v37 = vld [vmem:[#allocation16 + $0x9f0] sm:$0xff]  ;;  %v2663_v30 = vld [vmem:[#allocation16 + $0xa38] sm:$0xff]  ;;  %v6859_v26 = vmul.f32 %v2612_v5, %v7839_v56  ;;  %v2429_v40 = vadd.f32 %v6805_v35, %v2404_v19  ;;  %v6869_v53 = vmul.f32 %v2638_v8, %v7857_v10 }
 0x46c   :  { %v2662_v20 = vld [vmem:[#allocation16 + $0xa30] sm:$0xff]  ;;  %v2688_v58 = vld [vmem:[#allocation16 + $0xa78] sm:$0xff]  ;;  %v6866_v9 = vmul.f32 %v2637_v37, %v7841_v15  ;;  %v2478_v46 = vadd.f32 %v2470_v11, %v2453_v31  ;;  %v2882_v19 = vpack.c.bf16 %v2877_v12, %v2876_v50 }
 0x46d   :  { %v4204_v29 = vld [vmem:[#allocation18 + $0x70] ss:$8 sps:$4 sm:$0xff]   ;;  %v6872_v52 = vmul.f32 %v2662_v20, %v7842_v23  ;;  %v2454_v51 = vadd.f32 %v6813_v54, %v2429_v40  ;;  %v7862_v54 = vld [vmem:[#allocation113_spill] sm:$0xff] }
 0x46e   :  { %v2687_v16 = vld [vmem:[#allocation16 + $0xa70] sm:$0xff]  ;;  %v2713_v63 = vld [vmem:[#allocation16 + $0xab8] sm:$0xff]  ;;  %3148 = vmatpush1.bf16.msra.mxu1 %v4204_v29 }
 0x46f   :  { %v2712_v25 = vld [vmem:[#allocation16 + $0xab0] sm:$0xff]  ;;  %v2738_v56 = vld [vmem:[#allocation16 + $0xaf8] sm:$0xff]  ;;  %v6879_v57 = vmul.f32 %v2687_v16, %v7843_v41  ;;  %3033 = vmatmul.mubr.bf16.gmra.mrb[8].mxu1 %v2882_v19 }
 0x470   :  { %v2737_v43 = vld [vmem:[#allocation16 + $0xaf0] sm:$0xff]  ;;  %v2763_v15 = vld [vmem:[#allocation16 + $0xb38] sm:$0xff]  ;;  %v6886_v62 = vmul.f32 %v2712_v25, %v7853_v27  ;;  %v6897_v16 = vmul.f32 %v2738_v56, %v7862_v54  ;;  %3042 = vmatprep.mubr.bf16.mxu1 %v7830_v28  ;;  %v1353_v54 = vrot.slane %v7850_v6, 1 }
 0x471   :  { %v7858_v48 = vld [vmem:[#allocation123_spill] sm:$0xff]  ;;  %v7859_v37 = vld [vmem:[#allocation124_spill] sm:$0xff]  ;;  %v7861_v41 = vld [vmem:[#allocation69_spill] sm:$0xff]  ;;  %v6894_v29 = vmul.f32 %v2737_v43, %v7854_v44 }
 0x472   :  { %v6876_v59 = vmul.f32 %v2663_v30, %v7858_v48  ;;  %v2762_v35 = vld [vmem:[#allocation16 + $0xb30] sm:$0xff]  ;;  %v6883_v23 = vmul.f32 %v2688_v58, %v7859_v37  ;;  %v2788_v49 = vld [vmem:[#allocation16 + $0xb78] sm:$0xff]  ;;  %4029 = vmatprep.subr.bf16.mxu1 %v7861_v41  ;;  %v2503_v30 = vadd.f32 %v6823_v34, %v2478_v46  ;;  %v2479_v58 = vadd.f32 %v6819_v61, %v2454_v51  ;;  %v7871_v41 = vld [vmem:[#allocation34_spill] sm:$0xff] }
 0x473   :  { %v2787_v5 = vld [vmem:[#allocation16 + $0xb70] sm:$0xff]  ;;  %v2813_v20 = vld [vmem:[#allocation16 + $0xbb8] sm:$0xff]  ;;  %v6901_v25 = vmul.f32 %v2762_v35, %v7855_v24  ;;  %v1312_v24 = vld [vmem:[#allocation15] sm:$0xff] }
 0x474   :  { %v7860_v60 = vld [vmem:[#allocation112_spill] sm:$0xff]  ;;  %v6907_v50 = vmul.f32 %v2787_v5, %v7856_v32  ;;  %v2528_v34 = vadd.f32 %v6830_v18, %v2503_v30  ;;  %v7865_v12 = vld [vmem:[#allocation121_spill] sm:$0xff]  ;;  %v2504_v46 = vadd.f32 %v6826_v22, %v2479_v58  ;;  %v7866_v35 = vld [vmem:[#allocation122_spill] sm:$0xff] }
 0x475   :  { %v6889_v11 = vmul.f32 %v2713_v63, %v7860_v60  ;;  %v2812_v8 = vld [vmem:[#allocation16 + $0xbb0] sm:$0xff]  ;;  %v2838_v27 = vld [vmem:[#allocation16 + $0xbf8] sm:$0xff]  ;;  %v7863_v63 = vld [vmem:[#allocation114_spill] sm:$0xff]  ;;  %v6917_v61 = vmul.f32 %v2813_v20, %v7865_v12 }
 0x476   :  { %v2837_v36 = vld [vmem:[#allocation16 + $0xbf0] sm:$0xff]  ;;  %v6904_v40 = vmul.f32 %v2763_v15, %v7863_v63  ;;  %v6914_v56 = vmul.f32 %v2812_v8, %v7857_v10  ;;  %v6925_v15 = vmul.f32 %v2838_v27, %v7866_v35  ;;  %v1313_v5 = vld [vmem:[#allocation15 + $0x8] sm:$0xff]  ;;  %v2553_v10 = vadd.f32 %v6838_v2, %v2528_v34 }
 0x477   :  { %v2862_v31 = vld [vmem:[#allocation16 + $0xc30] sm:$0xff]  ;;  %v6922_v32 = vmul.f32 %v2837_v36, %v7858_v48  ;;  %v7869_v8 = vld [vmem:[#allocation70_spill] sm:$0xff]  ;;  %v6946_v48 = vsel %vm577_vm0, %v1296_v4, %v1297_v21  ;;  %v2529_v2 = vadd.f32 %v6833_v3, %v2504_v46 }
 0x478   :  { %v7864_v44 = vld [vmem:[#allocation108_spill] sm:$0xff]  ;;  %v6928_v18 = vmul.f32 %v2862_v31, %v7859_v37  ;;  %v7867_v51 = vld [vmem:[#allocation107_spill] sm:$0xff]  ;;  %v7870_v20 = vrot.slane %v7869_v8, 7  ;;  %v2578_v36 = vadd.f32 %v6845_v0, %v2553_v10  ;;  %v1354_v31 = vrot.slane %v7851_v42, 1  ;;  %v7874_v63 = vld [vmem:[#allocation86_spill] sm:$0xff] }
 0x479   :  { %v6911_v43 = vmul.f32 %v2788_v49, %v7864_v44  ;;  %v7491_v60 = vrot.slane %v7867_v51, 7  ;;  %v7868_v49 = vrot.slane %v7829_v7, 7  ;;  %v2554_v58 = vadd.f32 %v6841_v33, %v2529_v2  ;;  %v7875_v0 = vld [vmem:[#allocation115_spill] sm:$0xff]  ;;  %v1395_v46 = vld [vmem:[#allocation15 + $0xc0] sm:$0xff] }
 0x47a   :  { %v1355_v44 = vrot.slane %v7867_v51, 1  ;;  %v7493_v12 = vrot.slane %v7875_v0, 1  ;;  %v1396_v35 = vld [vmem:[#allocation15 + $0xc8] sm:$0xff]  ;;  %v2603_v10 = vadd.f32 %v6852_v1, %v2578_v36  ;;  %v1420_v2 = vld [vmem:[#allocation15 + $0x100] sm:$0xff] }
 0x47b   :  { %v6938_v22 = vsel %vm577_vm0, %v7870_v20, %v7868_v49  ;;  %v7872_v37 = vmov %v7868_v49  ;;  %v6966_v3 = vsel %vm577_vm0, %v1297_v21, %v7491_v60  ;;  %v7876_v21 = vld [vmem:[#allocation94_spill] sm:$0xff]  ;;  %v7877_v20 = vrot.slane %v7829_v7, 1 }
 0x47c   :  { %v6955_v19 = vsel %vm577_vm0, %v7872_v37, %v1296_v4  ;;  %v1320_v30 = vmul.f32 %v1312_v24, %v6938_v22  ;;  %v1370_v4 = vld [vmem:[#allocation15 + $0x80] sm:$0xff]  ;;  %v1371_v24 = vld [vmem:[#allocation15 + $0x88] sm:$0xff]  ;;  %v6991_v1 = vsel %vm691_vm1, %v1355_v44, %v7493_v12  ;;  %v6995_v36 = vsel %vm691_vm1, %v1354_v31, %v1355_v44 }
 0x47d   :  { %7873 = vst [vmem:[#allocation116_spill] sm:$0xff] %v6955_v19  ;;  %v1321_v27 = vmul.f32 %v1313_v5, %v6955_v19  ;;  %v6978_v5 = vsel %vm691_vm1, %v1353_v54, %v1354_v31  ;;  %v6984_v33 = vsel %vm691_vm1, %v7877_v20, %v1353_v54  ;;  %v1421_v37 = vld [vmem:[#allocation15 + $0x108] sm:$0xff]  ;;  %v2628_v54 = vadd.f32 %v6859_v26, %v2603_v10  ;;  %v1470_v60 = vld [vmem:[#allocation15 + $0x180] sm:$0xff] }
 0x47e   :  { %v1345_v34 = vadd.f32 %v7874_v63, %v1320_v30  ;;  %v2579_v30 = vadd.f32 %v6848_v55, %v2554_v58  ;;  %v1445_v63 = vld [vmem:[#allocation15 + $0x140] sm:$0xff]  ;;  %v1379_v20 = vmul.f32 %v1371_v24, %v6978_v5  ;;  %v1403_v55 = vmul.f32 %v1395_v46, %v6955_v19 }
 0x47f   :  { %v1346_v49 = vadd.f32 %v7876_v21, %v1321_v27  ;;  %v1378_v27 = vmul.f32 %v1370_v4, %v6984_v33  ;;  %v1446_v21 = vld [vmem:[#allocation15 + $0x148] sm:$0xff]  ;;  %v1404_v58 = vmul.f32 %v1396_v35, %v6946_v48  ;;  %v1428_v31 = vmul.f32 %v1420_v2, %v7850_v6  ;;  %v1495_v4 = vld [vmem:[#allocation15 + $0x1c0] sm:$0xff] }
 0x480   :  { %v2604_v12 = vadd.f32 %v6855_v17, %v2579_v30  ;;  %v1429_v44 = vmul.f32 %v1421_v37, %v7851_v42  ;;  %v2653_v13 = vadd.f32 %v6866_v9, %v2628_v54  ;;  %v1453_v24 = vmul.f32 %v1445_v63, %v6978_v5  ;;  %v1520_v10 = vld [vmem:[#allocation15 + $0x200] sm:$0xff]  ;;  %v1521_v35 = vld [vmem:[#allocation15 + $0x208] sm:$0xff] }
 0x481   :  { %v1386_v39 = vadd.f32 %v1378_v27, %v1345_v34  ;;  %v1387_v26 = vadd.f32 %v1379_v20, %v1346_v49  ;;  %v1454_v46 = vmul.f32 %v1446_v21, %v6995_v36  ;;  %v1478_v17 = vmul.f32 %v1470_v60, %v6946_v48  ;;  %v1314_v49 = vld [vmem:[#allocation15 + $0x10] sm:$0xff]  ;;  %v1315_v27 = vld [vmem:[#allocation15 + $0x18] sm:$0xff]  ;;  %v1317_v20 = vld [vmem:[#allocation15 + $0x28] sm:$0xff] }
 0x482   :  { %v2629_v47 = vadd.f32 %v6862_v45, %v2604_v12  ;;  %v1479_v34 = vmul.f32 %v1471_v14, %v6966_v3  ;;  %v2678_v2 = vadd.f32 %v6872_v52, %v2653_v13  ;;  %v1503_v30 = vmul.f32 %v1495_v4, %v7851_v42  ;;  %v7878_v13 = vld [vmem:[#allocation46_spill] sm:$0xff] }
 0x483   :  { %v1411_v19 = vadd.f32 %v1403_v55, %v1386_v39  ;;  %v1412_v37 = vadd.f32 %v1404_v58, %v1387_v26  ;;  %v1504_v9 = vmul.f32 %v1496_v38, %v7867_v51  ;;  %v1528_v54 = vmul.f32 %v1520_v10, %v6995_v36  ;;  %v1316_v12 = vld [vmem:[#allocation15 + $0x20] sm:$0xff]  ;;  %v1334_v26 = vld [vmem:[#allocation15 + $0x68] sm:$0xff] }
 0x484   :  { %v2654_v63 = vadd.f32 %v6869_v53, %v2629_v47  ;;  %v1529_v39 = vmul.f32 %v1521_v35, %v6991_v1  ;;  %v2703_v45 = vadd.f32 %v6879_v57, %v2678_v2  ;;  %v1299_v14 = vrot.slane %v7875_v0, 7  ;;  %v1331_v53 = vld [vmem:[#allocation15 + $0x50] sm:$0xff] }
 0x485   :  { %v1436_v21 = vadd.f32 %v1428_v31, %v1411_v19  ;;  %v1437_v60 = vadd.f32 %v1429_v44, %v1412_v37  ;;  %v1300_v52 = vrot.slane %v7878_v13, 7  ;;  %v1322_v58 = vmul.f32 %v1314_v49, %v6946_v48  ;;  %v1332_v19 = vld [vmem:[#allocation15 + $0x58] sm:$0xff]  ;;  %v1333_v48 = vld [vmem:[#allocation15 + $0x60] sm:$0xff] }
 0x486   :  { %v2679_v38 = vadd.f32 %v6876_v59, %v2654_v63  ;;  %v1323_v47 = vmul.f32 %v1315_v27, %v6966_v3  ;;  %v2728_v31 = vadd.f32 %v6886_v62, %v2703_v45  ;;  %v7879_v44 = vrot.slane %v7867_v51, 7 }
 0x487   :  { %v1461_v55 = vadd.f32 %v1453_v24, %v1436_v21  ;;  %v1462_v4 = vadd.f32 %v1454_v46, %v1437_v60  ;;  %v7028_v57 = vsel %vm577_vm0, %v1299_v14, %v1300_v52  ;;  %v1339_v37 = vmul.f32 %v1331_v53, %v7851_v42 }
 0x488   :  { %v7034_v59 = vsel %vm577_vm0, %v7879_v44, %v1299_v14  ;;  %v2704_v24 = vadd.f32 %v6883_v23, %v2679_v38  ;;  %v1325_v46 = vmul.f32 %v1317_v20, %v7028_v57  ;;  %v2753_v35 = vadd.f32 %v6894_v29, %v2728_v31  ;;  %v1373_v20 = vld [vmem:[#allocation15 + $0x98] sm:$0xff]  ;;  %v1397_v29 = vld [vmem:[#allocation15 + $0xd0] sm:$0xff] }
 0x489   :  { %v1486_v10 = vadd.f32 %v1478_v17, %v1461_v55  ;;  %v1324_v62 = vmul.f32 %v1316_v12, %v7034_v59  ;;  %v1487_v2 = vadd.f32 %v1479_v34, %v1462_v4  ;;  %v1340_v49 = vmul.f32 %v1332_v19, %v7867_v51  ;;  %v1372_v12 = vld [vmem:[#allocation15 + $0x90] sm:$0xff]  ;;  %v7880_v19 = vld [vmem:[#allocation41_spill] sm:$0xff] }
 0x48a   :  { %v2729_v27 = vadd.f32 %v6889_v11, %v2704_v24  ;;  %v1341_v21 = vmul.f32 %v1333_v48, %v7875_v0  ;;  %v1342_v45 = vmul.f32 %v1334_v26, %v7878_v13  ;;  %v2778_v23 = vadd.f32 %v6901_v25, %v2753_v35  ;;  %v2863_v31 = vld [vmem:[#allocation16 + $0xc38] sm:$0xff] }
 0x48b   :  { %v1511_v63 = vadd.f32 %v1503_v30, %v1486_v10  ;;  %v1512_v17 = vadd.f32 %v1504_v9, %v1487_v2  ;;  %v1347_v60 = vadd.f32 %v1339_v37, %v1322_v58  ;;  %v1348_v14 = vadd.f32 %v1340_v49, %v1323_v47  ;;  %v1374_v9 = vld [vmem:[#allocation15 + $0xa0] sm:$0xff]  ;;  %v1375_v58 = vld [vmem:[#allocation15 + $0xa8] sm:$0xff] }
 0x48c   :  { %v2754_v34 = vadd.f32 %v6897_v16, %v2729_v27  ;;  %v1349_v38 = vadd.f32 %v1341_v21, %v1324_v62  ;;  %v1350_v55 = vadd.f32 %v1342_v45, %v1325_v46  ;;  %v2803_v11 = vadd.f32 %v6907_v50, %v2778_v23  ;;  %v1399_v10 = vld [vmem:[#allocation15 + $0xe0] sm:$0xff]  ;;  %v1422_v62 = vld [vmem:[#allocation15 + $0x110] sm:$0xff]  ;;  %v1423_v46 = vld [vmem:[#allocation15 + $0x118] sm:$0xff] }
 0x48d   :  { %v7047_v42 = vadd.f32 %v1528_v54, %v1511_v63  ;;  %v7050_v30 = vadd.f32 %v1529_v39, %v1512_v17  ;;  %v1357_v53 = vrot.slane %v7878_v13, 1  ;;  %v1358_v25 = vrot.slane %v7880_v19, 1  ;;  %v1398_v54 = vld [vmem:[#allocation15 + $0xd8] sm:$0xff]  ;;  %v1447_v63 = vld [vmem:[#allocation15 + $0x150] sm:$0xff] }
 0x48e   :  { %v2779_v47 = vadd.f32 %v6904_v40, %v2754_v34  ;;  %v1380_v4 = vmul.f32 %v1372_v12, %v6995_v36  ;;  %v1381_v16 = vmul.f32 %v1373_v20, %v6991_v1  ;;  %v1405_v44 = vmul.f32 %v1397_v29, %v6966_v3  ;;  %v7882_v2 = vld [vmem:[#allocation125_spill] sm:$0xff]  ;;  %v1497_v34 = vld [vmem:[#allocation15 + $0x1d0] sm:$0xff] }
 0x48f   :  { %v2828_v50 = vadd.f32 %v6914_v56, %v2803_v11  ;;  %v1544_v39 = vpack.c.bf16 %v7050_v30, %v7047_v42  ;;  %v7065_v48 = vsel %vm691_vm1, %v1357_v53, %v1358_v25  ;;  %v7881_v40 = vrot.slane %v7875_v0, 1  ;;  %v1448_v21 = vld [vmem:[#allocation15 + $0x158] sm:$0xff]  ;;  %v1476_v42 = vld [vmem:[#allocation15 + $0x1b0] sm:$0xff] }
 0x490   :  { %v2804_v26 = vadd.f32 %v6911_v43, %v2779_v47  ;;  %v1383_v3 = vmul.f32 %v1375_v58, %v7065_v48  ;;  %v1388_v56 = vadd.f32 %v1380_v4, %v1347_v60  ;;  %v2871_v37 = vmul.f32 %v2863_v31, %v7882_v2  ;;  %v1472_v60 = vld [vmem:[#allocation15 + $0x190] sm:$0xff]  ;;  %v1473_v12 = vld [vmem:[#allocation15 + $0x198] sm:$0xff] }
 0x491   :  { %v1364_v36 = vsel %vm691_vm1, %v7881_v40, %v1357_v53  ;;  %v2853_v35 = vadd.f32 %v6922_v32, %v2828_v50  ;;  %v1389_v49 = vadd.f32 %v1381_v16, %v1348_v14  ;;  %v1406_v27 = vmul.f32 %v1398_v54, %v7034_v59  ;;  %v1498_v11 = vld [vmem:[#allocation15 + $0x1d8] sm:$0xff]  ;;  %v1522_v53 = vld [vmem:[#allocation15 + $0x210] sm:$0xff] }
 0x492   :  { %v1382_v24 = vmul.f32 %v1374_v9, %v1364_v36  ;;  %v2829_v45 = vadd.f32 %v6917_v61, %v2804_v26  ;;  %v7079_v43 = vadd.f32 %v1383_v3, %v1350_v55  ;;  %v1413_v17 = vadd.f32 %v1405_v44, %v1388_v56  ;;  %v1523_v58 = vld [vmem:[#allocation15 + $0x218] sm:$0xff]  ;;  %v1318_v3 = vld [vmem:[#allocation15 + $0x30] sm:$0xff] }
 0x493   :  { %v1407_v20 = vmul.f32 %v1399_v10, %v7028_v57  ;;  %v1414_v29 = vadd.f32 %v1406_v27, %v1389_v49  ;;  %v1430_v32 = vmul.f32 %v1422_v62, %v7867_v51  ;;  %v1431_v14 = vmul.f32 %v1423_v46, %v7875_v0  ;;  %v1335_v51 = vld [vmem:[#allocation15 + $0x70] sm:$0xff]  ;;  %v1336_v54 = vld [vmem:[#allocation15 + $0x78] sm:$0xff]  ;;  %v1400_v27 = vld [vmem:[#allocation15 + $0xe8] sm:$0xff] }
 0x494   :  { %v7077_v23 = vadd.f32 %v1382_v24, %v1349_v38  ;;  %v2854_v9 = vadd.f32 %v6925_v15, %v2829_v45  ;;  %v2878_v61 = vadd.f32 %v6928_v18, %v2853_v35  ;;  %v1455_v38 = vmul.f32 %v1447_v63, %v6991_v1  ;;  %v1319_v56 = vld [vmem:[#allocation15 + $0x38] sm:$0xff]  ;;  %v1376_v46 = vld [vmem:[#allocation15 + $0xb0] sm:$0xff] }
 0x495   :  { %v1456_v55 = vmul.f32 %v1448_v21, %v1364_v36  ;;  %v1438_v47 = vadd.f32 %v1430_v32, %v1413_v17  ;;  %v1439_v31 = vadd.f32 %v1431_v14, %v1414_v29  ;;  %v1480_v4 = vmul.f32 %v1472_v60, %v7034_v59 }
 0x496   :  { %v1481_v16 = vmul.f32 %v1473_v12, %v7028_v57  ;;  %v2879_v44 = vadd.f32 %v2871_v37, %v2854_v9  ;;  %v1505_v50 = vmul.f32 %v1497_v34, %v7875_v0  ;;  %v1506_v40 = vmul.f32 %v1498_v11, %v7878_v13  ;;  %v1377_v0 = vld [vmem:[#allocation15 + $0xb8] sm:$0xff]  ;;  %v1424_v12 = vld [vmem:[#allocation15 + $0x120] sm:$0xff]  ;;  %v1425_v34 = vld [vmem:[#allocation15 + $0x128] sm:$0xff] }
 0x497   :  { %v1530_v15 = vmul.f32 %v1522_v53, %v1364_v36  ;;  %v1463_v26 = vadd.f32 %v1455_v38, %v1438_v47  ;;  %v1464_v18 = vadd.f32 %v1456_v55, %v1439_v31  ;;  %v1531_v1 = vmul.f32 %v1523_v58, %v7065_v48  ;;  %v1449_v11 = vld [vmem:[#allocation15 + $0x160] sm:$0xff]  ;;  %v1401_v58 = vld [vmem:[#allocation15 + $0xf0] sm:$0xff]  ;;  %v1450_v31 = vld [vmem:[#allocation15 + $0x168] sm:$0xff] }
 0x498   :  { %v1301_v24 = vrot.slane %v7880_v19, 7  ;;  %v2883_v10 = vpack.c.bf16 %v2879_v44, %v2878_v61  ;;  %v1343_v59 = vmul.f32 %v1335_v51, %v7880_v19  ;;  %v1344_v57 = vmul.f32 %v1336_v54, %v7869_v8  ;;  %v1474_v44 = vld [vmem:[#allocation15 + $0x1a0] sm:$0xff] }
 0x499   :  { %v1359_v62 = vrot.slane %v7869_v8, 1  ;;  %v1488_v35 = vadd.f32 %v1480_v4, %v1463_v26  ;;  %v1489_v2 = vadd.f32 %v1481_v16, %v1464_v18  ;;  %v7883_v36 = vrot.slane %v7869_v8, 7  ;;  %v1402_v18 = vld [vmem:[#allocation15 + $0xf8] sm:$0xff] }
 0x49a   :  { %v1306_v49 = vsel %vm577_vm0, %v1300_v52, %v1301_v24  ;;  %3043 = vmatmul.mubr.bf16.gmra.mrb[12].mxu1 %v2883_v10  ;;  %v7884_v45 = vrot.slane %v7829_v7, 1  ;;  %v1432_v47 = vmul.f32 %v1424_v12, %v7878_v13  ;;  %v1433_v54 = vmul.f32 %v1425_v34, %v7880_v19  ;;  %v1451_v13 = vld [vmem:[#allocation15 + $0x170] sm:$0xff]  ;;  %v1477_v12 = vld [vmem:[#allocation15 + $0x1b8] sm:$0xff] }
 0x49b   :  { %v1305_v37 = vsel %vm577_vm0, %v1301_v24, %v7883_v36  ;;  %v1326_v63 = vmul.f32 %v1318_v3, %v1306_v49  ;;  %v1362_v60 = vsel %vm691_vm1, %v1358_v25, %v1359_v62  ;;  %3165 = vmatprep.mubr.bf16.mxu1 %v7830_v28  ;;  %v1513_v29 = vadd.f32 %v1505_v50, %v1488_v35  ;;  %v1475_v50 = vld [vmem:[#allocation15 + $0x1a8] sm:$0xff]  ;;  %v1499_v3 = vld [vmem:[#allocation15 + $0x1e0] sm:$0xff]  ;;  %v1452_v36 = vld [vmem:[#allocation15 + $0x178] sm:$0xff] }
 0x49c   :  { %v1327_v21 = vmul.f32 %v1319_v56, %v1305_v37  ;;  %v7108_v17 = vsel %vm691_vm1, %v1359_v62, %v7884_v45  ;;  %v1514_v52 = vadd.f32 %v1506_v40, %v1489_v2  ;;  %v1384_v32 = vmul.f32 %v1376_v46, %v1362_v60  ;;  %v1500_v56 = vld [vmem:[#allocation15 + $0x1e8] sm:$0xff]  ;;  %v1524_v62 = vld [vmem:[#allocation15 + $0x220] sm:$0xff] }
 0x49d   :  { %v1385_v14 = vmul.f32 %v1377_v0, %v7108_v17  ;;  %v1351_v53 = vadd.f32 %v1343_v59, %v1326_v63  ;;  %v1408_v61 = vmul.f32 %v1400_v27, %v1306_v49  ;;  %v7116_v38 = vadd.f32 %v1530_v15, %v1513_v29  ;;  %v1525_v46 = vld [vmem:[#allocation15 + $0x228] sm:$0xff] }
 0x49e   :  { %v1352_v9 = vadd.f32 %v1344_v57, %v1327_v21  ;;  %v7118_v55 = vadd.f32 %v1531_v1, %v1514_v52  ;;  %v1415_v25 = vadd.f32 %v1407_v20, %v7077_v23  ;;  %v1457_v40 = vmul.f32 %v1449_v11, %v7065_v48  ;;  %v1426_v1 = vld [vmem:[#allocation15 + $0x130] sm:$0xff]  ;;  %v1427_v57 = vld [vmem:[#allocation15 + $0x138] sm:$0xff]  ;;  %v4337_v29 = vld [vmem:[#allocation21] ss:$8 sps:$4 sm:$0xff]  }
 0x49f   :  { %v1392_v4 = vadd.f32 %v1384_v32, %v1351_v53  ;;  %v1416_v51 = vadd.f32 %v1408_v61, %v7079_v43  ;;  %v1409_v23 = vmul.f32 %v1401_v58, %v1305_v37  ;;  %v1458_v24 = vmul.f32 %v1450_v31, %v1362_v60  ;;  %v1501_v11 = vld [vmem:[#allocation15 + $0x1f0] sm:$0xff] }
 0x4a0   :  { %v1393_v16 = vadd.f32 %v1385_v14, %v1352_v9  ;;  %v1545_v15 = vpack.c.bf16 %v7118_v55, %v7116_v38  ;;  %v1440_v26 = vadd.f32 %v1432_v47, %v1415_v25  ;;  %v1482_v43 = vmul.f32 %v1474_v44, %v1306_v49  ;;  %v4338_v53 = vld [vmem:[#allocation21 + $0x14] ss:$8 sps:$4 sm:$0xff]   ;;  %v4340_v44 = vld [vmem:[#allocation21 + $0x24] ss:$8 sps:$4 sm:$0xff]  }
 0x4a1   :  { %v1441_v20 = vadd.f32 %v1433_v54, %v1416_v51  ;;  %v1483_v59 = vmul.f32 %v1475_v50, %v1305_v37  ;;  %v1410_v0 = vmul.f32 %v1402_v18, %v6938_v22  ;;  %v1417_v35 = vadd.f32 %v1409_v23, %v1392_v4  ;;  %v1502_v38 = vld [vmem:[#allocation15 + $0x1f8] sm:$0xff]  ;;  %v1526_v47 = vld [vmem:[#allocation15 + $0x230] sm:$0xff] }
 0x4a2   :  { %v1465_v10 = vadd.f32 %v1457_v40, %v1440_v26  ;;  %3166 = vmatmul.mubr.bf16.vlgmr.msra.gmra.mrb[0].mxu1 %v1544_v39  ;;  %v1434_v2 = vmul.f32 %v1426_v1, %v7869_v8  ;;  %v1459_v27 = vmul.f32 %v1451_v13, %v7108_v17  ;;  %v1507_v37 = vmul.f32 %v1499_v3, %v7880_v19  ;;  %v7885_v58 = vld [vmem:[#allocation116_spill] sm:$0xff] }
 0x4a3   :  { %v1466_v48 = vadd.f32 %v1458_v24, %v1441_v20  ;;  %3175 = vmatprep.mubr.bf16.mxu1 %v7830_v28  ;;  %v1508_v63 = vmul.f32 %v1500_v56, %v7869_v8  ;;  %v1418_v39 = vadd.f32 %v1410_v0, %v1393_v16  ;;  %v1435_v21 = vmul.f32 %v1427_v57, %v7829_v7  ;;  %v4339_v16 = vld [vmem:[#allocation21 + $0x10] ss:$8 sps:$4 sm:$0xff]   ;;  %v4342_v20 = vld [vmem:[#allocation21 + $0x34] ss:$8 sps:$4 sm:$0xff]   ;;  %v4352_v57 = vld [vmem:[#allocation21 + $0x84] ss:$8 sps:$4 sm:$0xff]  }
 0x4a4   :  { %v1490_v49 = vadd.f32 %v1482_v43, %v1465_v10  ;;  %v1442_v45 = vadd.f32 %v1434_v2, %v1417_v35  ;;  %4045 = vmatpush1.bf16.msra.mxu1 %v4337_v29  ;;  %v1532_v32 = vmul.f32 %v1524_v62, %v1362_v60  ;;  %v1533_v14 = vmul.f32 %v1525_v46, %v7108_v17  ;;  %v1527_v54 = vld [vmem:[#allocation15 + $0x238] sm:$0xff]  ;;  %v4349_v10 = vld [vmem:[#allocation21 + $0x60] ss:$8 sps:$4 sm:$0xff]  }
 0x4a5   :  { %v1491_v30 = vadd.f32 %v1483_v59, %v1466_v48  ;;  %v1460_v34 = vmul.f32 %v1452_v36, %v6984_v33  ;;  %4030 = vmatprep.subr.bf16.mxu1 %v4338_v53  ;;  %v1443_v8 = vadd.f32 %v1435_v21, %v1418_v39  ;;  %v1484_v61 = vmul.f32 %v1476_v42, %v6938_v22  ;;  %v4343_v24 = vld [vmem:[#allocation21 + $0x30] ss:$8 sps:$4 sm:$0xff]   ;;  %v4346_v3 = vld [vmem:[#allocation21 + $0x54] ss:$8 sps:$4 sm:$0xff]   ;;  %v4353_v48 = vld [vmem:[#allocation21 + $0x80] ss:$8 sps:$4 sm:$0xff]  }
 0x4a6   :  { %v1515_v52 = vadd.f32 %v1507_v37, %v1490_v49  ;;  %v1467_v9 = vadd.f32 %v1459_v27, %v1442_v45  ;;  %v1485_v25 = vmul.f32 %v1477_v12, %v7885_v58  ;;  %v1509_v17 = vmul.f32 %v1501_v11, %v7829_v7  ;;  %v4341_v7 = vld [vmem:[#allocation21 + $0x20] ss:$8 sps:$4 sm:$0xff]   ;;  %v4347_v56 = vld [vmem:[#allocation21 + $0x50] ss:$8 sps:$4 sm:$0xff]   ;;  %v4350_v43 = vld [vmem:[#allocation21 + $0x74] ss:$8 sps:$4 sm:$0xff]  }
 0x4a7   :  { %v1516_v19 = vadd.f32 %v1508_v63, %v1491_v30  ;;  %v1468_v4 = vadd.f32 %v1460_v34, %v1443_v8  ;;  %v1510_v51 = vmul.f32 %v1502_v38, %v7850_v6  ;;  %v1534_v26 = vmul.f32 %v1526_v47, %v6984_v33  ;;  %v4345_v33 = vld [vmem:[#allocation21 + $0x40] ss:$8 sps:$4 sm:$0xff]   ;;  %v4351_v59 = vld [vmem:[#allocation21 + $0x70] ss:$8 sps:$4 sm:$0xff]   ;;  %v4245_v27 = vld [vmem:[#allocation21 + $0xc4] ss:$8 sps:$4 sm:$0xff]  }
 0x4a8   :  { %v1540_v55 = vadd.f32 %v1532_v32, %v1515_v52  ;;  %v1492_v60 = vadd.f32 %v1484_v61, %v1467_v9  ;;  %4046 = vmatpush1.bf16.msra.mxu1 %v4339_v16  ;;  %v1535_v1 = vmul.f32 %v1527_v54, %v6978_v5  ;;  %v4348_v5 = vld [vmem:[#allocation21 + $0x64] ss:$8 sps:$4 sm:$0xff]   ;;  %v7887_v62 = vld [vmem:[#allocation76_spill] sm:$0xff]  ;;  %v4243_v36 = vld [vmem:[#allocation21 + $0xc0] ss:$8 sps:$4 sm:$0xff]   ;;  %3554 = vmatprep.subr.bf16.mxu0 %v4245_v27 }
 0x4a9   :  { %v1541_v31 = vadd.f32 %v1533_v14, %v1516_v19  ;;  %4031 = vmatprep.subr.bf16.mxu1 %v4340_v44  ;;  %v1493_v22 = vadd.f32 %v1485_v25, %v1468_v4  ;;  %v7888_v46 = vld [vmem:[#allocation77_spill] sm:$0xff]  ;;  %v7890_v35 = vld [vmem:[#allocation42_spill] sm:$0xff]  ;;  %3555 = vmatpush1.bf16.msra.mxu0 %v4243_v36  ;;  %v4246_v37 = vld [vmem:[#allocation21 + $0xd0] ss:$8 sps:$4 sm:$0xff]  }
 0x4aa   :  { %3176 = vmatmul.mubr.bf16.gmra.mrb[4].mxu1 %v1545_v15  ;;  %v1517_v40 = vadd.f32 %v1509_v17, %v1492_v60  ;;  %v4344_v15 = vld [vmem:[#allocation21 + $0x44] ss:$8 sps:$4 sm:$0xff]   ;;  %v4248_v49 = vld [vmem:[#allocation21 + $0xd4] ss:$8 sps:$4 sm:$0xff]   ;;  %v4249_v63 = vld [vmem:[#allocation21 + $0xe0] ss:$8 sps:$4 sm:$0xff]  }
 0x4ab   :  { %v1546_v50 = vpack.c.bf16 %v1541_v31, %v1540_v55  ;;  %3185 = vmatprep.mubr.bf16.mxu1 %v7830_v28  ;;  %v1518_v18 = vadd.f32 %v1510_v51, %v1493_v22  ;;  %v7889_v0 = vld [vmem:[#allocation57_spill] sm:$0xff]  ;;  %v7891_v2 = vld [vmem:[#allocation58_spill] sm:$0xff]  ;;  %3556 = vmatprep.subr.bf16.mxu0 %v4248_v49  ;;  %v4252_v39 = vld [vmem:[#allocation21 + $0xf0] ss:$8 sps:$4 sm:$0xff]  }
 0x4ac   :  { %v1542_v23 = vadd.f32 %v1534_v26, %v1517_v40  ;;  %4047 = vmatpush1.bf16.msra.mxu1 %v4341_v7  ;;  %v4251_v42 = vld [vmem:[#allocation21 + $0xe4] ss:$8 sps:$4 sm:$0xff]   ;;  %v4254_v30 = vld [vmem:[#allocation21 + $0xf4] ss:$8 sps:$4 sm:$0xff]  }
 0x4ad   :  { %4032 = vmatprep.subr.bf16.mxu1 %v4342_v20  ;;  %v1543_v6 = vadd.f32 %v1535_v1, %v1518_v18  ;;  %3557 = vmatpush1.bf16.msra.mxu0 %v4246_v37  ;;  %v7892_v7 = vld [vmem:[#allocation51_spill] sm:$0xff] }
 0x4ae   :  { %3558 = vmatprep.subr.bf16.mxu0 %v4251_v42 }
 0x4af   :  { %v1547_v13 = vpack.c.bf16 %v1543_v6, %v1542_v23 }
 0x4b0   :  { %4048 = vmatpush1.bf16.msra.mxu1 %v4343_v24  ;;  %v7893_v24 = vld [vmem:[#allocation53_spill] sm:$0xff] }
 0x4b1   :  { %4033 = vmatprep.subr.bf16.mxu1 %v4344_v15  ;;  %3559 = vmatpush1.bf16.msra.mxu0 %v4249_v63 }
 0x4b2   :  { %3186 = vmatmul.mubr.bf16.gmra.mrb[8].mxu1 %v1546_v50  ;;  %3560 = vmatprep.subr.bf16.mxu0 %v4254_v30 }
 0x4b3   :  { %3195 = vmatprep.mubr.bf16.mxu1 %v7830_v28  ;;  %v7886_v28 = vld [vmem:[#allocation65_spill] sm:$0xff] }
 0x4b4   :  { %4049 = vmatpush1.bf16.msra.mxu1 %v4345_v33  ;;  %v7894_v33 = vld [vmem:[#allocation37_spill] sm:$0xff] }
 0x4b5   :  { %4034 = vmatprep.subr.bf16.mxu1 %v4346_v3  ;;  %3561 = vmatpush1.bf16.msra.mxu0 %v4252_v39 }
 0x4b8   :  { %4050 = vmatpush1.bf16.msra.mxu1 %v4347_v56 }
 0x4b9   :  { %4035 = vmatprep.subr.bf16.mxu1 %v4348_v5 }
 0x4ba   :  { %3196 = vmatmul.mubr.bf16.gmra.mrb[12].mxu1 %v1547_v13 }
 0x4bc   :  { %4051 = vmatpush1.bf16.msra.mxu1 %v4349_v10  ;;  %v7895_v10 = vld [vmem:[#allocation50_spill] sm:$0xff] }
 0x4bd   :  { %4036 = vmatprep.subr.bf16.mxu1 %v4350_v43 }
 0x4c0   :  { %4052 = vmatpush1.bf16.msra.mxu1 %v4351_v59 }
 0x4c1   :  { %4037 = vmatprep.subr.bf16.mxu1 %v4352_v57 }
 0x4c4   :  { %4053 = vmatpush1.bf16.msra.mxu1 %v4353_v48 }
 0x4c5   :  { %4038 = vmatprep.subr.bf16.mxu1 %v7886_v28 }
 0x4c8   :  { %4054 = vmatpush1.bf16.msra.mxu1 %v7887_v62 }
 0x4c9   :  { %4039 = vmatprep.subr.bf16.mxu1 %v7888_v46 }
 0x4cc   :  { %4055 = vmatpush1.bf16.msra.mxu1 %v7889_v0 }
 0x4cd   :  { %4040 = vmatprep.subr.bf16.mxu1 %v7890_v35 }
 0x4d0   :  { %4056 = vmatpush1.bf16.msra.mxu1 %v7891_v2 }
 0x4d1   :  { %4041 = vmatprep.subr.bf16.mxu1 %v4245_v27 }
 0x4d4   :  { %4057 = vmatpush1.bf16.msra.mxu1 %v4243_v36 }
 0x4d5   :  { %4042 = vmatprep.subr.bf16.mxu1 %v4248_v49 }
 0x4d8   :  { %4058 = vmatpush1.bf16.msra.mxu1 %v4246_v37 }
 0x4d9   :  { %4043 = vmatprep.subr.bf16.mxu1 %v4251_v42 }
 0x4dc   :  { %4059 = vmatpush1.bf16.msra.mxu1 %v4249_v63 }
 0x4dd   :  { %4044 = vmatprep.subr.bf16.mxu1 %v4254_v30 }
 0x4e0   :  { %4060 = vmatpush1.bf16.msra.mxu1 %v4252_v39 }
 0x575   :  { %v3167_v21 = vpop.f32.mrb[0].mxu1 }
 0x576   :  { %v3206_v45 = vadd.f32 3.0, %v3167_v21  ;;  %v3169_v12 = vpop.f32.mrb[1].mxu1 }
 0x577   :  { %v3207_v29 = vadd.f32 3.0, %v3169_v12  ;;  %v3171_v52 = vpop.f32.mrb[2].mxu1 }
 0x578   :  { %v3222_v32 = vmax.f32 %v3206_v45, 0.0  ;;  %v3208_v14 = vadd.f32 3.0, %v3171_v52  ;;  %v3173_v34 = vpop.f32.mrb[3].mxu1 }
 0x579   :  { %v3223_v11 = vmax.f32 %v3207_v29, 0.0  ;;  %v3209_v53 = vadd.f32 3.0, %v3173_v34 }
 0x57a   :  { %v3238_v19 = vmin.f32 %v3222_v32, 6.0  ;;  %v3224_v8 = vmax.f32 %v3208_v14, 0.0  ;;  %v7896_v32 = vld [vmem:[#allocation48_spill] sm:$0xff] }
 0x57b   :  { %v3239_v9 = vmin.f32 %v3223_v11, 6.0  ;;  %v3225_v61 = vmax.f32 %v3209_v53, 0.0  ;;  %v7897_v53 = vld [vmem:[#allocation55_spill] sm:$0xff] }
 0x57c   :  { %v3254_v38 = vmul.f32 %v3238_v19, %v3167_v21  ;;  %v3240_v55 = vmin.f32 %v3224_v8, 6.0  ;;  %v7898_v8 = vld [vmem:[#allocation66_spill] sm:$0xff] }
 0x57d   :  { %v3255_v58 = vmul.f32 %v3239_v9, %v3169_v12  ;;  %v3241_v25 = vmin.f32 %v3225_v61, 6.0  ;;  %v3177_v47 = vpop.f32.mrb[4].mxu1 }
 0x57e   :  { %v3256_v31 = vmul.f32 %v3240_v55, %v3171_v52  ;;  %v3210_v4 = vadd.f32 3.0, %v3177_v47  ;;  %v3179_v60 = vpop.f32.mrb[5].mxu1  ;;  %v3270_v17 = vmul.f32 0.16666667, %v3254_v38  ;;  %v7899_v55 = vld [vmem:[#allocation40_spill] sm:$0xff] }
 0x57f   :  { %v3271_v16 = vmul.f32 0.16666667, %v3255_v58  ;;  %v3257_v51 = vmul.f32 %v3241_v25, %v3173_v34  ;;  %v3211_v54 = vadd.f32 3.0, %v3179_v60  ;;  %v3181_v44 = vpop.f32.mrb[6].mxu1 }
 0x580   :  { %v3272_v50 = vmul.f32 0.16666667, %v3256_v31  ;;  %v3226_v22 = vmax.f32 %v3210_v4, 0.0  ;;  %v3212_v40 = vadd.f32 3.0, %v3181_v44  ;;  %v3183_v26 = vpop.f32.mrb[7].mxu1  ;;  %v7163_v43 = vadd.f32 %v3270_v17, %v7895_v10 }
 0x581   :  { %v3273_v18 = vmul.f32 0.16666667, %v3257_v51  ;;  %v3227_v1 = vmax.f32 %v3211_v54, 0.0  ;;  %v3213_v23 = vadd.f32 3.0, %v3183_v26  ;;  %v7157_v15 = vadd.f32 %v3271_v16, %v7893_v24 }
 0x582   :  { %v7154_v20 = vadd.f32 %v3272_v50, %v7892_v7  ;;  %v3242_v6 = vmin.f32 %v3226_v22, 6.0  ;;  %v3228_v13 = vmax.f32 %v3212_v40, 0.0 }
 0x583   :  { %v7160_v3 = vadd.f32 %v3273_v18, %v7894_v33  ;;  %v3243_v56 = vmin.f32 %v3227_v1, 6.0  ;;  %v3229_v5 = vmax.f32 %v3213_v23, 0.0 }
 0x584   :  { %v3258_v59 = vmul.f32 %v3242_v6, %v3177_v47  ;;  %v3244_v57 = vmin.f32 %v3228_v13, 6.0  ;;  %v3318_v0 = vpack.c.bf16 %v7154_v20, %v7163_v43 }
 0x585   :  { %v3259_v48 = vmul.f32 %v3243_v56, %v3179_v60  ;;  %v3245_v28 = vmin.f32 %v3229_v5, 6.0  ;;  %v3187_v62 = vpop.f32.mrb[8].mxu1  ;;  %v3319_v46 = vpack.c.bf16 %v7160_v3, %v7157_v15  ;;  %v7900_v56 = vld [vmem:[#allocation73_spill] sm:$0xff] }
 0x586   :  { %v3260_v35 = vmul.f32 %v3244_v57, %v3181_v44  ;;  %v3214_v2 = vadd.f32 3.0, %v3187_v62  ;;  %v3189_v36 = vpop.f32.mrb[9].mxu1  ;;  %v3274_v27 = vmul.f32 0.16666667, %v3258_v59  ;;  %v7901_v57 = vld [vmem:[#allocation72_spill] sm:$0xff] }
 0x587   :  { %v3275_v49 = vmul.f32 0.16666667, %v3259_v48  ;;  %v3261_v37 = vmul.f32 %v3245_v28, %v3183_v26  ;;  %v3215_v63 = vadd.f32 3.0, %v3189_v36  ;;  %v3191_v42 = vpop.f32.mrb[10].mxu1  ;;  %3562 = vmatprep.mubr.bf16.mxu0 %v3319_v46  ;;  %v7902_v28 = vld [vmem:[#allocation74_spill] sm:$0xff] }
 0x588   :  { %v3276_v30 = vmul.f32 0.16666667, %v3260_v35  ;;  %v3230_v39 = vmax.f32 %v3214_v2, 0.0  ;;  %v3216_v21 = vadd.f32 3.0, %v3191_v42  ;;  %v3193_v45 = vpop.f32.mrb[11].mxu1  ;;  %3563 = vmatmul.mubr.bf16.vlgmr.msra.gmra.mrb[16].mxu0 %v3318_v0  ;;  %v7179_v58 = vadd.f32 %v3274_v27, %v7899_v55  ;;  %v7903_v35 = vld [vmem:[#allocation71_spill] sm:$0xff] }
 0x589   :  { %v3277_v12 = vmul.f32 0.16666667, %v3261_v37  ;;  %v3231_v29 = vmax.f32 %v3215_v63, 0.0  ;;  %v3217_v52 = vadd.f32 3.0, %v3193_v45  ;;  %v7173_v19 = vadd.f32 %v3275_v49, %v7897_v53  ;;  %v7906_v53 = vld [vmem:[#allocation47_spill] sm:$0xff] }
 0x58a   :  { %v7170_v14 = vadd.f32 %v3276_v30, %v7896_v32  ;;  %v3246_v34 = vmin.f32 %v3230_v39, 6.0  ;;  %v3232_v11 = vmax.f32 %v3216_v21, 0.0 }
 0x58b   :  { %v7176_v9 = vadd.f32 %v3277_v12, %v7898_v8  ;;  %v3247_v61 = vmin.f32 %v3231_v29, 6.0  ;;  %v3233_v38 = vmax.f32 %v3217_v52, 0.0  ;;  %v7904_v52 = vld [vmem:[#allocation38_spill] sm:$0xff] }
 0x58c   :  { %v3262_v25 = vmul.f32 %v3246_v34, %v3187_v62  ;;  %v3248_v47 = vmin.f32 %v3232_v11, 6.0  ;;  %v3320_v44 = vpack.c.bf16 %v7170_v14, %v7179_v58  ;;  %v7905_v34 = vld [vmem:[#allocation54_spill] sm:$0xff] }
 0x58d   :  { %v3263_v31 = vmul.f32 %v3247_v61, %v3189_v36  ;;  %v3249_v4 = vmin.f32 %v3233_v38, 6.0  ;;  %v3197_v60 = vpop.f32.mrb[12].mxu1  ;;  %v3321_v17 = vpack.c.bf16 %v7176_v9, %v7173_v19  ;;  %v7907_v61 = vld [vmem:[#allocation44_spill] sm:$0xff] }
 0x58e   :  { %v3264_v16 = vmul.f32 %v3248_v47, %v3191_v42  ;;  %v3218_v51 = vadd.f32 3.0, %v3197_v60  ;;  %v3199_v54 = vpop.f32.mrb[13].mxu1  ;;  %v3278_v50 = vmul.f32 0.16666667, %v3262_v25  ;;  %v3358_v47 = vld [vmem:[#allocation22] sm:$0x3] }
 0x58f   :  { %v3279_v22 = vmul.f32 0.16666667, %v3263_v31  ;;  %v3265_v40 = vmul.f32 %v3249_v4, %v3193_v45  ;;  %v3219_v26 = vadd.f32 3.0, %v3199_v54  ;;  %v3201_v18 = vpop.f32.mrb[14].mxu1  ;;  %3572 = vmatprep.mubr.bf16.mxu0 %v3321_v17  ;;  %v7908_v31 = vld [vmem:[#allocation36_spill] sm:$0xff] }
 0x590   :  { %v3280_v1 = vmul.f32 0.16666667, %v3264_v16  ;;  %v3234_v23 = vmax.f32 %v3218_v51, 0.0  ;;  %v3220_v7 = vadd.f32 3.0, %v3201_v18  ;;  %v3203_v6 = vpop.f32.mrb[15].mxu1  ;;  %3573 = vmatmul.mubr.bf16.gmra.mrb[20].mxu0 %v3320_v44  ;;  %v7195_v2 = vadd.f32 %v3278_v50, %v7903_v35 }
 0x591   :  { %v3281_v13 = vmul.f32 0.16666667, %v3265_v40  ;;  %v3235_v24 = vmax.f32 %v3219_v26, 0.0  ;;  %v3221_v33 = vadd.f32 3.0, %v3203_v6  ;;  %v7189_v48 = vadd.f32 %v3279_v22, %v7901_v57 }
 0x592   :  { %v7186_v5 = vadd.f32 %v3280_v1, %v7900_v56  ;;  %v3250_v10 = vmin.f32 %v3234_v23, 6.0  ;;  %v3236_v59 = vmax.f32 %v3220_v7, 0.0  ;;  %v3367_v4 = vrot.slane %v3358_v47, %v7908_v31 }
 0x593   :  { %v7192_v62 = vadd.f32 %v3281_v13, %v7902_v28  ;;  %v3251_v46 = vmin.f32 %v3235_v24, 6.0  ;;  %v3237_v0 = vmax.f32 %v3221_v33, 0.0 }
 0x594   :  { %v3266_v36 = vmul.f32 %v3250_v10, %v3197_v60  ;;  %v3252_v27 = vmin.f32 %v3236_v59, 6.0  ;;  %v3322_v42 = vpack.c.bf16 %v7186_v5, %v7195_v2 }
 0x595   :  { %v3267_v49 = vmul.f32 %v3251_v46, %v3199_v54  ;;  %v3253_v37 = vmin.f32 %v3237_v0, 6.0  ;;  %v3323_v63 = vpack.c.bf16 %v7192_v62, %v7189_v48 }
 0x596   :  { %v3268_v30 = vmul.f32 %v3252_v27, %v3201_v18  ;;  %v3282_v45 = vmul.f32 0.16666667, %v3266_v36  ;;  %v7909_v18 = vld [vmem:[#allocation35_spill] sm:$0xff] }
 0x597   :  { %v3283_v39 = vmul.f32 0.16666667, %v3267_v49  ;;  %v3269_v21 = vmul.f32 %v3253_v37, %v3203_v6  ;;  %3582 = vmatprep.mubr.bf16.mxu1 %v3323_v63  ;;  %v7219_v1 = vrot.slane %v3358_v47, %v7909_v18 }
 0x598   :  { %v3284_v12 = vmul.f32 0.16666667, %v3268_v30  ;;  %3583 = vmatmul.mubr.bf16.vlgmr.msra.gmra.mrb[16].mxu1 %v3322_v42  ;;  %v7211_v38 = vadd.f32 %v3282_v45, %v7907_v61 }
 0x599   :  { %v3285_v29 = vmul.f32 0.16666667, %v3269_v21  ;;  %v7205_v11 = vadd.f32 %v3283_v39, %v7905_v34 }
 0x59a   :  { %v7202_v32 = vadd.f32 %v3284_v12, %v7904_v52 }
 0x59b   :  { %v7208_v8 = vadd.f32 %v3285_v29, %v7906_v53 }
 0x59c   :  { %v3324_v25 = vpack.c.bf16 %v7202_v32, %v7211_v38 }
 0x59d   :  { %v3325_v55 = vpack.c.bf16 %v7208_v8, %v7205_v11 }
 0x59f   :  { %3592 = vmatprep.mubr.bf16.mxu1 %v3325_v55 }
 0x5a0   :  { %3593 = vmatmul.mubr.bf16.gmra.mrb[20].mxu1 %v3324_v25 }
 0x65b   :  { %v3564_v60 = vpop.f32.mrb[16].mxu0 }
 0x65c   :  { %v3566_v17 = vpop.f32.mrb[17].mxu0  ;;  %v3565_v33 = vadd.f32 %v3564_v60, %v7219_v1 }
 0x65d   :  { %v3567_v16 = vadd.f32 %v3566_v17, %v3367_v4  ;;  %v3568_v51 = vpop.f32.mrb[18].mxu0  ;;  %v4027_v17 = vld [vmem:[#allocation24] ss:$0 sm:$0xff] }
 0x65e   :  { %v3570_v54 = vpop.f32.mrb[19].mxu0  ;;  %v3569_v59 = vadd.f32 %v3568_v51, %v7219_v1 }
 0x65f   :  { %v4019_v44 = vmul.f32 -1.442695, %v3567_v16  ;;  %v3571_v50 = vadd.f32 %v3570_v54, %v3367_v4 }
 0x661   :  { %4271 = vpow2.f32 %v4019_v44  ;;  %v4020_v22 = vmul.f32 -1.442695, %v3571_v50 }
 0x663   :  { %4273 = vpow2.f32 %v4020_v22  ;;  %v3574_v40 = vpop.f32.mrb[20].mxu0 }
 0x664   :  { %v3576_v26 = vpop.f32.mrb[21].mxu0  ;;  %v3575_v42 = vadd.f32 %v3574_v40, %v7219_v1 }
 0x665   :  { %v3577_v23 = vadd.f32 %v3576_v26, %v3367_v4  ;;  %v3578_v7 = vpop.f32.mrb[22].mxu0 }
 0x666   :  { %v3580_v6 = vpop.f32.mrb[23].mxu0  ;;  %v3579_v21 = vadd.f32 %v3578_v7, %v7219_v1 }
 0x667   :  { %v4021_v13 = vmul.f32 -1.442695, %v3577_v23  ;;  %v3581_v24 = vadd.f32 %v3580_v6, %v3367_v4 }
 0x669   :  { %4275 = vpow2.f32 %v4021_v13  ;;  %v4022_v56 = vmul.f32 -1.442695, %v3581_v24 }
 0x66b   :  { %v4272_v10 = vpop.eup %4271  ;;  %4277 = vpow2.f32 %v4022_v56  ;;  %v3584_v57 = vpop.f32.mrb[16].mxu1 }
 0x66c   :  { %v3635_v28 = vadd.f32 1.0, %v4272_v10  ;;  %v3586_v46 = vpop.f32.mrb[17].mxu1  ;;  %4279 = vtanh.f32 %v3565_v33  ;;  %v3585_v51 = vadd.f32 %v3584_v57, %v7219_v1 }
 0x66d   :  { %v4274_v0 = vpop.eup %4273  ;;  %v3587_v35 = vadd.f32 %v3586_v46, %v3367_v4  ;;  %v3588_v36 = vpop.f32.mrb[18].mxu1 }
 0x66e   :  { %4281 = vrcp.f32 %v3635_v28  ;;  %v3636_v27 = vadd.f32 1.0, %v4274_v0  ;;  %v3590_v49 = vpop.f32.mrb[19].mxu1  ;;  %v3589_v40 = vadd.f32 %v3588_v36, %v7219_v1 }
 0x66f   :  { %4283 = vtanh.f32 %v3569_v59  ;;  %v4023_v37 = vmul.f32 -1.442695, %v3587_v35  ;;  %v3591_v63 = vadd.f32 %v3590_v49, %v3367_v4 }
 0x670   :  { %4285 = vrcp.f32 %v3636_v27 }
 0x671   :  { %4287 = vpow2.f32 %v4023_v37  ;;  %v4024_v30 = vmul.f32 -1.442695, %v3591_v63 }
 0x673   :  { %v4276_v39 = vpop.eup %4275  ;;  %4289 = vpow2.f32 %v4024_v30  ;;  %v3594_v45 = vpop.f32.mrb[20].mxu1 }
 0x674   :  { %v3637_v12 = vadd.f32 1.0, %v4276_v39  ;;  %v3596_v29 = vpop.f32.mrb[21].mxu1  ;;  %4291 = vtanh.f32 %v3575_v42  ;;  %v3595_v56 = vadd.f32 %v3594_v45, %v7219_v1 }
 0x675   :  { %v4278_v52 = vpop.eup %4277  ;;  %v3597_v34 = vadd.f32 %v3596_v29, %v3367_v4  ;;  %v3598_v53 = vpop.f32.mrb[22].mxu1 }
 0x676   :  { %4293 = vrcp.f32 %v3637_v12  ;;  %v3638_v61 = vadd.f32 1.0, %v4278_v52  ;;  %v3600_v55 = vpop.f32.mrb[23].mxu1  ;;  %v4280_v25 = vpop.eup %4279  ;;  %v3599_v28 = vadd.f32 %v3598_v53, %v7219_v1 }
 0x677   :  { %4295 = vtanh.f32 %v3579_v21  ;;  %v4025_v47 = vmul.f32 -1.442695, %v3597_v34  ;;  %v3601_v31 = vadd.f32 %v3600_v55, %v3367_v4 }
 0x678   :  { %v4282_v60 = vpop.eup %4281  ;;  %4297 = vrcp.f32 %v3638_v61 }
 0x679   :  { %v4284_v16 = vpop.eup %4283  ;;  %4299 = vpow2.f32 %v4025_v47  ;;  %v4026_v54 = vmul.f32 -1.442695, %v3601_v31  ;;  %v3659_v44 = vmul.f32 %v4282_v60, %v4280_v25 }
 0x67a   :  { %v4286_v50 = vpop.eup %4285 }
 0x67b   :  { %v4288_v22 = vpop.eup %4287  ;;  %4301 = vpow2.f32 %v4026_v54  ;;  %v3674_v26 = vmul.f32 %v4027_v17, %v3659_v44  ;;  %v3660_v18 = vmul.f32 %v4286_v50, %v4284_v16  ;;  %v4028_v54 = vld [vmem:[#allocation3] ss:$0 sm:$0xff] }
 0x67c   :  { %v3639_v23 = vadd.f32 1.0, %v4288_v22  ;;  %4303 = vtanh.f32 %v3585_v51 }
 0x67d   :  { %v4290_v7 = vpop.eup %4289  ;;  %3682 = vadd.xlane.f32.xlu0 %v3674_v26  ;;  %v3675_v4 = vmul.f32 %v4027_v17, %v3660_v18 }
 0x67e   :  { %4305 = vrcp.f32 %v3639_v23  ;;  %v3640_v6 = vadd.f32 1.0, %v4290_v7  ;;  %v4292_v13 = vpop.eup %4291 }
 0x67f   :  { %4307 = vtanh.f32 %v3589_v40  ;;  %3684 = vadd.xlane.f32.xlu1 %v3675_v4 }
 0x680   :  { %v4294_v24 = vpop.eup %4293  ;;  %4309 = vrcp.f32 %v3640_v6 }
 0x681   :  { %v4296_v33 = vpop.eup %4295  ;;  %v3661_v10 = vmul.f32 %v4294_v24, %v4292_v13  ;;  %4311 = vtanh.f32 %v3595_v56 }
 0x682   :  { %v4298_v59 = vpop.eup %4297 }
 0x683   :  { %v4300_v57 = vpop.eup %4299  ;;  %v3676_v46 = vmul.f32 %v4027_v17, %v3661_v10  ;;  %v3662_v0 = vmul.f32 %v4298_v59, %v4296_v33 }
 0x684   :  { %v3641_v35 = vadd.f32 1.0, %v4300_v57 }
 0x685   :  { %v4302_v36 = vpop.eup %4301  ;;  %3686 = vadd.xlane.f32.xlu0 %v3676_v46  ;;  %v3677_v27 = vmul.f32 %v4027_v17, %v3662_v0 }
 0x686   :  { %4313 = vrcp.f32 %v3641_v35  ;;  %v3642_v49 = vadd.f32 1.0, %v4302_v36  ;;  %v4304_v37 = vpop.eup %4303 }
 0x687   :  { %4315 = vtanh.f32 %v3599_v28  ;;  %3688 = vadd.xlane.f32.xlu1 %v3677_v27 }
 0x688   :  { %v4306_v63 = vpop.eup %4305  ;;  %4317 = vrcp.f32 %v3642_v49 }
 0x689   :  { %v4308_v42 = vpop.eup %4307  ;;  %v3663_v30 = vmul.f32 %v4306_v63, %v4304_v37 }
 0x68a   :  { %v4310_v39 = vpop.eup %4309 }
 0x68b   :  { %v3678_v21 = vmul.f32 %v4027_v17, %v3663_v30  ;;  %v3664_v45 = vmul.f32 %v4310_v39, %v4308_v42  ;;  %v4312_v12 = vpop.eup %4311 }
 0x68d   :  { %3690 = vadd.xlane.f32.xlu0 %v3678_v21  ;;  %v3679_v1 = vmul.f32 %v4027_v17, %v3664_v45 }
 0x68f   :  { %3692 = vadd.xlane.f32.xlu1 %v3679_v1 }
 0x690   :  { %v4314_v29 = vpop.eup %4313 }
 0x691   :  { %v4316_v52 = vpop.eup %4315  ;;  %v3665_v34 = vmul.f32 %v4314_v29, %v4312_v12 }
 0x692   :  { %v4318_v53 = vpop.eup %4317 }
 0x693   :  { %v3680_v61 = vmul.f32 %v4027_v17, %v3665_v34  ;;  %v3666_v55 = vmul.f32 %v4318_v53, %v4316_v52 }
 0x695   :  { %3694 = vadd.xlane.f32.xlu0 %v3680_v61  ;;  %v3681_v25 = vmul.f32 %v4027_v17, %v3666_v55 }
 0x697   :  { %3696 = vadd.xlane.f32.xlu1 %v3681_v25 }
 0x70a   :  { %v3683_v31 = vpop.xlane.xlu0 %3682 }
 0x70b   :  { %v3705_v26 = vadd.f32 %v4028_v54, %v3683_v31 }
 0x70c   :  { %v3685_v47 = vpop.xlane.xlu1 %3684 }
 0x70d   :  { %v3706_v22 = vadd.f32 %v4028_v54, %v3685_v47  ;;  %v3714_v59 = vsel %vm3713_vm6, %v3705_v26, -inf }
 0x70f   :  { %v3715_v13 = vsel %vm3713_vm6, %v3706_v22, -inf }
 0x712   :  { %v3687_v16 = vpop.xlane.xlu0 %3686 }
 0x713   :  { %v3707_v23 = vadd.f32 %v4028_v54, %v3687_v16 }
 0x714   :  { %v3689_v60 = vpop.xlane.xlu1 %3688 }
 0x715   :  { %v3708_v7 = vadd.f32 %v4028_v54, %v3689_v60  ;;  %v3716_v57 = vsel %vm3713_vm6, %v3707_v23, -inf }
 0x717   :  { %v3717_v28 = vsel %vm3713_vm6, %v3708_v7, -inf }
 0x71a   :  { %v3691_v44 = vpop.xlane.xlu0 %3690 }
 0x71b   :  { %v3709_v40 = vadd.f32 %v4028_v54, %v3691_v44 }
 0x71c   :  { %v3693_v51 = vpop.xlane.xlu1 %3692 }
 0x71d   :  { %v3710_v50 = vadd.f32 %v4028_v54, %v3693_v51  ;;  %v3718_v24 = vsel %vm3713_vm6, %v3709_v40, -inf }
 0x71e   :  { %v3719_v0 = vmax.f32 %v3714_v59, %v3718_v24 }
 0x71f   :  { %v3720_v4 = vsel %vm3713_vm6, %v3710_v50, -inf }
 0x720   :  { %v3721_v10 = vmax.f32 %v3715_v13, %v3720_v4 }
 0x722   :  { %v3695_v18 = vpop.xlane.xlu0 %3694  ;;  %v3726_v27 = vmax.f32 %v3719_v0, %v3721_v10 }
 0x723   :  { %v3711_v6 = vadd.f32 %v4028_v54, %v3695_v18 }
 0x724   :  { %v3697_v17 = vpop.xlane.xlu1 %3696 }
 0x725   :  { %v3722_v33 = vsel %vm3713_vm6, %v3711_v6, -inf  ;;  %v3712_v56 = vadd.f32 %v4028_v54, %v3697_v17 }
 0x726   :  { %v3723_v35 = vmax.f32 %v3716_v57, %v3722_v33 }
 0x727   :  { %v3724_v46 = vsel %vm3713_vm6, %v3712_v56, -inf }
 0x728   :  { %v3725_v36 = vmax.f32 %v3717_v28, %v3724_v46 }
 0x72a   :  { %v3727_v49 = vmax.f32 %v3723_v35, %v3725_v36 }
 0x72c   :  { %v3728_v37 = vmax.f32 %v3726_v27, %v3727_v49 }
 0x72e   :  { %v3729_v63 = vrot.slane %v3728_v37, 4 }
 0x730   :  { %v3730_v42 = vmax.f32 %v3728_v37, %v3729_v63 }
 0x732   :  { %v3731_v30 = vrot.slane %v3730_v42, 2 }
 0x734   :  { %v3732_v39 = vmax.f32 %v3730_v42, %v3731_v30 }
 0x736   :  { %v3733_v21 = vrot.slane %v3732_v39, 1 }
 0x738   :  { %v3734_v45 = vmax.f32 %v3732_v39, %v3733_v21 }
 0x73a   :  { %v3735_v1 = vsub.f32 %v3705_v26, %v3734_v45  ;;  %v3736_v12 = vsub.f32 %v3706_v22, %v3734_v45  ;;  %v3737_v29 = vsub.f32 %v3707_v23, %v3734_v45  ;;  %v3738_v52 = vsub.f32 %v3708_v7, %v3734_v45 }
 0x73b   :  { %v3739_v53 = vsub.f32 %v3709_v40, %v3734_v45  ;;  %v3740_v25 = vsub.f32 %v3710_v50, %v3734_v45  ;;  %v3741_v31 = vsub.f32 %v3711_v6, %v3734_v45  ;;  %v3742_v16 = vsub.f32 %v3712_v56, %v3734_v45 }
 0x73c   :  { %v3743_v34 = vmul.f32 1.442695, %v3735_v1  ;;  %v3745_v61 = vmul.f32 1.442695, %v3736_v12  ;;  %v3747_v55 = vmul.f32 1.442695, %v3737_v29 }
 0x73d   :  { %v3749_v47 = vmul.f32 1.442695, %v3738_v52  ;;  %v3751_v60 = vmul.f32 1.442695, %v3739_v53  ;;  %v3753_v51 = vmul.f32 1.442695, %v3740_v25 }
 0x73e   :  { %4319 = vpow2.f32 %v3743_v34  ;;  %v3755_v54 = vmul.f32 1.442695, %v3741_v31  ;;  %v3757_v44 = vmul.f32 1.442695, %v3742_v16 }
 0x73f   :  { %4321 = vpow2.f32 %v3745_v61 }
 0x740   :  { %4323 = vpow2.f32 %v3747_v55 }
 0x741   :  { %4325 = vpow2.f32 %v3749_v47 }
 0x742   :  { %4327 = vpow2.f32 %v3751_v60 }
 0x743   :  { %4329 = vpow2.f32 %v3753_v51 }
 0x744   :  { %4331 = vpow2.f32 %v3755_v54 }
 0x745   :  { %4333 = vpow2.f32 %v3757_v44 }
 0x748   :  { %v4320_v22 = vpop.eup %4319 }
 0x749   :  { %v4322_v26 = vpop.eup %4321  ;;  %v3759_v40 = vsel %vm3713_vm6, %v4320_v22, 0.0 }
 0x74a   :  { %v4324_v50 = vpop.eup %4323  ;;  %v3760_v18 = vsel %vm3713_vm6, %v4322_v26, 0.0 }
 0x74b   :  { %v4326_v23 = vpop.eup %4325  ;;  %v3761_v7 = vadd.f32 %v3760_v18, %v3759_v40  ;;  %v3762_v4 = vsel %vm3713_vm6, %v4324_v50, 0.0 }
 0x74c   :  { %v4328_v6 = vpop.eup %4327  ;;  %v3764_v13 = vsel %vm3713_vm6, %v4326_v23, 0.0 }
 0x74d   :  { %v3763_v17 = vadd.f32 %v3762_v4, %v3761_v7  ;;  %v4330_v24 = vpop.eup %4329  ;;  %v3766_v56 = vsel %vm3713_vm6, %v4328_v6, 0.0 }
 0x74e   :  { %v4332_v10 = vpop.eup %4331  ;;  %v3768_v57 = vsel %vm3713_vm6, %v4330_v24, 0.0 }
 0x74f   :  { %v3765_v33 = vadd.f32 %v3764_v13, %v3763_v17  ;;  %v4334_v28 = vpop.eup %4333  ;;  %v3770_v0 = vsel %vm3713_vm6, %v4332_v10, 0.0 }
 0x750   :  { %v3772_v36 = vsel %vm3713_vm6, %v4334_v28, 0.0 }
 0x751   :  { %v3767_v59 = vadd.f32 %v3766_v56, %v3765_v33 }
 0x753   :  { %v3769_v46 = vadd.f32 %v3768_v57, %v3767_v59 }
 0x755   :  { %v3771_v35 = vadd.f32 %v3770_v0, %v3769_v46 }
 0x757   :  { %v3773_v27 = vadd.f32 %v3772_v36, %v3771_v35  ;;  %v4696_v36 = vmov 1966171168  }
 0x759   :  { %v3774_v49 = vrot.slane %v3773_v27, 4 }
 0x75b   :  { %v3775_v37 = vadd.f32 %v3774_v49, %v3773_v27  ;;  %v3875_v27 = vunpack.c.l.s4 %v4696_v36 }
 0x75d   :  { %v3776_v63 = vrot.slane %v3775_v37, 2 }
 0x75f   :  { %v3777_v42 = vadd.f32 %v3776_v63, %v3775_v37  ;;  %v3876_v63 = vunpack.c.0.s8 %v3875_v27 }
 0x761   :  { %v3778_v30 = vrot.slane %v3777_v42, 1 }
 0x763   :  { %v3779_v39 = vadd.f32 %v3778_v30, %v3777_v42 }
 0x765   :  { %4335 = vrcp.f32 %v3779_v39 }
 0x76f   :  { %v4336_v21 = vpop.eup %4335 }
 0x770   :  { %v3782_v45 = vmul.f32 %v4336_v21, %v4322_v26  ;;  %v3781_v1 = vmul.f32 %v4336_v21, %v4320_v22  ;;  %v3783_v12 = vmul.f32 %v4336_v21, %v4324_v50  ;;  %v3784_v29 = vmul.f32 %v4336_v21, %v4326_v23 }
 0x771   :  { %v3785_v52 = vmul.f32 %v4336_v21, %v4328_v6  ;;  %v3786_v34 = vmul.f32 %v4336_v21, %v4330_v24  ;;  %v3787_v53 = vmul.f32 %v4336_v21, %v4332_v10  ;;  %v3788_v61 = vmul.f32 %v4336_v21, %v4334_v28 }
 0x772   :  { %3796 = vperm.xlu1 %4098, %v3782_v45   ;;  %3791 = vperm.xlu0 %4097, %v3781_v1   ;;  %v7910_v1 = vlaneseq }
 0x774   :  { %vm3891_vm7 = vcmp.lt.s32.totalorder %v7910_v1, 256 }
 0x776   :  { %3801 = vperm.xlu1 %4098, %v3783_v12  }
 0x77a   :  { %3806 = vperm.xlu1 %4098, %v3784_v29  }
 0x77e   :  { %3811 = vperm.xlu1 %4098, %v3785_v52  }
 0x782   :  { %3816 = vperm.xlu1 %4098, %v3786_v34  }
 0x786   :  { %3821 = vperm.xlu1 %4098, %v3787_v53  }
 0x78a   :  { %3826 = vperm.xlu1 %4098, %v3788_v61  }
 0x7f1   :  { %v3797_v55 = vpop.permute.xlu1 %3796  ;;  %v3792_v47 = vpop.permute.xlu0 %3791 }
 0x7f2   :  { %v3831_v60 = vmul.f32 %v3797_v55, %v7154_v20  ;;  %v3832_v16 = vmul.f32 %v3797_v55, %v7160_v3  ;;  %v3829_v51 = vmul.f32 %v3792_v47, %v7163_v43  ;;  %v3830_v54 = vmul.f32 %v3792_v47, %v7157_v15 }
 0x7f4   :  { %v3845_v40 = vadd.f32 %v3831_v60, %v3829_v51  ;;  %v3858_v50 = vadd.f32 %v3832_v16, %v3830_v54 }
 0x7f5   :  { %v3802_v25 = vpop.permute.xlu1 %3801 }
 0x7f6   :  { %v3833_v22 = vmul.f32 %v3802_v25, %v7179_v58  ;;  %v3834_v26 = vmul.f32 %v3802_v25, %v7173_v19 }
 0x7f8   :  { %v3846_v4 = vadd.f32 %v3845_v40, %v3833_v22  ;;  %v3859_v20 = vadd.f32 %v3858_v50, %v3834_v26 }
 0x7f9   :  { %v3807_v31 = vpop.permute.xlu1 %3806 }
 0x7fa   :  { %v3835_v18 = vmul.f32 %v3807_v31, %v7170_v14  ;;  %v3836_v23 = vmul.f32 %v3807_v31, %v7176_v9 }
 0x7fc   :  { %v3847_v6 = vadd.f32 %v3846_v4, %v3835_v18  ;;  %v3860_v15 = vadd.f32 %v3859_v20, %v3836_v23 }
 0x7fd   :  { %v3812_v44 = vpop.permute.xlu1 %3811 }
 0x7fe   :  { %v3837_v3 = vmul.f32 %v3812_v44, %v7195_v2  ;;  %v3838_v43 = vmul.f32 %v3812_v44, %v7189_v48 }
 0x800   :  { %v3848_v13 = vadd.f32 %v3847_v6, %v3837_v3  ;;  %v3861_v24 = vadd.f32 %v3860_v15, %v3838_v43 }
 0x801   :  { %v3817_v7 = vpop.permute.xlu1 %3816 }
 0x802   :  { %v3839_v17 = vmul.f32 %v3817_v7, %v7186_v5  ;;  %v3840_v58 = vmul.f32 %v3817_v7, %v7192_v62 }
 0x804   :  { %v3849_v33 = vadd.f32 %v3848_v13, %v3839_v17  ;;  %v3862_v56 = vadd.f32 %v3861_v24, %v3840_v58 }
 0x805   :  { %v3822_v19 = vpop.permute.xlu1 %3821 }
 0x806   :  { %v3841_v14 = vmul.f32 %v3822_v19, %v7211_v38  ;;  %v3842_v9 = vmul.f32 %v3822_v19, %v7205_v11 }
 0x808   :  { %v3850_v59 = vadd.f32 %v3849_v33, %v3841_v14  ;;  %v3863_v2 = vadd.f32 %v3862_v56, %v3842_v9 }
 0x809   :  { %v3827_v10 = vpop.permute.xlu1 %3826 }
 0x80a   :  { %v3843_v48 = vmul.f32 %v3827_v10, %v7202_v32  ;;  %v3844_v57 = vmul.f32 %v3827_v10, %v7208_v8  ;;  %v3879_v32 = vsub.s32 %v3876_v63, %v7871_v41 }
 0x80c   :  { %v3851_v28 = vadd.f32 %v3850_v59, %v3843_v48  ;;  %v3864_v5 = vadd.f32 %v3863_v2, %v3844_v57 }
 0x80e   :  { %v3852_v46 = vrot.slane %v3851_v28, 4  ;;  %v3865_v62 = vrot.slane %v3864_v5, 4 }
 0x810   :  { %v3853_v0 = vadd.f32 %v3852_v46, %v3851_v28  ;;  %v3866_v35 = vadd.f32 %v3865_v62, %v3864_v5 }
 0x812   :  { %v3854_v38 = vrot.slane %v3853_v0, 2  ;;  %v3867_v49 = vrot.slane %v3866_v35, 2 }
 0x814   :  { %v3855_v11 = vadd.f32 %v3854_v38, %v3853_v0  ;;  %v3868_v37 = vadd.f32 %v3867_v49, %v3866_v35 }
 0x816   :  { %v3856_v42 = vrot.slane %v3855_v11, 1  ;;  %v3869_v30 = vrot.slane %v3868_v37, 1 }
 0x818   :  { %v3857_v39 = vadd.f32 %v3856_v42, %v3855_v11  ;;  %v3870_v21 = vadd.f32 %v3869_v30, %v3868_v37 }
 0x81a   :  { %v3873_v8 = vcombine.low %v3857_v39, %v3870_v21 }
 0x81c   :  { %v3880_v45 = vrot.slane %v3873_v8, %v3879_v32 }
 0x81e   :  { %v3887_v12 = vrot.slane %v3880_v45, %v3879_v32 }
 0x820   :  { %3893 = vst.msk [vmem:[#allocation25] sm:$0x3] %vm3891_vm7, %v3887_v12 }
 0x821   :  { %4651 = shalt.err (!%p4648_p10)
}
 0x822   :  { %s4652_s30 = scalar_lea.hbm %s7290_s15, 32 }
 0x823   :  { %p4653_p11 = scmp.ne.s32.totalorder %s7290_s15, %s4652_s30  ;;  %p4656_p12 = scmp.lt.u32.totalorder %s4652_s30, %s7290_s15 }
 0x825   :  { %p4658_p13 = pnand %p4656_p12, %p4653_p11 }
 0x827   :  { %4661 = shalt.err (!%p4658_p13)
}
 0x828   :  { %3903 = dma.vmem_to_hbm [thread:$0]  %s3901_s8, 32, %s7290_s15, [#allocation6]  }
 0x829   :  { %4676 = dma.done.wait [#allocation6], 32  }
 0x82a   :  { %4677 = vsyncadd [#allocation6], 4294967264 }
 0x82b   :  { %3907 = vsyncpa [#allocation5], 1 }
 0x82c   :  { %3908 = vsyncpa [#allocation8], 1 }
 0x82d   :  { %3909 = vsyncpa [#allocation11], 1 }
 0x82e   :  { %3910 = vsyncpa [#allocation14], 1 }
 0x82f   :  { %3911 = vsyncpa [#allocation17], 1 }
 0x830   :  { %3912 = vsyncpa [#allocation20], 1 }
 0x831   :  { %3913 = vsyncpa [#allocation23], 1 }
 0x832   :  { %3914 = vsyncpa [#allocation6], 1 }

</bundles_post_ra>
